<compile_context>
chip_gen: v5e
topology: v5e:2x2
jax: 0.10.0
libtpu: 0.0.40
codegen_flags: <defaults>
</compile_context>

<pallas_src>
import functools

import jax
import jax.numpy as jnp
from jax.experimental import pallas as pl
from jax.experimental.pallas import tpu as pltpu


def _layer_norm(v, g, b, eps=1e-5):
    mu = jnp.mean(v, axis=-1, keepdims=True)
    vc = v - mu
    var = jnp.mean(vc * vc, axis=-1, keepdims=True)
    return vc * jax.lax.rsqrt(var + eps) * g + b


# ---------------------------------------------------------------------------
# Pallas kernel: one post-norm transformer encoder layer per grid step along
# the layer axis; activations carried in a persistent VMEM scratch.
# ---------------------------------------------------------------------------
def transformer_layer_kernel(x_ref,
                             wqkv_ref, bqkv_ref, wo_ref, bo_ref,
                             g1_ref, be1_ref,
                             w1_ref, b1_ref, w2_ref, b2_ref,
                             g2_ref, be2_ref,
                             gf_ref, bef_ref,
                             out_ref,
                             x_scr,
                             *, heads, head_dim, tb, seq_len):
    l = pl.program_id(1)
    E = heads * head_dim
    rows = tb * seq_len
    scale = 1.0 / float(head_dim) ** 0.5

    # Load the input slab into the fp32 activation carry at the first layer.
    @pl.when(l == 0)
    def _():
        x_scr[...] = x_ref[...].reshape(rows, E).astype(jnp.float32)

    x = x_scr[...]                                   # (rows, E) fp32 residual stream
    xb = x.astype(jnp.bfloat16)

    # ----- fused QKV projection: one full-width MXU matmul -----
    qkv = jnp.dot(xb, wqkv_ref[0],
                  preferred_element_type=jnp.float32) + bqkv_ref[0]      # (rows, 3E)
    q = qkv[:, :E] * scale                            # torch scales q (incl. bias)
    k = qkv[:, E:2 * E]
    v = qkv[:, 2 * E:]

    # ----- per-head attention (small (S,S) score matmuls, batched over TB) -----
    head_outs = []
    for h in range(heads):
        sl = slice(h * head_dim, (h + 1) * head_dim)
        qh = q[:, sl].reshape(tb, seq_len, head_dim).astype(jnp.bfloat16)
        kh = k[:, sl].reshape(tb, seq_len, head_dim).astype(jnp.bfloat16)
        vh = v[:, sl].reshape(tb, seq_len, head_dim).astype(jnp.bfloat16)
        s = jnp.einsum('bqd,bkd->bqk', qh, kh,
                       preferred_element_type=jnp.float32)               # (tb,S,S)
        s = s - jnp.max(s, axis=-1, keepdims=True)
        p = jnp.exp(s)
        p = p * pl.reciprocal(jnp.sum(p, axis=-1, keepdims=True), approx=True)
        oh = jnp.einsum('bqk,bkd->bqd', p.astype(jnp.bfloat16), vh,
                        preferred_element_type=jnp.float32)              # (tb,S,Dh)
        head_outs.append(oh.reshape(rows, head_dim))
    attn = jnp.concatenate(head_outs, axis=-1)                           # (rows, E)

    # ----- output projection: single full-K matmul against Wo^T -----
    attn = jnp.dot(attn.astype(jnp.bfloat16), wo_ref[0],
                   preferred_element_type=jnp.float32) + bo_ref[0]
    x = _layer_norm(x + attn, g1_ref[0], be1_ref[0])

    # ----- feed forward -----
    hid = jnp.dot(x.astype(jnp.bfloat16), w1_ref[0],
                  preferred_element_type=jnp.float32) + b1_ref[0]
    hid = jnp.maximum(hid, 0.0)
    ff = jnp.dot(hid.astype(jnp.bfloat16), w2_ref[0],
                 preferred_element_type=jnp.float32) + b2_ref[0]
    x = _layer_norm(x + ff, g2_ref[0], be2_ref[0])

    x_scr[...] = x

    # Final TransformerEncoder norm; output block is resident across the layer
    # axis, so this single store is what gets written back to HBM.
    @pl.when(l == pl.num_programs(1) - 1)
    def _():
        y = _layer_norm(x, gf_ref[...], bef_ref[...])
        out_ref[...] = y.reshape(tb, seq_len, E).astype(out_ref.dtype)


def pallas_transformer(seq, kp, *, n_layers, heads, tb=None):
    B, S, E = seq.shape
    assert E % heads == 0
    head_dim = E // heads

    if tb is None:
        # largest divisor of B keeping the matmul M dimension (tb*S) <= 512
        tb = 1
        for cand in range(1, B + 1):
            if B % cand == 0 and cand * S <= 512:
                tb = cand
    nb = B // tb

    layer_names = ['wqkv', 'bqkv', 'wo', 'bo', 'g1', 'be1',
                   'w1', 'b1', 'w2', 'b2', 'g2', 'be2']

    def layer_spec(name):
        a = kp[name]
        nd = a.ndim
        return pl.BlockSpec((1,) + a.shape[1:],
                            lambda b, l, _nd=nd: (l,) + (0,) * (_nd - 1))

    in_specs = [pl.BlockSpec((tb, S, E), lambda b, l: (b, 0, 0))]
    in_specs += [layer_spec(n) for n in layer_names]
    in_specs += [pl.BlockSpec(kp['gf'].shape, lambda b, l: (0, 0)),
                 pl.BlockSpec(kp['bef'].shape, lambda b, l: (0, 0))]

    kernel = functools.partial(transformer_layer_kernel, heads=heads,
                               head_dim=head_dim, tb=tb, seq_len=S)
    return pl.pallas_call(
        kernel,
        out_shape=jax.ShapeDtypeStruct((B, S, E), jnp.float32),
        grid=(nb, n_layers),
        in_specs=in_specs,
        out_specs=pl.BlockSpec((tb, S, E), lambda b, l: (b, 0, 0)),
        scratch_shapes=[pltpu.VMEM((tb * S, E), jnp.float32)],
        compiler_params=pltpu.CompilerParams(
            dimension_semantics=("parallel", "arbitrary")),
    )(seq, *[kp[n] for n in layer_names], kp['gf'], kp['bef'])


# ---------------------------------------------------------------------------
# Parameters (deterministic, synthetic — same shapes as the nn.Module)
# ---------------------------------------------------------------------------
def trunc_normal(key, shape, std=0.02):
    # mimics torch: x.normal_().fmod_(2).mul_(std)
    r = jax.random.normal(key, shape, dtype=jnp.float32)
    return (r - 2.0 * jnp.trunc(r / 2.0)) * std


def init_params(key, clip_length, embed_dim, n_layers, heads, dim_ff):
    E, L, F = embed_dim, n_layers, dim_ff
    S = clip_length + 3
    ks = jax.random.split(key, 16)
    return dict(
        cnt_token=trunc_normal(ks[0], (1, 1, E)),
        sep_token=trunc_normal(ks[1], (1, 1, E)),
        pos_embed=trunc_normal(ks[2], (1, S, E)),
        # per-layer attention (torch orientation: weight is (out, in))
        Wq=trunc_normal(ks[3], (L, E, E)),
        Wk=trunc_normal(ks[4], (L, E, E)),
        Wv=trunc_normal(ks[5], (L, E, E)),
        Wo=trunc_normal(ks[6], (L, E, E)),
        bq=trunc_normal(ks[7], (L, E)),
        bk=trunc_normal(ks[8], (L, E)),
        bv=trunc_normal(ks[9], (L, E)),
        bo=trunc_normal(ks[10], (L, E)),
        # per-layer MLP
        W1=trunc_normal(ks[11], (L, F, E)),
        b1=trunc_normal(ks[12], (L, F)),
        W2=trunc_normal(ks[13], (L, E, F)),
        b2=trunc_normal(ks[14], (L, E)),
        # layer norms (torch init: weight=1, bias=0)
        g1=jnp.ones((L, E), jnp.float32), be1=jnp.zeros((L, E), jnp.float32),
        g2=jnp.ones((L, E), jnp.float32), be2=jnp.zeros((L, E), jnp.float32),
        gf=jnp.ones((E,), jnp.float32), bef=jnp.zeros((E,), jnp.float32),
    )


def to_kernel_params(P):
    L, E, _ = P['Wq'].shape
    F = P['W1'].shape[1]
    # fused QKV weight (input-major, lane-dense): (L, E, 3E)
    wqkv = jnp.concatenate([jnp.transpose(P['Wq'], (0, 2, 1)),
                            jnp.transpose(P['Wk'], (0, 2, 1)),
                            jnp.transpose(P['Wv'], (0, 2, 1))], axis=-1)
    bqkv = jnp.concatenate([P['bq'], P['bk'], P['bv']], axis=-1).reshape(L, 1, 3 * E)
    return dict(
        wqkv=wqkv.astype(jnp.bfloat16),
        bqkv=bqkv,
        wo=jnp.transpose(P['Wo'], (0, 2, 1)).astype(jnp.bfloat16),
        bo=P['bo'].reshape(L, 1, E),
        g1=P['g1'].reshape(L, 1, E), be1=P['be1'].reshape(L, 1, E),
        w1=jnp.transpose(P['W1'], (0, 2, 1)).astype(jnp.bfloat16),
        b1=P['b1'].reshape(L, 1, F),
        w2=jnp.transpose(P['W2'], (0, 2, 1)).astype(jnp.bfloat16),
        b2=P['b2'].reshape(L, 1, E),
        g2=P['g2'].reshape(L, 1, E), be2=P['be2'].reshape(L, 1, E),
        gf=P['gf'].reshape(1, E), bef=P['bef'].reshape(1, E),
    )


# ---------------------------------------------------------------------------
# Module forward (glue in plain JAX, hot path in Pallas)
# ---------------------------------------------------------------------------
def bprompt_fusing_forward(P, x, ord_emb, *, clip_length, heads, n_layers):
    b, n, f, c = x.shape
    assert f == clip_length
    B = b * n
    xf = x.reshape(B, f, c)
    oe = ord_emb.reshape(-1, ord_emb.shape[-1]).reshape(B, 1, c)
    cnt = jnp.broadcast_to(P['cnt_token'], (B, 1, c))
    sep = jnp.broadcast_to(P['sep_token'], (B, 1, c))
    seq = jnp.concatenate([cnt, oe, sep, xf], axis=1) + P['pos_embed']   # (B, f+3, c)
    kp = to_kernel_params(P)
    out = pallas_transformer(seq.astype(jnp.float32), kp,
                             n_layers=n_layers, heads=heads)             # (B, f+3, c)
    out = out.reshape(b, n, f + 3, c)
    return out[:, :, 0], out[:, :, -clip_length:]


# Pure-JAX fp32 reference (same math, torch-oriented weights) for a sanity check.
def ref_forward(P, x, ord_emb, *, clip_length, heads, n_layers):
    b, n, f, c = x.shape
    B = b * n
    H = heads
    Dh = c // H
    xf = x.reshape(B, f, c)
    oe = ord_emb.reshape(-1, c).reshape(B, 1, c)
    cnt = jnp.broadcast_to(P['cnt_token'], (B, 1, c))
    sep = jnp.broadcast_to(P['sep_token'], (B, 1, c))
    z = jnp.concatenate([cnt, oe, sep, xf], axis=1) + P['pos_embed']
    scale = 1.0 / float(Dh) ** 0.5
    for l in range(n_layers):
        q = (z @ P['Wq'][l].T + P['bq'][l]) * scale
        k = z @ P['Wk'][l].T + P['bk'][l]
        v = z @ P['Wv'][l].T + P['bv'][l]

        def split(t):
            return t.reshape(B, -1, H, Dh).transpose(0, 2, 1, 3)

        qh, kh, vh = split(q), split(k), split(v)
        s = jnp.einsum('bhqd,bhkd->bhqk', qh, kh)
        p = jax.nn.softmax(s, axis=-1)
        o = jnp.einsum('bhqk,bhkd->bhqd', p, vh).transpose(0, 2, 1, 3).reshape(B, -1, c)
        attn = o @ P['Wo'][l].T + P['bo'][l]
        z = _layer_norm(z + attn, P['g1'][l], P['be1'][l])
        hid = jnp.maximum(z @ P['W1'][l].T + P['b1'][l], 0.0)
        ff = hid @ P['W2'][l].T + P['b2'][l]
        z = _layer_norm(z + ff, P['g2'][l], P['be2'][l])
    z = _layer_norm(z, P['gf'], P['bef'])
    z = z.reshape(b, n, f + 3, c)
    return z[:, :, 0], z[:, :, -clip_length:]


if __name__ == "__main__":
    # Small shapes consistent with the module's forward.
    # embed_dim/heads chosen so head_dim == 128 (lane-aligned slices/stores).
    b, n, clip_length = 2, 2, 5          # f == clip_length, S = clip_length + 3 = 8
    embed_dim, n_layers, heads = 512, 2, 4
    dim_ff = 512                         # torch default is 2048; small for the test

    key = jax.random.PRNGKey(0)
    kparam, kx, ko = jax.random.split(key, 3)
    P = init_params(kparam, clip_length, embed_dim, n_layers, heads, dim_ff)
    x = jax.random.normal(kx, (b, n, clip_length, embed_dim), jnp.float32)
    ord_emb = jax.random.normal(ko, (b, n, embed_dim), jnp.float32)

    cls_out, frame_out = bprompt_fusing_forward(
        P, x, ord_emb, clip_length=clip_length, heads=heads, n_layers=n_layers)
    jax.block_until_ready((cls_out, frame_out))

    cls_ref, frame_ref = ref_forward(
        P, x, ord_emb, clip_length=clip_length, heads=heads, n_layers=n_layers)

    assert cls_out.shape == (b, n, embed_dim)
    assert frame_out.shape == (b, n, clip_length, embed_dim)
    # bf16 matmul operands (fp32 accumulation) => loosened tolerance vs fp32 ref.
    assert bool(jnp.allclose(cls_out, cls_ref, atol=2e-2, rtol=2e-2))
    assert bool(jnp.allclose(frame_out, frame_ref, atol=2e-2, rtol=2e-2))
    print("KERNEL_OK")
</pallas_src>

<mosaic_0001>
module attributes {stable_mosaic.version = 11 : i64} {
  func.func @transformer_layer_kernel(%arg0: i32, %arg1: i32, %arg2: memref<4x8x512xf32, #tpu.memory_space<vmem>>, %arg3: memref<1x512x1536xbf16, #tpu.memory_space<vmem>>, %arg4: memref<1x1x1536xf32, #tpu.memory_space<vmem>>, %arg5: memref<1x512x512xbf16, #tpu.memory_space<vmem>>, %arg6: memref<1x1x512xf32, #tpu.memory_space<vmem>>, %arg7: memref<1x1x512xf32, #tpu.memory_space<vmem>>, %arg8: memref<1x1x512xf32, #tpu.memory_space<vmem>>, %arg9: memref<1x512x512xbf16, #tpu.memory_space<vmem>>, %arg10: memref<1x1x512xf32, #tpu.memory_space<vmem>>, %arg11: memref<1x512x512xbf16, #tpu.memory_space<vmem>>, %arg12: memref<1x1x512xf32, #tpu.memory_space<vmem>>, %arg13: memref<1x1x512xf32, #tpu.memory_space<vmem>>, %arg14: memref<1x1x512xf32, #tpu.memory_space<vmem>>, %arg15: memref<1x512xf32, #tpu.memory_space<vmem>>, %arg16: memref<1x512xf32, #tpu.memory_space<vmem>>, %arg17: memref<4x8x512xf32, #tpu.memory_space<vmem>>, %arg18: memref<32x512xf32, #tpu.memory_space<vmem>>) attributes {dimension_semantics = [#tpu.dimension_semantics<parallel>, #tpu.dimension_semantics<arbitrary>], iteration_bounds = array<i64: 1, 2>, scalar_prefetch = 0 : i64, scratch_operands = 1 : i64, tpu.core_type = #tpu.core_type<tc>, window_params = [{transform_indices = @transform_0, window_bounds = array<i64: 4, 8, 512>}, {transform_indices = @transform_1, window_bounds = array<i64: 1, 512, 1536>}, {transform_indices = @transform_2, window_bounds = array<i64: 1, 1, 1536>}, {transform_indices = @transform_3, window_bounds = array<i64: 1, 512, 512>}, {transform_indices = @transform_4, window_bounds = array<i64: 1, 1, 512>}, {transform_indices = @transform_5, window_bounds = array<i64: 1, 1, 512>}, {transform_indices = @transform_6, window_bounds = array<i64: 1, 1, 512>}, {transform_indices = @transform_7, window_bounds = array<i64: 1, 512, 512>}, {transform_indices = @transform_8, window_bounds = array<i64: 1, 1, 512>}, {transform_indices = @transform_9, window_bounds = array<i64: 1, 512, 512>}, {transform_indices = @transform_10, window_bounds = array<i64: 1, 1, 512>}, {transform_indices = @transform_11, window_bounds = array<i64: 1, 1, 512>}, {transform_indices = @transform_12, window_bounds = array<i64: 1, 1, 512>}, {pipeline_mode = #tpu.pipeline_mode<synchronous>, transform_indices = @transform_13, window_bounds = array<i64: 1, 512>}, {pipeline_mode = #tpu.pipeline_mode<synchronous>, transform_indices = @transform_14, window_bounds = array<i64: 1, 512>}, {transform_indices = @transform_15, window_bounds = array<i64: 4, 8, 512>}]} {
    %c0_i32 = arith.constant 0 : i32
    %0 = arith.cmpi eq, %arg1, %c0_i32 : i32
    %1 = arith.extui %0 : i1 to i32
    %c0_i32_0 = arith.constant 0 : i32
    %2 = arith.cmpi ne, %1, %c0_i32_0 : i32
    scf.if %2 {
      %c0_72 = arith.constant 0 : index
      %c0_73 = arith.constant 0 : index
      %c0_74 = arith.constant 0 : index
      %190 = vector.load %arg2[%c0_72, %c0_73, %c0_74] : memref<4x8x512xf32, #tpu.memory_space<vmem>>, vector<4x8x512xf32>
      %191 = vector.shape_cast %190 : vector<4x8x512xf32> to vector<32x512xf32>
      %c0_75 = arith.constant 0 : index
      %c0_76 = arith.constant 0 : index
      %192 = vector.load %arg18[%c0_75, %c0_76] : memref<32x512xf32, #tpu.memory_space<vmem>>, vector<32x512xf32>
      tpu.vector_store %arg18[%c0_75, %c0_76], %191 {strides = array<i32>} : memref<32x512xf32, #tpu.memory_space<vmem>>, vector<32x512xf32>,
    } else {
    }
    %c0 = arith.constant 0 : index
    %c0_1 = arith.constant 0 : index
    %3 = vector.load %arg18[%c0, %c0_1] : memref<32x512xf32, #tpu.memory_space<vmem>>, vector<32x512xf32>
    %4 = arith.truncf %3 : vector<32x512xf32> to vector<32x512xbf16>
    %c0_2 = arith.constant 0 : index
    %c0_3 = arith.constant 0 : index
    %c0_4 = arith.constant 0 : index
    %5 = vector.load %arg3[%c0_2, %c0_3, %c0_4] : memref<1x512x1536xbf16, #tpu.memory_space<vmem>>, vector<1x512x1536xbf16>
    %6 = vector.shape_cast %5 : vector<1x512x1536xbf16> to vector<512x1536xbf16>
    %cst = arith.constant dense<0.000000e+00> : vector<32x1536xf32>
    %7 = tpu.matmul %4, %6, %cst {dimension_numbers = #tpu.dot_dimension_numbers<[1], [0], [0], [1], [0, 0, 1, 1], [], []>} : vector<32x512xbf16>, vector<512x1536xbf16>, vector<32x1536xf32> -> vector<32x1536xf32>
    %c0_5 = arith.constant 0 : index
    %c0_6 = arith.constant 0 : index
    %c0_7 = arith.constant 0 : index
    %8 = vector.load %arg4[%c0_5, %c0_6, %c0_7] : memref<1x1x1536xf32, #tpu.memory_space<vmem>>, vector<1x1x1536xf32>
    %9 = vector.shape_cast %8 : vector<1x1x1536xf32> to vector<1x1536xf32>
    %10 = vector.broadcast %9 : vector<1x1536xf32> to vector<32x1536xf32>
    %11 = arith.addf %7, %10 : vector<32x1536xf32>
    %12 = vector.extract_strided_slice %11 {offsets = [0, 0], sizes = [32, 512], strides = [1, 1]} : vector<32x1536xf32> to vector<32x512xf32>
    %cst_8 = arith.constant 0.0883883461 : f32
    %13 = vector.broadcast %cst_8 : f32 to vector<32x512xf32>
    %14 = arith.mulf %12, %13 : vector<32x512xf32>
    %15 = vector.extract_strided_slice %11 {offsets = [0, 512], sizes = [32, 512], strides = [1, 1]} : vector<32x1536xf32> to vector<32x512xf32>
    %16 = vector.extract_strided_slice %11 {offsets = [0, 1024], sizes = [32, 512], strides = [1, 1]} : vector<32x1536xf32> to vector<32x512xf32>
    %17 = vector.extract_strided_slice %14 {offsets = [0, 0], sizes = [32, 128], strides = [1, 1]} : vector<32x512xf32> to vector<32x128xf32>
    %18 = vector.shape_cast %17 : vector<32x128xf32> to vector<4x8x128xf32>
    %19 = arith.truncf %18 : vector<4x8x128xf32> to vector<4x8x128xbf16>
    %20 = vector.extract_strided_slice %15 {offsets = [0, 0], sizes = [32, 128], strides = [1, 1]} : vector<32x512xf32> to vector<32x128xf32>
    %21 = vector.shape_cast %20 : vector<32x128xf32> to vector<4x8x128xf32>
    %22 = arith.truncf %21 : vector<4x8x128xf32> to vector<4x8x128xbf16>
    %23 = vector.extract_strided_slice %16 {offsets = [0, 0], sizes = [32, 128], strides = [1, 1]} : vector<32x512xf32> to vector<32x128xf32>
    %24 = vector.shape_cast %23 : vector<32x128xf32> to vector<4x8x128xf32>
    %25 = arith.truncf %24 : vector<4x8x128xf32> to vector<4x8x128xbf16>
    "tpu.trace_start"() <{level = 10 : i32, message = "bqd,bkd->bqk"}> : () -> ()
    %cst_9 = arith.constant dense<0.000000e+00> : vector<4x8x8xf32>
    %26 = tpu.matmul %19, %22, %cst_9 {dimension_numbers = #tpu.dot_dimension_numbers<[2], [2], [1], [1], [0, 0, 0, 1, 1, 1], [0], [0]>} : vector<4x8x128xbf16>, vector<4x8x128xbf16>, vector<4x8x8xf32> -> vector<4x8x8xf32>
    "tpu.trace_stop"() : () -> ()
    %cst_10 = arith.constant dense<0xFF800000> : vector<4x8xf32>
    %27 = vector.multi_reduction <maximumf>, %26, %cst_10 [2] : vector<4x8x8xf32> to vector<4x8xf32>
    %28 = vector.shape_cast %27 : vector<4x8xf32> to vector<4x8x1xf32>
    %29 = vector.broadcast %28 : vector<4x8x1xf32> to vector<4x8x8xf32>
    %30 = arith.subf %26, %29 : vector<4x8x8xf32>
    %31 = math.exp %30 : vector<4x8x8xf32>
    %cst_11 = arith.constant dense<0.000000e+00> : vector<4x8xf32>
    %32 = vector.multi_reduction <add>, %31, %cst_11 [2] : vector<4x8x8xf32> to vector<4x8xf32>
    %33 = vector.shape_cast %32 : vector<4x8xf32> to vector<4x8x1xf32>
    %34 = tpu.reciprocal %33 {approx = true} : vector<4x8x1xf32> -> vector<4x8x1xf32>
    %35 = vector.broadcast %34 : vector<4x8x1xf32> to vector<4x8x8xf32>
    %36 = arith.mulf %31, %35 : vector<4x8x8xf32>
    %37 = arith.truncf %36 : vector<4x8x8xf32> to vector<4x8x8xbf16>
    "tpu.trace_start"() <{level = 10 : i32, message = "bqk,bkd->bqd"}> : () -> ()
    %cst_12 = arith.constant dense<0.000000e+00> : vector<4x8x128xf32>
    %38 = tpu.matmul %37, %25, %cst_12 {dimension_numbers = #tpu.dot_dimension_numbers<[2], [1], [1], [2], [0, 0, 0, 1, 1, 2], [0], [0]>} : vector<4x8x8xbf16>, vector<4x8x128xbf16>, vector<4x8x128xf32> -> vector<4x8x128xf32>
    "tpu.trace_stop"() : () -> ()
    %39 = vector.shape_cast %38 : vector<4x8x128xf32> to vector<32x128xf32>
    %40 = vector.extract_strided_slice %14 {offsets = [0, 128], sizes = [32, 128], strides = [1, 1]} : vector<32x512xf32> to vector<32x128xf32>
    %41 = vector.shape_cast %40 : vector<32x128xf32> to vector<4x8x128xf32>
    %42 = arith.truncf %41 : vector<4x8x128xf32> to vector<4x8x128xbf16>
    %43 = vector.extract_strided_slice %15 {offsets = [0, 128], sizes = [32, 128], strides = [1, 1]} : vector<32x512xf32> to vector<32x128xf32>
    %44 = vector.shape_cast %43 : vector<32x128xf32> to vector<4x8x128xf32>
    %45 = arith.truncf %44 : vector<4x8x128xf32> to vector<4x8x128xbf16>
    %46 = vector.extract_strided_slice %16 {offsets = [0, 128], sizes = [32, 128], strides = [1, 1]} : vector<32x512xf32> to vector<32x128xf32>
    %47 = vector.shape_cast %46 : vector<32x128xf32> to vector<4x8x128xf32>
    %48 = arith.truncf %47 : vector<4x8x128xf32> to vector<4x8x128xbf16>
    "tpu.trace_start"() <{level = 10 : i32, message = "bqd,bkd->bqk"}> : () -> ()
    %cst_13 = arith.constant dense<0.000000e+00> : vector<4x8x8xf32>
    %49 = tpu.matmul %42, %45, %cst_13 {dimension_numbers = #tpu.dot_dimension_numbers<[2], [2], [1], [1], [0, 0, 0, 1, 1, 1], [0], [0]>} : vector<4x8x128xbf16>, vector<4x8x128xbf16>, vector<4x8x8xf32> -> vector<4x8x8xf32>
    "tpu.trace_stop"() : () -> ()
    %cst_14 = arith.constant dense<0xFF800000> : vector<4x8xf32>
    %50 = vector.multi_reduction <maximumf>, %49, %cst_14 [2] : vector<4x8x8xf32> to vector<4x8xf32>
    %51 = vector.shape_cast %50 : vector<4x8xf32> to vector<4x8x1xf32>
    %52 = vector.broadcast %51 : vector<4x8x1xf32> to vector<4x8x8xf32>
    %53 = arith.subf %49, %52 : vector<4x8x8xf32>
    %54 = math.exp %53 : vector<4x8x8xf32>
    %cst_15 = arith.constant dense<0.000000e+00> : vector<4x8xf32>
    %55 = vector.multi_reduction <add>, %54, %cst_15 [2] : vector<4x8x8xf32> to vector<4x8xf32>
    %56 = vector.shape_cast %55 : vector<4x8xf32> to vector<4x8x1xf32>
    %57 = tpu.reciprocal %56 {approx = true} : vector<4x8x1xf32> -> vector<4x8x1xf32>
    %58 = vector.broadcast %57 : vector<4x8x1xf32> to vector<4x8x8xf32>
    %59 = arith.mulf %54, %58 : vector<4x8x8xf32>
    %60 = arith.truncf %59 : vector<4x8x8xf32> to vector<4x8x8xbf16>
    "tpu.trace_start"() <{level = 10 : i32, message = "bqk,bkd->bqd"}> : () -> ()
    %cst_16 = arith.constant dense<0.000000e+00> : vector<4x8x128xf32>
    %61 = tpu.matmul %60, %48, %cst_16 {dimension_numbers = #tpu.dot_dimension_numbers<[2], [1], [1], [2], [0, 0, 0, 1, 1, 2], [0], [0]>} : vector<4x8x8xbf16>, vector<4x8x128xbf16>, vector<4x8x128xf32> -> vector<4x8x128xf32>
    "tpu.trace_stop"() : () -> ()
    %62 = vector.shape_cast %61 : vector<4x8x128xf32> to vector<32x128xf32>
    %63 = vector.extract_strided_slice %14 {offsets = [0, 256], sizes = [32, 128], strides = [1, 1]} : vector<32x512xf32> to vector<32x128xf32>
    %64 = vector.shape_cast %63 : vector<32x128xf32> to vector<4x8x128xf32>
    %65 = arith.truncf %64 : vector<4x8x128xf32> to vector<4x8x128xbf16>
    %66 = vector.extract_strided_slice %15 {offsets = [0, 256], sizes = [32, 128], strides = [1, 1]} : vector<32x512xf32> to vector<32x128xf32>
    %67 = vector.shape_cast %66 : vector<32x128xf32> to vector<4x8x128xf32>
    %68 = arith.truncf %67 : vector<4x8x128xf32> to vector<4x8x128xbf16>
    %69 = vector.extract_strided_slice %16 {offsets = [0, 256], sizes = [32, 128], strides = [1, 1]} : vector<32x512xf32> to vector<32x128xf32>
    %70 = vector.shape_cast %69 : vector<32x128xf32> to vector<4x8x128xf32>
    %71 = arith.truncf %70 : vector<4x8x128xf32> to vector<4x8x128xbf16>
    "tpu.trace_start"() <{level = 10 : i32, message = "bqd,bkd->bqk"}> : () -> ()
    %cst_17 = arith.constant dense<0.000000e+00> : vector<4x8x8xf32>
    %72 = tpu.matmul %65, %68, %cst_17 {dimension_numbers = #tpu.dot_dimension_numbers<[2], [2], [1], [1], [0, 0, 0, 1, 1, 1], [0], [0]>} : vector<4x8x128xbf16>, vector<4x8x128xbf16>, vector<4x8x8xf32> -> vector<4x8x8xf32>
    "tpu.trace_stop"() : () -> ()
    %cst_18 = arith.constant dense<0xFF800000> : vector<4x8xf32>
    %73 = vector.multi_reduction <maximumf>, %72, %cst_18 [2] : vector<4x8x8xf32> to vector<4x8xf32>
    %74 = vector.shape_cast %73 : vector<4x8xf32> to vector<4x8x1xf32>
    %75 = vector.broadcast %74 : vector<4x8x1xf32> to vector<4x8x8xf32>
    %76 = arith.subf %72, %75 : vector<4x8x8xf32>
    %77 = math.exp %76 : vector<4x8x8xf32>
    %cst_19 = arith.constant dense<0.000000e+00> : vector<4x8xf32>
    %78 = vector.multi_reduction <add>, %77, %cst_19 [2] : vector<4x8x8xf32> to vector<4x8xf32>
    %79 = vector.shape_cast %78 : vector<4x8xf32> to vector<4x8x1xf32>
    %80 = tpu.reciprocal %79 {approx = true} : vector<4x8x1xf32> -> vector<4x8x1xf32>
    %81 = vector.broadcast %80 : vector<4x8x1xf32> to vector<4x8x8xf32>
    %82 = arith.mulf %77, %81 : vector<4x8x8xf32>
    %83 = arith.truncf %82 : vector<4x8x8xf32> to vector<4x8x8xbf16>
    "tpu.trace_start"() <{level = 10 : i32, message = "bqk,bkd->bqd"}> : () -> ()
    %cst_20 = arith.constant dense<0.000000e+00> : vector<4x8x128xf32>
    %84 = tpu.matmul %83, %71, %cst_20 {dimension_numbers = #tpu.dot_dimension_numbers<[2], [1], [1], [2], [0, 0, 0, 1, 1, 2], [0], [0]>} : vector<4x8x8xbf16>, vector<4x8x128xbf16>, vector<4x8x128xf32> -> vector<4x8x128xf32>
    "tpu.trace_stop"() : () -> ()
    %85 = vector.shape_cast %84 : vector<4x8x128xf32> to vector<32x128xf32>
    %86 = vector.extract_strided_slice %14 {offsets = [0, 384], sizes = [32, 128], strides = [1, 1]} : vector<32x512xf32> to vector<32x128xf32>
    %87 = vector.shape_cast %86 : vector<32x128xf32> to vector<4x8x128xf32>
    %88 = arith.truncf %87 : vector<4x8x128xf32> to vector<4x8x128xbf16>
    %89 = vector.extract_strided_slice %15 {offsets = [0, 384], sizes = [32, 128], strides = [1, 1]} : vector<32x512xf32> to vector<32x128xf32>
    %90 = vector.shape_cast %89 : vector<32x128xf32> to vector<4x8x128xf32>
    %91 = arith.truncf %90 : vector<4x8x128xf32> to vector<4x8x128xbf16>
    %92 = vector.extract_strided_slice %16 {offsets = [0, 384], sizes = [32, 128], strides = [1, 1]} : vector<32x512xf32> to vector<32x128xf32>
    %93 = vector.shape_cast %92 : vector<32x128xf32> to vector<4x8x128xf32>
    %94 = arith.truncf %93 : vector<4x8x128xf32> to vector<4x8x128xbf16>
    "tpu.trace_start"() <{level = 10 : i32, message = "bqd,bkd->bqk"}> : () -> ()
    %cst_21 = arith.constant dense<0.000000e+00> : vector<4x8x8xf32>
    %95 = tpu.matmul %88, %91, %cst_21 {dimension_numbers = #tpu.dot_dimension_numbers<[2], [2], [1], [1], [0, 0, 0, 1, 1, 1], [0], [0]>} : vector<4x8x128xbf16>, vector<4x8x128xbf16>, vector<4x8x8xf32> -> vector<4x8x8xf32>
    "tpu.trace_stop"() : () -> ()
    %cst_22 = arith.constant dense<0xFF800000> : vector<4x8xf32>
    %96 = vector.multi_reduction <maximumf>, %95, %cst_22 [2] : vector<4x8x8xf32> to vector<4x8xf32>
    %97 = vector.shape_cast %96 : vector<4x8xf32> to vector<4x8x1xf32>
    %98 = vector.broadcast %97 : vector<4x8x1xf32> to vector<4x8x8xf32>
    %99 = arith.subf %95, %98 : vector<4x8x8xf32>
    %100 = math.exp %99 : vector<4x8x8xf32>
    %cst_23 = arith.constant dense<0.000000e+00> : vector<4x8xf32>
    %101 = vector.multi_reduction <add>, %100, %cst_23 [2] : vector<4x8x8xf32> to vector<4x8xf32>
    %102 = vector.shape_cast %101 : vector<4x8xf32> to vector<4x8x1xf32>
    %103 = tpu.reciprocal %102 {approx = true} : vector<4x8x1xf32> -> vector<4x8x1xf32>
    %104 = vector.broadcast %103 : vector<4x8x1xf32> to vector<4x8x8xf32>
    %105 = arith.mulf %100, %104 : vector<4x8x8xf32>
    %106 = arith.truncf %105 : vector<4x8x8xf32> to vector<4x8x8xbf16>
    "tpu.trace_start"() <{level = 10 : i32, message = "bqk,bkd->bqd"}> : () -> ()
    %cst_24 = arith.constant dense<0.000000e+00> : vector<4x8x128xf32>
    %107 = tpu.matmul %106, %94, %cst_24 {dimension_numbers = #tpu.dot_dimension_numbers<[2], [1], [1], [2], [0, 0, 0, 1, 1, 2], [0], [0]>} : vector<4x8x8xbf16>, vector<4x8x128xbf16>, vector<4x8x128xf32> -> vector<4x8x128xf32>
    "tpu.trace_stop"() : () -> ()
    %108 = vector.shape_cast %107 : vector<4x8x128xf32> to vector<32x128xf32>
    %109 = tpu.concatenate %39, %62, %85, %108 in 1 : vector<32x128xf32>, vector<32x128xf32>, vector<32x128xf32>, vector<32x128xf32> -> vector<32x512xf32>
    %110 = arith.truncf %109 : vector<32x512xf32> to vector<32x512xbf16>
    %c0_25 = arith.constant 0 : index
    %c0_26 = arith.constant 0 : index
    %c0_27 = arith.constant 0 : index
    %111 = vector.load %arg5[%c0_25, %c0_26, %c0_27] : memref<1x512x512xbf16, #tpu.memory_space<vmem>>, vector<1x512x512xbf16>
    %112 = vector.shape_cast %111 : vector<1x512x512xbf16> to vector<512x512xbf16>
    %cst_28 = arith.constant dense<0.000000e+00> : vector<32x512xf32>
    %113 = tpu.matmul %110, %112, %cst_28 {dimension_numbers = #tpu.dot_dimension_numbers<[1], [0], [0], [1], [0, 0, 1, 1], [], []>} : vector<32x512xbf16>, vector<512x512xbf16>, vector<32x512xf32> -> vector<32x512xf32>
    %c0_29 = arith.constant 0 : index
    %c0_30 = arith.constant 0 : index
    %c0_31 = arith.constant 0 : index
    %114 = vector.load %arg6[%c0_29, %c0_30, %c0_31] : memref<1x1x512xf32, #tpu.memory_space<vmem>>, vector<1x1x512xf32>
    %115 = vector.shape_cast %114 : vector<1x1x512xf32> to vector<1x512xf32>
    %116 = vector.broadcast %115 : vector<1x512xf32> to vector<32x512xf32>
    %117 = arith.addf %113, %116 : vector<32x512xf32>
    %118 = arith.addf %3, %117 : vector<32x512xf32>
    %c0_32 = arith.constant 0 : index
    %c0_33 = arith.constant 0 : index
    %c0_34 = arith.constant 0 : index
    %119 = vector.load %arg7[%c0_32, %c0_33, %c0_34] : memref<1x1x512xf32, #tpu.memory_space<vmem>>, vector<1x1x512xf32>
    %120 = vector.shape_cast %119 : vector<1x1x512xf32> to vector<1x512xf32>
    %c0_35 = arith.constant 0 : index
    %c0_36 = arith.constant 0 : index
    %c0_37 = arith.constant 0 : index
    %121 = vector.load %arg8[%c0_35, %c0_36, %c0_37] : memref<1x1x512xf32, #tpu.memory_space<vmem>>, vector<1x1x512xf32>
    %122 = vector.shape_cast %121 : vector<1x1x512xf32> to vector<1x512xf32>
    %cst_38 = arith.constant dense<0.000000e+00> : vector<32xf32>
    %123 = vector.multi_reduction <add>, %118, %cst_38 [1] : vector<32x512xf32> to vector<32xf32>
    %124 = vector.shape_cast %123 : vector<32xf32> to vector<32x1xf32>
    %cst_39 = arith.constant 5.120000e+02 : f32
    %125 = vector.broadcast %cst_39 : f32 to vector<32x1xf32>
    %126 = arith.divf %124, %125 : vector<32x1xf32>
    %127 = vector.broadcast %126 : vector<32x1xf32> to vector<32x512xf32>
    %128 = arith.subf %118, %127 : vector<32x512xf32>
    %129 = arith.mulf %128, %128 : vector<32x512xf32>
    %cst_40 = arith.constant dense<0.000000e+00> : vector<32xf32>
    %130 = vector.multi_reduction <add>, %129, %cst_40 [1] : vector<32x512xf32> to vector<32xf32>
    %131 = vector.shape_cast %130 : vector<32xf32> to vector<32x1xf32>
    %cst_41 = arith.constant 5.120000e+02 : f32
    %132 = vector.broadcast %cst_41 : f32 to vector<32x1xf32>
    %133 = arith.divf %131, %132 : vector<32x1xf32>
    %cst_42 = arith.constant 9.99999974E-6 : f32
    %134 = vector.broadcast %cst_42 : f32 to vector<32x1xf32>
    %135 = arith.addf %133, %134 : vector<32x1xf32>
    %136 = math.rsqrt %135 : vector<32x1xf32>
    %137 = vector.broadcast %136 : vector<32x1xf32> to vector<32x512xf32>
    %138 = arith.mulf %128, %137 : vector<32x512xf32>
    %139 = vector.broadcast %120 : vector<1x512xf32> to vector<32x512xf32>
    %140 = arith.mulf %138, %139 : vector<32x512xf32>
    %141 = vector.broadcast %122 : vector<1x512xf32> to vector<32x512xf32>
    %142 = arith.addf %140, %141 : vector<32x512xf32>
    %143 = arith.truncf %142 : vector<32x512xf32> to vector<32x512xbf16>
    %c0_43 = arith.constant 0 : index
    %c0_44 = arith.constant 0 : index
    %c0_45 = arith.constant 0 : index
    %144 = vector.load %arg9[%c0_43, %c0_44, %c0_45] : memref<1x512x512xbf16, #tpu.memory_space<vmem>>, vector<1x512x512xbf16>
    %145 = vector.shape_cast %144 : vector<1x512x512xbf16> to vector<512x512xbf16>
    %cst_46 = arith.constant dense<0.000000e+00> : vector<32x512xf32>
    %146 = tpu.matmul %143, %145, %cst_46 {dimension_numbers = #tpu.dot_dimension_numbers<[1], [0], [0], [1], [0, 0, 1, 1], [], []>} : vector<32x512xbf16>, vector<512x512xbf16>, vector<32x512xf32> -> vector<32x512xf32>
    %c0_47 = arith.constant 0 : index
    %c0_48 = arith.constant 0 : index
    %c0_49 = arith.constant 0 : index
    %147 = vector.load %arg10[%c0_47, %c0_48, %c0_49] : memref<1x1x512xf32, #tpu.memory_space<vmem>>, vector<1x1x512xf32>
    %148 = vector.shape_cast %147 : vector<1x1x512xf32> to vector<1x512xf32>
    %149 = vector.broadcast %148 : vector<1x512xf32> to vector<32x512xf32>
    %150 = arith.addf %146, %149 : vector<32x512xf32>
    %cst_50 = arith.constant 0.000000e+00 : f32
    %151 = vector.broadcast %cst_50 : f32 to vector<32x512xf32>
    %152 = arith.maximumf %150, %151 : vector<32x512xf32>
    %153 = arith.truncf %152 : vector<32x512xf32> to vector<32x512xbf16>
    %c0_51 = arith.constant 0 : index
    %c0_52 = arith.constant 0 : index
    %c0_53 = arith.constant 0 : index
    %154 = vector.load %arg11[%c0_51, %c0_52, %c0_53] : memref<1x512x512xbf16, #tpu.memory_space<vmem>>, vector<1x512x512xbf16>
    %155 = vector.shape_cast %154 : vector<1x512x512xbf16> to vector<512x512xbf16>
    %cst_54 = arith.constant dense<0.000000e+00> : vector<32x512xf32>
    %156 = tpu.matmul %153, %155, %cst_54 {dimension_numbers = #tpu.dot_dimension_numbers<[1], [0], [0], [1], [0, 0, 1, 1], [], []>} : vector<32x512xbf16>, vector<512x512xbf16>, vector<32x512xf32> -> vector<32x512xf32>
    %c0_55 = arith.constant 0 : index
    %c0_56 = arith.constant 0 : index
    %c0_57 = arith.constant 0 : index
    %157 = vector.load %arg12[%c0_55, %c0_56, %c0_57] : memref<1x1x512xf32, #tpu.memory_space<vmem>>, vector<1x1x512xf32>
    %158 = vector.shape_cast %157 : vector<1x1x512xf32> to vector<1x512xf32>
    %159 = vector.broadcast %158 : vector<1x512xf32> to vector<32x512xf32>
    %160 = arith.addf %156, %159 : vector<32x512xf32>
    %161 = arith.addf %142, %160 : vector<32x512xf32>
    %c0_58 = arith.constant 0 : index
    %c0_59 = arith.constant 0 : index
    %c0_60 = arith.constant 0 : index
    %162 = vector.load %arg13[%c0_58, %c0_59, %c0_60] : memref<1x1x512xf32, #tpu.memory_space<vmem>>, vector<1x1x512xf32>
    %163 = vector.shape_cast %162 : vector<1x1x512xf32> to vector<1x512xf32>
    %c0_61 = arith.constant 0 : index
    %c0_62 = arith.constant 0 : index
    %c0_63 = arith.constant 0 : index
    %164 = vector.load %arg14[%c0_61, %c0_62, %c0_63] : memref<1x1x512xf32, #tpu.memory_space<vmem>>, vector<1x1x512xf32>
    %165 = vector.shape_cast %164 : vector<1x1x512xf32> to vector<1x512xf32>
    %cst_64 = arith.constant dense<0.000000e+00> : vector<32xf32>
    %166 = vector.multi_reduction <add>, %161, %cst_64 [1] : vector<32x512xf32> to vector<32xf32>
    %167 = vector.shape_cast %166 : vector<32xf32> to vector<32x1xf32>
    %cst_65 = arith.constant 5.120000e+02 : f32
    %168 = vector.broadcast %cst_65 : f32 to vector<32x1xf32>
    %169 = arith.divf %167, %168 : vector<32x1xf32>
    %170 = vector.broadcast %169 : vector<32x1xf32> to vector<32x512xf32>
    %171 = arith.subf %161, %170 : vector<32x512xf32>
    %172 = arith.mulf %171, %171 : vector<32x512xf32>
    %cst_66 = arith.constant dense<0.000000e+00> : vector<32xf32>
    %173 = vector.multi_reduction <add>, %172, %cst_66 [1] : vector<32x512xf32> to vector<32xf32>
    %174 = vector.shape_cast %173 : vector<32xf32> to vector<32x1xf32>
    %cst_67 = arith.constant 5.120000e+02 : f32
    %175 = vector.broadcast %cst_67 : f32 to vector<32x1xf32>
    %176 = arith.divf %174, %175 : vector<32x1xf32>
    %cst_68 = arith.constant 9.99999974E-6 : f32
    %177 = vector.broadcast %cst_68 : f32 to vector<32x1xf32>
    %178 = arith.addf %176, %177 : vector<32x1xf32>
    %179 = math.rsqrt %178 : vector<32x1xf32>
    %180 = vector.broadcast %179 : vector<32x1xf32> to vector<32x512xf32>
    %181 = arith.mulf %171, %180 : vector<32x512xf32>
    %182 = vector.broadcast %163 : vector<1x512xf32> to vector<32x512xf32>
    %183 = arith.mulf %181, %182 : vector<32x512xf32>
    %184 = vector.broadcast %165 : vector<1x512xf32> to vector<32x512xf32>
    %185 = arith.addf %183, %184 : vector<32x512xf32>
    %c0_69 = arith.constant 0 : index
    %c0_70 = arith.constant 0 : index
    %186 = vector.load %arg18[%c0_69, %c0_70] : memref<32x512xf32, #tpu.memory_space<vmem>>, vector<32x512xf32>
    tpu.vector_store %arg18[%c0_69, %c0_70], %185 {strides = array<i32>} : memref<32x512xf32, #tpu.memory_space<vmem>>, vector<32x512xf32>,
    %c1_i32 = arith.constant 1 : i32
    %187 = arith.cmpi eq, %arg1, %c1_i32 : i32
    %188 = arith.extui %187 : i1 to i32
    %c0_i32_71 = arith.constant 0 : i32
    %189 = arith.cmpi ne, %188, %c0_i32_71 : i32
    scf.if %189 {
      %c0_72 = arith.constant 0 : index
      %c0_73 = arith.constant 0 : index
      %190 = vector.load %arg15[%c0_72, %c0_73] : memref<1x512xf32, #tpu.memory_space<vmem>>, vector<1x512xf32>
      %c0_74 = arith.constant 0 : index
      %c0_75 = arith.constant 0 : index
      %191 = vector.load %arg16[%c0_74, %c0_75] : memref<1x512xf32, #tpu.memory_space<vmem>>, vector<1x512xf32>
      %cst_76 = arith.constant dense<0.000000e+00> : vector<32xf32>
      %192 = vector.multi_reduction <add>, %185, %cst_76 [1] : vector<32x512xf32> to vector<32xf32>
      %193 = vector.shape_cast %192 : vector<32xf32> to vector<32x1xf32>
      %cst_77 = arith.constant 5.120000e+02 : f32
      %194 = vector.broadcast %cst_77 : f32 to vector<32x1xf32>
      %195 = arith.divf %193, %194 : vector<32x1xf32>
      %196 = vector.broadcast %195 : vector<32x1xf32> to vector<32x512xf32>
      %197 = arith.subf %185, %196 : vector<32x512xf32>
      %198 = arith.mulf %197, %197 : vector<32x512xf32>
      %cst_78 = arith.constant dense<0.000000e+00> : vector<32xf32>
      %199 = vector.multi_reduction <add>, %198, %cst_78 [1] : vector<32x512xf32> to vector<32xf32>
      %200 = vector.shape_cast %199 : vector<32xf32> to vector<32x1xf32>
      %cst_79 = arith.constant 5.120000e+02 : f32
      %201 = vector.broadcast %cst_79 : f32 to vector<32x1xf32>
      %202 = arith.divf %200, %201 : vector<32x1xf32>
      %cst_80 = arith.constant 9.99999974E-6 : f32
      %203 = vector.broadcast %cst_80 : f32 to vector<32x1xf32>
      %204 = arith.addf %202, %203 : vector<32x1xf32>
      %205 = math.rsqrt %204 : vector<32x1xf32>
      %206 = vector.broadcast %205 : vector<32x1xf32> to vector<32x512xf32>
      %207 = arith.mulf %197, %206 : vector<32x512xf32>
      %208 = vector.broadcast %190 : vector<1x512xf32> to vector<32x512xf32>
      %209 = arith.mulf %207, %208 : vector<32x512xf32>
      %210 = vector.broadcast %191 : vector<1x512xf32> to vector<32x512xf32>
      %211 = arith.addf %209, %210 : vector<32x512xf32>
      %212 = vector.shape_cast %211 : vector<32x512xf32> to vector<4x8x512xf32>
      %c0_81 = arith.constant 0 : index
      %c0_82 = arith.constant 0 : index
      %c0_83 = arith.constant 0 : index
      %213 = vector.load %arg17[%c0_81, %c0_82, %c0_83] : memref<4x8x512xf32, #tpu.memory_space<vmem>>, vector<4x8x512xf32>
      tpu.vector_store %arg17[%c0_81, %c0_82, %c0_83], %212 {strides = array<i32>} : memref<4x8x512xf32, #tpu.memory_space<vmem>>, vector<4x8x512xf32>,
    } else {
    }
    return
  }
  func.func @transform_0(%arg0: i32, %arg1: i32) -> (i32, i32, i32) {
    %c0_i32 = arith.constant 0 : i32
    %c0_i32_0 = arith.constant 0 : i32
    %c0_i32_1 = arith.constant 0 : i32
    return %arg0, %c0_i32, %c0_i32_0 : i32, i32, i32
  }
  func.func @transform_1(%arg0: i32, %arg1: i32) -> (i32, i32, i32) {
    %c0_i32 = arith.constant 0 : i32
    %c0_i32_0 = arith.constant 0 : i32
    %c0_i32_1 = arith.constant 0 : i32
    return %arg1, %c0_i32, %c0_i32_0 : i32, i32, i32
  }
  func.func @transform_2(%arg0: i32, %arg1: i32) -> (i32, i32, i32) {
    %c0_i32 = arith.constant 0 : i32
    %c0_i32_0 = arith.constant 0 : i32
    %c0_i32_1 = arith.constant 0 : i32
    return %arg1, %c0_i32, %c0_i32_0 : i32, i32, i32
  }
  func.func @transform_3(%arg0: i32, %arg1: i32) -> (i32, i32, i32) {
    %c0_i32 = arith.constant 0 : i32
    %c0_i32_0 = arith.constant 0 : i32
    %c0_i32_1 = arith.constant 0 : i32
    return %arg1, %c0_i32, %c0_i32_0 : i32, i32, i32
  }
  func.func @transform_4(%arg0: i32, %arg1: i32) -> (i32, i32, i32) {
    %c0_i32 = arith.constant 0 : i32
    %c0_i32_0 = arith.constant 0 : i32
    %c0_i32_1 = arith.constant 0 : i32
    return %arg1, %c0_i32, %c0_i32_0 : i32, i32, i32
  }
  func.func @transform_5(%arg0: i32, %arg1: i32) -> (i32, i32, i32) {
    %c0_i32 = arith.constant 0 : i32
    %c0_i32_0 = arith.constant 0 : i32
    %c0_i32_1 = arith.constant 0 : i32
    return %arg1, %c0_i32, %c0_i32_0 : i32, i32, i32
  }
  func.func @transform_6(%arg0: i32, %arg1: i32) -> (i32, i32, i32) {
    %c0_i32 = arith.constant 0 : i32
    %c0_i32_0 = arith.constant 0 : i32
    %c0_i32_1 = arith.constant 0 : i32
    return %arg1, %c0_i32, %c0_i32_0 : i32, i32, i32
  }
  func.func @transform_7(%arg0: i32, %arg1: i32) -> (i32, i32, i32) {
    %c0_i32 = arith.constant 0 : i32
    %c0_i32_0 = arith.constant 0 : i32
    %c0_i32_1 = arith.constant 0 : i32
    return %arg1, %c0_i32, %c0_i32_0 : i32, i32, i32
  }
  func.func @transform_8(%arg0: i32, %arg1: i32) -> (i32, i32, i32) {
    %c0_i32 = arith.constant 0 : i32
    %c0_i32_0 = arith.constant 0 : i32
    %c0_i32_1 = arith.constant 0 : i32
    return %arg1, %c0_i32, %c0_i32_0 : i32, i32, i32
  }
  func.func @transform_9(%arg0: i32, %arg1: i32) -> (i32, i32, i32) {
    %c0_i32 = arith.constant 0 : i32
    %c0_i32_0 = arith.constant 0 : i32
    %c0_i32_1 = arith.constant 0 : i32
    return %arg1, %c0_i32, %c0_i32_0 : i32, i32, i32
  }
  func.func @transform_10(%arg0: i32, %arg1: i32) -> (i32, i32, i32) {
    %c0_i32 = arith.constant 0 : i32
    %c0_i32_0 = arith.constant 0 : i32
    %c0_i32_1 = arith.constant 0 : i32
    return %arg1, %c0_i32, %c0_i32_0 : i32, i32, i32
  }
  func.func @transform_11(%arg0: i32, %arg1: i32) -> (i32, i32, i32) {
    %c0_i32 = arith.constant 0 : i32
    %c0_i32_0 = arith.constant 0 : i32
    %c0_i32_1 = arith.constant 0 : i32
    return %arg1, %c0_i32, %c0_i32_0 : i32, i32, i32
  }
  func.func @transform_12(%arg0: i32, %arg1: i32) -> (i32, i32, i32) {
    %c0_i32 = arith.constant 0 : i32
    %c0_i32_0 = arith.constant 0 : i32
    %c0_i32_1 = arith.constant 0 : i32
    return %arg1, %c0_i32, %c0_i32_0 : i32, i32, i32
  }
  func.func @transform_13(%arg0: i32, %arg1: i32) -> (i32, i32) {
    %c0_i32 = arith.constant 0 : i32
    %c0_i32_0 = arith.constant 0 : i32
    %c0_i32_1 = arith.constant 0 : i32
    return %c0_i32, %c0_i32_0 : i32, i32
  }
  func.func @transform_14(%arg0: i32, %arg1: i32) -> (i32, i32) {
    %c0_i32 = arith.constant 0 : i32
    %c0_i32_0 = arith.constant 0 : i32
    %c0_i32_1 = arith.constant 0 : i32
    return %c0_i32, %c0_i32_0 : i32, i32
  }
  func.func @transform_15(%arg0: i32, %arg1: i32) -> (i32, i32, i32) {
    %c0_i32 = arith.constant 0 : i32
    %c0_i32_0 = arith.constant 0 : i32
    %c0_i32_1 = arith.constant 0 : i32
    return %arg0, %c0_i32, %c0_i32_0 : i32, i32, i32
  }
}

</mosaic_0001>

<bundles_post_ra>
// kernel: tpu_custom_call.1
= control target key start
LH: loop header
LB: loop body
LE: loop exit
PB: predicated region body
PF: predicated region fallthrough
CT: control target
= control target key end

     0   :  { %s17565_s0 = inlined_call_operand.hbm [shape: f32[4,8,512], index: 0, kind: input, shape index: {}]   ;;  %s17566_s1 = inlined_call_operand.hbm [shape: bf16[2,512,1536], index: 1, kind: input, shape index: {}]   ;;  %s17567_s2 = inlined_call_operand.hbm [shape: f32[2,1,1536], index: 2, kind: input, shape index: {}]   ;;  %s17568_s3 = inlined_call_operand.hbm [shape: bf16[2,512,512], index: 3, kind: input, shape index: {}]   ;;  %s17569_s4 = inlined_call_operand.hbm [shape: f32[2,1,512], index: 4, kind: input, shape index: {}]   ;;  %s17570_s5 = inlined_call_operand.hbm [shape: f32[2,1,512], index: 5, kind: input, shape index: {}]   ;;  %s17571_s6 = inlined_call_operand.hbm [shape: f32[2,1,512], index: 6, kind: input, shape index: {}]   ;;  %s17572_s7 = inlined_call_operand.hbm [shape: bf16[2,512,512], index: 7, kind: input, shape index: {}]   ;;  %s17573_s8 = inlined_call_operand.hbm [shape: f32[2,1,512], index: 8, kind: input, shape index: {}]   ;;  %s17574_s9 = inlined_call_operand.hbm [shape: bf16[2,512,512], index: 9, kind: input, shape index: {}]   ;;  %s17575_s10 = inlined_call_operand.hbm [shape: f32[2,1,512], index: 10, kind: input, shape index: {}]   ;;  %s17576_s11 = inlined_call_operand.hbm [shape: f32[2,1,512], index: 11, kind: input, shape index: {}]   ;;  %s17577_s12 = inlined_call_operand.hbm [shape: f32[2,1,512], index: 12, kind: input, shape index: {}]   ;;  %s17578_s13 = inlined_call_operand.hbm [shape: f32[1,512], index: 13, kind: input, shape index: {}]   ;;  %s17579_s14 = inlined_call_operand.hbm [shape: f32[1,512], index: 14, kind: input, shape index: {}]   ;;  %s17580_s15 = inlined_call_operand.hbm [shape: f32[4,8,512], index: 15, kind: output, shape index: {}]  }
   0x1   :  { %17608 = sst [smem:[#allocation64_spill]] %s17565_s0 }
   0x2   :  { %17609 = sst [smem:[#allocation65_spill]] %s17566_s1 }
   0x3   :  { %17610 = sst [smem:[#allocation66_spill]] %s17567_s2 }
   0x4   :  { %17611 = sst [smem:[#allocation67_spill]] %s17568_s3 }
   0x5   :  { %17612 = sst [smem:[#allocation68_spill]] %s17569_s4 }
   0x6   :  { %17613 = sst [smem:[#allocation69_spill]] %s17570_s5 }
   0x7   :  { %17614 = sst [smem:[#allocation70_spill]] %s17575_s10 }
   0x8   :  { %17615 = sst [smem:[#allocation71_spill]] %s17577_s12 }
   0x9   :  { %17616 = sst [smem:[#allocation72_spill]] %s17578_s13 }
   0xa   :  { %17617 = sst [smem:[#allocation73_spill]] %s17580_s15 }
   0xb   :  { %20 = vsyncpa [#allocation4], 0 }
   0xc   :  { %21 = vsyncpa [#allocation7], 0 }
   0xd   :  { %23 = vsyncpa [#allocation7 + $0x1], 0 }
   0xe   :  { %24 = vsyncpa [#allocation10], 0 }
   0xf   :  { %26 = vsyncpa [#allocation10 + $0x1], 0 }
  0x10   :  { %27 = vsyncpa [#allocation13], 0 }
  0x11   :  { %29 = vsyncpa [#allocation13 + $0x1], 0 }
  0x12   :  { %30 = vsyncpa [#allocation16], 0 }
  0x13   :  { %32 = vsyncpa [#allocation16 + $0x1], 0 }
  0x14   :  { %33 = vsyncpa [#allocation19], 0 }
  0x15   :  { %35 = vsyncpa [#allocation19 + $0x1], 0 }
  0x16   :  { %36 = vsyncpa [#allocation22], 0 }
  0x17   :  { %38 = vsyncpa [#allocation22 + $0x1], 0 }
  0x18   :  { %39 = vsyncpa [#allocation25], 0 }
  0x19   :  { %40 = vsyncpa [#allocation5], 0  ;;  %s14126_s18 = smov 0   ;;  %s14128_s19 = smov 0  }
  0x1a   :  { %s14130_s20 = smov 0   ;;  %s14132_s21 = smov 0  }
  0x1b   :  { %s14134_s22 = smov 0   ;;  %s14136_s23 = smov 0  }
  0x1c LB: > { %17618 = sst [smem:[#allocation37_spill]] %s14015_s19  ;;  %s14155_s24 = sadd.s32 4294967295, %s14031_s23   ;;  %s14031_s23 = sphi %s14136_s23, %s46_s23   ;;  %s14027_s22 = sphi %s14134_s22, %s17717_s22   ;;  %s14023_s21 = sphi %s14132_s21, %s17716_s21   ;;  %s14019_s20 = sphi %s14130_s20, %s17715_s20   ;;  %s14015_s19 = sphi %s14128_s19, %s17714_s19   ;;  %s14011_s18 = sphi %s14126_s18, %s17711_s18  }
  0x1d   : > { %17619 = sst [smem:[#allocation38_spill]] %s14023_s21  ;;  %s55_s25 = sadd.s32 1, %s14027_s22 }
  0x1e   : > { %17620 = sst [smem:[#allocation39_spill]] %s14155_s24  ;;  %p56_p0 = scmp.ge.s32.totalorder %s55_s25, 2 }
  0x1f   : > { %s91_s26 = sadd.s32 1, %s14019_s20  ;;  %p98_p1 = scmp.ne.s32.totalorder %s14019_s20, %s14015_s19 }
  0x20   : > { %p99_p2 = scmp.eq.s32.totalorder %s14031_s23, 0  ;;  %s17719_s25 = smov (%p56_p0, %s55_s25), 0 }
  0x21   : > { %17621 = sst [smem:[#allocation40_spill]] %s17719_s25  ;;  %p104_p4 = scmp.ne.s32.totalorder %s14015_s19, %s14011_s18 }
  0x22   : > { %p14164_p3 = por %p99_p2, %p98_p1  ;;  %s88_s28 = ssub.s32 %s14027_s22, %s17719_s25 }
  0x23   : > { %p105_p5 = scmp.eq.s32.totalorder %s14155_s24, 0  ;;  %p89_p6 = scmp.eq.s32.totalorder %s88_s28, 0 }
  0x24   : > { %p9354_p7 = scmp.ge.s32.totalorder %s14031_s23, 1  ;;  %p469_p9 = scmp.lt.s32.totalorder %s14031_s23, 3 }
  0x25   : > { %p14175_p8 = por %p105_p5, %p104_p4  ;;  %s17628_s13 = sld [smem:[#allocation72_spill]] }
  0x26   : > { %s14181_s30 = scalar_select %p89_p6, %s14019_s20, %s91_s26  }
  0x27   : > { %s17623_s29 = scalar_select %p14175_p8, 1, 0 }
  0x28   : > { %17625 = sst [smem:[#allocation42_spill]] %s14181_s30  ;;  %p14183_p10 = pnand %p9354_p7, %p469_p9 }
  0x29   : > { %17624 = sst [smem:[#allocation41_spill]] %s17623_s29  ;;  %s14033_s28 = smov [#allocation24]  }
  0x2a   : > { %s17626_s16 = scalar_select %p14183_p10, 1, 0 }
  0x2b   : > { %s499_s18 = sshll.u32 %s17628_s13, 4  ;;  %p13308_p11 = pneg %p14183_p10  ;;  %s500_s18 = int_to_ptr.hbm [resolvable:$true] %s499_s18 }
  0x2c   : > { %17627 = sst [smem:[#allocation43_spill]] %s17626_s16  ;;  %s501_s25 = sshll.u32 %s14033_s28, 4  ;;  %s502_s25 = int_to_ptr.vmem [resolvable:$true] %s501_s25 }
  0x2d   : > { %p14194_p12 = pnand %p13308_p11, %p105_p5  ;;  %s17630_s0 = sld [smem:[#allocation64_spill]] }
  0x2e   : > { %s14034_s17 = smov [#allocation3]   ;;  %s511_s19 = sshll.u32 %s17579_s14, 4  ;;  %s512_s19 = int_to_ptr.hbm [resolvable:$true] %s511_s19 }
  0x2f   : > { %13314 = dma.hbm_to_vmem [thread:$0]  (!%p14194_p12), %s500_s18, 64, %s502_s25, [#allocation25]  }
  0x30   : > { %s486_s13 = sshll.u32 %s14034_s17, 4  ;;  %s14035_s24 = smov 512   ;;  %s487_s13 = int_to_ptr.vmem [resolvable:$true] %s486_s13 }
  0x31   : > { %s14036_s16 = smov 32   ;;  %s14037_s12 = smov [#allocation26]  }
  0x32   : > { %s513_s10 = sshll.u32 %s14037_s12, 4  ;;  %p9358_p13 = scmp.ge.s32.totalorder %s14031_s23, 2  ;;  %s514_s10 = int_to_ptr.vmem [resolvable:$true] %s513_s10 }
  0x33   : > { %s484_s15 = sshll.u32 %s17630_s0, 4  ;;  %s14212_s25 = sand.u32 (!%p9358_p13), 1, %s14031_s23   ;;  %s485_s15 = int_to_ptr.hbm [resolvable:$true] %s484_s15 }
  0x34   : > { %13311 = dma.hbm_to_vmem [thread:$0]  (!%p14194_p12), %s485_s15, 2048, %s487_s13, [#allocation4], %s14035_s24, %s14035_s24, %s14036_s16  }
  0x35   : > { %13317 = dma.hbm_to_vmem [thread:$0]  (!%p14194_p12), %s512_s19, 64, %s514_s10, [#allocation25]  }
  0x36   : > { %520 = sbr.rel (%p9358_p13) target bundleno = 110 (0x6e), region = 28  ;;  %s14215_s29 = sand.u32 (!%p9358_p13), 1, %s14019_s20  }
  0x37   : > { %s13262_s12 = smul.u32 (!%p9358_p13), 3072, %s14215_s29  ;;  %s17631_s1 = sld [smem:[#allocation65_spill]] (!%p9358_p13) }
  0x38   : > { %s13263_s13 = smul.u32 (!%p9358_p13), 3072, %s14027_s22  ;;  %s17588_s18 = scalar_lea.sflag (!%p9358_p13), [#allocation7], %s14212_s25 }
  0x39   : > { %s528_s24 = scalar_lea.vmem (!%p9358_p13), [#allocation6], %s13262_s12  ;;  %s14038_s26 = smov (!%p9358_p13), 768  }
  0x3a   : > { %s536_s30 = sshll.u32 (!%p9358_p13), %s528_s24, 4  ;;  %s14039_s15 = smov (!%p9358_p13), 48   ;;  %s537_s30 = int_to_ptr.vmem [resolvable:$true] %s536_s30 }
  0x3b   : > { %s14228_s17 = sshll.u32 %s14215_s29, 10  ;;  %s14231_s28 = sshll.u32 %s14027_s22, 10 }
  0x3c   : > { %s17632_s3 = sld [smem:[#allocation67_spill]]  ;;  %s14250_s12 = sshll.u32 %s14027_s22, 2 }
  0x3d   : > { %s533_s19 = scalar_lea.hbm %s17631_s1, %s13263_s13  ;;  %s17633_s5 = sld [smem:[#allocation69_spill]] }
  0x3e   : > { %s534_s16 = sshll.u32 %s533_s19, 4  ;;  %s569_s19 = scalar_lea.vmem [#allocation9], %s14228_s17  ;;  %s535_s16 = int_to_ptr.hbm [resolvable:$true] %s534_s16 }
  0x3f   : > { %13274 = dma.hbm_to_vmem [thread:$0]  (%p14164_p3), %s535_s16, 49152, %s537_s30, %s17588_s18, %s14038_s26, %s14038_s26, %s14039_s15  }
  0x40   : > { %s577_s24 = sshll.u32 %s569_s19, 4  ;;  %s17589_s30 = scalar_lea.sflag [#allocation10], %s14212_s25  ;;  %s578_s24 = int_to_ptr.vmem [resolvable:$true] %s577_s24 }
  0x41   : > { %s17590_s16 = smov 256   ;;  %s17592_s26 = smov 16  }
  0x42   : > { %s574_s21 = scalar_lea.hbm %s17632_s3, %s14231_s28  ;;  %s14247_s15 = sshll.u32 %s14215_s29, 2 }
  0x43   : > { %s575_s10 = sshll.u32 %s574_s21, 4  ;;  %s614_s19 = scalar_lea.hbm %s17633_s5, %s14250_s12  ;;  %s576_s10 = int_to_ptr.hbm [resolvable:$true] %s575_s10 }
  0x44   : > { %13276 = dma.hbm_to_vmem [thread:$0]  (%p14164_p3), %s576_s10, 16384, %s578_s24, %s17589_s30, %s17590_s16, %s17590_s16, %s17592_s26  }
  0x45   : > { %s610_s18 = scalar_lea.vmem [#allocation12], %s14247_s15  ;;  %s616_s1 = sshll.u32 %s614_s19, 4  ;;  %s617_s1 = int_to_ptr.hbm [resolvable:$true] %s616_s1 }
  0x46   : > { %s618_s0 = sshll.u32 %s610_s18, 4  ;;  %s17594_s10 = scalar_lea.sflag [#allocation13], %s14212_s25  ;;  %s619_s0 = int_to_ptr.vmem [resolvable:$true] %s618_s0 }
  0x47   : > { %13278 = dma.hbm_to_vmem [thread:$0]  (%p14164_p3), %s617_s1, 64, %s619_s0, %s17594_s10  }
  0x48   : > { %s653_s13 = scalar_lea.hbm %s17572_s7, %s14231_s28  ;;  %s648_s16 = scalar_lea.vmem [#allocation15], %s14228_s17 }
  0x49   : > { %s654_s21 = sshll.u32 %s653_s13, 4  ;;  %s656_s26 = sshll.u32 %s648_s16, 4  ;;  %s655_s21 = int_to_ptr.hbm [resolvable:$true] %s654_s21  ;;  %s657_s26 = int_to_ptr.vmem [resolvable:$true] %s656_s26 }
  0x4a   : > { %s17596_s18 = scalar_lea.sflag [#allocation16], %s14212_s25  ;;  %s17634_s19 = smov 16  }
  0x4b   : > { %s17635_s3 = smov 256   ;;  %s694_s30 = scalar_lea.hbm %s17574_s9, %s14231_s28 }
  0x4c   : > { %13280 = dma.hbm_to_vmem [thread:$0]  (%p14164_p3), %s655_s21, 16384, %s657_s26, %s17596_s18, %s17635_s3, %s17635_s3, %s17634_s19  }
  0x4d   : > { %s689_s24 = scalar_lea.vmem [#allocation18], %s14228_s17  ;;  %s695_s13 = sshll.u32 %s694_s30, 4  ;;  %s696_s13 = int_to_ptr.hbm [resolvable:$true] %s695_s13 }
  0x4e   : > { %s697_s16 = sshll.u32 %s689_s24, 4  ;;  %s17595_s10 = scalar_lea.sflag [#allocation19], %s14212_s25  ;;  %s698_s16 = int_to_ptr.vmem [resolvable:$true] %s697_s16 }
  0x4f   : > { %13282 = dma.hbm_to_vmem [thread:$0]  (%p14164_p3), %s696_s13, 16384, %s698_s16, %s17595_s10, %s17635_s3, %s17635_s3, %s17634_s19  }
  0x50   : > { %s734_s0 = scalar_lea.hbm %s17576_s11, %s14250_s12  ;;  %s730_s1 = scalar_lea.vmem [#allocation21], %s14247_s15 }
  0x51   : > { %s736_s28 = sshll.u32 %s734_s0, 4  ;;  %s738_s17 = sshll.u32 %s730_s1, 4  ;;  %s737_s28 = int_to_ptr.hbm [resolvable:$true] %s736_s28  ;;  %s739_s17 = int_to_ptr.vmem [resolvable:$true] %s738_s17 }
  0x52   : > { %s17597_s30 = scalar_lea.sflag [#allocation22], %s14212_s25  ;;  %s13264_s24 = smul.u32 12, %s14215_s29 }
  0x53   : > { %13284 = dma.hbm_to_vmem [thread:$0]  (%p14164_p3), %s737_s28, 64, %s739_s17, %s17597_s30  }
  0x54   : > { %s13265_s3 = smul.u32 12, %s14027_s22  ;;  %s17636_s4 = sld [smem:[#allocation68_spill]] }
  0x55   : > { %s17637_s2 = sld [smem:[#allocation66_spill]]  ;;  %s550_s10 = scalar_lea.vmem [#allocation8], %s13264_s24 }
  0x56   : > { %s558_s18 = sshll.u32 %s550_s10, 4  ;;  %s17638_s29 = scalar_lea.sflag [#allocation7], %s14212_s25  ;;  %s559_s18 = int_to_ptr.vmem [resolvable:$true] %s558_s18 }
  0x57   : > { %s591_s17 = scalar_lea.vmem [#allocation11], %s14247_s15  ;;  %s633_s10 = scalar_lea.hbm %s17571_s6, %s14250_s12 }
  0x58   : > { %s599_s19 = sshll.u32 %s591_s17, 4  ;;  %s17639_s24 = scalar_lea.sflag [#allocation10], %s14212_s25  ;;  %s600_s19 = int_to_ptr.vmem [resolvable:$true] %s599_s19 }
  0x59   : > { %s629_s21 = scalar_lea.vmem [#allocation14], %s14247_s15  ;;  %s670_s16 = scalar_lea.vmem [#allocation17], %s14247_s15 }
  0x5a   : > { %s595_s13 = scalar_lea.hbm %s17636_s4, %s14250_s12  ;;  %s637_s0 = sshll.u32 %s629_s21, 4  ;;  %s638_s0 = int_to_ptr.vmem [resolvable:$true] %s637_s0 }
  0x5b   : > { %s597_s26 = sshll.u32 %s595_s13, 4  ;;  %s554_s1 = scalar_lea.hbm %s17637_s2, %s13265_s3  ;;  %s598_s26 = int_to_ptr.hbm [resolvable:$true] %s597_s26 }
  0x5c   : > { %s556_s28 = sshll.u32 %s554_s1, 4  ;;  %s635_s13 = sshll.u32 %s633_s10, 4  ;;  %s557_s28 = int_to_ptr.hbm [resolvable:$true] %s556_s28  ;;  %s636_s13 = int_to_ptr.hbm [resolvable:$true] %s635_s13 }
  0x5d   : > { %13275 = dma.hbm_to_vmem [thread:$0]  (%p14164_p3), %s557_s28, 192, %s559_s18, %s17638_s29  }
  0x5e   : > { %13277 = dma.hbm_to_vmem [thread:$0]  (%p14164_p3), %s598_s26, 64, %s600_s19, %s17639_s24  }
  0x5f   : > { %s17640_s18 = scalar_lea.sflag [#allocation13], %s14212_s25  ;;  %s674_s29 = scalar_lea.hbm %s17573_s8, %s14250_s12 }
  0x60   : > { %13279 = dma.hbm_to_vmem [thread:$0]  (%p14164_p3), %s636_s13, 64, %s638_s0, %s17640_s18  }
  0x61   : > { %s676_s17 = sshll.u32 %s674_s29, 4  ;;  %s678_s26 = sshll.u32 %s670_s16, 4  ;;  %s677_s17 = int_to_ptr.hbm [resolvable:$true] %s676_s17  ;;  %s679_s26 = int_to_ptr.vmem [resolvable:$true] %s678_s26 }
  0x62   : > { %s17641_s19 = scalar_lea.sflag [#allocation16], %s14212_s25  ;;  %s17642_s24 = sld [smem:[#allocation70_spill]] }
  0x63   : > { %13281 = dma.hbm_to_vmem [thread:$0]  (%p14164_p3), %s677_s17, 64, %s679_s26, %s17641_s19  }
  0x64   : > { %s711_s0 = scalar_lea.vmem [#allocation20], %s14247_s15  ;;  %s17643_s1 = scalar_lea.sflag [#allocation19], %s14212_s25 }
  0x65   : > { %s719_s18 = sshll.u32 %s711_s0, 4  ;;  %s17644_s16 = sld [smem:[#allocation71_spill]]  ;;  %s720_s18 = int_to_ptr.vmem [resolvable:$true] %s719_s18 }
  0x66   : > { %s749_s4 = scalar_lea.vmem [#allocation23], %s14247_s15  ;;  %s17645_s17 = scalar_lea.sflag [#allocation22], %s14212_s25 }
  0x67   : > { %s757_s5 = sshll.u32 %s749_s4, 4  ;;  %s758_s5 = int_to_ptr.vmem [resolvable:$true] %s757_s5 }
  0x68   : > { %s715_s21 = scalar_lea.hbm %s17642_s24, %s14250_s12 }
  0x69   : > { %s717_s13 = sshll.u32 %s715_s21, 4  ;;  %s718_s13 = int_to_ptr.hbm [resolvable:$true] %s717_s13 }
  0x6a   : > { %13283 = dma.hbm_to_vmem [thread:$0]  (%p14164_p3), %s718_s13, 64, %s720_s18, %s17643_s1  }
  0x6b   : > { %s753_s30 = scalar_lea.hbm %s17644_s16, %s14250_s12 }
  0x6c   : > { %s755_s2 = sshll.u32 %s753_s30, 4  ;;  %s756_s2 = int_to_ptr.hbm [resolvable:$true] %s755_s2 }
  0x6d   : > { %13285 = dma.hbm_to_vmem [thread:$0]  (%p14164_p3), %s756_s2, 64, %s758_s5, %s17645_s17  }
  0x6e PF: > { %766 = sbr.rel (%p14183_p10) target bundleno = 3948 (0xf6c), region = 80 }
  0x73   : > { %s17647_s19 = sld [smem:[#allocation39_spill]] }
  0x74   : > { %13974 = dma.done.wait (%p105_p5), [#allocation4], 2048  }
  0x75   : > { %13976 = vsyncadd (%p105_p5), [#allocation4], 4294965248  ;;  %s17648_s12 = sld [smem:[#allocation37_spill]] }
  0x79   : > { %s14359_s15 = sand.u32 1, %s17647_s19  }
  0x7a   : > { %s774_s25 = scalar_lea.sflag [#allocation7], %s14359_s15 }
  0x7b   : > { %s775_s4 = sand.u32 1, %s17648_s12  }
  0x7c   : > { %s13266_s27 = smul.u32 3072, %s775_s4 }
  0x7e   : > { %s14363_s2 = scalar_lea.vmem [#allocation6], %s13266_s27 }
  0x7f   : > { %13978 = dma.done.wait (%p14175_p8), %s774_s25, 49344  }
  0x80   : > { %13980 = vsyncadd (%p14175_p8), %s774_s25, 4294917952  ;;  %s13267_s5 = smul.u32 12, %s775_s4  ;;  %s9385_s3 = sshll.u32 %s775_s4, 10 }
  0x81   : > { %s794_s24 = scalar_lea.sflag [#allocation10], %s14359_s15  ;;  %s14372_s21 = scalar_lea.vmem [#allocation9], %s9385_s3 }
  0x82   : > { %s14369_s10 = scalar_lea.vmem [#allocation8], %s13267_s5 }
  0x83   : > { %13982 = dma.done.wait (%p14175_p8), %s794_s24, 16448  }
  0x84   : > { %13984 = vsyncadd (%p14175_p8), %s794_s24, 4294950848  ;;  %s14378_s13 = sshll.u32 %s775_s4, 2  ;;  %s814_s18 = scalar_lea.sflag [#allocation13], %s14359_s15 }
  0x85   : > { %s807_s0 = scalar_lea.vmem [#allocation11], %s14378_s13  ;;  %s817_s1 = scalar_lea.vmem [#allocation12], %s14378_s13 }
  0x86   : > { %13986 = dma.done.wait (%p14175_p8), %s814_s18, 128  }
  0x87   : > { %13988 = vsyncadd (%p14175_p8), %s814_s18, 4294967168  ;;  %s827_s28 = scalar_lea.vmem [#allocation14], %s14378_s13  ;;  %s834_s29 = scalar_lea.sflag [#allocation16], %s14359_s15 }
  0x88   : > { %s14389_s16 = scalar_lea.vmem [#allocation15], %s9385_s3 }
  0x89   : > { %13990 = dma.done.wait (%p14175_p8), %s834_s29, 16448  }
  0x8a   : > { %13992 = vsyncadd (%p14175_p8), %s834_s29, 4294950848  ;;  %s847_s17 = scalar_lea.vmem [#allocation17], %s14378_s13  ;;  %s854_s26 = scalar_lea.sflag [#allocation19], %s14359_s15 }
  0x8b   : > { %s14397_s12 = scalar_lea.vmem [#allocation18], %s9385_s3 }
  0x8c   : > { %13994 = dma.done.wait (%p14175_p8), %s854_s26, 16448  }
  0x8d   : > { %13996 = vsyncadd (%p14175_p8), %s854_s26, 4294950848  ;;  %s867_s4 = scalar_lea.vmem [#allocation20], %s14378_s13  ;;  %s874_s27 = scalar_lea.sflag [#allocation22], %s14359_s15 }
  0x8e   : > { %s877_s25 = scalar_lea.vmem [#allocation21], %s14378_s13 }
  0x8f   : > { %13998 = dma.done.wait (%p14175_p8), %s874_s27, 128  }
  0x90   : > { %14000 = vsyncadd (%p14175_p8), %s874_s27, 4294967168  ;;  %s887_s5 = scalar_lea.vmem [#allocation23], %s14378_s13 }
  0x91   : > { %14002 = dma.done.wait (%p105_p5), [#allocation25], 128  }
  0x92   : > { %14004 = vsyncadd (%p105_p5), [#allocation25], 4294967168  ;;  %s17650_s3 = sld [smem:[#allocation38_spill]] }
  0x98   : > { %p9397_p0 = scmp.ne.s32.totalorder %s17650_s3, 0 }
  0x9a   : > { %1001 = sbr.rel (%p9397_p0) target bundleno = 176 (0xb0), region = 144 }
  0x9f   : > { %v1002_v0 = vld [vmem:[#allocation3] sm:$0xff]  ;;  %v1003_v1 = vld [vmem:[#allocation3 + $0x8] sm:$0xff]  ;;  %v1004_v2 = vld [vmem:[#allocation3 + $0x10] sm:$0xff] }
  0xa0   : > { %1018 = vst [vmem:[#allocation2 + $0x30] sm:$0xff] %v1002_v0  ;;  %v1005_v3 = vld [vmem:[#allocation3 + $0x18] sm:$0xff]  ;;  %v1006_v4 = vld [vmem:[#allocation3 + $0x20] sm:$0xff]  ;;  %v1007_v5 = vld [vmem:[#allocation3 + $0x28] sm:$0xff] }
  0xa1   : > { %1019 = vst [vmem:[#allocation2] sm:$0xff] %v1003_v1  ;;  %v1008_v6 = vld [vmem:[#allocation3 + $0x30] sm:$0xff]  ;;  %v1009_v7 = vld [vmem:[#allocation3 + $0x38] sm:$0xff]  ;;  %v1010_v8 = vld [vmem:[#allocation3 + $0x40] sm:$0xff] }
  0xa2   : > { %1020 = vst [vmem:[#allocation2 + $0x58] sm:$0xff] %v1004_v2  ;;  %v1011_v9 = vld [vmem:[#allocation3 + $0x48] sm:$0xff]  ;;  %v1012_v10 = vld [vmem:[#allocation3 + $0x50] sm:$0xff]  ;;  %v1013_v11 = vld [vmem:[#allocation3 + $0x58] sm:$0xff] }
  0xa3   : > { %1021 = vst [vmem:[#allocation2 + $0x18] sm:$0xff] %v1005_v3  ;;  %v1014_v12 = vld [vmem:[#allocation3 + $0x60] sm:$0xff]  ;;  %v1015_v13 = vld [vmem:[#allocation3 + $0x68] sm:$0xff]  ;;  %v1016_v14 = vld [vmem:[#allocation3 + $0x70] sm:$0xff] }
  0xa4   : > { %1022 = vst [vmem:[#allocation2 + $0x50] sm:$0xff] %v1006_v4  ;;  %v1017_v15 = vld [vmem:[#allocation3 + $0x78] sm:$0xff] }
  0xa5   : > { %1023 = vst [vmem:[#allocation2 + $0x68] sm:$0xff] %v1007_v5 }
  0xa6   : > { %1024 = vst [vmem:[#allocation2 + $0x8] sm:$0xff] %v1008_v6 }
  0xa7   : > { %1025 = vst [vmem:[#allocation2 + $0x48] sm:$0xff] %v1009_v7 }
  0xa8   : > { %1026 = vst [vmem:[#allocation2 + $0x40] sm:$0xff] %v1010_v8 }
  0xa9   : > { %1027 = vst [vmem:[#allocation2 + $0x20] sm:$0xff] %v1011_v9 }
  0xaa   : > { %1028 = vst [vmem:[#allocation2 + $0x10] sm:$0xff] %v1012_v10 }
  0xab   : > { %1029 = vst [vmem:[#allocation2 + $0x38] sm:$0xff] %v1013_v11 }
  0xac   : > { %1030 = vst [vmem:[#allocation2 + $0x60] sm:$0xff] %v1014_v12 }
  0xad   : > { %1031 = vst [vmem:[#allocation2 + $0x70] sm:$0xff] %v1015_v13 }
  0xae   : > { %1032 = vst [vmem:[#allocation2 + $0x78] sm:$0xff] %v1016_v14 }
  0xaf   : > { %1033 = vst [vmem:[#allocation2 + $0x28] sm:$0xff] %v1017_v15 }
  0xb0 PF: > { %v9736_v16 = vld [vmem:[%s14363_s2 + $0x2a0] sm:$0xf]  ;;  %v12584_v17 = vld [vmem:[%s14363_s2 + $0x2cc] sm:$0xf0]  ;;  %vm4434_vm0 = vcmask 1043456   ;;  %vm4382_vm1 = vcmask 64512  }
  0xb1   : > { %v10120_v18 = vld [vmem:[%s14363_s2 + $0x5a0] sm:$0xf]  ;;  %v9737_v19 = vor.u32 %v12584_v17, %v9736_v16  ;;  %v12680_v20 = vld [vmem:[%s14363_s2 + $0x5cc] sm:$0xf0]  ;;  %s17707_s19 = sld [smem:[#allocation38_spill]] }
  0xb2   : > { %v10504_v21 = vld [vmem:[%s14363_s2 + $0x8a0] sm:$0xf]  ;;  %v12776_v22 = vld [vmem:[%s14363_s2 + $0x8cc] sm:$0xf0]  ;;  %v10121_v23 = vor.u32 %v12680_v20, %v10120_v18 }
  0xb3   : > { %v10505_v24 = vor.u32 %v12776_v22, %v10504_v21  ;;  %v10888_v25 = vld [vmem:[%s14363_s2 + $0xba0] sm:$0xf]  ;;  %v12872_v26 = vld [vmem:[%s14363_s2 + $0xbcc] sm:$0xf0]  ;;  %3390 = vmatpush.bf16.msra.mxu0 %v9737_v19 }
  0xb4   : > { %v9688_v27 = vld [vmem:[%s14363_s2 + $0x240] sm:$0xf]  ;;  %v10889_v28 = vor.u32 %v12872_v26, %v10888_v25  ;;  %v12572_v29 = vld [vmem:[%s14363_s2 + $0x26c] sm:$0xf0]  ;;  %3409 = vmatpush.bf16.msra.mxu1 %v10121_v23 }
  0xb5   : > { %v10072_v30 = vld [vmem:[%s14363_s2 + $0x540] sm:$0xf]  ;;  %v12668_v31 = vld [vmem:[%s14363_s2 + $0x56c] sm:$0xf0]  ;;  %3428 = vmatpush.bf16.msra.mxu2 %v10505_v24  ;;  %v9689_v32 = vor.u32 %v12572_v29, %v9688_v27 }
  0xb6   : > { %v10073_v33 = vor.u32 %v12668_v31, %v10072_v30  ;;  %v10456_v34 = vld [vmem:[%s14363_s2 + $0x840] sm:$0xf]  ;;  %v12764_v35 = vld [vmem:[%s14363_s2 + $0x86c] sm:$0xf0]  ;;  %3447 = vmatpush.bf16.msra.mxu3 %v10889_v28 }
  0xb7   : > { %v10840_v36 = vld [vmem:[%s14363_s2 + $0xb40] sm:$0xf]  ;;  %v10457_v37 = vor.u32 %v12764_v35, %v10456_v34  ;;  %v12860_v38 = vld [vmem:[%s14363_s2 + $0xb6c] sm:$0xf0]  ;;  %3391 = vmatpush.bf16.msra.mxu0 %v9689_v32  ;;  %p12486_p1 = scmp.ne.s32.totalorder %s17707_s19, 1 }
  0xb8   : > { %v9640_v39 = vld [vmem:[%s14363_s2 + $0x1e0] sm:$0xf]  ;;  %v12560_v40 = vld [vmem:[%s14363_s2 + $0x20c] sm:$0xf0]  ;;  %v10841_v41 = vor.u32 %v12860_v38, %v10840_v36  ;;  %3410 = vmatpush.bf16.msra.mxu1 %v10073_v33 }
  0xb9   : > { %v10024_v42 = vld [vmem:[%s14363_s2 + $0x4e0] sm:$0xf]  ;;  %v12656_v43 = vld [vmem:[%s14363_s2 + $0x50c] sm:$0xf0]  ;;  %v9641_v45 = vor.u32 %v12560_v40, %v9640_v39  ;;  %3429 = vmatpush.bf16.msra.mxu2 %v10457_v37 }
  0xba   : > { %v10408_v44 = vld [vmem:[%s14363_s2 + $0x7e0] sm:$0xf]  ;;  %v12752_v46 = vld [vmem:[%s14363_s2 + $0x80c] sm:$0xf0]  ;;  %v10025_v49 = vor.u32 %v12656_v43, %v10024_v42  ;;  %3448 = vmatpush.bf16.msra.mxu3 %v10841_v41 }
  0xbb   : > { %v10792_v47 = vld [vmem:[%s14363_s2 + $0xae0] sm:$0xf]  ;;  %v12848_v48 = vld [vmem:[%s14363_s2 + $0xb0c] sm:$0xf0]  ;;  %v10409_v50 = vor.u32 %v12752_v46, %v10408_v44  ;;  %3392 = vmatpush.bf16.msra.mxu0 %v9641_v45 }
  0xbc   : > { %v9592_v51 = vld [vmem:[%s14363_s2 + $0x180] sm:$0xf]  ;;  %v12548_v52 = vld [vmem:[%s14363_s2 + $0x1ac] sm:$0xf0]  ;;  %v10793_v54 = vor.u32 %v12848_v48, %v10792_v47  ;;  %3411 = vmatpush.bf16.msra.mxu1 %v10025_v49  ;;  %v1039_v47 = vld [vmem:[#allocation2 + $0x68] sm:$0xff] }
  0xbd   : > { %v9976_v53 = vld [vmem:[%s14363_s2 + $0x480] sm:$0xf]  ;;  %v12644_v55 = vld [vmem:[%s14363_s2 + $0x4ac] sm:$0xf0]  ;;  %v9593_v60 = vor.u32 %v12548_v52, %v9592_v51  ;;  %3430 = vmatpush.bf16.msra.mxu2 %v10409_v50  ;;  %v12770_v48 = vld [vmem:[%s14363_s2 + $0x8a4] sm:$0xf] }
  0xbe   : > { %v10360_v56 = vld [vmem:[%s14363_s2 + $0x780] sm:$0xf]  ;;  %v12740_v57 = vld [vmem:[%s14363_s2 + $0x7ac] sm:$0xf0]  ;;  %v9977_v61 = vor.u32 %v12644_v55, %v9976_v53  ;;  %3449 = vmatpush.bf16.msra.mxu3 %v10793_v54  ;;  %v10506_v49 = vld [vmem:[%s14363_s2 + $0x8d0] sm:$0xf0] }
  0xbf   : > { %v10744_v58 = vld [vmem:[%s14363_s2 + $0xa80] sm:$0xf]  ;;  %v12836_v59 = vld [vmem:[%s14363_s2 + $0xaac] sm:$0xf0]  ;;  %v10361_v62 = vor.u32 %v12740_v57, %v10360_v56  ;;  %3393 = vmatpush.bf16.msra.mxu0 %v9593_v60  ;;  %v1036_v51 = vld [vmem:[#allocation2 + $0x58] sm:$0xff]  ;;  %v10509_v60 = vor.u32 %v12770_v48, %v10506_v49 }
  0xc0   : > { %v9544_v63 = vld [vmem:[%s14363_s2 + $0x120] sm:$0xf]  ;;  %v12536_v0 = vld [vmem:[%s14363_s2 + $0x14c] sm:$0xf0]  ;;  %v10745_v2 = vor.u32 %v12836_v59, %v10744_v58  ;;  %3412 = vmatpush.bf16.msra.mxu1 %v9977_v61  ;;  %v12674_v52 = vld [vmem:[%s14363_s2 + $0x5a4] sm:$0xf] }
  0xc1   : > { %v9928_v1 = vld [vmem:[%s14363_s2 + $0x420] sm:$0xf]  ;;  %v12632_v3 = vld [vmem:[%s14363_s2 + $0x44c] sm:$0xf0]  ;;  %v9545_v8 = vor.u32 %v12536_v0, %v9544_v63  ;;  %3431 = vmatpush.bf16.msra.mxu2 %v10361_v62  ;;  %v10122_v53 = vld [vmem:[%s14363_s2 + $0x5d0] sm:$0xf0] }
  0xc2   : > { %v10312_v4 = vld [vmem:[%s14363_s2 + $0x720] sm:$0xf]  ;;  %v12728_v5 = vld [vmem:[%s14363_s2 + $0x74c] sm:$0xf0]  ;;  %v9929_v9 = vor.u32 %v12632_v3, %v9928_v1  ;;  %3450 = vmatpush.bf16.msra.mxu3 %v10745_v2  ;;  %v1040_v56 = vld [vmem:[#allocation2 + $0x8] sm:$0xff]  ;;  %v10125_v1 = vor.u32 %v12674_v52, %v10122_v53 }
  0xc3   : > { %v10696_v6 = vld [vmem:[%s14363_s2 + $0xa20] sm:$0xf]  ;;  %v12824_v7 = vld [vmem:[%s14363_s2 + $0xa4c] sm:$0xf0]  ;;  %v10313_v10 = vor.u32 %v12728_v5, %v10312_v4  ;;  %3394 = vmatpush.bf16.msra.mxu0 %v9545_v8  ;;  %v1037_v57 = vld [vmem:[#allocation2 + $0x18] sm:$0xff] }
  0xc4   : > { %v9496_v11 = vld [vmem:[%s14363_s2 + $0xc0] sm:$0xf]  ;;  %v12524_v12 = vld [vmem:[%s14363_s2 + $0xec] sm:$0xf0]  ;;  %v10697_v14 = vor.u32 %v12824_v7, %v10696_v6  ;;  %3413 = vmatpush.bf16.msra.mxu1 %v9929_v9  ;;  %v1041_v58 = vld [vmem:[#allocation2 + $0x48] sm:$0xff]  ;;  %v14494_v6 = vpack.c.bf16 %v1040_v56, %v1036_v51 }
  0xc5   : > { %v9880_v13 = vld [vmem:[%s14363_s2 + $0x3c0] sm:$0xf]  ;;  %v12620_v15 = vld [vmem:[%s14363_s2 + $0x3ec] sm:$0xf0]  ;;  %v9497_v20 = vor.u32 %v12524_v12, %v9496_v11  ;;  %3432 = vmatpush.bf16.msra.mxu2 %v10313_v10  ;;  %v12578_v61 = vld [vmem:[%s14363_s2 + $0x2a4] sm:$0xf]  ;;  %v14498_v9 = vpack.c.bf16 %v1041_v58, %v1037_v57 }
  0xc6   : > { %v10264_v16 = vld [vmem:[%s14363_s2 + $0x6c0] sm:$0xf]  ;;  %v12716_v17 = vld [vmem:[%s14363_s2 + $0x6ec] sm:$0xf0]  ;;  %v9881_v21 = vor.u32 %v12620_v15, %v9880_v13  ;;  %3451 = vmatpush.bf16.msra.mxu3 %v10697_v14  ;;  %v9738_v62 = vld [vmem:[%s14363_s2 + $0x2d0] sm:$0xf0] }
  0xc7   : > { %v10648_v18 = vld [vmem:[%s14363_s2 + $0x9c0] sm:$0xf]  ;;  %v12812_v19 = vld [vmem:[%s14363_s2 + $0x9ec] sm:$0xf0]  ;;  %v10265_v22 = vor.u32 %v12716_v17, %v10264_v16  ;;  %3395 = vmatpush.bf16.msra.mxu0 %v9497_v20  ;;  %v12866_v63 = vld [vmem:[%s14363_s2 + $0xba4] sm:$0xf]  ;;  %v9741_v10 = vor.u32 %v12578_v61, %v9738_v62 }
  0xc8   : > { %v9448_v23 = vld [vmem:[%s14363_s2 + $0x60] sm:$0xf]  ;;  %v12512_v24 = vld [vmem:[%s14363_s2 + $0x8c] sm:$0xf0]  ;;  %v10649_v26 = vor.u32 %v12812_v19, %v10648_v18  ;;  %3414 = vmatpush.bf16.msra.mxu1 %v9881_v21  ;;  %v10890_v2 = vld [vmem:[%s14363_s2 + $0xbd0] sm:$0xf0] }
  0xc9   : > { %v9832_v25 = vld [vmem:[%s14363_s2 + $0x360] sm:$0xf]  ;;  %v12608_v27 = vld [vmem:[%s14363_s2 + $0x38c] sm:$0xf0]  ;;  %v9449_v33 = vor.u32 %v12512_v24, %v9448_v23  ;;  %3433 = vmatpush.bf16.msra.mxu2 %v10265_v22  ;;  %v12758_v3 = vld [vmem:[%s14363_s2 + $0x844] sm:$0xf]  ;;  %v10893_v11 = vor.u32 %v12866_v63, %v10890_v2 }
  0xca   : > { %v10216_v28 = vld [vmem:[%s14363_s2 + $0x660] sm:$0xf]  ;;  %v12704_v29 = vld [vmem:[%s14363_s2 + $0x68c] sm:$0xf0]  ;;  %v9833_v37 = vor.u32 %v12608_v27, %v9832_v25  ;;  %3452 = vmatpush.bf16.msra.mxu3 %v10649_v26  ;;  %v10458_v4 = vld [vmem:[%s14363_s2 + $0x870] sm:$0xf0] }
  0xcb   : > { %v10600_v30 = vld [vmem:[%s14363_s2 + $0x960] sm:$0xf]  ;;  %v12800_v31 = vld [vmem:[%s14363_s2 + $0x98c] sm:$0xf0]  ;;  %v10217_v38 = vor.u32 %v12704_v29, %v10216_v28  ;;  %3396 = vmatpush.bf16.msra.mxu0 %v9449_v33  ;;  %v12662_v7 = vld [vmem:[%s14363_s2 + $0x544] sm:$0xf]  ;;  %v10461_v12 = vor.u32 %v12758_v3, %v10458_v4 }
  0xcc   : > { %v9400_v32 = vld [vmem:[%s14363_s2] sm:$0xf]  ;;  %v12500_v34 = vld [vmem:[%s14363_s2 + $0x2c] sm:$0xf0]  ;;  %v10601_v42 = vor.u32 %v12800_v31, %v10600_v30  ;;  %3415 = vmatpush.bf16.msra.mxu1 %v9833_v37  ;;  %v10074_v8 = vld [vmem:[%s14363_s2 + $0x570] sm:$0xf0] }
  0xcd   : > { %v9784_v35 = vld [vmem:[%s14363_s2 + $0x300] sm:$0xf]  ;;  %v12596_v36 = vld [vmem:[%s14363_s2 + $0x32c] sm:$0xf0]  ;;  %v9401_v50 = vor.u32 %v12500_v34, %v9400_v32  ;;  %3434 = vmatpush.bf16.msra.mxu2 %v10217_v38  ;;  %v12566_v13 = vld [vmem:[%s14363_s2 + $0x244] sm:$0xf]  ;;  %v10077_v16 = vor.u32 %v12662_v7, %v10074_v8 }
  0xce   : > { %v10168_v39 = vld [vmem:[%s14363_s2 + $0x600] sm:$0xf]  ;;  %v12692_v40 = vld [vmem:[%s14363_s2 + $0x62c] sm:$0xf0]  ;;  %v9785_v54 = vor.u32 %v12596_v36, %v9784_v35  ;;  %3453 = vmatpush.bf16.msra.mxu3 %v10601_v42  ;;  %v9690_v14 = vld [vmem:[%s14363_s2 + $0x270] sm:$0xf0] }
  0xcf   : > { %v10552_v41 = vld [vmem:[%s14363_s2 + $0x900] sm:$0xf]  ;;  %v12788_v43 = vld [vmem:[%s14363_s2 + $0x92c] sm:$0xf0]  ;;  %v10169_v55 = vor.u32 %v12692_v40, %v10168_v39  ;;  %3397 = vmatpush.bf16.msra.mxu0 %v9401_v50  ;;  %v12854_v15 = vld [vmem:[%s14363_s2 + $0xb44] sm:$0xf]  ;;  %v9693_v22 = vor.u32 %v12566_v13, %v9690_v14 }
  0xd0   : > { %v1034_v44 = vld [vmem:[#allocation2 + $0x30] sm:$0xff]  ;;  %v1035_v46 = vld [vmem:[#allocation2] sm:$0xff]  ;;  %v10553_v59 = vor.u32 %v12788_v43, %v10552_v41  ;;  %3416 = vmatpush.bf16.msra.mxu1 %v9785_v54  ;;  %v1048_v52 = vld [vmem:[#allocation2 + $0x78] sm:$0xff] }
  0xd1   : > { %v1038_v45 = vld [vmem:[#allocation2 + $0x50] sm:$0xff]  ;;  %v14492_v5 = vpack.c.bf16 %v1039_v47, %v1035_v46  ;;  %3435 = vmatpush.bf16.msra.mxu2 %v10169_v55  ;;  %v12746_v18 = vld [vmem:[%s14363_s2 + $0x7e4] sm:$0xf]  ;;  %v1045_v53 = vld [vmem:[#allocation2 + $0x38] sm:$0xff] }
  0xd2   : > { %v14487_v0 = vpack.c.bf16 %v1038_v45, %v1034_v44  ;;  %3454 = vmatpush.bf16.msra.mxu3 %v10553_v59  ;;  %v10842_v17 = vld [vmem:[%s14363_s2 + $0xb70] sm:$0xf0]  ;;  %v12650_v20 = vld [vmem:[%s14363_s2 + $0x4e4] sm:$0xf]  ;;  %v1049_v54 = vld [vmem:[#allocation2 + $0x28] sm:$0xff] }
  0xd3   : > { %v10410_v19 = vld [vmem:[%s14363_s2 + $0x810] sm:$0xf0]  ;;  %3417 = vmatmul.bf16.vlgmr.msra.gmra.mxu1 %v14492_v5  ;;  %3466 = vmatpush.bf16.msrb.mxu0 %v9741_v10  ;;  %v10845_v23 = vor.u32 %v12854_v15, %v10842_v17  ;;  %v12554_v25 = vld [vmem:[%s14363_s2 + $0x1e4] sm:$0xf]  ;;  %v14542_v8 = vpack.c.bf16 %v1049_v54, %v1045_v53  ;;  %v12765_v53 = vld [vmem:[%s14363_s2 + $0x874] sm:$0xf0] }
  0xd4   : > { %3398 = vmatmul.bf16.vlgmr.msra.gmra.mxu0 %v14487_v0  ;;  %3485 = vmatpush.bf16.msrb.mxu1 %v10125_v1  ;;  %v10026_v21 = vld [vmem:[%s14363_s2 + $0x510] sm:$0xf0]  ;;  %v10413_v24 = vor.u32 %v12746_v18, %v10410_v19  ;;  %v12842_v27 = vld [vmem:[%s14363_s2 + $0xae4] sm:$0xf] }
  0xd5   : > { %3504 = vmatpush.bf16.msrb.mxu2 %v10509_v60  ;;  %3455 = vmatmul.bf16.vlgmr.msra.gmra.mxu3 %v14498_v9  ;;  %v9642_v26 = vld [vmem:[%s14363_s2 + $0x210] sm:$0xf0]  ;;  %v10029_v28 = vor.u32 %v12650_v20, %v10026_v21  ;;  %v12734_v30 = vld [vmem:[%s14363_s2 + $0x784] sm:$0xf] }
  0xd6   : > { %3436 = vmatmul.bf16.vlgmr.msra.gmra.mxu2 %v14494_v6  ;;  %3523 = vmatpush.bf16.msrb.mxu3 %v10893_v11  ;;  %v10794_v29 = vld [vmem:[%s14363_s2 + $0xb10] sm:$0xf0]  ;;  %v12638_v32 = vld [vmem:[%s14363_s2 + $0x484] sm:$0xf]  ;;  %v9645_v34 = vor.u32 %v12554_v25, %v9642_v26 }
  0xd7   : > { %v10362_v31 = vld [vmem:[%s14363_s2 + $0x7b0] sm:$0xf0]  ;;  %3467 = vmatpush.bf16.msrb.mxu0 %v9693_v22  ;;  %v12542_v35 = vld [vmem:[%s14363_s2 + $0x184] sm:$0xf]  ;;  %v10797_v38 = vor.u32 %v12842_v27, %v10794_v29 }
  0xd8   : > { %3486 = vmatpush.bf16.msrb.mxu1 %v10077_v16  ;;  %v9978_v33 = vld [vmem:[%s14363_s2 + $0x4b0] sm:$0xf0]  ;;  %v12830_v37 = vld [vmem:[%s14363_s2 + $0xa84] sm:$0xf]  ;;  %v10365_v39 = vor.u32 %v12734_v30, %v10362_v31 }
  0xd9   : > { %3505 = vmatpush.bf16.msrb.mxu2 %v10461_v12  ;;  %v9594_v36 = vld [vmem:[%s14363_s2 + $0x1b0] sm:$0xf0]  ;;  %v1042_v41 = vld [vmem:[#allocation2 + $0x40] sm:$0xff]  ;;  %v9981_v43 = vor.u32 %v12638_v32, %v9978_v33 }
  0xda   : > { %3524 = vmatpush.bf16.msrb.mxu3 %v10845_v23  ;;  %v10746_v40 = vld [vmem:[%s14363_s2 + $0xab0] sm:$0xf0]  ;;  %v1046_v42 = vld [vmem:[#allocation2 + $0x60] sm:$0xff]  ;;  %v9597_v51 = vor.u32 %v12542_v35, %v9594_v36  ;;  %v12777_v35 = vld [vmem:[%s14363_s2 + $0x8d4] sm:$0xf0] }
  0xdb   : > { %v1043_v44 = vld [vmem:[#allocation2 + $0x20] sm:$0xff]  ;;  %v1047_v45 = vld [vmem:[#allocation2 + $0x70] sm:$0xff]  ;;  %3468 = vmatpush.bf16.msrb.mxu0 %v9645_v34  ;;  %v10749_v55 = vor.u32 %v12830_v37, %v10746_v40  ;;  %v14531_v60 = vpack.c.bf16 %v1046_v42, %v1042_v41  ;;  %v10512_v34 = vld [vmem:[%s14363_s2 + $0x8a8] sm:$0xf] }
  0xdc   : > { %3487 = vmatpush.bf16.msrb.mxu1 %v10029_v28  ;;  %v12722_v46 = vld [vmem:[%s14363_s2 + $0x724] sm:$0xf]  ;;  %v10314_v47 = vld [vmem:[%s14363_s2 + $0x750] sm:$0xf0]  ;;  %v14536_v2 = vpack.c.bf16 %v1047_v45, %v1043_v44 }
  0xdd   : > { %3506 = vmatpush.bf16.msrb.mxu2 %v10413_v24  ;;  %v1044_v48 = vld [vmem:[#allocation2 + $0x10] sm:$0xff]  ;;  %v12626_v49 = vld [vmem:[%s14363_s2 + $0x424] sm:$0xf]  ;;  %v10317_v56 = vor.u32 %v12722_v46, %v10314_v47  ;;  %v9744_v46 = vld [vmem:[%s14363_s2 + $0x2a8] sm:$0xf] }
  0xde   : > { %v9930_v50 = vld [vmem:[%s14363_s2 + $0x450] sm:$0xf0]  ;;  %3525 = vmatpush.bf16.msrb.mxu3 %v10797_v38  ;;  %v12530_v57 = vld [vmem:[%s14363_s2 + $0x124] sm:$0xf]  ;;  %v14538_v3 = vpack.c.bf16 %v1048_v52, %v1044_v48  ;;  %v10128_v38 = vld [vmem:[%s14363_s2 + $0x5a8] sm:$0xf]  ;;  %v10513_v48 = vor.u32 %v12777_v35, %v10512_v34 }
  0xdf   : > { %v9546_v58 = vld [vmem:[%s14363_s2 + $0x150] sm:$0xf0]  ;;  %v12818_v59 = vld [vmem:[%s14363_s2 + $0xa24] sm:$0xf]  ;;  %v9933_v61 = vor.u32 %v12626_v49, %v9930_v50  ;;  %3469 = vmatpush.bf16.msrb.mxu0 %v9597_v51  ;;  %v12585_v47 = vld [vmem:[%s14363_s2 + $0x2d4] sm:$0xf0] }
  0xe0   : > { %3488 = vmatpush.bf16.msrb.mxu1 %v9981_v43  ;;  %v10698_v62 = vld [vmem:[%s14363_s2 + $0xa50] sm:$0xf0]  ;;  %v12710_v63 = vld [vmem:[%s14363_s2 + $0x6c4] sm:$0xf]  ;;  %v9549_v10 = vor.u32 %v12530_v57, %v9546_v58  ;;  %v10896_v49 = vld [vmem:[%s14363_s2 + $0xba8] sm:$0xf] }
  0xe1   : > { %3507 = vmatpush.bf16.msrb.mxu2 %v10365_v39  ;;  %v10266_v1 = vld [vmem:[%s14363_s2 + $0x6f0] sm:$0xf0]  ;;  %v12614_v4 = vld [vmem:[%s14363_s2 + $0x3c4] sm:$0xf]  ;;  %v10701_v11 = vor.u32 %v12818_v59, %v10698_v62  ;;  %v12681_v39 = vld [vmem:[%s14363_s2 + $0x5d4] sm:$0xf0] }
  0xe2   : > { %v9882_v7 = vld [vmem:[%s14363_s2 + $0x3f0] sm:$0xf0]  ;;  %3526 = vmatpush.bf16.msrb.mxu3 %v10749_v55  ;;  %v10269_v12 = vor.u32 %v12710_v63, %v10266_v1  ;;  %v12518_v13 = vld [vmem:[%s14363_s2 + $0xc4] sm:$0xf]  ;;  %v10129_v50 = vor.u32 %v12681_v39, %v10128_v38  ;;  %v12873_v51 = vld [vmem:[%s14363_s2 + $0xbd4] sm:$0xf0] }
  0xe3   : > { %v9498_v14 = vld [vmem:[%s14363_s2 + $0xf0] sm:$0xf0]  ;;  %v12806_v15 = vld [vmem:[%s14363_s2 + $0x9c4] sm:$0xf]  ;;  %v9885_v16 = vor.u32 %v12614_v4, %v9882_v7  ;;  %3422 = vmatmul.bf16.gmra.mxu1 %v14536_v2  ;;  %3470 = vmatpush.bf16.msrb.mxu0 %v9549_v10  ;;  %v10464_v52 = vld [vmem:[%s14363_s2 + $0x848] sm:$0xf]  ;;  %v10897_v59 = vor.u32 %v12873_v51, %v10896_v49 }
  0xe4   : > { %3403 = vmatmul.bf16.gmra.mxu0 %v14531_v60  ;;  %3489 = vmatpush.bf16.msrb.mxu1 %v9933_v61  ;;  %v10650_v17 = vld [vmem:[%s14363_s2 + $0x9f0] sm:$0xf0]  ;;  %v12698_v18 = vld [vmem:[%s14363_s2 + $0x664] sm:$0xf]  ;;  %v9501_v22 = vor.u32 %v12518_v13, %v9498_v14  ;;  %v9696_v57 = vld [vmem:[%s14363_s2 + $0x248] sm:$0xf]  ;;  %v10465_v63 = vor.u32 %v12765_v53, %v10464_v52 }
  0xe5   : > { %3508 = vmatpush.bf16.msrb.mxu2 %v10317_v56  ;;  %v10218_v19 = vld [vmem:[%s14363_s2 + $0x690] sm:$0xf0]  ;;  %v12602_v20 = vld [vmem:[%s14363_s2 + $0x364] sm:$0xf]  ;;  %3460 = vmatmul.bf16.gmra.mxu3 %v14542_v8  ;;  %v10653_v24 = vor.u32 %v12806_v15, %v10650_v17  ;;  %v9745_v56 = vor.u32 %v12585_v47, %v9744_v46  ;;  %v12573_v58 = vld [vmem:[%s14363_s2 + $0x274] sm:$0xf0] }
  0xe6   : > { %3441 = vmatmul.bf16.gmra.mxu2 %v14538_v3  ;;  %v9834_v21 = vld [vmem:[%s14363_s2 + $0x390] sm:$0xf0]  ;;  %v12506_v23 = vld [vmem:[%s14363_s2 + $0x64] sm:$0xf]  ;;  %3527 = vmatpush.bf16.msrb.mxu3 %v10701_v11  ;;  %v10221_v25 = vor.u32 %v12698_v18, %v10218_v19  ;;  %v10080_v61 = vld [vmem:[%s14363_s2 + $0x548] sm:$0xf]  ;;  %v9697_v11 = vor.u32 %v12573_v58, %v9696_v57 }
  0xe7   : > { %v9450_v26 = vld [vmem:[%s14363_s2 + $0x90] sm:$0xf0]  ;;  %v12794_v27 = vld [vmem:[%s14363_s2 + $0x964] sm:$0xf]  ;;  %v9837_v29 = vor.u32 %v12602_v20, %v9834_v21  ;;  %3471 = vmatpush.bf16.msrb.mxu0 %v9501_v22  ;;  %v12669_v62 = vld [vmem:[%s14363_s2 + $0x574] sm:$0xf0] }
  0xe8   : > { %v10602_v28 = vld [vmem:[%s14363_s2 + $0x990] sm:$0xf0]  ;;  %3490 = vmatpush.bf16.msrb.mxu1 %v9885_v16  ;;  %v12686_v30 = vld [vmem:[%s14363_s2 + $0x604] sm:$0xf]  ;;  %v9453_v36 = vor.u32 %v12506_v23, %v9450_v26  ;;  %v10848_v1 = vld [vmem:[%s14363_s2 + $0xb48] sm:$0xf] }
  0xe9   : > { %3509 = vmatpush.bf16.msrb.mxu2 %v10269_v12  ;;  %v10170_v31 = vld [vmem:[%s14363_s2 + $0x630] sm:$0xf0]  ;;  %v12590_v32 = vld [vmem:[%s14363_s2 + $0x304] sm:$0xf]  ;;  %v10605_v40 = vor.u32 %v12794_v27, %v10602_v28  ;;  %v12861_v4 = vld [vmem:[%s14363_s2 + $0xb74] sm:$0xf0]  ;;  %v10081_v12 = vor.u32 %v12669_v62, %v10080_v61 }
  0xea   : > { %v9786_v33 = vld [vmem:[%s14363_s2 + $0x330] sm:$0xf0]  ;;  %v12494_v37 = vld [vmem:[%s14363_s2 + $0x4] sm:$0xf]  ;;  %3528 = vmatpush.bf16.msrb.mxu3 %v10653_v24  ;;  %v10173_v41 = vor.u32 %v12686_v30, %v10170_v31  ;;  %v10416_v7 = vld [vmem:[%s14363_s2 + $0x7e8] sm:$0xf]  ;;  %v10849_v15 = vor.u32 %v12861_v4, %v10848_v1 }
  0xeb   : > { %v9402_v42 = vld [vmem:[%s14363_s2 + $0x30] sm:$0xf0]  ;;  %v12782_v43 = vld [vmem:[%s14363_s2 + $0x904] sm:$0xf]  ;;  %v9789_v45 = vor.u32 %v12590_v32, %v9786_v33  ;;  %3472 = vmatpush.bf16.msrb.mxu0 %v9453_v36  ;;  %v12753_v10 = vld [vmem:[%s14363_s2 + $0x814] sm:$0xf0] }
  0xec   : > { %v10554_v44 = vld [vmem:[%s14363_s2 + $0x930] sm:$0xf0]  ;;  %3491 = vmatpush.bf16.msrb.mxu1 %v9837_v29  ;;  %v9405_v54 = vor.u32 %v12494_v37, %v9402_v42  ;;  %v9648_v13 = vld [vmem:[%s14363_s2 + $0x1e8] sm:$0xf]  ;;  %v12561_v14 = vld [vmem:[%s14363_s2 + $0x214] sm:$0xf0]  ;;  %v10417_v18 = vor.u32 %v12753_v10, %v10416_v7 }
  0xed   : > { %3510 = vmatpush.bf16.msrb.mxu2 %v10221_v25  ;;  %v10557_v55 = vor.u32 %v12782_v43, %v10554_v44  ;;  %v10032_v16 = vld [vmem:[%s14363_s2 + $0x4e8] sm:$0xf]  ;;  %v12657_v17 = vld [vmem:[%s14363_s2 + $0x514] sm:$0xf0]  ;;  %v9649_v23 = vor.u32 %v12561_v14, %v9648_v13 }
  0xee   : > { %3529 = vmatpush.bf16.msrb.mxu3 %v10605_v40  ;;  %v10800_v19 = vld [vmem:[%s14363_s2 + $0xae8] sm:$0xf]  ;;  %v12849_v20 = vld [vmem:[%s14363_s2 + $0xb14] sm:$0xf0]  ;;  %v10033_v24 = vor.u32 %v12657_v17, %v10032_v16  ;;  %v10514_v16 = vld [vmem:[%s14363_s2 + $0x8d8] sm:$0xf0] }
  0xef   : > { %3473 = vmatpush.bf16.msrb.mxu0 %v9405_v54  ;;  %v10368_v21 = vld [vmem:[%s14363_s2 + $0x788] sm:$0xf]  ;;  %v12741_v22 = vld [vmem:[%s14363_s2 + $0x7b4] sm:$0xf0]  ;;  %v10801_v27 = vor.u32 %v12849_v20, %v10800_v19 }
  0xf0   : > { %3492 = vmatpush.bf16.msrb.mxu1 %v9789_v45  ;;  %v9600_v25 = vld [vmem:[%s14363_s2 + $0x188] sm:$0xf]  ;;  %v12549_v26 = vld [vmem:[%s14363_s2 + $0x1b4] sm:$0xf0]  ;;  %v10369_v30 = vor.u32 %v12741_v22, %v10368_v21 }
  0xf1   : > { %3511 = vmatpush.bf16.msrb.mxu2 %v10173_v41  ;;  %v9984_v28 = vld [vmem:[%s14363_s2 + $0x488] sm:$0xf]  ;;  %v12645_v29 = vld [vmem:[%s14363_s2 + $0x4b4] sm:$0xf0]  ;;  %v9601_v35 = vor.u32 %v12549_v26, %v9600_v25 }
  0xf2   : > { %3530 = vmatpush.bf16.msrb.mxu3 %v10557_v55  ;;  %v10752_v31 = vld [vmem:[%s14363_s2 + $0xa88] sm:$0xf]  ;;  %v12837_v32 = vld [vmem:[%s14363_s2 + $0xab4] sm:$0xf0]  ;;  %v9985_v36 = vor.u32 %v12645_v29, %v9984_v28  ;;  %v9746_v28 = vld [vmem:[%s14363_s2 + $0x2d8] sm:$0xf0] }
  0xf3   : > { %3542 = vmatpush.bf16.msra.mxu0 %v9745_v56  ;;  %3493 = vmatmul.bf16.vlgmr.msrb.gmra.mxu1 %v14492_v5  ;;  %v10320_v33 = vld [vmem:[%s14363_s2 + $0x728] sm:$0xf]  ;;  %v12729_v34 = vld [vmem:[%s14363_s2 + $0x754] sm:$0xf0]  ;;  %v10753_v39 = vor.u32 %v12837_v32, %v10752_v31  ;;  %v12675_v29 = vld [vmem:[%s14363_s2 + $0x5ac] sm:$0xf] }
  0xf4   : > { %3561 = vmatpush.bf16.msra.mxu1 %v10129_v50  ;;  %3474 = vmatmul.bf16.vlgmr.msrb.gmra.mxu0 %v14487_v0  ;;  %v9552_v37 = vld [vmem:[%s14363_s2 + $0x128] sm:$0xf]  ;;  %v12537_v38 = vld [vmem:[%s14363_s2 + $0x154] sm:$0xf0]  ;;  %v10321_v42 = vor.u32 %v12729_v34, %v10320_v33  ;;  %v10130_v31 = vld [vmem:[%s14363_s2 + $0x5d8] sm:$0xf0] }
  0xf5   : > { %3580 = vmatpush.bf16.msra.mxu2 %v10513_v48  ;;  %3531 = vmatmul.bf16.vlgmr.msrb.gmra.mxu3 %v14498_v9  ;;  %v9936_v40 = vld [vmem:[%s14363_s2 + $0x428] sm:$0xf]  ;;  %v12633_v41 = vld [vmem:[%s14363_s2 + $0x454] sm:$0xf0]  ;;  %v9553_v47 = vor.u32 %v12537_v38, %v9552_v37  ;;  %v12867_v32 = vld [vmem:[%s14363_s2 + $0xbac] sm:$0xf] }
  0xf6   : > { %3599 = vmatpush.bf16.msra.mxu3 %v10897_v59  ;;  %3512 = vmatmul.bf16.vlgmr.msrb.gmra.mxu2 %v14494_v6  ;;  %v10704_v43 = vld [vmem:[%s14363_s2 + $0xa28] sm:$0xf]  ;;  %v12825_v44 = vld [vmem:[%s14363_s2 + $0xa54] sm:$0xf0]  ;;  %v9937_v48 = vor.u32 %v12633_v41, %v9936_v40  ;;  %v10898_v33 = vld [vmem:[%s14363_s2 + $0xbd8] sm:$0xf0]  ;;  %v10133_v40 = vor.u32 %v12675_v29, %v10130_v31 }
  0xf7   : > { %3543 = vmatpush.bf16.msra.mxu0 %v9697_v11  ;;  %v10272_v45 = vld [vmem:[%s14363_s2 + $0x6c8] sm:$0xf]  ;;  %v12717_v46 = vld [vmem:[%s14363_s2 + $0x6f4] sm:$0xf0]  ;;  %v10705_v51 = vor.u32 %v12825_v44, %v10704_v43  ;;  %v10466_v37 = vld [vmem:[%s14363_s2 + $0x878] sm:$0xf0]  ;;  %v10901_v41 = vor.u32 %v12867_v32, %v10898_v33 }
  0xf8   : > { %3562 = vmatpush.bf16.msra.mxu1 %v10081_v12  ;;  %v9504_v49 = vld [vmem:[%s14363_s2 + $0xc8] sm:$0xf]  ;;  %v12525_v50 = vld [vmem:[%s14363_s2 + $0xf4] sm:$0xf0]  ;;  %v10273_v54 = vor.u32 %v12717_v46, %v10272_v45  ;;  %v9698_v43 = vld [vmem:[%s14363_s2 + $0x278] sm:$0xf0] }
  0xf9   : > { %3581 = vmatpush.bf16.msra.mxu2 %v10465_v63  ;;  %v9888_v52 = vld [vmem:[%s14363_s2 + $0x3c8] sm:$0xf]  ;;  %v12621_v53 = vld [vmem:[%s14363_s2 + $0x3f4] sm:$0xf0]  ;;  %v9505_v59 = vor.u32 %v12525_v50, %v9504_v49  ;;  %v12663_v44 = vld [vmem:[%s14363_s2 + $0x54c] sm:$0xf] }
  0xfa   : > { %3600 = vmatpush.bf16.msra.mxu3 %v10849_v15  ;;  %v10656_v55 = vld [vmem:[%s14363_s2 + $0x9c8] sm:$0xf]  ;;  %v12813_v56 = vld [vmem:[%s14363_s2 + $0x9f4] sm:$0xf0]  ;;  %v9889_v61 = vor.u32 %v12621_v53, %v9888_v52  ;;  %v12771_v15 = vld [vmem:[%s14363_s2 + $0x8ac] sm:$0xf] }
  0xfb   : > { %3544 = vmatpush.bf16.msra.mxu0 %v9649_v23  ;;  %v10224_v57 = vld [vmem:[%s14363_s2 + $0x668] sm:$0xf]  ;;  %v12705_v58 = vld [vmem:[%s14363_s2 + $0x694] sm:$0xf0]  ;;  %v10657_v1 = vor.u32 %v12813_v56, %v10656_v55  ;;  %v10082_v45 = vld [vmem:[%s14363_s2 + $0x578] sm:$0xf0] }
  0xfc   : > { %3563 = vmatpush.bf16.msra.mxu1 %v10033_v24  ;;  %v9456_v62 = vld [vmem:[%s14363_s2 + $0x68] sm:$0xf]  ;;  %v12513_v63 = vld [vmem:[%s14363_s2 + $0x94] sm:$0xf0]  ;;  %v10225_v10 = vor.u32 %v12705_v58, %v10224_v57  ;;  %v12555_v50 = vld [vmem:[%s14363_s2 + $0x1ec] sm:$0xf]  ;;  %v10085_v52 = vor.u32 %v12663_v44, %v10082_v45 }
  0xfd   : > { %3582 = vmatpush.bf16.msra.mxu2 %v10417_v18  ;;  %v9840_v4 = vld [vmem:[%s14363_s2 + $0x368] sm:$0xf]  ;;  %v12609_v7 = vld [vmem:[%s14363_s2 + $0x394] sm:$0xf0]  ;;  %v9457_v17 = vor.u32 %v12513_v63, %v9456_v62  ;;  %v12747_v55 = vld [vmem:[%s14363_s2 + $0x7ec] sm:$0xf] }
  0xfe   : > { %3601 = vmatpush.bf16.msra.mxu3 %v10801_v27  ;;  %v10608_v11 = vld [vmem:[%s14363_s2 + $0x968] sm:$0xf]  ;;  %v12801_v12 = vld [vmem:[%s14363_s2 + $0x994] sm:$0xf0]  ;;  %v9841_v18 = vor.u32 %v12609_v7, %v9840_v4  ;;  %v12579_v27 = vld [vmem:[%s14363_s2 + $0x2ac] sm:$0xf] }
  0xff   : > { %3545 = vmatpush.bf16.msra.mxu0 %v9601_v35  ;;  %v10176_v13 = vld [vmem:[%s14363_s2 + $0x608] sm:$0xf]  ;;  %v12693_v14 = vld [vmem:[%s14363_s2 + $0x634] sm:$0xf0]  ;;  %v10609_v22 = vor.u32 %v12801_v12, %v10608_v11  ;;  %v10418_v56 = vld [vmem:[%s14363_s2 + $0x818] sm:$0xf0] }
 0x100   : > { %3564 = vmatpush.bf16.msra.mxu1 %v9985_v36  ;;  %v9408_v19 = vld [vmem:[%s14363_s2 + $0x8] sm:$0xf]  ;;  %v12501_v20 = vld [vmem:[%s14363_s2 + $0x34] sm:$0xf0]  ;;  %v10177_v24 = vor.u32 %v12693_v14, %v10176_v13  ;;  %v12759_v36 = vld [vmem:[%s14363_s2 + $0x84c] sm:$0xf]  ;;  %v10421_v62 = vor.u32 %v12747_v55, %v10418_v56 }
 0x101   : > { %3583 = vmatpush.bf16.msra.mxu2 %v10369_v30  ;;  %v9792_v21 = vld [vmem:[%s14363_s2 + $0x308] sm:$0xf]  ;;  %v12597_v23 = vld [vmem:[%s14363_s2 + $0x334] sm:$0xf0]  ;;  %v10517_v30 = vor.u32 %v12771_v15, %v10514_v16  ;;  %v9409_v34 = vor.u32 %v12501_v20, %v9408_v19  ;;  %v10469_v46 = vor.u32 %v12759_v36, %v10466_v37  ;;  %v10034_v57 = vld [vmem:[%s14363_s2 + $0x518] sm:$0xf0] }
 0x102   : > { %3602 = vmatpush.bf16.msra.mxu3 %v10753_v39  ;;  %v10560_v25 = vld [vmem:[%s14363_s2 + $0x908] sm:$0xf]  ;;  %v12789_v26 = vld [vmem:[%s14363_s2 + $0x934] sm:$0xf0]  ;;  %v9793_v35 = vor.u32 %v12597_v23, %v9792_v21  ;;  %v9749_v39 = vor.u32 %v12579_v27, %v9746_v28  ;;  %v12843_v58 = vld [vmem:[%s14363_s2 + $0xaec] sm:$0xf] }
 0x103   : > { %3546 = vmatpush.bf16.msra.mxu0 %v9553_v47  ;;  %3498 = vmatmul.bf16.gmra.mxu1 %v14536_v2  ;;  %v10561_v38 = vor.u32 %v12789_v26, %v10560_v25  ;;  %v12855_v47 = vld [vmem:[%s14363_s2 + $0xb4c] sm:$0xf]  ;;  %v10370_v12 = vld [vmem:[%s14363_s2 + $0x7b8] sm:$0xf0] }
 0x104   : > { %3565 = vmatpush.bf16.msra.mxu1 %v9937_v48  ;;  %3479 = vmatmul.bf16.gmra.mxu0 %v14531_v60  ;;  %v10850_v48 = vld [vmem:[%s14363_s2 + $0xb78] sm:$0xf0]  ;;  %v12543_v63 = vld [vmem:[%s14363_s2 + $0x18c] sm:$0xf] }
 0x105   : > { %3584 = vmatpush.bf16.msra.mxu2 %v10321_v42  ;;  %3536 = vmatmul.bf16.gmra.mxu3 %v14542_v8  ;;  %v12567_v42 = vld [vmem:[%s14363_s2 + $0x24c] sm:$0xf]  ;;  %v10853_v53 = vor.u32 %v12855_v47, %v10850_v48  ;;  %v9986_v13 = vld [vmem:[%s14363_s2 + $0x4b8] sm:$0xf0] }
 0x106   : > { %3603 = vmatpush.bf16.msra.mxu3 %v10705_v51  ;;  %3517 = vmatmul.bf16.gmra.mxu2 %v14538_v3  ;;  %v9701_v49 = vor.u32 %v12567_v42, %v9698_v43  ;;  %v9650_v51 = vld [vmem:[%s14363_s2 + $0x218] sm:$0xf0]  ;;  %v12735_v11 = vld [vmem:[%s14363_s2 + $0x78c] sm:$0xf] }
 0x107   : > { %3547 = vmatpush.bf16.msra.mxu0 %v9505_v59  ;;  %v10802_v59 = vld [vmem:[%s14363_s2 + $0xb18] sm:$0xf0]  ;;  %v12831_v14 = vld [vmem:[%s14363_s2 + $0xa8c] sm:$0xf] }
 0x108   : > { %3566 = vmatpush.bf16.msra.mxu1 %v9889_v61  ;;  %v9653_v61 = vor.u32 %v12555_v50, %v9650_v51  ;;  %v10805_v7 = vor.u32 %v12843_v58, %v10802_v59  ;;  %v10754_v15 = vld [vmem:[%s14363_s2 + $0xab8] sm:$0xf0]  ;;  %v12723_v23 = vld [vmem:[%s14363_s2 + $0x72c] sm:$0xf] }
 0x109   : > { %3585 = vmatpush.bf16.msra.mxu2 %v10273_v54  ;;  %v12651_v54 = vld [vmem:[%s14363_s2 + $0x4ec] sm:$0xf]  ;;  %v9554_v19 = vld [vmem:[%s14363_s2 + $0x158] sm:$0xf0]  ;;  %v10757_v21 = vor.u32 %v12831_v14, %v10754_v15  ;;  %v12778_v15 = vld [vmem:[%s14363_s2 + $0x8dc] sm:$0xf0] }
 0x10a   : > { %3604 = vmatpush.bf16.msra.mxu3 %v10657_v1  ;;  %v9602_v1 = vld [vmem:[%s14363_s2 + $0x1b8] sm:$0xf0]  ;;  %v10037_v4 = vor.u32 %v12651_v54, %v10034_v57  ;;  %v12819_v26 = vld [vmem:[%s14363_s2 + $0xa2c] sm:$0xf] }
 0x10b   : > { %3548 = vmatpush.bf16.msra.mxu0 %v9457_v17  ;;  %v9605_v16 = vor.u32 %v12543_v63, %v9602_v1  ;;  %v10373_v17 = vor.u32 %v12735_v11, %v10370_v12  ;;  %v9938_v25 = vld [vmem:[%s14363_s2 + $0x458] sm:$0xf0]  ;;  %v12507_v42 = vld [vmem:[%s14363_s2 + $0x6c] sm:$0xf]  ;;  %v12682_v11 = vld [vmem:[%s14363_s2 + $0x5dc] sm:$0xf0] }
 0x10c   : > { %3567 = vmatpush.bf16.msra.mxu1 %v9841_v18  ;;  %v12531_v18 = vld [vmem:[%s14363_s2 + $0x12c] sm:$0xf]  ;;  %v10706_v27 = vld [vmem:[%s14363_s2 + $0xa58] sm:$0xf0]  ;;  %v10520_v12 = vld [vmem:[%s14363_s2 + $0x8b0] sm:$0xf] }
 0x10d   : > { %3586 = vmatpush.bf16.msra.mxu2 %v10225_v10  ;;  %v12639_v10 = vld [vmem:[%s14363_s2 + $0x48c] sm:$0xf]  ;;  %v9557_v28 = vor.u32 %v12531_v18, %v9554_v19  ;;  %v9506_v31 = vld [vmem:[%s14363_s2 + $0xf8] sm:$0xf0]  ;;  %v10709_v33 = vor.u32 %v12819_v26, %v10706_v27  ;;  %v10088_v26 = vld [vmem:[%s14363_s2 + $0x550] sm:$0xf] }
 0x10e   : > { %3605 = vmatpush.bf16.msra.mxu3 %v10609_v22  ;;  %v9989_v20 = vor.u32 %v12639_v10, %v9986_v13  ;;  %v12627_v22 = vld [vmem:[%s14363_s2 + $0x42c] sm:$0xf]  ;;  %v10274_v36 = vld [vmem:[%s14363_s2 + $0x6f8] sm:$0xf0]  ;;  %v10136_v10 = vld [vmem:[%s14363_s2 + $0x5b0] sm:$0xf] }
 0x10f   : > { %3549 = vmatpush.bf16.msra.mxu0 %v9409_v34  ;;  %v9941_v32 = vor.u32 %v12627_v22, %v9938_v25  ;;  %v12615_v34 = vld [vmem:[%s14363_s2 + $0x3cc] sm:$0xf]  ;;  %v9890_v37 = vld [vmem:[%s14363_s2 + $0x3f8] sm:$0xf0]  ;;  %v9704_v22 = vld [vmem:[%s14363_s2 + $0x250] sm:$0xf] }
 0x110   : > { %3568 = vmatpush.bf16.msra.mxu1 %v9793_v35  ;;  %v12711_v35 = vld [vmem:[%s14363_s2 + $0x6cc] sm:$0xf]  ;;  %v9458_v43 = vld [vmem:[%s14363_s2 + $0x98] sm:$0xf0]  ;;  %v9893_v44 = vor.u32 %v12615_v34, %v9890_v37  ;;  %v12670_v27 = vld [vmem:[%s14363_s2 + $0x57c] sm:$0xf0] }
 0x111   : > { %3587 = vmatpush.bf16.msra.mxu2 %v10177_v24  ;;  %v10322_v24 = vld [vmem:[%s14363_s2 + $0x758] sm:$0xf0]  ;;  %v12699_v47 = vld [vmem:[%s14363_s2 + $0x66c] sm:$0xf]  ;;  %v12562_v37 = vld [vmem:[%s14363_s2 + $0x21c] sm:$0xf0] }
 0x112   : > { %3606 = vmatpush.bf16.msra.mxu3 %v10561_v38  ;;  %v10325_v29 = vor.u32 %v12723_v23, %v10322_v24  ;;  %v12807_v38 = vld [vmem:[%s14363_s2 + $0x9cc] sm:$0xf]  ;;  %v10226_v48 = vld [vmem:[%s14363_s2 + $0x698] sm:$0xf0]  ;;  %v12574_v23 = vld [vmem:[%s14363_s2 + $0x27c] sm:$0xf0]  ;;  %v10521_v24 = vor.u32 %v12778_v15, %v10520_v12 }
 0x113   : > { %3618 = vmatpush.bf16.msrb.mxu0 %v9749_v39  ;;  %3569 = vmatmul.bf16.vlgmr.msra.gmra.mxu1 %v14492_v5  ;;  %v10658_v39 = vld [vmem:[%s14363_s2 + $0x9f8] sm:$0xf0]  ;;  %v12795_v50 = vld [vmem:[%s14363_s2 + $0x96c] sm:$0xf]  ;;  %v10229_v54 = vor.u32 %v12699_v47, %v10226_v48  ;;  %v12550_v47 = vld [vmem:[%s14363_s2 + $0x1bc] sm:$0xf0] }
 0x114   : > { %3637 = vmatpush.bf16.msrb.mxu1 %v10133_v40  ;;  %3550 = vmatmul.bf16.vlgmr.msra.gmra.mxu0 %v14487_v0  ;;  %v10661_v45 = vor.u32 %v12807_v38, %v10658_v39  ;;  %v10610_v51 = vld [vmem:[%s14363_s2 + $0x998] sm:$0xf0]  ;;  %v12591_v56 = vld [vmem:[%s14363_s2 + $0x30c] sm:$0xf]  ;;  %v10040_v38 = vld [vmem:[%s14363_s2 + $0x4f0] sm:$0xf] }
 0x115   : > { %3656 = vmatpush.bf16.msrb.mxu2 %v10517_v30  ;;  %3607 = vmatmul.bf16.vlgmr.msra.gmra.mxu3 %v14498_v9  ;;  %v12519_v30 = vld [vmem:[%s14363_s2 + $0xcc] sm:$0xf]  ;;  %v9410_v55 = vld [vmem:[%s14363_s2 + $0x38] sm:$0xf0]  ;;  %v10613_v59 = vor.u32 %v12795_v50, %v10610_v51  ;;  %v12658_v39 = vld [vmem:[%s14363_s2 + $0x51c] sm:$0xf0] }
 0x116   : > { %3675 = vmatpush.bf16.msrb.mxu3 %v10901_v41  ;;  %3588 = vmatmul.bf16.vlgmr.msra.gmra.mxu2 %v14494_v6  ;;  %v9509_v40 = vor.u32 %v12519_v30, %v9506_v31  ;;  %v10277_v41 = vor.u32 %v12711_v35, %v10274_v36  ;;  %v9794_v57 = vld [vmem:[%s14363_s2 + $0x338] sm:$0xf0]  ;;  %v12783_v63 = vld [vmem:[%s14363_s2 + $0x90c] sm:$0xf]  ;;  %v10856_v30 = vld [vmem:[%s14363_s2 + $0xb50] sm:$0xf] }
 0x117   : > { %3619 = vmatpush.bf16.msrb.mxu0 %v9701_v49  ;;  %v9842_v49 = vld [vmem:[%s14363_s2 + $0x398] sm:$0xf0]  ;;  %v9797_v18 = vor.u32 %v12591_v56, %v9794_v57  ;;  %v12862_v31 = vld [vmem:[%s14363_s2 + $0xb7c] sm:$0xf0]  ;;  %v9656_v36 = vld [vmem:[%s14363_s2 + $0x1f0] sm:$0xf] }
 0x118   : > { %3638 = vmatpush.bf16.msrb.mxu1 %v10085_v52  ;;  %v12495_v52 = vld [vmem:[%s14363_s2 + $0xc] sm:$0xf]  ;;  %v10562_v1 = vld [vmem:[%s14363_s2 + $0x938] sm:$0xf0]  ;;  %v10857_v35 = vor.u32 %v12862_v31, %v10856_v30  ;;  %v9992_v50 = vld [vmem:[%s14363_s2 + $0x490] sm:$0xf] }
 0x119   : > { %3657 = vmatpush.bf16.msrb.mxu2 %v10469_v46  ;;  %v12603_v46 = vld [vmem:[%s14363_s2 + $0x36c] sm:$0xf]  ;;  %v9413_v13 = vor.u32 %v12495_v52, %v9410_v55  ;;  %v10565_v19 = vor.u32 %v12783_v63, %v10562_v1  ;;  %v12646_v51 = vld [vmem:[%s14363_s2 + $0x4bc] sm:$0xf0]  ;;  %v10376_v52 = vld [vmem:[%s14363_s2 + $0x790] sm:$0xf] }
 0x11a   : > { %3676 = vmatpush.bf16.msrb.mxu3 %v10853_v53  ;;  %v9461_v53 = vor.u32 %v12507_v42, %v9458_v43  ;;  %v9845_v58 = vor.u32 %v12603_v46, %v9842_v49  ;;  %v10808_v42 = vld [vmem:[%s14363_s2 + $0xaf0] sm:$0xf]  ;;  %v12850_v43 = vld [vmem:[%s14363_s2 + $0xb1c] sm:$0xf0]  ;;  %v9993_v57 = vor.u32 %v12646_v51, %v9992_v50  ;;  %v12676_v50 = vld [vmem:[%s14363_s2 + $0x5b4] sm:$0xf] }
 0x11b   : > { %3620 = vmatpush.bf16.msrb.mxu0 %v9653_v61  ;;  %v12687_v61 = vld [vmem:[%s14363_s2 + $0x60c] sm:$0xf]  ;;  %v9608_v46 = vld [vmem:[%s14363_s2 + $0x190] sm:$0xf]  ;;  %v10809_v49 = vor.u32 %v12850_v43, %v10808_v42  ;;  %v12838_v55 = vld [vmem:[%s14363_s2 + $0xabc] sm:$0xf0] }
 0x11c   : > { %3639 = vmatpush.bf16.msrb.mxu1 %v10037_v4  ;;  %v9752_v4 = vld [vmem:[%s14363_s2 + $0x2b0] sm:$0xf]  ;;  %v9609_v56 = vor.u32 %v12550_v47, %v9608_v46  ;;  %v12634_v1 = vld [vmem:[%s14363_s2 + $0x45c] sm:$0xf0]  ;;  %v10138_v51 = vld [vmem:[%s14363_s2 + $0x5e0] sm:$0xf0] }
 0x11d   : > { %3658 = vmatpush.bf16.msrb.mxu2 %v10421_v62  ;;  %v10178_v62 = vld [vmem:[%s14363_s2 + $0x638] sm:$0xf0]  ;;  %v9944_v63 = vld [vmem:[%s14363_s2 + $0x430] sm:$0xf]  ;;  %v12526_v15 = vld [vmem:[%s14363_s2 + $0xfc] sm:$0xf0] }
 0x11e   : > { %3677 = vmatpush.bf16.msrb.mxu3 %v10805_v7  ;;  %v12586_v7 = vld [vmem:[%s14363_s2 + $0x2dc] sm:$0xf0]  ;;  %v10181_v14 = vor.u32 %v12687_v61, %v10178_v62  ;;  %v9848_v30 = vld [vmem:[%s14363_s2 + $0x370] sm:$0xf] }
 0x11f   : > { %3621 = vmatpush.bf16.msrb.mxu0 %v9605_v16  ;;  %v10904_v16 = vld [vmem:[%s14363_s2 + $0xbb0] sm:$0xf]  ;;  %v12610_v31 = vld [vmem:[%s14363_s2 + $0x39c] sm:$0xf0] }
 0x120   : > { %3640 = vmatpush.bf16.msrb.mxu1 %v9989_v20  ;;  %v9753_v20 = vor.u32 %v12586_v7, %v9752_v4  ;;  %v10328_v4 = vld [vmem:[%s14363_s2 + $0x730] sm:$0xf]  ;;  %v12730_v7 = vld [vmem:[%s14363_s2 + $0x75c] sm:$0xf0] }
 0x121   : > { %3659 = vmatpush.bf16.msrb.mxu2 %v10373_v17  ;;  %v12874_v17 = vld [vmem:[%s14363_s2 + $0xbdc] sm:$0xf0]  ;;  %v10568_v46 = vld [vmem:[%s14363_s2 + $0x910] sm:$0xf] }
 0x122   : > { %3678 = vmatpush.bf16.msrb.mxu3 %v10757_v21  ;;  %v10137_v21 = vor.u32 %v12682_v11, %v10136_v10  ;;  %v10905_v25 = vor.u32 %v12874_v17, %v10904_v16  ;;  %v10712_v10 = vld [vmem:[%s14363_s2 + $0xa30] sm:$0xf]  ;;  %v12826_v11 = vld [vmem:[%s14363_s2 + $0xa5c] sm:$0xf0]  ;;  %v10329_v16 = vor.u32 %v12730_v7, %v10328_v4  ;;  %v12664_v4 = vld [vmem:[%s14363_s2 + $0x554] sm:$0xf] }
 0x123   : > { %3622 = vmatpush.bf16.msrb.mxu0 %v9557_v28  ;;  %3574 = vmatmul.bf16.gmra.mxu1 %v14536_v2  ;;  %v10472_v28 = vld [vmem:[%s14363_s2 + $0x850] sm:$0xf]  ;;  %v10713_v17 = vor.u32 %v12826_v11, %v10712_v10  ;;  %v12790_v47 = vld [vmem:[%s14363_s2 + $0x93c] sm:$0xf0]  ;;  %v10090_v11 = vld [vmem:[%s14363_s2 + $0x580] sm:$0xf0] }
 0x124   : > { %3641 = vmatpush.bf16.msrb.mxu1 %v9941_v32  ;;  %3555 = vmatmul.bf16.gmra.mxu0 %v14531_v60  ;;  %v9705_v32 = vor.u32 %v12574_v23, %v9704_v22  ;;  %v10664_v22 = vld [vmem:[%s14363_s2 + $0x9d0] sm:$0xf]  ;;  %v12814_v23 = vld [vmem:[%s14363_s2 + $0x9fc] sm:$0xf0] }
 0x125   : > { %3660 = vmatpush.bf16.msrb.mxu2 %v10325_v29  ;;  %3612 = vmatmul.bf16.gmra.mxu3 %v14542_v8  ;;  %v12766_v29 = vld [vmem:[%s14363_s2 + $0x87c] sm:$0xf0] }
 0x126   : > { %3679 = vmatpush.bf16.msrb.mxu3 %v10709_v33  ;;  %3593 = vmatmul.bf16.gmra.mxu2 %v14538_v3  ;;  %v10089_v33 = vor.u32 %v12670_v27, %v10088_v26  ;;  %v10473_v34 = vor.u32 %v12766_v29, %v10472_v28  ;;  %v9464_v26 = vld [vmem:[%s14363_s2 + $0x70] sm:$0xf]  ;;  %v12514_v27 = vld [vmem:[%s14363_s2 + $0x9c] sm:$0xf0]  ;;  %v10665_v29 = vor.u32 %v12814_v23, %v10664_v22 }
 0x127   : > { %3623 = vmatpush.bf16.msrb.mxu0 %v9509_v40  ;;  %v10424_v40 = vld [vmem:[%s14363_s2 + $0x7f0] sm:$0xf] }
 0x128   : > { %3642 = vmatpush.bf16.msrb.mxu1 %v9893_v44  ;;  %v9657_v44 = vor.u32 %v12562_v37, %v9656_v36  ;;  %v9416_v36 = vld [vmem:[%s14363_s2 + $0x10] sm:$0xf]  ;;  %v9465_v37 = vor.u32 %v12514_v27, %v9464_v26  ;;  %v12748_v26 = vld [vmem:[%s14363_s2 + $0x7f4] sm:$0xf]  ;;  %v10426_v27 = vld [vmem:[%s14363_s2 + $0x820] sm:$0xf0] }
 0x129   : > { %3661 = vmatpush.bf16.msrb.mxu2 %v10277_v41  ;;  %v12754_v41 = vld [vmem:[%s14363_s2 + $0x81c] sm:$0xf0] }
 0x12a   : > { %3680 = vmatpush.bf16.msrb.mxu3 %v10661_v45  ;;  %v10041_v45 = vor.u32 %v12658_v39, %v10040_v38  ;;  %v10425_v48 = vor.u32 %v12754_v41, %v10424_v40  ;;  %v9849_v38 = vor.u32 %v12610_v31, %v9848_v30  ;;  %v12502_v39 = vld [vmem:[%s14363_s2 + $0x3c] sm:$0xf0]  ;;  %v9800_v40 = vld [vmem:[%s14363_s2 + $0x310] sm:$0xf] }
 0x12b   : > { %3624 = vmatpush.bf16.msrb.mxu0 %v9461_v53  ;;  %v12742_v53 = vld [vmem:[%s14363_s2 + $0x7bc] sm:$0xf0] }
 0x12c   : > { %3643 = vmatpush.bf16.msrb.mxu1 %v9845_v58  ;;  %v9560_v58 = vld [vmem:[%s14363_s2 + $0x130] sm:$0xf]  ;;  %v10377_v61 = vor.u32 %v12742_v53, %v10376_v52  ;;  %v12598_v41 = vld [vmem:[%s14363_s2 + $0x33c] sm:$0xf0]  ;;  %v12772_v52 = vld [vmem:[%s14363_s2 + $0x8b4] sm:$0xf]  ;;  %v9417_v53 = vor.u32 %v12502_v39, %v9416_v36 }
 0x12d   : > { %3662 = vmatpush.bf16.msrb.mxu2 %v10229_v54  ;;  %v10760_v54 = vld [vmem:[%s14363_s2 + $0xa90] sm:$0xf]  ;;  %v9610_v36 = vld [vmem:[%s14363_s2 + $0x1c0] sm:$0xf0]  ;;  %v12640_v39 = vld [vmem:[%s14363_s2 + $0x494] sm:$0xf] }
 0x12e   : > { %3681 = vmatpush.bf16.msrb.mxu3 %v10613_v59  ;;  %v12538_v59 = vld [vmem:[%s14363_s2 + $0x15c] sm:$0xf0]  ;;  %v10761_v62 = vor.u32 %v12838_v55, %v10760_v54  ;;  %v9801_v54 = vor.u32 %v12598_v41, %v9800_v40  ;;  %v10522_v55 = vld [vmem:[%s14363_s2 + $0x8e0] sm:$0xf0]  ;;  %v12736_v41 = vld [vmem:[%s14363_s2 + $0x794] sm:$0xf] }
 0x12f   : > { %3625 = vmatpush.bf16.msrb.mxu0 %v9413_v13  ;;  %v9561_v12 = vor.u32 %v12538_v59, %v9560_v58  ;;  %v9945_v13 = vor.u32 %v12634_v1, %v9944_v63  ;;  %v10569_v59 = vor.u32 %v12790_v47, %v10568_v46  ;;  %v12568_v63 = vld [vmem:[%s14363_s2 + $0x254] sm:$0xf]  ;;  %v9706_v1 = vld [vmem:[%s14363_s2 + $0x280] sm:$0xf0]  ;;  %v10525_v7 = vor.u32 %v12772_v52, %v10522_v55 }
 0x130   : > { %3644 = vmatpush.bf16.msrb.mxu1 %v9797_v18  ;;  %v9896_v18 = vld [vmem:[%s14363_s2 + $0x3d0] sm:$0xf]  ;;  %v9994_v40 = vld [vmem:[%s14363_s2 + $0x4c0] sm:$0xf0]  ;;  %v12628_v52 = vld [vmem:[%s14363_s2 + $0x434] sm:$0xf] }
 0x131   : > { %3663 = vmatpush.bf16.msrb.mxu2 %v10181_v14  ;;  %v9512_v14 = vld [vmem:[%s14363_s2 + $0xd0] sm:$0xf]  ;;  %v9997_v47 = vor.u32 %v12640_v39, %v9994_v40  ;;  %v12496_v40 = vld [vmem:[%s14363_s2 + $0x14] sm:$0xf] }
 0x132   : > { %3682 = vmatpush.bf16.msrb.mxu3 %v10565_v19  ;;  %v12622_v19 = vld [vmem:[%s14363_s2 + $0x3fc] sm:$0xf0] }
 0x133   : > { %3694 = vmatpush.bf16.msra.mxu0 %v9753_v20  ;;  %3645 = vmatmul.bf16.vlgmr.msrb.gmra.mxu1 %v14492_v5  ;;  %v10280_v20 = vld [vmem:[%s14363_s2 + $0x6d0] sm:$0xf] }
 0x134   : > { %3713 = vmatpush.bf16.msra.mxu1 %v10137_v21  ;;  %3626 = vmatmul.bf16.vlgmr.msrb.gmra.mxu0 %v14487_v0  ;;  %v12718_v21 = vld [vmem:[%s14363_s2 + $0x6fc] sm:$0xf0] }
 0x135   : > { %3732 = vmatpush.bf16.msra.mxu2 %v10521_v24  ;;  %3683 = vmatmul.bf16.vlgmr.msrb.gmra.mxu3 %v14498_v9  ;;  %v9513_v24 = vor.u32 %v12526_v15, %v9512_v14  ;;  %v10281_v28 = vor.u32 %v12718_v21, %v10280_v20  ;;  %v10474_v14 = vld [vmem:[%s14363_s2 + $0x880] sm:$0xf0]  ;;  %v12856_v15 = vld [vmem:[%s14363_s2 + $0xb54] sm:$0xf] }
 0x136   : > { %3751 = vmatpush.bf16.msra.mxu3 %v10905_v25  ;;  %3664 = vmatmul.bf16.vlgmr.msrb.gmra.mxu2 %v14494_v6  ;;  %v9897_v25 = vor.u32 %v12622_v19, %v9896_v18  ;;  %v10093_v18 = vor.u32 %v12664_v4, %v10090_v11  ;;  %v12556_v20 = vld [vmem:[%s14363_s2 + $0x1f4] sm:$0xf]  ;;  %v9658_v21 = vld [vmem:[%s14363_s2 + $0x220] sm:$0xf0] }
 0x137   : > { %3695 = vmatpush.bf16.msra.mxu0 %v9705_v32  ;;  %v10232_v32 = vld [vmem:[%s14363_s2 + $0x670] sm:$0xf]  ;;  %v9514_v11 = vld [vmem:[%s14363_s2 + $0x100] sm:$0xf0] }
 0x138   : > { %3714 = vmatpush.bf16.msra.mxu1 %v10089_v33  ;;  %v12706_v33 = vld [vmem:[%s14363_s2 + $0x69c] sm:$0xf0] }
 0x139   : > { %3733 = vmatpush.bf16.msra.mxu2 %v10473_v34  ;;  %v10616_v34 = vld [vmem:[%s14363_s2 + $0x970] sm:$0xf]  ;;  %v10233_v42 = vor.u32 %v12706_v33, %v10232_v32  ;;  %v9661_v33 = vor.u32 %v12556_v20, %v9658_v21  ;;  %v10282_v20 = vld [vmem:[%s14363_s2 + $0x700] sm:$0xf0]  ;;  %v12808_v21 = vld [vmem:[%s14363_s2 + $0x9d4] sm:$0xf] }
 0x13a   : > { %3752 = vmatpush.bf16.msra.mxu3 %v10857_v35  ;;  %v12802_v35 = vld [vmem:[%s14363_s2 + $0x99c] sm:$0xf0] }
 0x13b   : > { %3696 = vmatpush.bf16.msra.mxu0 %v9657_v44  ;;  %v10617_v43 = vor.u32 %v12802_v35, %v10616_v34  ;;  %v10184_v44 = vld [vmem:[%s14363_s2 + $0x610] sm:$0xf]  ;;  %v12544_v35 = vld [vmem:[%s14363_s2 + $0x194] sm:$0xf] }
 0x13c   : > { %3715 = vmatpush.bf16.msra.mxu1 %v10041_v45  ;;  %v12694_v45 = vld [vmem:[%s14363_s2 + $0x63c] sm:$0xf0]  ;;  %v9613_v46 = vor.u32 %v12544_v35, %v9610_v36  ;;  %v12796_v35 = vld [vmem:[%s14363_s2 + $0x974] sm:$0xf]  ;;  %v10618_v36 = vld [vmem:[%s14363_s2 + $0x9a0] sm:$0xf0] }
 0x13d   : > { %3734 = vmatpush.bf16.msra.mxu2 %v10425_v48  ;;  %v12580_v48 = vld [vmem:[%s14363_s2 + $0x2b4] sm:$0xf]  ;;  %v10185_v58 = vor.u32 %v12694_v45, %v10184_v44  ;;  %v10762_v45 = vld [vmem:[%s14363_s2 + $0xac0] sm:$0xf0] }
 0x13e   : > { %3753 = vmatpush.bf16.msra.mxu3 %v10809_v49  ;;  %v9754_v49 = vld [vmem:[%s14363_s2 + $0x2e0] sm:$0xf0]  ;;  %v12832_v44 = vld [vmem:[%s14363_s2 + $0xa94] sm:$0xf] }
 0x13f   : > { %3697 = vmatpush.bf16.msra.mxu0 %v9609_v56  ;;  %v12868_v56 = vld [vmem:[%s14363_s2 + $0xbb4] sm:$0xf] }
 0x140   : > { %3716 = vmatpush.bf16.msra.mxu1 %v9993_v57  ;;  %v10906_v57 = vld [vmem:[%s14363_s2 + $0xbe0] sm:$0xf0] }
 0x141   : > { %3735 = vmatpush.bf16.msra.mxu2 %v10377_v61  ;;  %v9757_v61 = vor.u32 %v12580_v48, %v9754_v49  ;;  %v10909_v10 = vor.u32 %v12868_v56, %v10906_v57  ;;  %v12532_v48 = vld [vmem:[%s14363_s2 + $0x134] sm:$0xf]  ;;  %v9562_v49 = vld [vmem:[%s14363_s2 + $0x160] sm:$0xf0] }
 0x142   : > { %3754 = vmatpush.bf16.msra.mxu3 %v10761_v62  ;;  %v10141_v62 = vor.u32 %v12676_v50, %v10138_v51  ;;  %v10765_v51 = vor.u32 %v12832_v44, %v10762_v45  ;;  %v10330_v56 = vld [vmem:[%s14363_s2 + $0x760] sm:$0xf0]  ;;  %v12820_v57 = vld [vmem:[%s14363_s2 + $0xa34] sm:$0xf]  ;;  %v9565_v4 = vor.u32 %v12532_v48, %v9562_v49 }
 0x143   : > { %3698 = vmatpush.bf16.msra.mxu0 %v9561_v12  ;;  %3650 = vmatmul.bf16.gmra.mxu1 %v14536_v2  ;;  %v12760_v12 = vld [vmem:[%s14363_s2 + $0x854] sm:$0xf]  ;;  %v9418_v45 = vld [vmem:[%s14363_s2 + $0x40] sm:$0xf0] }
 0x144   : > { %3717 = vmatpush.bf16.msra.mxu1 %v9945_v13  ;;  %3631 = vmatmul.bf16.gmra.mxu0 %v14531_v60  ;;  %v14798_v13 = vld [vmem:[%s14369_s10] sm:$0xff]  ;;  %v10477_v22 = vor.u32 %v12760_v12, %v10474_v14 }
 0x145   : > { %3736 = vmatpush.bf16.msra.mxu2 %v10329_v16  ;;  %3688 = vmatmul.bf16.gmra.mxu3 %v14542_v8  ;;  %v10858_v16 = vld [vmem:[%s14363_s2 + $0xb80] sm:$0xf0]  ;;  %v14804_v19 = vperm.slane %v14798_v13, 0 }
 0x146   : > { %3755 = vmatpush.bf16.msra.mxu3 %v10713_v17  ;;  %3669 = vmatmul.bf16.gmra.mxu2 %v14538_v3  ;;  %v9709_v17 = vor.u32 %v12568_v63, %v9706_v1  ;;  %v10861_v23 = vor.u32 %v12856_v15, %v10858_v16  ;;  %v12616_v16 = vld [vmem:[%s14363_s2 + $0x3d4] sm:$0xf] }
 0x147   : > { %3699 = vmatpush.bf16.msra.mxu0 %v9513_v24  ;;  %v12652_v24 = vld [vmem:[%s14363_s2 + $0x4f4] sm:$0xf] }
 0x148   : > { %3718 = vmatpush.bf16.msra.mxu1 %v9897_v25  ;;  %v10042_v25 = vld [vmem:[%s14363_s2 + $0x520] sm:$0xf0] }
 0x149   : > { %3737 = vmatpush.bf16.msra.mxu2 %v10281_v28  ;;  %v12844_v28 = vld [vmem:[%s14363_s2 + $0xaf4] sm:$0xf]  ;;  %v10045_v34 = vor.u32 %v12652_v24, %v10042_v25 }
 0x14a   : > { %3756 = vmatpush.bf16.msra.mxu3 %v10665_v29  ;;  %v10810_v29 = vld [vmem:[%s14363_s2 + $0xb20] sm:$0xf0] }
 0x14b   : > { %3700 = vmatpush.bf16.msra.mxu0 %v9465_v37  ;;  %v10429_v37 = vor.u32 %v12748_v26, %v10426_v27  ;;  %v12508_v26 = vld [vmem:[%s14363_s2 + $0x74] sm:$0xf]  ;;  %v9466_v27 = vld [vmem:[%s14363_s2 + $0xa0] sm:$0xf0] }
 0x14c   : > { %3719 = vmatpush.bf16.msra.mxu1 %v9849_v38  ;;  %v10813_v38 = vor.u32 %v12844_v28, %v10810_v29 }
 0x14d   : > { %3738 = vmatpush.bf16.msra.mxu2 %v10233_v42 }
 0x14e   : > { %3757 = vmatpush.bf16.msra.mxu3 %v10617_v43  ;;  %v10378_v43 = vld [vmem:[%s14363_s2 + $0x7c0] sm:$0xf0] }
 0x14f   : > { %3701 = vmatpush.bf16.msra.mxu0 %v9417_v53  ;;  %v10381_v50 = vor.u32 %v12736_v41, %v10378_v43  ;;  %v9946_v53 = vld [vmem:[%s14363_s2 + $0x460] sm:$0xf0]  ;;  %v9469_v43 = vor.u32 %v12508_v26, %v9466_v27  ;;  %v12671_v26 = vld [vmem:[%s14363_s2 + $0x584] sm:$0xf0]  ;;  %v10480_v27 = vld [vmem:[%s14363_s2 + $0x858] sm:$0xf] }
 0x150   : > { %3720 = vmatpush.bf16.msra.mxu1 %v9801_v54  ;;  %v3418_v32 = vpop.f32.mrf.mxu1  ;;  %v12724_v54 = vld [vmem:[%s14363_s2 + $0x734] sm:$0xf] }
 0x151   : > { %3739 = vmatpush.bf16.msra.mxu2 %v10185_v58  ;;  %v3399_v30 = vpop.f32.mrf.mxu0  ;;  %v10714_v58 = vld [vmem:[%s14363_s2 + $0xa60] sm:$0xf0]  ;;  %v10333_v14 = vor.u32 %v12724_v54, %v10330_v56  ;;  %v9760_v56 = vld [vmem:[%s14363_s2 + $0x2b8] sm:$0xf] }
 0x152   : > { %3758 = vmatpush.bf16.msra.mxu3 %v10569_v59  ;;  %v3400_v31 = vadd.f32 %v3399_v30, %v14804_v19  ;;  %v10717_v15 = vor.u32 %v12820_v57, %v10714_v58  ;;  %v12604_v30 = vld [vmem:[%s14363_s2 + $0x374] sm:$0xf]  ;;  %v12587_v57 = vld [vmem:[%s14363_s2 + $0x2e4] sm:$0xf0]  ;;  %v10144_v58 = vld [vmem:[%s14363_s2 + $0x5b8] sm:$0xf] }
 0x153   : > { %3770 = vmatpush.bf16.msrb.mxu0 %v9757_v61  ;;  %3721 = vmatmul.bf16.vlgmr.msra.gmra.mxu1 %v14492_v5 }
 0x154   : > { %3789 = vmatpush.bf16.msrb.mxu1 %v10141_v62  ;;  %v3419_v42 = vadd.f32 %v3418_v32, %v3400_v31  ;;  %3702 = vmatmul.bf16.vlgmr.msra.gmra.mxu0 %v14487_v0  ;;  %v9850_v31 = vld [vmem:[%s14363_s2 + $0x3a0] sm:$0xf0]  ;;  %v12700_v32 = vld [vmem:[%s14363_s2 + $0x674] sm:$0xf] }
 0x155   : > { %3808 = vmatpush.bf16.msrb.mxu2 %v10525_v7  ;;  %3759 = vmatmul.bf16.vlgmr.msra.gmra.mxu3 %v14498_v9  ;;  %v9949_v7 = vor.u32 %v12628_v52, %v9946_v53  ;;  %v9853_v44 = vor.u32 %v12604_v30, %v9850_v31  ;;  %v10186_v52 = vld [vmem:[%s14363_s2 + $0x640] sm:$0xf0]  ;;  %v12784_v53 = vld [vmem:[%s14363_s2 + $0x914] sm:$0xf]  ;;  %v12767_v30 = vld [vmem:[%s14363_s2 + $0x884] sm:$0xf0] }
 0x156   : > { %3827 = vmatpush.bf16.msrb.mxu3 %v10909_v10  ;;  %3740 = vmatmul.bf16.vlgmr.msra.gmra.mxu2 %v14494_v6  ;;  %v12520_v10 = vld [vmem:[%s14363_s2 + $0xd4] sm:$0xf]  ;;  %v10864_v31 = vld [vmem:[%s14363_s2 + $0xb58] sm:$0xf] }
 0x157   : > { %3771 = vmatpush.bf16.msrb.mxu0 %v9709_v17  ;;  %v9898_v17 = vld [vmem:[%s14363_s2 + $0x400] sm:$0xf0]  ;;  %v9517_v24 = vor.u32 %v12520_v10, %v9514_v11 }
 0x158   : > { %3790 = vmatpush.bf16.msrb.mxu1 %v10093_v18  ;;  %v3456_v61 = vpop.f32.mrf.mxu3  ;;  %v3420_v1 = vpop.f32.mrf.mxu1  ;;  %v12712_v18 = vld [vmem:[%s14363_s2 + $0x6d4] sm:$0xf]  ;;  %v9901_v25 = vor.u32 %v12616_v16, %v9898_v17  ;;  %v9712_v17 = vld [vmem:[%s14363_s2 + $0x258] sm:$0xf] }
 0x159   : > { %3809 = vmatpush.bf16.msrb.mxu2 %v10477_v22  ;;  %v3437_v55 = vpop.f32.mrf.mxu2  ;;  %v3401_v62 = vpop.f32.mrf.mxu0  ;;  %v10666_v22 = vld [vmem:[%s14363_s2 + $0xa00] sm:$0xf0]  ;;  %v10285_v28 = vor.u32 %v12712_v18, %v10282_v20  ;;  %v12575_v18 = vld [vmem:[%s14363_s2 + $0x284] sm:$0xf0] }
 0x15a   : > { %3828 = vmatpush.bf16.msrb.mxu3 %v10861_v23  ;;  %v3438_v59 = vadd.f32 %v3437_v55, %v3419_v42  ;;  %v3402_v63 = vadd.f32 %v3401_v62, %v14804_v19  ;;  %v10669_v29 = vor.u32 %v12808_v21, %v10666_v22  ;;  %v10570_v55 = vld [vmem:[%s14363_s2 + $0x940] sm:$0xf0]  ;;  %v9421_v62 = vor.u32 %v12496_v40, %v9418_v45  ;;  %v10048_v40 = vld [vmem:[%s14363_s2 + $0x4f8] sm:$0xf]  ;;  %v12851_v45 = vld [vmem:[%s14363_s2 + $0xb24] sm:$0xf0] }
 0x15b   : > { %3772 = vmatpush.bf16.msrb.mxu0 %v9661_v33  ;;  %v10573_v11 = vor.u32 %v12784_v53, %v10570_v55 }
 0x15c   : > { %3791 = vmatpush.bf16.msrb.mxu1 %v10045_v34  ;;  %v14838_v12 = vadd.f32 %v3456_v61, %v3438_v59  ;;  %v3421_v23 = vadd.f32 %v3420_v1, %v3402_v63  ;;  %v10234_v34 = vld [vmem:[%s14363_s2 + $0x6a0] sm:$0xf0]  ;;  %v12683_v59 = vld [vmem:[%s14363_s2 + $0x5e4] sm:$0xf0]  ;;  %v10528_v61 = vld [vmem:[%s14363_s2 + $0x8b8] sm:$0xf] }
 0x15d   : > { %3810 = vmatpush.bf16.msrb.mxu2 %v10429_v37  ;;  %v10237_v49 = vor.u32 %v12700_v32, %v10234_v34  ;;  %v12779_v1 = vld [vmem:[%s14363_s2 + $0x8e4] sm:$0xf0]  ;;  %v9713_v34 = vor.u32 %v12575_v18, %v9712_v17 }
 0x15e   : > { %3829 = vmatpush.bf16.msrb.mxu3 %v10813_v38  ;;  %v10529_v20 = vor.u32 %v12779_v1, %v10528_v61  ;;  %v12863_v32 = vld [vmem:[%s14363_s2 + $0xb84] sm:$0xf0]  ;;  %v10768_v1 = vld [vmem:[%s14363_s2 + $0xa98] sm:$0xf] }
 0x15f   : > { %3773 = vmatpush.bf16.msrb.mxu0 %v9613_v46  ;;  %v12592_v46 = vld [vmem:[%s14363_s2 + $0x314] sm:$0xf] }
 0x160   : > { %3792 = vmatpush.bf16.msrb.mxu1 %v9997_v47  ;;  %v3458_v38 = vpop.f32.mrf.mxu3  ;;  %v3423_v42 = vpop.f32.mrf.mxu1  ;;  %v9802_v47 = vld [vmem:[%s14363_s2 + $0x340] sm:$0xf0] }
 0x161   : > { %3811 = vmatpush.bf16.msrb.mxu2 %v10381_v50  ;;  %v3439_v33 = vpop.f32.mrf.mxu2  ;;  %v3404_v39 = vpop.f32.mrf.mxu0  ;;  %v10621_v50 = vor.u32 %v12796_v35, %v10618_v36  ;;  %v9805_v63 = vor.u32 %v12592_v46, %v9802_v47  ;;  %v9664_v36 = vld [vmem:[%s14363_s2 + $0x1f8] sm:$0xf]  ;;  %v14897_v46 = vperm.slane %v14798_v13, 1 }
 0x162   : > { %3830 = vmatpush.bf16.msrb.mxu3 %v10765_v51  ;;  %v3440_v37 = vadd.f32 %v3439_v33, %v3421_v23  ;;  %v3405_v41 = vadd.f32 %v3404_v39, %v14804_v19  ;;  %v12688_v51 = vld [vmem:[%s14363_s2 + $0x614] sm:$0xf]  ;;  %v10865_v39 = vor.u32 %v12863_v32, %v10864_v31 }
 0x163   : > { %3774 = vmatpush.bf16.msrb.mxu0 %v9565_v4  ;;  %v10912_v4 = vld [vmem:[%s14363_s2 + $0xbb8] sm:$0xf]  ;;  %v10189_v10 = vor.u32 %v12688_v51, %v10186_v52  ;;  %3726 = vmatmul.bf16.gmra.mxu1 %v14536_v2  ;;  %v12551_v52 = vld [vmem:[%s14363_s2 + $0x1c4] sm:$0xf0] }
 0x164   : > { %3793 = vmatpush.bf16.msrb.mxu1 %v9949_v7  ;;  %v14859_v48 = vadd.f32 %v3458_v38, %v3440_v37  ;;  %v3424_v54 = vadd.f32 %v3423_v42, %v3405_v41  ;;  %v12875_v7 = vld [vmem:[%s14363_s2 + $0xbe4] sm:$0xf0]  ;;  %3707 = vmatmul.bf16.gmra.mxu0 %v14531_v60  ;;  %v10481_v38 = vor.u32 %v12767_v30, %v10480_v27  ;;  %v10432_v42 = vld [vmem:[%s14363_s2 + $0x7f8] sm:$0xf] }
 0x165   : > { %3812 = vmatpush.bf16.msrb.mxu2 %v10333_v14  ;;  %v9761_v14 = vor.u32 %v12587_v57, %v9760_v56  ;;  %3764 = vmatmul.bf16.gmra.mxu3 %v14542_v8  ;;  %v10913_v21 = vor.u32 %v12875_v7, %v10912_v4  ;;  %v12659_v41 = vld [vmem:[%s14363_s2 + $0x524] sm:$0xf0]  ;;  %v9616_v51 = vld [vmem:[%s14363_s2 + $0x198] sm:$0xf] }
 0x166   : > { %3831 = vmatpush.bf16.msrb.mxu3 %v10717_v15  ;;  %v10145_v15 = vor.u32 %v12683_v59, %v10144_v58  ;;  %3745 = vmatmul.bf16.gmra.mxu2 %v14538_v3  ;;  %v10000_v57 = vld [vmem:[%s14363_s2 + $0x498] sm:$0xf]  ;;  %v12647_v58 = vld [vmem:[%s14363_s2 + $0x4c4] sm:$0xf0] }
 0x167   : > { %3775 = vmatpush.bf16.msrb.mxu0 %v9517_v24  ;;  %v10384_v59 = vld [vmem:[%s14363_s2 + $0x798] sm:$0xf]  ;;  %v12839_v4 = vld [vmem:[%s14363_s2 + $0xac4] sm:$0xf0] }
 0x168   : > { %3794 = vmatpush.bf16.msrb.mxu1 %v9901_v25  ;;  %v3461_v23 = vpop.f32.mrf.mxu3  ;;  %v10096_v25 = vld [vmem:[%s14363_s2 + $0x558] sm:$0xf]  ;;  %v12527_v30 = vld [vmem:[%s14363_s2 + $0x104] sm:$0xf0] }
 0x169   : > { %3813 = vmatpush.bf16.msrb.mxu2 %v10285_v28  ;;  %v3442_v16 = vpop.f32.mrf.mxu2  ;;  %v3406_v24 = vpop.f32.mrf.mxu0  ;;  %v10097_v35 = vor.u32 %v12671_v26, %v10096_v25  ;;  %v10720_v25 = vld [vmem:[%s14363_s2 + $0xa38] sm:$0xf]  ;;  %v12827_v26 = vld [vmem:[%s14363_s2 + $0xa64] sm:$0xf0] }
 0x16a   : > { %3832 = vmatpush.bf16.msrb.mxu3 %v10669_v29  ;;  %v3443_v22 = vadd.f32 %v3442_v16, %v3424_v54  ;;  %v3407_v28 = vadd.f32 %v3406_v24, %v14804_v19  ;;  %v3425_v29 = vpop.f32.mrf.mxu1  ;;  %v12563_v19 = vld [vmem:[%s14363_s2 + $0x224] sm:$0xf0]  ;;  %v10721_v32 = vor.u32 %v12827_v26, %v10720_v25  ;;  %v12581_v26 = vld [vmem:[%s14363_s2 + $0x2bc] sm:$0xf] }
 0x16b   : > { %3776 = vmatpush.bf16.msrb.mxu0 %v9469_v43  ;;  %v12755_v43 = vld [vmem:[%s14363_s2 + $0x824] sm:$0xf0]  ;;  %v9665_v47 = vor.u32 %v12563_v19, %v9664_v36  ;;  %v9904_v36 = vld [vmem:[%s14363_s2 + $0x3d8] sm:$0xf] }
 0x16c   : > { %3795 = vmatpush.bf16.msrb.mxu1 %v9853_v44  ;;  %v14886_v33 = vadd.f32 %v3461_v23, %v3443_v22  ;;  %v3426_v37 = vadd.f32 %v3425_v29, %v3407_v28  ;;  %v10816_v44 = vld [vmem:[%s14363_s2 + $0xaf8] sm:$0xf]  ;;  %v10433_v53 = vor.u32 %v12755_v43, %v10432_v42  ;;  %v12539_v16 = vld [vmem:[%s14363_s2 + $0x164] sm:$0xf0] }
 0x16d   : > { %3814 = vmatpush.bf16.msrb.mxu2 %v10237_v49  ;;  %v10049_v49 = vor.u32 %v12659_v41, %v10048_v40  ;;  %v10817_v54 = vor.u32 %v12851_v45, %v10816_v44  ;;  %v12635_v22 = vld [vmem:[%s14363_s2 + $0x464] sm:$0xf0]  ;;  %v10336_v23 = vld [vmem:[%s14363_s2 + $0x738] sm:$0xf] }
 0x16e   : > { %3833 = vmatpush.bf16.msrb.mxu3 %v10621_v50  ;;  %v12731_v24 = vld [vmem:[%s14363_s2 + $0x764] sm:$0xf0]  ;;  %v9520_v29 = vld [vmem:[%s14363_s2 + $0xd8] sm:$0xf] }
 0x16f   : > { %3777 = vmatpush.bf16.msrb.mxu0 %v9421_v62  ;;  %v10337_v31 = vor.u32 %v12731_v24, %v10336_v23  ;;  %v12623_v19 = vld [vmem:[%s14363_s2 + $0x404] sm:$0xf0]  ;;  %v10672_v42 = vld [vmem:[%s14363_s2 + $0x9d8] sm:$0xf] }
 0x170   : > { %3796 = vmatpush.bf16.msrb.mxu1 %v9805_v63  ;;  %v3463_v56 = vpop.f32.mrf.mxu3  ;;  %v12743_v63 = vld [vmem:[%s14363_s2 + $0x7c4] sm:$0xf0] }
 0x171   : > { %3815 = vmatpush.bf16.msrb.mxu2 %v10189_v10  ;;  %v3444_v50 = vpop.f32.mrf.mxu2  ;;  %v3475_v61 = vpop.f32.mrf.mxu0  ;;  %v10385_v18 = vor.u32 %v12743_v63, %v10384_v59  ;;  %v12719_v41 = vld [vmem:[%s14363_s2 + $0x704] sm:$0xf0]  ;;  %v10624_v59 = vld [vmem:[%s14363_s2 + $0x978] sm:$0xf] }
 0x172   : > { %3834 = vmatpush.bf16.msrb.mxu3 %v10573_v11  ;;  %v3445_v55 = vadd.f32 %v3444_v50, %v3426_v37  ;;  %v3494_v62 = vpop.f32.mrf.mxu1  ;;  %v3476_v10 = vadd.f32 %v3475_v61, %v14897_v46  ;;  %v9617_v11 = vor.u32 %v12551_v52, %v9616_v51  ;;  %v10288_v37 = vld [vmem:[%s14363_s2 + $0x6d8] sm:$0xf]  ;;  %v12815_v43 = vld [vmem:[%s14363_s2 + $0xa04] sm:$0xf0] }
 0x173   : > { %3846 = vmatpush.bf16.msra.mxu0 %v9761_v14  ;;  %v10001_v14 = vor.u32 %v12647_v58, %v10000_v57  ;;  %3797 = vmatmul.bf16.vlgmr.msrb.gmra.mxu1 %v14492_v5  ;;  %v9472_v50 = vld [vmem:[%s14363_s2 + $0x78] sm:$0xf]  ;;  %v12515_v51 = vld [vmem:[%s14363_s2 + $0xa4] sm:$0xf0]  ;;  %v10289_v52 = vor.u32 %v12719_v41, %v10288_v37  ;;  %v10914_v37 = vld [vmem:[%s14363_s2 + $0xbe8] sm:$0xf0] }
 0x174   : > { %3865 = vmatpush.bf16.msra.mxu1 %v10145_v15  ;;  %v14907_v7 = vadd.f32 %v3463_v56, %v3445_v55  ;;  %v9568_v15 = vld [vmem:[%s14363_s2 + $0x138] sm:$0xf]  ;;  %v3495_v17 = vadd.f32 %v3494_v62, %v3476_v10  ;;  %3778 = vmatmul.bf16.vlgmr.msrb.gmra.mxu0 %v14487_v0  ;;  %v12611_v55 = vld [vmem:[%s14363_s2 + $0x3a4] sm:$0xf0]  ;;  %v9473_v63 = vor.u32 %v12515_v51, %v9472_v50  ;;  %v12665_v50 = vld [vmem:[%s14363_s2 + $0x55c] sm:$0xf] }
 0x175   : > { %3884 = vmatpush.bf16.msra.mxu2 %v10529_v20  ;;  %v10769_v20 = vor.u32 %v12839_v4, %v10768_v1  ;;  %v9569_v27 = vor.u32 %v12539_v16, %v9568_v15  ;;  %3835 = vmatmul.bf16.vlgmr.msrb.gmra.mxu3 %v14498_v9  ;;  %v10240_v56 = vld [vmem:[%s14363_s2 + $0x678] sm:$0xf]  ;;  %v12707_v58 = vld [vmem:[%s14363_s2 + $0x6a4] sm:$0xf0]  ;;  %v10098_v51 = vld [vmem:[%s14363_s2 + $0x588] sm:$0xf0] }
 0x176   : > { %3903 = vmatpush.bf16.msra.mxu3 %v10913_v21  ;;  %v9952_v21 = vld [vmem:[%s14363_s2 + $0x438] sm:$0xf]  ;;  %3816 = vmatmul.bf16.vlgmr.msrb.gmra.mxu2 %v14494_v6  ;;  %v12803_v61 = vld [vmem:[%s14363_s2 + $0x9a4] sm:$0xf0] }
 0x177   : > { %3847 = vmatpush.bf16.msra.mxu0 %v9713_v34  ;;  %v9953_v28 = vor.u32 %v12635_v22, %v9952_v21  ;;  %v9424_v62 = vld [vmem:[%s14363_s2 + $0x18] sm:$0xf]  ;;  %v12503_v4 = vld [vmem:[%s14363_s2 + $0x44] sm:$0xf0]  ;;  %v10625_v15 = vor.u32 %v12803_v61, %v10624_v59  ;;  %v10101_v61 = vor.u32 %v12665_v50, %v10098_v51  ;;  %v12629_v50 = vld [vmem:[%s14363_s2 + $0x43c] sm:$0xf] }
 0x178   : > { %3866 = vmatpush.bf16.msra.mxu1 %v10097_v35  ;;  %v3532_v35 = vpop.f32.mrf.mxu3  ;;  %v9808_v10 = vld [vmem:[%s14363_s2 + $0x318] sm:$0xf]  ;;  %v12791_v25 = vld [vmem:[%s14363_s2 + $0x944] sm:$0xf0]  ;;  %v9954_v51 = vld [vmem:[%s14363_s2 + $0x468] sm:$0xf0] }
 0x179   : > { %3885 = vmatpush.bf16.msra.mxu2 %v10481_v38  ;;  %v3513_v34 = vpop.f32.mrf.mxu2  ;;  %v10576_v21 = vld [vmem:[%s14363_s2 + $0x918] sm:$0xf] }
 0x17a   : > { %3904 = vmatpush.bf16.msra.mxu3 %v10865_v39  ;;  %v3514_v38 = vadd.f32 %v3513_v34, %v3495_v17  ;;  %v3477_v39 = vpop.f32.mrf.mxu0  ;;  %v3496_v40 = vpop.f32.mrf.mxu1  ;;  %v9425_v34 = vor.u32 %v12503_v4, %v9424_v62  ;;  %v9666_v4 = vld [vmem:[%s14363_s2 + $0x228] sm:$0xf0] }
 0x17b   : > { %3848 = vmatpush.bf16.msra.mxu0 %v9665_v47  ;;  %v3478_v44 = vadd.f32 %v3477_v39, %v14897_v46  ;;  %v9521_v47 = vor.u32 %v12527_v30, %v9520_v29  ;;  %v12677_v29 = vld [vmem:[%s14363_s2 + $0x5bc] sm:$0xf]  ;;  %v10146_v30 = vld [vmem:[%s14363_s2 + $0x5e8] sm:$0xf0] }
 0x17c   : > { %3867 = vmatpush.bf16.msra.mxu1 %v10049_v49  ;;  %v14931_v45 = vadd.f32 %v3532_v35, %v3514_v38  ;;  %v9905_v49 = vor.u32 %v12623_v19, %v9904_v36  ;;  %v10530_v36 = vld [vmem:[%s14363_s2 + $0x8e8] sm:$0xf0]  ;;  %v12869_v19 = vld [vmem:[%s14363_s2 + $0xbbc] sm:$0xf] }
 0x17d   : > { %3886 = vmatpush.bf16.msra.mxu2 %v10433_v53  ;;  %v10673_v53 = vor.u32 %v12815_v43, %v10672_v42  ;;  %v3497_v57 = vadd.f32 %v3496_v40, %v3478_v44  ;;  %v10577_v40 = vor.u32 %v12791_v25, %v10576_v21  ;;  %v10149_v42 = vor.u32 %v12677_v29, %v10146_v30  ;;  %v12569_v43 = vld [vmem:[%s14363_s2 + $0x25c] sm:$0xf]  ;;  %v9714_v44 = vld [vmem:[%s14363_s2 + $0x288] sm:$0xf0] }
 0x17e   : > { %3905 = vmatpush.bf16.msra.mxu3 %v10817_v54  ;;  %v9856_v54 = vld [vmem:[%s14363_s2 + $0x378] sm:$0xf]  ;;  %v9717_v59 = vor.u32 %v12569_v43, %v9714_v44  ;;  %v12845_v21 = vld [vmem:[%s14363_s2 + $0xafc] sm:$0xf]  ;;  %v10002_v30 = vld [vmem:[%s14363_s2 + $0x4c8] sm:$0xf0] }
 0x17f   : > { %3849 = vmatpush.bf16.msra.mxu0 %v9617_v11  ;;  %v9857_v1 = vor.u32 %v12611_v55, %v9856_v54  ;;  %v12599_v11 = vld [vmem:[%s14363_s2 + $0x344] sm:$0xf0]  ;;  %v12857_v54 = vld [vmem:[%s14363_s2 + $0xb5c] sm:$0xf]  ;;  %v10866_v55 = vld [vmem:[%s14363_s2 + $0xb88] sm:$0xf0] }
 0x180   : > { %3868 = vmatpush.bf16.msra.mxu1 %v10001_v14  ;;  %v10241_v14 = vor.u32 %v12707_v58, %v10240_v56  ;;  %v3534_v17 = vpop.f32.mrf.mxu3  ;;  %v9809_v35 = vor.u32 %v12599_v11, %v9808_v10  ;;  %v10869_v11 = vor.u32 %v12857_v54, %v10866_v55  ;;  %v12545_v25 = vld [vmem:[%s14363_s2 + $0x19c] sm:$0xf]  ;;  %v9570_v43 = vld [vmem:[%s14363_s2 + $0x168] sm:$0xf0] }
 0x181   : > { %3887 = vmatpush.bf16.msra.mxu2 %v10385_v18  ;;  %v3515_v16 = vpop.f32.mrf.mxu2  ;;  %v10192_v18 = vld [vmem:[%s14363_s2 + $0x618] sm:$0xf]  ;;  %v10338_v55 = vld [vmem:[%s14363_s2 + $0x768] sm:$0xf0] }
 0x182   : > { %3906 = vmatpush.bf16.msra.mxu3 %v10769_v20  ;;  %v12695_v20 = vld [vmem:[%s14363_s2 + $0x644] sm:$0xf0]  ;;  %v3516_v22 = vadd.f32 %v3515_v16, %v3497_v57  ;;  %v3480_v23 = vpop.f32.mrf.mxu0  ;;  %v3499_v24 = vpop.f32.mrf.mxu1  ;;  %v10050_v16 = vld [vmem:[%s14363_s2 + $0x528] sm:$0xf0] }
 0x183   : > { %3850 = vmatpush.bf16.msra.mxu0 %v9569_v27  ;;  %v9762_v27 = vld [vmem:[%s14363_s2 + $0x2e8] sm:$0xf0]  ;;  %v10193_v39 = vor.u32 %v12695_v20, %v10192_v18  ;;  %3802 = vmatmul.bf16.gmra.mxu1 %v14536_v2 }
 0x184   : > { %3869 = vmatpush.bf16.msra.mxu1 %v9953_v28  ;;  %v3481_v28 = vadd.f32 %v3480_v23, %v14897_v46  ;;  %v9765_v41 = vor.u32 %v12581_v26, %v9762_v27  ;;  %3783 = vmatmul.bf16.gmra.mxu0 %v14531_v60  ;;  %v10434_v20 = vld [vmem:[%s14363_s2 + $0x828] sm:$0xf0]  ;;  %v12641_v27 = vld [vmem:[%s14363_s2 + $0x49c] sm:$0xf] }
 0x185   : > { %3888 = vmatpush.bf16.msra.mxu2 %v10337_v31  ;;  %v12773_v31 = vld [vmem:[%s14363_s2 + $0x8bc] sm:$0xf]  ;;  %3840 = vmatmul.bf16.gmra.mxu3 %v14542_v8  ;;  %v9618_v26 = vld [vmem:[%s14363_s2 + $0x1c8] sm:$0xf0] }
 0x186   : > { %3907 = vmatpush.bf16.msra.mxu3 %v10721_v32  ;;  %v14955_v32 = vadd.f32 %v3534_v17, %v3516_v22  ;;  %v3500_v38 = vadd.f32 %v3499_v24, %v3481_v28  ;;  %v12749_v17 = vld [vmem:[%s14363_s2 + $0x7fc] sm:$0xf]  ;;  %v10818_v22 = vld [vmem:[%s14363_s2 + $0xb28] sm:$0xf0]  ;;  %3821 = vmatmul.bf16.gmra.mxu2 %v14538_v3 }
 0x187   : > { %3851 = vmatpush.bf16.msra.mxu0 %v9521_v47  ;;  %v10533_v47 = vor.u32 %v12773_v31, %v10530_v36  ;;  %v10437_v28 = vor.u32 %v12749_v17, %v10434_v20  ;;  %v10821_v29 = vor.u32 %v12845_v21, %v10818_v22  ;;  %v12737_v31 = vld [vmem:[%s14363_s2 + $0x79c] sm:$0xf]  ;;  %v10770_v36 = vld [vmem:[%s14363_s2 + $0xac8] sm:$0xf0] }
 0x188   : > { %3870 = vmatpush.bf16.msra.mxu1 %v9905_v49  ;;  %v10917_v49 = vor.u32 %v12869_v19, %v10914_v37  ;;  %v3537_v57 = vpop.f32.mrf.mxu3  ;;  %v14992_v19 = vperm.slane %v14798_v13, 2  ;;  %v10674_v17 = vld [vmem:[%s14363_s2 + $0xa08] sm:$0xf0] }
 0x189   : > { %3889 = vmatpush.bf16.msra.mxu2 %v10289_v52  ;;  %v12761_v52 = vld [vmem:[%s14363_s2 + $0x85c] sm:$0xf]  ;;  %v3518_v56 = vpop.f32.mrf.mxu2 }
 0x18a   : > { %3908 = vmatpush.bf16.msra.mxu3 %v10673_v53  ;;  %v10482_v53 = vld [vmem:[%s14363_s2 + $0x888] sm:$0xf0]  ;;  %v3519_v58 = vadd.f32 %v3518_v56, %v3500_v38  ;;  %v3482_v62 = vpop.f32.mrf.mxu0  ;;  %v12821_v56 = vld [vmem:[%s14363_s2 + $0xa3c] sm:$0xf] }
 0x18b   : > { %3852 = vmatpush.bf16.msra.mxu0 %v9473_v63  ;;  %v3501_v63 = vpop.f32.mrf.mxu1  ;;  %v10485_v10 = vor.u32 %v12761_v52, %v10482_v53  ;;  %v12725_v52 = vld [vmem:[%s14363_s2 + $0x73c] sm:$0xf] }
 0x18c   : > { %3871 = vmatpush.bf16.msra.mxu1 %v9857_v1  ;;  %v12557_v1 = vld [vmem:[%s14363_s2 + $0x1fc] sm:$0xf]  ;;  %v14976_v18 = vadd.f32 %v3537_v57, %v3519_v58  ;;  %v10722_v57 = vld [vmem:[%s14363_s2 + $0xa68] sm:$0xf0] }
 0x18d   : > { %3890 = vmatpush.bf16.msra.mxu2 %v10241_v14  ;;  %v3483_v14 = vadd.f32 %v3482_v62, %v14897_v46  ;;  %v9669_v23 = vor.u32 %v12557_v1, %v9666_v4  ;;  %v12521_v62 = vld [vmem:[%s14363_s2 + $0xdc] sm:$0xf]  ;;  %v10341_v1 = vor.u32 %v12725_v52, %v10338_v55  ;;  %v10725_v4 = vor.u32 %v12821_v56, %v10722_v57  ;;  %v10194_v52 = vld [vmem:[%s14363_s2 + $0x648] sm:$0xf0]  ;;  %v9768_v56 = vld [vmem:[%s14363_s2 + $0x2c0] sm:$0xf] }
 0x18e   : > { %3909 = vmatpush.bf16.msra.mxu3 %v10625_v15  ;;  %v12653_v15 = vld [vmem:[%s14363_s2 + $0x4fc] sm:$0xf]  ;;  %v10578_v55 = vld [vmem:[%s14363_s2 + $0x948] sm:$0xf0]  ;;  %v12588_v57 = vld [vmem:[%s14363_s2 + $0x2ec] sm:$0xf0] }
 0x18f   : > { %3853 = vmatpush.bf16.msra.mxu0 %v9425_v34  ;;  %v3502_v46 = vadd.f32 %v3501_v63, %v3483_v14  ;;  %v10053_v24 = vor.u32 %v12653_v15, %v10050_v16  ;;  %v10386_v34 = vld [vmem:[%s14363_s2 + $0x7c8] sm:$0xf0]  ;;  %v12713_v14 = vld [vmem:[%s14363_s2 + $0x6dc] sm:$0xf] }
 0x190   : > { %3872 = vmatpush.bf16.msra.mxu1 %v9809_v35  ;;  %v12833_v35 = vld [vmem:[%s14363_s2 + $0xa9c] sm:$0xf]  ;;  %v3539_v38 = vpop.f32.mrf.mxu3  ;;  %v10389_v44 = vor.u32 %v12737_v31, %v10386_v34  ;;  %v9522_v63 = vld [vmem:[%s14363_s2 + $0x108] sm:$0xf0] }
 0x191   : > { %3891 = vmatpush.bf16.msra.mxu2 %v10193_v39  ;;  %v3520_v37 = vpop.f32.mrf.mxu2  ;;  %v10773_v13 = vor.u32 %v12833_v35, %v10770_v36  ;;  %v10290_v15 = vld [vmem:[%s14363_s2 + $0x708] sm:$0xf0]  ;;  %v12809_v16 = vld [vmem:[%s14363_s2 + $0x9dc] sm:$0xf]  ;;  %v9525_v22 = vor.u32 %v12521_v62, %v9522_v63 }
 0x192   : > { %3910 = vmatpush.bf16.msra.mxu3 %v10577_v40  ;;  %v3521_v39 = vadd.f32 %v3520_v37, %v3502_v46  ;;  %v9621_v40 = vor.u32 %v12545_v25, %v9618_v26  ;;  %v10293_v26 = vor.u32 %v12713_v14, %v10290_v15  ;;  %v9858_v31 = vld [vmem:[%s14363_s2 + $0x3a8] sm:$0xf0]  ;;  %v12701_v34 = vld [vmem:[%s14363_s2 + $0x67c] sm:$0xf]  ;;  %v12876_v14 = vld [vmem:[%s14363_s2 + $0xbec] sm:$0xf0] }
 0x193   : > { %3922 = vmatpush.bf16.msrb.mxu0 %v9765_v41  ;;  %v10005_v41 = vor.u32 %v12641_v27, %v10002_v30  ;;  %v10677_v27 = vor.u32 %v12809_v16, %v10674_v17  ;;  %v12605_v30 = vld [vmem:[%s14363_s2 + $0x37c] sm:$0xf]  ;;  %3873 = vmatmul.bf16.vlgmr.msra.gmra.mxu1 %v14492_v5  ;;  %v10242_v36 = vld [vmem:[%s14363_s2 + $0x6a8] sm:$0xf0] }
 0x194   : > { %3941 = vmatpush.bf16.msrb.mxu1 %v10149_v42  ;;  %v12533_v42 = vld [vmem:[%s14363_s2 + $0x13c] sm:$0xf]  ;;  %v14999_v53 = vadd.f32 %v3539_v38, %v3521_v39  ;;  %3854 = vmatmul.bf16.vlgmr.msra.gmra.mxu0 %v14487_v0  ;;  %v10626_v38 = vld [vmem:[%s14363_s2 + $0x9a8] sm:$0xf0] }
 0x195   : > { %3960 = vmatpush.bf16.msrb.mxu2 %v10533_v47  ;;  %v3551_v47 = vpop.f32.mrf.mxu0  ;;  %v12797_v37 = vld [vmem:[%s14363_s2 + $0x97c] sm:$0xf]  ;;  %3911 = vmatmul.bf16.vlgmr.msra.gmra.mxu3 %v14498_v9 }
 0x196   : > { %3979 = vmatpush.bf16.msrb.mxu3 %v10917_v49  ;;  %v3570_v49 = vpop.f32.mrf.mxu1  ;;  %v3552_v54 = vadd.f32 %v3551_v47, %v14992_v19  ;;  %3892 = vmatmul.bf16.vlgmr.msra.gmra.mxu2 %v14494_v6 }
 0x197   : > { %3923 = vmatpush.bf16.msrb.mxu0 %v9717_v59  ;;  %v9573_v59 = vor.u32 %v12533_v42, %v9570_v43  ;;  %v9861_v42 = vor.u32 %v12605_v30, %v9858_v31  ;;  %v9426_v43 = vld [vmem:[%s14363_s2 + $0x48] sm:$0xf0]  ;;  %v10104_v30 = vld [vmem:[%s14363_s2 + $0x560] sm:$0xf]  ;;  %v12672_v31 = vld [vmem:[%s14363_s2 + $0x58c] sm:$0xf0] }
 0x198   : > { %3942 = vmatpush.bf16.msrb.mxu1 %v10101_v61  ;;  %v3571_v58 = vadd.f32 %v3570_v49, %v3552_v54  ;;  %v9957_v61 = vor.u32 %v12629_v50, %v9954_v51  ;;  %v3608_v21 = vpop.f32.mrf.mxu3  ;;  %v10245_v49 = vor.u32 %v12701_v34, %v10242_v36  ;;  %v10629_v50 = vor.u32 %v12797_v37, %v10626_v38  ;;  %v12689_v51 = vld [vmem:[%s14363_s2 + $0x61c] sm:$0xf]  ;;  %v10488_v34 = vld [vmem:[%s14363_s2 + $0x860] sm:$0xf]  ;;  %v12864_v37 = vld [vmem:[%s14363_s2 + $0xb8c] sm:$0xf0] }
 0x199   : > { %3961 = vmatpush.bf16.msrb.mxu2 %v10485_v10  ;;  %v12617_v10 = vld [vmem:[%s14363_s2 + $0x3dc] sm:$0xf]  ;;  %v3589_v20 = vpop.f32.mrf.mxu2  ;;  %v10197_v16 = vor.u32 %v12689_v51, %v10194_v52  ;;  %v10872_v36 = vld [vmem:[%s14363_s2 + $0xb60] sm:$0xf]  ;;  %v12660_v51 = vld [vmem:[%s14363_s2 + $0x52c] sm:$0xf0] }
 0x19a   : > { %3980 = vmatpush.bf16.msrb.mxu3 %v10869_v11  ;;  %v9906_v11 = vld [vmem:[%s14363_s2 + $0x408] sm:$0xf0]  ;;  %v3590_v25 = vadd.f32 %v3589_v20, %v3571_v58  ;;  %v12785_v54 = vld [vmem:[%s14363_s2 + $0x91c] sm:$0xf]  ;;  %v10152_v58 = vld [vmem:[%s14363_s2 + $0x5c0] sm:$0xf] }
 0x19b   : > { %3924 = vmatpush.bf16.msrb.mxu0 %v9669_v23  ;;  %v9909_v46 = vor.u32 %v12617_v10, %v9906_v11  ;;  %v12509_v23 = vld [vmem:[%s14363_s2 + $0x7c] sm:$0xf]  ;;  %v12780_v10 = vld [vmem:[%s14363_s2 + $0x8ec] sm:$0xf0]  ;;  %v10920_v11 = vld [vmem:[%s14363_s2 + $0xbc0] sm:$0xf]  ;;  %v10581_v17 = vor.u32 %v12785_v54, %v10578_v55 }
 0x19c   : > { %3943 = vmatpush.bf16.msrb.mxu1 %v10053_v24  ;;  %v9474_v24 = vld [vmem:[%s14363_s2 + $0xa8] sm:$0xf0]  ;;  %v15026_v39 = vadd.f32 %v3608_v21, %v3590_v25  ;;  %v10440_v52 = vld [vmem:[%s14363_s2 + $0x800] sm:$0xf] }
 0x19d   : > { %3962 = vmatpush.bf16.msrb.mxu2 %v10437_v28  ;;  %v3553_v28 = vpop.f32.mrf.mxu0 }
 0x19e   : > { %3981 = vmatpush.bf16.msrb.mxu3 %v10821_v29  ;;  %v3572_v29 = vpop.f32.mrf.mxu1  ;;  %v3554_v35 = vadd.f32 %v3553_v28, %v14992_v19  ;;  %v9720_v28 = vld [vmem:[%s14363_s2 + $0x260] sm:$0xf] }
 0x19f   : > { %3925 = vmatpush.bf16.msrb.mxu0 %v9621_v40  ;;  %v12497_v40 = vld [vmem:[%s14363_s2 + $0x1c] sm:$0xf] }
 0x1a0   : > { %3944 = vmatpush.bf16.msrb.mxu1 %v10005_v41  ;;  %v9477_v41 = vor.u32 %v12509_v23, %v9474_v24  ;;  %v3573_v47 = vadd.f32 %v3572_v29, %v3554_v35  ;;  %v3610_v63 = vpop.f32.mrf.mxu3  ;;  %v12576_v29 = vld [vmem:[%s14363_s2 + $0x28c] sm:$0xf0] }
 0x1a1   : > { %3963 = vmatpush.bf16.msrb.mxu2 %v10389_v44  ;;  %v12593_v44 = vld [vmem:[%s14363_s2 + $0x31c] sm:$0xf]  ;;  %v3591_v62 = vpop.f32.mrf.mxu2  ;;  %v12768_v35 = vld [vmem:[%s14363_s2 + $0x88c] sm:$0xf0]  ;;  %v9721_v38 = vor.u32 %v12576_v29, %v9720_v28  ;;  %v9576_v28 = vld [vmem:[%s14363_s2 + $0x140] sm:$0xf] }
 0x1a2   : > { %3982 = vmatpush.bf16.msrb.mxu3 %v10773_v13  ;;  %v9810_v13 = vld [vmem:[%s14363_s2 + $0x348] sm:$0xf0]  ;;  %v3592_v15 = vadd.f32 %v3591_v62, %v3573_v47  ;;  %v10873_v47 = vor.u32 %v12864_v37, %v10872_v36  ;;  %v12540_v29 = vld [vmem:[%s14363_s2 + $0x16c] sm:$0xf0]  ;;  %v10344_v37 = vld [vmem:[%s14363_s2 + $0x740] sm:$0xf] }
 0x1a3   : > { %3926 = vmatpush.bf16.msrb.mxu0 %v9573_v59  ;;  %v12684_v59 = vld [vmem:[%s14363_s2 + $0x5ec] sm:$0xf0]  ;;  %3878 = vmatmul.bf16.gmra.mxu1 %v14536_v2 }
 0x1a4   : > { %3945 = vmatpush.bf16.msrb.mxu1 %v9957_v61  ;;  %v10536_v61 = vld [vmem:[%s14363_s2 + $0x8c0] sm:$0xf]  ;;  %v15045_v24 = vadd.f32 %v3610_v63, %v3592_v15  ;;  %3859 = vmatmul.bf16.gmra.mxu0 %v14531_v60  ;;  %v12648_v15 = vld [vmem:[%s14363_s2 + $0x4cc] sm:$0xf0] }
 0x1a5   : > { %3964 = vmatpush.bf16.msrb.mxu2 %v10341_v1  ;;  %v9429_v1 = vor.u32 %v12497_v40, %v9426_v43  ;;  %v3556_v20 = vpop.f32.mrf.mxu0  ;;  %v10537_v25 = vor.u32 %v12780_v10, %v10536_v61  ;;  %v10105_v40 = vor.u32 %v12672_v31, %v10104_v30  ;;  %v9672_v43 = vld [vmem:[%s14363_s2 + $0x200] sm:$0xf]  ;;  %3916 = vmatmul.bf16.gmra.mxu3 %v14542_v8  ;;  %v12636_v36 = vld [vmem:[%s14363_s2 + $0x46c] sm:$0xf0] }
 0x1a6   : > { %3983 = vmatpush.bf16.msrb.mxu3 %v10725_v4  ;;  %v9813_v4 = vor.u32 %v12593_v44, %v9810_v13  ;;  %v3575_v21 = vpop.f32.mrf.mxu1  ;;  %v3557_v23 = vadd.f32 %v3556_v20, %v14992_v19  ;;  %17651 = vst [vmem:[#allocation44_spill] sm:$0xff] %v15045_v24  ;;  %v12564_v44 = vld [vmem:[%s14363_s2 + $0x22c] sm:$0xf0]  ;;  %v10489_v13 = vor.u32 %v12768_v35, %v10488_v34  ;;  %v10008_v10 = vld [vmem:[%s14363_s2 + $0x4a0] sm:$0xf] }
 0x1a7   : > { %3927 = vmatpush.bf16.msrb.mxu0 %v9525_v22  ;;  %v9769_v22 = vor.u32 %v12588_v57, %v9768_v56  ;;  %v12756_v56 = vld [vmem:[%s14363_s2 + $0x82c] sm:$0xf0]  ;;  %v10824_v57 = vld [vmem:[%s14363_s2 + $0xb00] sm:$0xf]  ;;  %3897 = vmatmul.bf16.gmra.mxu2 %v14538_v3  ;;  %v9673_v62 = vor.u32 %v12564_v44, %v9672_v43 }
 0x1a8   : > { %3946 = vmatpush.bf16.msrb.mxu1 %v9909_v46  ;;  %v10153_v46 = vor.u32 %v12684_v59, %v10152_v58  ;;  %v12852_v58 = vld [vmem:[%s14363_s2 + $0xb2c] sm:$0xf0]  ;;  %v10776_v20 = vld [vmem:[%s14363_s2 + $0xaa0] sm:$0xf] }
 0x1a9   : > { %3965 = vmatpush.bf16.msrb.mxu2 %v10293_v26  ;;  %v10921_v26 = vor.u32 %v12876_v14, %v10920_v11  ;;  %v10825_v11 = vor.u32 %v12852_v58, %v10824_v57  ;;  %v9960_v35 = vld [vmem:[%s14363_s2 + $0x440] sm:$0xf]  ;;  %v12828_v43 = vld [vmem:[%s14363_s2 + $0xa6c] sm:$0xf0] }
 0x1aa   : > { %3984 = vmatpush.bf16.msrb.mxu3 %v10677_v27  ;;  %v3576_v27 = vadd.f32 %v3575_v21, %v3557_v23  ;;  %v12840_v21 = vld [vmem:[%s14363_s2 + $0xacc] sm:$0xf0]  ;;  %v10296_v58 = vld [vmem:[%s14363_s2 + $0x6e0] sm:$0xf] }
 0x1ab   : > { %3928 = vmatpush.bf16.msrb.mxu0 %v9477_v41  ;;  %v3594_v41 = vpop.f32.mrf.mxu2  ;;  %v10777_v31 = vor.u32 %v12840_v21, %v10776_v20  ;;  %v12624_v57 = vld [vmem:[%s14363_s2 + $0x40c] sm:$0xf0]  ;;  %v9864_v20 = vld [vmem:[%s14363_s2 + $0x380] sm:$0xf] }
 0x1ac   : > { %3947 = vmatpush.bf16.msrb.mxu1 %v9861_v42  ;;  %v3613_v42 = vpop.f32.mrf.mxu3  ;;  %v12612_v21 = vld [vmem:[%s14363_s2 + $0x3ac] sm:$0xf0] }
 0x1ad   : > { %3966 = vmatpush.bf16.msrb.mxu2 %v10245_v49  ;;  %v3595_v49 = vadd.f32 %v3594_v41, %v3576_v27  ;;  %v3558_v54 = vpop.f32.mrf.mxu0  ;;  %v12732_v41 = vld [vmem:[%s14363_s2 + $0x76c] sm:$0xf0] }
 0x1ae   : > { %3985 = vmatpush.bf16.msrb.mxu3 %v10629_v50  ;;  %v10056_v50 = vld [vmem:[%s14363_s2 + $0x500] sm:$0xf]  ;;  %v3577_v55 = vpop.f32.mrf.mxu1  ;;  %v3559_v59 = vadd.f32 %v3558_v54, %v14992_v19  ;;  %v10441_v19 = vor.u32 %v12756_v56, %v10440_v52  ;;  %v12528_v52 = vld [vmem:[%s14363_s2 + $0x10c] sm:$0xf0]  ;;  %v10345_v54 = vor.u32 %v12732_v41, %v10344_v37 }
 0x1af   : > { %3929 = vmatpush.bf16.msrb.mxu0 %v9429_v1  ;;  %v15068_v61 = vadd.f32 %v3613_v42, %v3595_v49  ;;  %v10057_v63 = vor.u32 %v12660_v51, %v10056_v50  ;;  %v9624_v1 = vld [vmem:[%s14363_s2 + $0x1a0] sm:$0xf]  ;;  %v9961_v49 = vor.u32 %v12636_v36, %v9960_v35  ;;  %v9865_v36 = vor.u32 %v12612_v21, %v9864_v20  ;;  %v12504_v37 = vld [vmem:[%s14363_s2 + $0x4c] sm:$0xf0]  ;;  %v12570_v21 = vld [vmem:[%s14363_s2 + $0x264] sm:$0xf] }
 0x1b0   : > { %3948 = vmatpush.bf16.msrb.mxu1 %v9813_v4  ;;  %v12552_v4 = vld [vmem:[%s14363_s2 + $0x1cc] sm:$0xf0]  ;;  %v3578_v14 = vadd.f32 %v3577_v55, %v3559_v59  ;;  %v10728_v42 = vld [vmem:[%s14363_s2 + $0xa40] sm:$0xf] }
 0x1b1   : > { %3967 = vmatpush.bf16.msrb.mxu2 %v10197_v16  ;;  %17652 = vst [vmem:[#allocation45_spill] sm:$0xff] %v15068_v61  ;;  %v10392_v16 = vld [vmem:[%s14363_s2 + $0x7a0] sm:$0xf]  ;;  %v9625_v23 = vor.u32 %v12552_v4, %v9624_v1  ;;  %v10729_v55 = vor.u32 %v12828_v43, %v10728_v42  ;;  %v12720_v59 = vld [vmem:[%s14363_s2 + $0x70c] sm:$0xf0] }
 0x1b2   : > { %3986 = vmatpush.bf16.msrb.mxu3 %v10581_v17  ;;  %v12744_v17 = vld [vmem:[%s14363_s2 + $0x7cc] sm:$0xf0]  ;;  %v9528_v51 = vld [vmem:[%s14363_s2 + $0xe0] sm:$0xf] }
 0x1b3   : > { %3998 = vmatpush.bf16.msra.mxu0 %v9769_v22  ;;  %v15079_v22 = vld [vmem:[%s14369_s10] sm:$0xff]  ;;  %v10393_v30 = vor.u32 %v12744_v17, %v10392_v16  ;;  %v9529_v1 = vor.u32 %v12528_v52, %v9528_v51  ;;  %3949 = vmatmul.bf16.vlgmr.msrb.gmra.mxu1 %v14492_v5  ;;  %v9770_v52 = vld [vmem:[%s14363_s2 + $0x2f0] sm:$0xf0] }
 0x1b4   : > { %4017 = vmatpush.bf16.msra.mxu1 %v10153_v46  ;;  %v15082_v46 = vperm.slane %v15079_v22, 3  ;;  %v3615_v27 = vpop.f32.mrf.mxu3  ;;  %v9912_v56 = vld [vmem:[%s14363_s2 + $0x3e0] sm:$0xf]  ;;  %3930 = vmatmul.bf16.vlgmr.msrb.gmra.mxu0 %v14487_v0  ;;  %v12582_v51 = vld [vmem:[%s14363_s2 + $0x2c4] sm:$0xf] }
 0x1b5   : > { %4036 = vmatpush.bf16.msra.mxu2 %v10537_v25  ;;  %v10009_v25 = vor.u32 %v12648_v15, %v10008_v10  ;;  %v9913_v4 = vor.u32 %v12624_v57, %v9912_v56  ;;  %v10297_v15 = vor.u32 %v12720_v59, %v10296_v58  ;;  %3987 = vmatmul.bf16.vlgmr.msrb.gmra.mxu3 %v14498_v9  ;;  %v12774_v56 = vld [vmem:[%s14363_s2 + $0x8c4] sm:$0xf]  ;;  %v10538_v59 = vld [vmem:[%s14363_s2 + $0x8f0] sm:$0xf0] }
 0x1b6   : > { %4055 = vmatpush.bf16.msra.mxu3 %v10921_v26  ;;  %v3596_v26 = vpop.f32.mrf.mxu2 }
 0x1b7   : > { %3999 = vmatpush.bf16.msra.mxu0 %v9721_v38  ;;  %v3597_v34 = vadd.f32 %v3596_v26, %v3578_v14  ;;  %v3627_v38 = vpop.f32.mrf.mxu0  ;;  %v12516_v14 = vld [vmem:[%s14363_s2 + $0xac] sm:$0xf0]  ;;  %3968 = vmatmul.bf16.vlgmr.msrb.gmra.mxu2 %v14494_v6 }
 0x1b8   : > { %4018 = vmatpush.bf16.msra.mxu1 %v10105_v40  ;;  %v3646_v40 = vpop.f32.mrf.mxu1  ;;  %v3628_v44 = vadd.f32 %v3627_v38, %v15082_v46  ;;  %v9816_v38 = vld [vmem:[%s14363_s2 + $0x320] sm:$0xf] }
 0x1b9   : > { %4037 = vmatpush.bf16.msra.mxu2 %v10489_v13  ;;  %v15093_v13 = vadd.f32 %v3615_v27, %v3597_v34  ;;  %v12708_v27 = vld [vmem:[%s14363_s2 + $0x6ac] sm:$0xf0]  ;;  %v9432_v34 = vld [vmem:[%s14363_s2 + $0x20] sm:$0xf] }
 0x1ba   : > { %4056 = vmatpush.bf16.msra.mxu3 %v10873_v47  ;;  %v9577_v47 = vor.u32 %v12540_v29, %v9576_v28  ;;  %v3647_v50 = vadd.f32 %v3646_v40, %v3628_v44  ;;  %v10632_v28 = vld [vmem:[%s14363_s2 + $0x980] sm:$0xf]  ;;  %v12804_v29 = vld [vmem:[%s14363_s2 + $0x9ac] sm:$0xf0]  ;;  %v9433_v57 = vor.u32 %v12504_v37, %v9432_v34  ;;  %v10874_v37 = vld [vmem:[%s14363_s2 + $0xb90] sm:$0xf0] }
 0x1bb   : > { %4000 = vmatpush.bf16.msra.mxu0 %v9673_v62  ;;  %17653 = vst [vmem:[#allocation46_spill] sm:$0xff] %v15093_v13  ;;  %v10680_v62 = vld [vmem:[%s14363_s2 + $0x9e0] sm:$0xf]  ;;  %v12600_v40 = vld [vmem:[%s14363_s2 + $0x34c] sm:$0xf0]  ;;  %v10633_v42 = vor.u32 %v12804_v29, %v10632_v28 }
 0x1bc   : > { %4019 = vmatpush.bf16.msra.mxu1 %v10057_v63  ;;  %v12816_v63 = vld [vmem:[%s14363_s2 + $0xa0c] sm:$0xf0]  ;;  %v10200_v44 = vld [vmem:[%s14363_s2 + $0x620] sm:$0xf]  ;;  %v9817_v58 = vor.u32 %v12600_v40, %v9816_v38  ;;  %v12666_v28 = vld [vmem:[%s14363_s2 + $0x564] sm:$0xf] }
 0x1bd   : > { %4038 = vmatpush.bf16.msra.mxu2 %v10441_v19  ;;  %v3684_v19 = vpop.f32.mrf.mxu3  ;;  %v10681_v16 = vor.u32 %v12816_v63, %v10680_v62  ;;  %v12870_v62 = vld [vmem:[%s14363_s2 + $0xbc4] sm:$0xf]  ;;  %v10922_v63 = vld [vmem:[%s14363_s2 + $0xbf0] sm:$0xf0] }
 0x1be   : > { %4057 = vmatpush.bf16.msra.mxu3 %v10825_v11  ;;  %v3665_v10 = vpop.f32.mrf.mxu2  ;;  %v9480_v11 = vld [vmem:[%s14363_s2 + $0x80] sm:$0xf]  ;;  %v10106_v29 = vld [vmem:[%s14363_s2 + $0x590] sm:$0xf0] }
 0x1bf   : > { %4001 = vmatpush.bf16.msra.mxu0 %v9625_v23  ;;  %v3666_v17 = vadd.f32 %v3665_v10, %v3647_v50  ;;  %v10248_v23 = vld [vmem:[%s14363_s2 + $0x680] sm:$0xf]  ;;  %v9481_v35 = vor.u32 %v12516_v14, %v9480_v11  ;;  %v12792_v50 = vld [vmem:[%s14363_s2 + $0x94c] sm:$0xf0]  ;;  %v10109_v40 = vor.u32 %v12666_v28, %v10106_v29  ;;  %v12534_v28 = vld [vmem:[%s14363_s2 + $0x144] sm:$0xf] }
 0x1c0   : > { %4020 = vmatpush.bf16.msra.mxu1 %v10009_v25  ;;  %v3629_v25 = vpop.f32.mrf.mxu0  ;;  %v3648_v26 = vpop.f32.mrf.mxu1  ;;  %v10249_v41 = vor.u32 %v12708_v27, %v10248_v23  ;;  %v9722_v23 = vld [vmem:[%s14363_s2 + $0x290] sm:$0xf0] }
 0x1c1   : > { %4039 = vmatpush.bf16.msra.mxu2 %v10393_v30  ;;  %v3630_v30 = vadd.f32 %v3629_v25, %v15082_v46  ;;  %v10541_v25 = vor.u32 %v12774_v56, %v10538_v59  ;;  %v9725_v38 = vor.u32 %v12570_v21, %v9722_v23  ;;  %v10778_v21 = vld [vmem:[%s14363_s2 + $0xad0] sm:$0xf0] }
 0x1c2   : > { %4058 = vmatpush.bf16.msra.mxu3 %v10777_v31  ;;  %v15116_v31 = vadd.f32 %v3684_v19, %v3666_v17  ;;  %v9578_v29 = vld [vmem:[%s14363_s2 + $0x170] sm:$0xf0] }
 0x1c3   : > { %4002 = vmatpush.bf16.msra.mxu0 %v9577_v47  ;;  %v3649_v43 = vadd.f32 %v3648_v26, %v3630_v30  ;;  %v12696_v47 = vld [vmem:[%s14363_s2 + $0x64c] sm:$0xf0]  ;;  %v10925_v26 = vor.u32 %v12870_v62, %v10922_v63  ;;  %v12762_v30 = vld [vmem:[%s14363_s2 + $0x864] sm:$0xf]  ;;  %3954 = vmatmul.bf16.gmra.mxu1 %v14536_v2 }
 0x1c4   : > { %4021 = vmatpush.bf16.msra.mxu1 %v9961_v49  ;;  %17654 = vst [vmem:[#allocation47_spill] sm:$0xff] %v15116_v31  ;;  %v10584_v49 = vld [vmem:[%s14363_s2 + $0x920] sm:$0xf]  ;;  %v10201_v10 = vor.u32 %v12696_v47, %v10200_v44  ;;  %v12654_v47 = vld [vmem:[%s14363_s2 + $0x504] sm:$0xf]  ;;  %3935 = vmatmul.bf16.gmra.mxu0 %v14531_v60 }
 0x1c5   : > { %4040 = vmatpush.bf16.msra.mxu2 %v10345_v54  ;;  %v12678_v54 = vld [vmem:[%s14363_s2 + $0x5c4] sm:$0xf]  ;;  %v10585_v19 = vor.u32 %v12792_v50, %v10584_v49  ;;  %v10058_v49 = vld [vmem:[%s14363_s2 + $0x530] sm:$0xf0]  ;;  %3992 = vmatmul.bf16.gmra.mxu3 %v14542_v8 }
 0x1c6   : > { %4059 = vmatpush.bf16.msra.mxu3 %v10729_v55  ;;  %v10154_v55 = vld [vmem:[%s14363_s2 + $0x5f0] sm:$0xf0]  ;;  %v12750_v50 = vld [vmem:[%s14363_s2 + $0x804] sm:$0xf]  ;;  %v10061_v63 = vor.u32 %v12654_v47, %v10058_v49  ;;  %v9581_v47 = vor.u32 %v12534_v28, %v9578_v29 }
 0x1c7   : > { %4003 = vmatpush.bf16.msra.mxu0 %v9529_v1  ;;  %v3667_v1 = vpop.f32.mrf.mxu2  ;;  %v10157_v17 = vor.u32 %v12678_v54, %v10154_v55  ;;  %v10826_v54 = vld [vmem:[%s14363_s2 + $0xb30] sm:$0xf0]  ;;  %3973 = vmatmul.bf16.gmra.mxu2 %v14538_v3  ;;  %v12498_v28 = vld [vmem:[%s14363_s2 + $0x24] sm:$0xf] }
 0x1c8   : > { %4022 = vmatpush.bf16.msra.mxu1 %v9913_v4  ;;  %v3686_v4 = vpop.f32.mrf.mxu3  ;;  %v3668_v11 = vadd.f32 %v3667_v1, %v3649_v43  ;;  %v3632_v14 = vpop.f32.mrf.mxu0 }
 0x1c9   : > { %4041 = vmatpush.bf16.msra.mxu2 %v10297_v15  ;;  %v3651_v15 = vpop.f32.mrf.mxu1  ;;  %v3633_v20 = vadd.f32 %v3632_v14, %v15082_v46 }
 0x1ca   : > { %4060 = vmatpush.bf16.msra.mxu3 %v10681_v16  ;;  %v9773_v16 = vor.u32 %v12582_v51, %v9770_v52  ;;  %v15137_v27 = vadd.f32 %v3686_v4, %v3668_v11  ;;  %v10442_v51 = vld [vmem:[%s14363_s2 + $0x830] sm:$0xf0]  ;;  %v12846_v52 = vld [vmem:[%s14363_s2 + $0xb04] sm:$0xf] }
 0x1cb   : > { %4004 = vmatpush.bf16.msra.mxu0 %v9481_v35  ;;  %v3652_v34 = vadd.f32 %v3651_v15, %v3633_v20  ;;  %v10490_v35 = vld [vmem:[%s14363_s2 + $0x890] sm:$0xf0]  ;;  %v12546_v4 = vld [vmem:[%s14363_s2 + $0x1a4] sm:$0xf]  ;;  %v10829_v11 = vor.u32 %v12846_v52, %v10826_v54 }
 0x1cc   : > { %4023 = vmatpush.bf16.msra.mxu1 %v9865_v36  ;;  %17655 = vst [vmem:[#allocation48_spill] sm:$0xff] %v15137_v27  ;;  %v12858_v36 = vld [vmem:[%s14363_s2 + $0xb64] sm:$0xf]  ;;  %v10493_v43 = vor.u32 %v12762_v30, %v10490_v35  ;;  %v10394_v20 = vld [vmem:[%s14363_s2 + $0x7d0] sm:$0xf0] }
 0x1cd   : > { %4042 = vmatpush.bf16.msra.mxu2 %v10249_v41  ;;  %v12558_v41 = vld [vmem:[%s14363_s2 + $0x204] sm:$0xf]  ;;  %v10877_v44 = vor.u32 %v12858_v36, %v10874_v37  ;;  %v9962_v36 = vld [vmem:[%s14363_s2 + $0x470] sm:$0xf0]  ;;  %v10208_v27 = vld [vmem:[%s14363_s2 + $0x628] sm:$0xf] }
 0x1ce   : > { %4061 = vmatpush.bf16.msra.mxu3 %v10633_v42  ;;  %v9674_v42 = vld [vmem:[%s14363_s2 + $0x230] sm:$0xf0]  ;;  %v12642_v15 = vld [vmem:[%s14363_s2 + $0x4a4] sm:$0xf] }
 0x1cf   : > { %4005 = vmatpush.bf16.msra.mxu0 %v9433_v57  ;;  %v3670_v55 = vpop.f32.mrf.mxu2  ;;  %v9677_v62 = vor.u32 %v12558_v41, %v9674_v42  ;;  %v12630_v35 = vld [vmem:[%s14363_s2 + $0x444] sm:$0xf]  ;;  %v10730_v41 = vld [vmem:[%s14363_s2 + $0xa70] sm:$0xf0] }
 0x1d0   : > { %4024 = vmatpush.bf16.msra.mxu1 %v9817_v58  ;;  %v3689_v56 = vpop.f32.mrf.mxu3  ;;  %v3671_v57 = vadd.f32 %v3670_v55, %v3652_v34  ;;  %v3634_v58 = vpop.f32.mrf.mxu0  ;;  %v12726_v37 = vld [vmem:[%s14363_s2 + $0x744] sm:$0xf]  ;;  %v9965_v49 = vor.u32 %v12630_v35, %v9962_v36  ;;  %v9434_v36 = vld [vmem:[%s14363_s2 + $0x50] sm:$0xf0] }
 0x1d1   : > { %4043 = vmatpush.bf16.msra.mxu2 %v10201_v10  ;;  %v3653_v59 = vpop.f32.mrf.mxu1  ;;  %v3635_v1 = vadd.f32 %v3634_v58, %v15082_v46  ;;  %v9626_v10 = vld [vmem:[%s14363_s2 + $0x1d0] sm:$0xf0]  ;;  %v12834_v46 = vld [vmem:[%s14363_s2 + $0xaa4] sm:$0xf] }
 0x1d2   : > { %4062 = vmatpush.bf16.msra.mxu3 %v10585_v19  ;;  %v10445_v19 = vor.u32 %v12750_v50, %v10442_v51  ;;  %v15156_v14 = vadd.f32 %v3689_v56, %v3671_v57  ;;  %v10781_v34 = vor.u32 %v12834_v46, %v10778_v21  ;;  %v12522_v50 = vld [vmem:[%s14363_s2 + $0xe4] sm:$0xf]  ;;  %v9530_v51 = vld [vmem:[%s14363_s2 + $0x110] sm:$0xf0] }
 0x1d3   : > { %4074 = vmatpush.bf16.msrb.mxu0 %v9773_v16  ;;  %v10010_v16 = vld [vmem:[%s14363_s2 + $0x4d0] sm:$0xf0]  ;;  %v3654_v23 = vadd.f32 %v3653_v59, %v3635_v1  ;;  %v12618_v58 = vld [vmem:[%s14363_s2 + $0x3e4] sm:$0xf]  ;;  %4025 = vmatmul.bf16.vlgmr.msra.gmra.mxu1 %v14492_v5 }
 0x1d4   : > { %4093 = vmatpush.bf16.msrb.mxu1 %v10157_v17  ;;  %17656 = vst [vmem:[#allocation49_spill] sm:$0xff] %v15156_v14  ;;  %v12738_v17 = vld [vmem:[%s14363_s2 + $0x7a4] sm:$0xf]  ;;  %v9914_v59 = vld [vmem:[%s14363_s2 + $0x410] sm:$0xf0]  ;;  %4006 = vmatmul.bf16.vlgmr.msra.gmra.mxu0 %v14487_v0 }
 0x1d5   : > { %4112 = vmatpush.bf16.msrb.mxu2 %v10541_v25  ;;  %v9629_v25 = vor.u32 %v12546_v4, %v9626_v10  ;;  %v10397_v30 = vor.u32 %v12738_v17, %v10394_v20  ;;  %v12810_v1 = vld [vmem:[%s14363_s2 + $0x9e4] sm:$0xf]  ;;  %v10682_v4 = vld [vmem:[%s14363_s2 + $0xa10] sm:$0xf0]  ;;  %v9533_v10 = vor.u32 %v12522_v50, %v9530_v51  ;;  %v9776_v51 = vld [vmem:[%s14363_s2 + $0x2c8] sm:$0xf]  ;;  %4063 = vmatmul.bf16.vlgmr.msra.gmra.mxu3 %v14498_v9 }
 0x1d6   : > { %4131 = vmatpush.bf16.msrb.mxu3 %v10925_v26  ;;  %v10013_v26 = vor.u32 %v12642_v15, %v10010_v16  ;;  %v9482_v15 = vld [vmem:[%s14363_s2 + $0xb0] sm:$0xf0]  ;;  %v10685_v17 = vor.u32 %v12810_v1, %v10682_v4  ;;  %v12606_v20 = vld [vmem:[%s14363_s2 + $0x384] sm:$0xf]  ;;  %v12781_v1 = vld [vmem:[%s14363_s2 + $0x8f4] sm:$0xf0] }
 0x1d7   : > { %4075 = vmatpush.bf16.msrb.mxu0 %v9725_v38  ;;  %v10346_v38 = vld [vmem:[%s14363_s2 + $0x770] sm:$0xf0]  ;;  %v3672_v42 = vpop.f32.mrf.mxu2  ;;  %v12702_v21 = vld [vmem:[%s14363_s2 + $0x684] sm:$0xf]  ;;  %4044 = vmatmul.bf16.vlgmr.msra.gmra.mxu2 %v14494_v6  ;;  %v10928_v4 = vld [vmem:[%s14363_s2 + $0xbc8] sm:$0xf] }
 0x1d8   : > { %4094 = vmatpush.bf16.msrb.mxu1 %v10109_v40  ;;  %v12822_v40 = vld [vmem:[%s14363_s2 + $0xa44] sm:$0xf]  ;;  %v10349_v52 = vor.u32 %v12726_v37, %v10346_v38  ;;  %v15180_v56 = vpop.f32.mrf.mxu0  ;;  %v9866_v46 = vld [vmem:[%s14363_s2 + $0x3b0] sm:$0xf0]  ;;  %v12793_v14 = vld [vmem:[%s14363_s2 + $0x954] sm:$0xf0] }
 0x1d9   : > { %4113 = vmatpush.bf16.msrb.mxu2 %v10493_v43  ;;  %v3691_v43 = vpop.f32.mrf.mxu3  ;;  %v10733_v54 = vor.u32 %v12822_v40, %v10730_v41  ;;  %v15182_v57 = vpop.f32.mrf.mxu1  ;;  %v12594_v37 = vld [vmem:[%s14363_s2 + $0x324] sm:$0xf]  ;;  %v9818_v38 = vld [vmem:[%s14363_s2 + $0x350] sm:$0xf0] }
 0x1da   : > { %4132 = vmatpush.bf16.msrb.mxu3 %v10877_v44  ;;  %v3673_v44 = vadd.f32 %v3672_v42, %v3654_v23  ;;  %v10250_v23 = vld [vmem:[%s14363_s2 + $0x6b0] sm:$0xf0] }
 0x1db   : > { %4076 = vmatpush.bf16.msrb.mxu0 %v9677_v62  ;;  %v12714_v62 = vld [vmem:[%s14363_s2 + $0x6e4] sm:$0xf]  ;;  %v10253_v40 = vor.u32 %v12702_v21, %v10250_v23  ;;  %v10586_v50 = vld [vmem:[%s14363_s2 + $0x950] sm:$0xf0]  ;;  %v10112_v23 = vld [vmem:[%s14363_s2 + $0x568] sm:$0xf] }
 0x1dc   : > { %4095 = vmatpush.bf16.msrb.mxu1 %v10061_v63  ;;  %v15178_v55 = vadd.f32 %v3691_v43, %v3673_v44  ;;  %v10298_v63 = vld [vmem:[%s14363_s2 + $0x710] sm:$0xf0]  ;;  %v12690_v44 = vld [vmem:[%s14363_s2 + $0x624] sm:$0xf] }
 0x1dd   : > { %4114 = vmatpush.bf16.msrb.mxu2 %v10445_v19  ;;  %v9917_v19 = vor.u32 %v12618_v58, %v9914_v59  ;;  %v10301_v16 = vor.u32 %v12714_v62, %v10298_v63  ;;  %v12685_v58 = vld [vmem:[%s14363_s2 + $0x5f4] sm:$0xf0]  ;;  %v10544_v59 = vld [vmem:[%s14363_s2 + $0x8c8] sm:$0xf]  ;;  %v9437_v62 = vor.u32 %v12498_v28, %v9434_v36  ;;  %v9821_v63 = vor.u32 %v12594_v37, %v9818_v38 }
 0x1de   : > { %4133 = vmatpush.bf16.msrb.mxu3 %v10829_v11  ;;  %17657 = vst [vmem:[#allocation50_spill] sm:$0xff] %v15178_v55  ;;  %v12510_v11 = vld [vmem:[%s14363_s2 + $0x84] sm:$0xf]  ;;  %v12769_v28 = vld [vmem:[%s14363_s2 + $0x894] sm:$0xf0] }
 0x1df   : > { %4077 = vmatpush.bf16.msrb.mxu0 %v9629_v25  ;;  %v12798_v25 = vld [vmem:[%s14363_s2 + $0x984] sm:$0xf]  ;;  %v9485_v29 = vor.u32 %v12510_v11, %v9482_v15 }
 0x1e0   : > { %4096 = vmatpush.bf16.msrb.mxu1 %v10013_v26  ;;  %v10634_v26 = vld [vmem:[%s14363_s2 + $0x9b0] sm:$0xf0]  ;;  %v15206_v42 = vpop.f32.mrf.mxu0 }
 0x1e1   : > { %4115 = vmatpush.bf16.msrb.mxu2 %v10397_v30  ;;  %v9869_v30 = vor.u32 %v12606_v20, %v9866_v46  ;;  %v15201_v35 = vpop.f32.mrf.mxu3  ;;  %v10637_v41 = vor.u32 %v12798_v25, %v10634_v26  ;;  %v15208_v43 = vpop.f32.mrf.mxu1  ;;  %v12577_v20 = vld [vmem:[%s14363_s2 + $0x294] sm:$0xf0]  ;;  %v10545_v46 = vor.u32 %v12781_v1, %v10544_v59  ;;  %v10496_v26 = vld [vmem:[%s14363_s2 + $0x868] sm:$0xf] }
 0x1e2   : > { %4134 = vmatpush.bf16.msrb.mxu3 %v10781_v34  ;;  %v15199_v34 = vpop.f32.mrf.mxu2  ;;  %v12673_v25 = vld [vmem:[%s14363_s2 + $0x594] sm:$0xf0] }
 0x1e3   : > { %4078 = vmatpush.bf16.msrb.mxu0 %v9581_v47  ;;  %v10202_v47 = vld [vmem:[%s14363_s2 + $0x650] sm:$0xf0]  ;;  %v12757_v59 = vld [vmem:[%s14363_s2 + $0x834] sm:$0xf0]  ;;  %4030 = vmatmul.bf16.gmra.mxu1 %v14536_v2 }
 0x1e4   : > { %4097 = vmatpush.bf16.msrb.mxu1 %v9965_v49  ;;  %v12786_v49 = vld [vmem:[%s14363_s2 + $0x924] sm:$0xf]  ;;  %4011 = vmatmul.bf16.gmra.mxu0 %v14531_v60 }
 0x1e5   : > { %4116 = vmatpush.bf16.msrb.mxu2 %v10349_v52  ;;  %v12589_v52 = vld [vmem:[%s14363_s2 + $0x2f4] sm:$0xf0]  ;;  %v10589_v11 = vor.u32 %v12786_v49, %v10586_v50  ;;  %v10497_v50 = vor.u32 %v12769_v28, %v10496_v26  ;;  %4068 = vmatmul.bf16.gmra.mxu3 %v14542_v8 }
 0x1e6   : > { %4135 = vmatpush.bf16.msrb.mxu3 %v10733_v54  ;;  %v10160_v54 = vld [vmem:[%s14363_s2 + $0x5c8] sm:$0xf]  ;;  %v9777_v15 = vor.u32 %v12589_v52, %v9776_v51  ;;  %v12565_v49 = vld [vmem:[%s14363_s2 + $0x234] sm:$0xf0] }
 0x1e7   : > { %4079 = vmatpush.bf16.msrb.mxu0 %v9533_v10  ;;  %v12877_v10 = vld [vmem:[%s14363_s2 + $0xbf4] sm:$0xf0]  ;;  %v10064_v52 = vld [vmem:[%s14363_s2 + $0x508] sm:$0xf]  ;;  %4049 = vmatmul.bf16.gmra.mxu2 %v14538_v3 }
 0x1e8   : > { %4098 = vmatpush.bf16.msrb.mxu1 %v9917_v19  ;;  %v10205_v19 = vor.u32 %v12690_v44, %v10202_v47  ;;  %v10929_v21 = vor.u32 %v12877_v10, %v10928_v4  ;;  %v15238_v38 = vpop.f32.mrf.mxu0  ;;  %v10113_v44 = vor.u32 %v12673_v25, %v10112_v23  ;;  %v9680_v47 = vld [vmem:[%s14363_s2 + $0x208] sm:$0xf]  ;;  %v12841_v23 = vld [vmem:[%s14363_s2 + $0xad4] sm:$0xf0] }
 0x1e9   : > { %4117 = vmatpush.bf16.msrb.mxu2 %v10301_v16  ;;  %v10161_v16 = vor.u32 %v12685_v58, %v10160_v54  ;;  %v15236_v37 = vpop.f32.mrf.mxu3  ;;  %v12661_v54 = vld [vmem:[%s14363_s2 + $0x534] sm:$0xf0]  ;;  %v10448_v58 = vld [vmem:[%s14363_s2 + $0x808] sm:$0xf]  ;;  %v9681_v1 = vor.u32 %v12565_v49, %v9680_v47 }
 0x1ea   : > { %4136 = vmatpush.bf16.msrb.mxu3 %v10685_v17  ;;  %v9728_v17 = vld [vmem:[%s14363_s2 + $0x268] sm:$0xf]  ;;  %v15234_v36 = vpop.f32.mrf.mxu2  ;;  %v10065_v4 = vor.u32 %v12661_v54, %v10064_v52  ;;  %v12541_v47 = vld [vmem:[%s14363_s2 + $0x174] sm:$0xf0] }
 0x1eb   : > { %4080 = vmatpush.bf16.msrb.mxu0 %v9485_v29  ;;  %v10880_v29 = vld [vmem:[%s14363_s2 + $0xb68] sm:$0xf]  ;;  %v12637_v52 = vld [vmem:[%s14363_s2 + $0x474] sm:$0xf0] }
 0x1ec   : > { %4099 = vmatpush.bf16.msrb.mxu1 %v9869_v30  ;;  %v12865_v30 = vld [vmem:[%s14363_s2 + $0xb94] sm:$0xf0]  ;;  %v9632_v10 = vld [vmem:[%s14363_s2 + $0x1a8] sm:$0xf] }
 0x1ed   : > { %4118 = vmatpush.bf16.msrb.mxu2 %v10253_v40  ;;  %v15240_v40 = vpop.f32.mrf.mxu1  ;;  %v10881_v51 = vor.u32 %v12865_v30, %v10880_v29  ;;  %v10352_v54 = vld [vmem:[%s14363_s2 + $0x748] sm:$0xf] }
 0x1ee   : > { %4137 = vmatpush.bf16.msrb.mxu3 %v10637_v41  ;;  %v9729_v41 = vor.u32 %v12577_v20, %v9728_v17  ;;  %v12649_v17 = vld [vmem:[%s14363_s2 + $0x4d4] sm:$0xf0]  ;;  %v10400_v20 = vld [vmem:[%s14363_s2 + $0x7a8] sm:$0xf] }
 0x1ef   : > { %4081 = vmatpush.bf16.msrb.mxu0 %v9437_v62  ;;  %v10832_v62 = vld [vmem:[%s14363_s2 + $0xb08] sm:$0xf] }
 0x1f0   : > { %4100 = vmatpush.bf16.msrb.mxu1 %v9821_v63  ;;  %v12853_v63 = vld [vmem:[%s14363_s2 + $0xb34] sm:$0xf0]  ;;  %v15262_v28 = vpop.f32.mrf.mxu0 }
 0x1f1   : > { %4119 = vmatpush.bf16.msrb.mxu2 %v10205_v19  ;;  %v12553_v19 = vld [vmem:[%s14363_s2 + $0x1d4] sm:$0xf0]  ;;  %v15260_v26 = vpop.f32.mrf.mxu3 }
 0x1f2   : > { %4138 = vmatpush.bf16.msrb.mxu3 %v10589_v11  ;;  %v10449_v11 = vor.u32 %v12757_v59, %v10448_v58  ;;  %v15258_v25 = vpop.f32.mrf.mxu2  ;;  %v9633_v30 = vor.u32 %v12553_v19, %v9632_v10  ;;  %v12733_v58 = vld [vmem:[%s14363_s2 + $0x774] sm:$0xf0]  ;;  %v10736_v59 = vld [vmem:[%s14363_s2 + $0xa48] sm:$0xf] }
 0x1f3   : > { %4150 = vmatpush.bf16.msra.mxu0 %v9777_v15  ;;  %v10833_v15 = vor.u32 %v12853_v63, %v10832_v62  ;;  %v12829_v62 = vld [vmem:[%s14363_s2 + $0xa74] sm:$0xf0]  ;;  %v9920_v19 = vld [vmem:[%s14363_s2 + $0x3e8] sm:$0xf]  ;;  %4101 = vmatmul.bf16.vlgmr.msrb.gmra.mxu1 %v14492_v5 }
 0x1f4   : > { %4169 = vmatpush.bf16.msra.mxu1 %v10161_v16  ;;  %v10016_v16 = vld [vmem:[%s14363_s2 + $0x4a8] sm:$0xf]  ;;  %v12529_v10 = vld [vmem:[%s14363_s2 + $0x114] sm:$0xf0]  ;;  %4082 = vmatmul.bf16.vlgmr.msrb.gmra.mxu0 %v14487_v0 }
 0x1f5   : > { %4188 = vmatpush.bf16.msra.mxu2 %v10545_v46  ;;  %v12745_v46 = vld [vmem:[%s14363_s2 + $0x7d4] sm:$0xf0]  ;;  %v15264_v29 = vpop.f32.mrf.mxu1  ;;  %4139 = vmatmul.bf16.vlgmr.msrb.gmra.mxu3 %v14498_v9 }
 0x1f6   : > { %4207 = vmatpush.bf16.msra.mxu3 %v10929_v21  ;;  %v10784_v21 = vld [vmem:[%s14363_s2 + $0xaa8] sm:$0xf]  ;;  %v10401_v49 = vor.u32 %v12745_v46, %v10400_v20  ;;  %v12721_v20 = vld [vmem:[%s14363_s2 + $0x714] sm:$0xf0] }
 0x1f7   : > { %4151 = vmatpush.bf16.msra.mxu0 %v9729_v41  ;;  %v10017_v41 = vor.u32 %v12649_v17, %v10016_v16  ;;  %v12625_v16 = vld [vmem:[%s14363_s2 + $0x414] sm:$0xf0]  ;;  %v10304_v17 = vld [vmem:[%s14363_s2 + $0x6e8] sm:$0xf]  ;;  %4120 = vmatmul.bf16.vlgmr.msrb.gmra.mxu2 %v14494_v6 }
 0x1f8   : > { %4170 = vmatpush.bf16.msra.mxu1 %v10113_v44  ;;  %v9584_v44 = vld [vmem:[%s14363_s2 + $0x148] sm:$0xf] }
 0x1f9   : > { %4189 = vmatpush.bf16.msra.mxu2 %v10497_v50  ;;  %v10785_v50 = vor.u32 %v12841_v23, %v10784_v21  ;;  %v9585_v63 = vor.u32 %v12541_v47, %v9584_v44  ;;  %v10688_v46 = vld [vmem:[%s14363_s2 + $0x9e8] sm:$0xf]  ;;  %v12817_v21 = vld [vmem:[%s14363_s2 + $0xa14] sm:$0xf0]  ;;  %v9921_v47 = vor.u32 %v12625_v16, %v9920_v19 }
 0x1fa   : > { %4208 = vmatpush.bf16.msra.mxu3 %v10881_v51  ;;  %v9968_v51 = vld [vmem:[%s14363_s2 + $0x448] sm:$0xf]  ;;  %v15286_v23 = vpop.f32.mrf.mxu2  ;;  %v12805_v19 = vld [vmem:[%s14363_s2 + $0x9b4] sm:$0xf0] }
 0x1fb   : > { %4152 = vmatpush.bf16.msra.mxu0 %v9681_v1  ;;  %v9969_v1 = vor.u32 %v12637_v52, %v9968_v51  ;;  %v10305_v51 = vor.u32 %v12721_v20, %v10304_v17  ;;  %v10689_v52 = vor.u32 %v12817_v21, %v10688_v46  ;;  %v12505_v20 = vld [vmem:[%s14363_s2 + $0x54] sm:$0xf0]  ;;  %v9824_v46 = vld [vmem:[%s14363_s2 + $0x328] sm:$0xf] }
 0x1fc   : > { %4171 = vmatpush.bf16.msra.mxu1 %v10065_v4  ;;  %v9536_v4 = vld [vmem:[%s14363_s2 + $0xe8] sm:$0xf]  ;;  %v12601_v21 = vld [vmem:[%s14363_s2 + $0x354] sm:$0xf0] }
 0x1fd   : > { %4190 = vmatpush.bf16.msra.mxu2 %v10449_v11  ;;  %v10353_v11 = vor.u32 %v12733_v58, %v10352_v54  ;;  %v9537_v44 = vor.u32 %v12529_v10, %v9536_v4  ;;  %v3779_v54 = vpop.f32.mrf.mxu0  ;;  %v3798_v58 = vpop.f32.mrf.mxu1  ;;  %v12709_v4 = vld [vmem:[%s14363_s2 + $0x6b4] sm:$0xf0]  ;;  %v10640_v10 = vld [vmem:[%s14363_s2 + $0x988] sm:$0xf]  ;;  %v9825_v31 = vor.u32 %v12601_v21, %v9824_v46  ;;  %v12667_v21 = vld [vmem:[%s14363_s2 + $0x56c] sm:$0xf] }
 0x1fe   : > { %4209 = vmatpush.bf16.msra.mxu3 %v10833_v15  ;;  %v10737_v15 = vor.u32 %v12829_v62, %v10736_v59  ;;  %v9872_v59 = vld [vmem:[%s14363_s2 + $0x388] sm:$0xf]  ;;  %v12613_v62 = vld [vmem:[%s14363_s2 + $0x3b4] sm:$0xf0]  ;;  %v10641_v55 = vor.u32 %v12805_v19, %v10640_v10  ;;  %v10930_v10 = vld [vmem:[%s14363_s2 + $0xbf8] sm:$0xf0] }
 0x1ff   : > { %4153 = vmatpush.bf16.msra.mxu0 %v9633_v30  ;;  %v15288_v30 = vpop.f32.mrf.mxu3  ;;  %v9873_v17 = vor.u32 %v12613_v62, %v9872_v59  ;;  %v12775_v59 = vld [vmem:[%s14363_s2 + $0x8cc] sm:$0xf] }
 0x200   : > { %4172 = vmatpush.bf16.msra.mxu1 %v10017_v41  ;;  %v15291_v41 = vperm.slane %v15079_v22, 5 }
 0x201   : > { %4191 = vmatpush.bf16.msra.mxu2 %v10401_v49  ;;  %v9488_v49 = vld [vmem:[%s14363_s2 + $0x88] sm:$0xf] }
 0x202   : > { %4210 = vmatpush.bf16.msra.mxu3 %v10785_v50  ;;  %v12517_v50 = vld [vmem:[%s14363_s2 + $0xb4] sm:$0xf0] }
 0x203   : > { %4154 = vmatpush.bf16.msra.mxu0 %v9585_v63  ;;  %v10256_v63 = vld [vmem:[%s14363_s2 + $0x688] sm:$0xf]  ;;  %v9489_v16 = vor.u32 %v12517_v50, %v9488_v49  ;;  %v12679_v49 = vld [vmem:[%s14363_s2 + $0x5cc] sm:$0xf]  ;;  %v10162_v50 = vld [vmem:[%s14363_s2 + $0x5f8] sm:$0xf0]  ;;  %4106 = vmatmul.bf16.gmra.mxu1 %v14536_v2 }
 0x204   : > { %4173 = vmatpush.bf16.msra.mxu1 %v9969_v1  ;;  %v3780_v1 = vadd.f32 %v3779_v54, %v15291_v41  ;;  %v10257_v54 = vor.u32 %v12709_v4, %v10256_v63  ;;  %v10546_v63 = vld [vmem:[%s14363_s2 + $0x8f8] sm:$0xf0]  ;;  %v12871_v4 = vld [vmem:[%s14363_s2 + $0xbcc] sm:$0xf]  ;;  %4087 = vmatmul.bf16.gmra.mxu0 %v14531_v60 }
 0x205   : > { %4192 = vmatpush.bf16.msra.mxu2 %v10353_v11  ;;  %v9440_v11 = vld [vmem:[%s14363_s2 + $0x28] sm:$0xf]  ;;  %v3781_v61 = vpop.f32.mrf.mxu0  ;;  %v10933_v46 = vor.u32 %v12871_v4, %v10930_v10  ;;  %v10450_v10 = vld [vmem:[%s14363_s2 + $0x838] sm:$0xf0]  ;;  %4144 = vmatmul.bf16.gmra.mxu3 %v14542_v8 }
 0x206   : > { %4211 = vmatpush.bf16.msra.mxu3 %v10737_v15  ;;  %v3799_v15 = vadd.f32 %v3798_v58, %v3780_v1  ;;  %v12583_v58 = vld [vmem:[%s14363_s2 + $0x2cc] sm:$0xf]  ;;  %v9778_v1 = vld [vmem:[%s14363_s2 + $0x2f8] sm:$0xf0]  ;;  %v9441_v62 = vor.u32 %v12505_v20, %v9440_v11  ;;  %v3782_v20 = vadd.f32 %v3781_v61, %v15291_v41 }
 0x207   : > { %4155 = vmatpush.bf16.msra.mxu0 %v9537_v44  ;;  %v12697_v44 = vld [vmem:[%s14363_s2 + $0x654] sm:$0xf0]  ;;  %v9781_v11 = vor.u32 %v12583_v58, %v9778_v1  ;;  %v12859_v61 = vld [vmem:[%s14363_s2 + $0xb6c] sm:$0xf]  ;;  %v10882_v58 = vld [vmem:[%s14363_s2 + $0xb98] sm:$0xf0]  ;;  %4125 = vmatmul.bf16.gmra.mxu2 %v14538_v3 }
 0x208   : > { %4174 = vmatpush.bf16.msra.mxu1 %v9921_v47  ;;  %v10592_v47 = vld [vmem:[%s14363_s2 + $0x928] sm:$0xf]  ;;  %v10209_v19 = vor.u32 %v12697_v44, %v10208_v27  ;;  %v9730_v27 = vld [vmem:[%s14363_s2 + $0x298] sm:$0xf0]  ;;  %v12763_v44 = vld [vmem:[%s14363_s2 + $0x86c] sm:$0xf] }
 0x209   : > { %4193 = vmatpush.bf16.msra.mxu2 %v10305_v51  ;;  %v3817_v51 = vpop.f32.mrf.mxu2  ;;  %v10593_v24 = vor.u32 %v12793_v14, %v10592_v47  ;;  %v10498_v47 = vld [vmem:[%s14363_s2 + $0x898] sm:$0xf0] }
 0x20a   : > { %4212 = vmatpush.bf16.msra.mxu3 %v10689_v52  ;;  %v3836_v52 = vpop.f32.mrf.mxu3  ;;  %v3818_v13 = vadd.f32 %v3817_v51, %v3799_v15  ;;  %v10549_v15 = vor.u32 %v12775_v59, %v10546_v63  ;;  %v9682_v59 = vld [vmem:[%s14363_s2 + $0x238] sm:$0xf0]  ;;  %v12655_v51 = vld [vmem:[%s14363_s2 + $0x50c] sm:$0xf] }
 0x20b   : > { %4156 = vmatpush.bf16.msra.mxu0 %v9489_v16  ;;  %v3800_v16 = vpop.f32.mrf.mxu1  ;;  %v12751_v63 = vld [vmem:[%s14363_s2 + $0x80c] sm:$0xf] }
 0x20c   : > { %4175 = vmatpush.bf16.msra.mxu1 %v9873_v17  ;;  %v10165_v17 = vor.u32 %v12679_v49, %v10162_v50  ;;  %v15325_v14 = vadd.f32 %v3836_v52, %v3818_v13  ;;  %v3801_v1 = vadd.f32 %v3800_v16, %v3782_v20  ;;  %v12559_v50 = vld [vmem:[%s14363_s2 + $0x20c] sm:$0xf]  ;;  %v10066_v52 = vld [vmem:[%s14363_s2 + $0x538] sm:$0xf0] }
 0x20d   : > { %4194 = vmatpush.bf16.msra.mxu2 %v10257_v54  ;;  %v10114_v54 = vld [vmem:[%s14363_s2 + $0x598] sm:$0xf0]  ;;  %v10069_v20 = vor.u32 %v12655_v51, %v10066_v52  ;;  %v12535_v52 = vld [vmem:[%s14363_s2 + $0x14c] sm:$0xf] }
 0x20e   : > { %4213 = vmatpush.bf16.msra.mxu3 %v10641_v55  ;;  %v12571_v55 = vld [vmem:[%s14363_s2 + $0x26c] sm:$0xf]  ;;  %v10117_v49 = vor.u32 %v12667_v21, %v10114_v54  ;;  %v10834_v16 = vld [vmem:[%s14363_s2 + $0xb38] sm:$0xf0]  ;;  %v3784_v54 = vpop.f32.mrf.mxu0 }
 0x20f   : > { %4157 = vmatpush.bf16.msra.mxu0 %v9441_v62  ;;  %v9733_v13 = vor.u32 %v12571_v55, %v9730_v27  ;;  %v10885_v62 = vor.u32 %v12859_v61, %v10882_v58  ;;  %v12547_v55 = vld [vmem:[%s14363_s2 + $0x1ac] sm:$0xf]  ;;  %v9634_v27 = vld [vmem:[%s14363_s2 + $0x1d8] sm:$0xf0] }
 0x210   : > { %4176 = vmatpush.bf16.msra.mxu1 %v9825_v31  ;;  %v10501_v31 = vor.u32 %v12763_v44, %v10498_v47  ;;  %v12643_v47 = vld [vmem:[%s14363_s2 + $0x4ac] sm:$0xf]  ;;  %v10018_v61 = vld [vmem:[%s14363_s2 + $0x4d8] sm:$0xf0] }
 0x211   : > { %4195 = vmatpush.bf16.msra.mxu2 %v10209_v19  ;;  %v12847_v19 = vld [vmem:[%s14363_s2 + $0xb0c] sm:$0xf]  ;;  %v10021_v51 = vor.u32 %v12643_v47, %v10018_v61 }
 0x212   : > { %4214 = vmatpush.bf16.msra.mxu3 %v10593_v24  ;;  %v3819_v24 = vpop.f32.mrf.mxu2  ;;  %v3838_v4 = vpop.f32.mrf.mxu3  ;;  %v10837_v21 = vor.u32 %v12847_v19, %v10834_v16  ;;  %v12739_v58 = vld [vmem:[%s14363_s2 + $0x7ac] sm:$0xf]  ;;  %v9970_v19 = vld [vmem:[%s14363_s2 + $0x478] sm:$0xf0] }
 0x213   : > { %4226 = vmatpush.bf16.msrb.mxu0 %v9781_v11  ;;  %v3820_v11 = vadd.f32 %v3819_v24, %v3801_v1  ;;  %v3803_v44 = vpop.f32.mrf.mxu1  ;;  %v3785_v1 = vadd.f32 %v3784_v54, %v15291_v41  ;;  %v12727_v16 = vld [vmem:[%s14363_s2 + $0x74c] sm:$0xf]  ;;  %v10738_v54 = vld [vmem:[%s14363_s2 + $0xa78] sm:$0xf0]  ;;  %4177 = vmatmul.bf16.vlgmr.msra.gmra.mxu1 %v14492_v5 }
 0x214   : > { %4245 = vmatpush.bf16.msrb.mxu1 %v10165_v17  ;;  %v9685_v17 = vor.u32 %v12559_v50, %v9682_v59  ;;  %v10786_v50 = vld [vmem:[%s14363_s2 + $0xad8] sm:$0xf0]  ;;  %v1450_v59 = vperm.slane %v15079_v22, 4  ;;  %v12823_v22 = vld [vmem:[%s14363_s2 + $0xa4c] sm:$0xf]  ;;  %4158 = vmatmul.bf16.vlgmr.msra.gmra.mxu0 %v14487_v0 }
 0x215   : > { %4264 = vmatpush.bf16.msrb.mxu2 %v10549_v15  ;;  %v15343_v15 = vadd.f32 %v3838_v4, %v3820_v11  ;;  %v10354_v11 = vld [vmem:[%s14363_s2 + $0x778] sm:$0xf0]  ;;  %v10741_v61 = vor.u32 %v12823_v22, %v10738_v54  ;;  %v12703_v54 = vld [vmem:[%s14363_s2 + $0x68c] sm:$0xf]  ;;  %4215 = vmatmul.bf16.vlgmr.msra.gmra.mxu3 %v14498_v9 }
 0x216   : > { %4283 = vmatpush.bf16.msrb.mxu3 %v10933_v46  ;;  %v10453_v46 = vor.u32 %v12751_v63, %v10450_v10  ;;  %v9586_v63 = vld [vmem:[%s14363_s2 + $0x178] sm:$0xf0]  ;;  %v12631_v10 = vld [vmem:[%s14363_s2 + $0x44c] sm:$0xf]  ;;  %v10357_v47 = vor.u32 %v12727_v16, %v10354_v11 }
 0x217   : > { %4227 = vmatpush.bf16.msrb.mxu0 %v9733_v13  ;;  %v10402_v13 = vld [vmem:[%s14363_s2 + $0x7d8] sm:$0xf0]  ;;  %4196 = vmatmul.bf16.vlgmr.msra.gmra.mxu2 %v14494_v6 }
 0x218   : > { %4246 = vmatpush.bf16.msrb.mxu1 %v10117_v49  ;;  %v12835_v49 = vld [vmem:[%s14363_s2 + $0xaac] sm:$0xf]  ;;  %v10405_v24 = vor.u32 %v12739_v58, %v10402_v13  ;;  %v3786_v58 = vpop.f32.mrf.mxu0  ;;  %v9490_v16 = vld [vmem:[%s14363_s2 + $0xb8] sm:$0xf0] }
 0x219   : > { %4265 = vmatpush.bf16.msrb.mxu2 %v10501_v31  ;;  %v3804_v31 = vadd.f32 %v3803_v44, %v3785_v1  ;;  %v10789_v4 = vor.u32 %v12835_v49, %v10786_v50  ;;  %v12619_v13 = vld [vmem:[%s14363_s2 + $0x3ec] sm:$0xf]  ;;  %v9922_v49 = vld [vmem:[%s14363_s2 + $0x418] sm:$0xf0] }
 0x21a   : > { %4284 = vmatpush.bf16.msrb.mxu3 %v10885_v62  ;;  %v9637_v62 = vor.u32 %v12547_v55, %v9634_v27  ;;  %v9589_v55 = vor.u32 %v12535_v52, %v9586_v63  ;;  %v9973_v27 = vor.u32 %v12631_v10, %v9970_v19  ;;  %v12715_v50 = vld [vmem:[%s14363_s2 + $0x6ec] sm:$0xf]  ;;  %v3787_v52 = vadd.f32 %v3786_v58, %v15291_v41  ;;  %v9874_v22 = vld [vmem:[%s14363_s2 + $0x3b8] sm:$0xf0] }
 0x21b   : > { %4228 = vmatpush.bf16.msrb.mxu0 %v9685_v17  ;;  %v3822_v17 = vpop.f32.mrf.mxu2  ;;  %v3805_v1 = vpop.f32.mrf.mxu1  ;;  %v12811_v63 = vld [vmem:[%s14363_s2 + $0x9ec] sm:$0xf]  ;;  %v3711_v10 = vadd.f32 %v15262_v28, %v1450_v59  ;;  %v9925_v19 = vor.u32 %v12619_v13, %v9922_v49  ;;  %v9442_v49 = vld [vmem:[%s14363_s2 + $0x58] sm:$0xf0] }
 0x21c   : > { %4247 = vmatpush.bf16.msrb.mxu1 %v10069_v20  ;;  %v3841_v20 = vpop.f32.mrf.mxu3  ;;  %v3823_v44 = vadd.f32 %v3822_v17, %v3804_v31  ;;  %v10306_v31 = vld [vmem:[%s14363_s2 + $0x718] sm:$0xf0]  ;;  %v12607_v28 = vld [vmem:[%s14363_s2 + $0x38c] sm:$0xf] }
 0x21d   : > { %4266 = vmatpush.bf16.msrb.mxu2 %v10453_v46  ;;  %v12523_v46 = vld [vmem:[%s14363_s2 + $0xec] sm:$0xf]  ;;  %v10258_v17 = vld [vmem:[%s14363_s2 + $0x6b8] sm:$0xf0] }
 0x21e   : > { %4285 = vmatpush.bf16.msrb.mxu3 %v10837_v21  ;;  %v9538_v21 = vld [vmem:[%s14363_s2 + $0x118] sm:$0xf0]  ;;  %v12499_v13 = vld [vmem:[%s14363_s2 + $0x2c] sm:$0xf] }
 0x21f   : > { %4229 = vmatpush.bf16.msrb.mxu0 %v9637_v62  ;;  %v3704_v62 = vadd.f32 %v15180_v56, %v1450_v59  ;;  %v15378_v56 = vadd.f32 %v3841_v20, %v3823_v44  ;;  %v9541_v41 = vor.u32 %v12523_v46, %v9538_v21  ;;  %v10642_v46 = vld [vmem:[%s14363_s2 + $0x9b8] sm:$0xf0]  ;;  %v15391_v21 = vld [vmem:[%s14369_s10] sm:$0xff] }
 0x220   : > { %4248 = vmatpush.bf16.msrb.mxu1 %v10021_v51  ;;  %v3706_v51 = vadd.f32 %v15206_v42, %v1450_v59  ;;  %v3806_v42 = vadd.f32 %v3805_v1, %v3787_v52  ;;  %v15394_v44 = vperm.slane %v15391_v21, 6  ;;  %v12595_v52 = vld [vmem:[%s14363_s2 + $0x32c] sm:$0xf] }
 0x221   : > { %4267 = vmatpush.bf16.msrb.mxu2 %v10405_v24  ;;  %v10690_v24 = vld [vmem:[%s14363_s2 + $0xa18] sm:$0xf0]  ;;  %v3723_v20 = vadd.f32 %v15182_v57, %v3704_v62 }
 0x222   : > { %4286 = vmatpush.bf16.msrb.mxu3 %v10789_v4  ;;  %v3709_v4 = vadd.f32 %v15238_v38, %v1450_v59  ;;  %v12511_v38 = vld [vmem:[%s14363_s2 + $0x8c] sm:$0xf]  ;;  %v10309_v59 = vor.u32 %v12715_v50, %v10306_v31  ;;  %v10693_v11 = vor.u32 %v12811_v63, %v10690_v24  ;;  %v9826_v31 = vld [vmem:[%s14363_s2 + $0x358] sm:$0xf0] }
 0x223   : > { %4230 = vmatpush.bf16.msrb.mxu0 %v9589_v55  ;;  %v3725_v55 = vadd.f32 %v15208_v43, %v3706_v51  ;;  %v3824_v58 = vpop.f32.mrf.mxu2  ;;  %v9493_v1 = vor.u32 %v12511_v38, %v9490_v16  ;;  %v9877_v43 = vor.u32 %v12607_v28, %v9874_v22  ;;  %v3874_v51 = vpop.f32.mrf.mxu1  ;;  %v12691_v63 = vld [vmem:[%s14363_s2 + $0x62c] sm:$0xf]  ;;  %v3742_v24 = vadd.f32 %v15199_v34, %v3723_v20  ;;  %v10594_v38 = vld [vmem:[%s14363_s2 + $0x958] sm:$0xf0] }
 0x224   : > { %4249 = vmatpush.bf16.msrb.mxu1 %v9973_v27  ;;  %v12799_v27 = vld [vmem:[%s14363_s2 + $0x98c] sm:$0xf]  ;;  %v3843_v57 = vpop.f32.mrf.mxu3  ;;  %v3825_v50 = vadd.f32 %v3824_v58, %v3806_v42  ;;  %v9829_v22 = vor.u32 %v12595_v52, %v9826_v31  ;;  %4163 = vmatmul.bf16.gmra.mxu0 %v14531_v60 }
 0x225   : > { %4268 = vmatpush.bf16.msrb.mxu2 %v10357_v47  ;;  %v3728_v47 = vadd.f32 %v15240_v40, %v3709_v4  ;;  %v10261_v40 = vor.u32 %v12703_v54, %v10258_v17  ;;  %v10645_v62 = vor.u32 %v12799_v27, %v10642_v46  ;;  %v3744_v4 = vadd.f32 %v15234_v36, %v3725_v55 }
 0x226   : > { %4287 = vmatpush.bf16.msrb.mxu3 %v10741_v61  ;;  %v3730_v61 = vadd.f32 %v15264_v29, %v3711_v10  ;;  %v3855_v29 = vpop.f32.mrf.mxu0  ;;  %v15411_v28 = vadd.f32 %v3843_v57, %v3825_v50  ;;  %v3761_v54 = vadd.f32 %v15201_v35, %v3742_v24  ;;  %4182 = vmatmul.bf16.gmra.mxu1 %v14536_v2 }
 0x227   : > { %4231 = vmatpush.bf16.msrb.mxu0 %v9541_v41  ;;  %v3856_v10 = vadd.f32 %v3855_v29, %v15394_v44  ;;  %v10210_v41 = vld [vmem:[%s14363_s2 + $0x658] sm:$0xf0]  ;;  %v3747_v16 = vadd.f32 %v15258_v25, %v3728_v47  ;;  %v3763_v17 = vadd.f32 %v15236_v37, %v3744_v4  ;;  %4201 = vmatmul.bf16.gmra.mxu2 %v14538_v3 }
 0x228   : > { %4250 = vmatpush.bf16.msrb.mxu1 %v9925_v19  ;;  %v12787_v19 = vld [vmem:[%s14363_s2 + $0x92c] sm:$0xf]  ;;  %v3749_v42 = vadd.f32 %v15286_v23, %v3730_v61  ;;  %v10213_v34 = vor.u32 %v12691_v63, %v10210_v41  ;;  %v4322_v61 = vpack.c.bf16 %v3761_v54, %v3761_v54  ;;  %4220 = vmatmul.bf16.gmra.mxu3 %v14542_v8 }
 0x229   : > { %4269 = vmatpush.bf16.msrb.mxu2 %v10309_v59  ;;  %v3875_v59 = vadd.f32 %v3874_v51, %v3856_v10  ;;  %v10597_v36 = vor.u32 %v12787_v19, %v10594_v38  ;;  %v3766_v20 = vadd.f32 %v15260_v26, %v3747_v16  ;;  %v4323_v58 = vpack.c.bf16 %v3763_v17, %v3763_v17 }
 0x22a   : > { %4288 = vmatpush.bf16.msrb.mxu3 %v10693_v11  ;;  %v9445_v11 = vor.u32 %v12499_v13, %v9442_v49  ;;  %v3768_v25 = vadd.f32 %v15288_v30, %v3749_v42  ;;  %v15438_v10 = vperm.slane %v15391_v21, 7 }
 0x22b   : > { %4232 = vmatpush.bf16.msrb.mxu0 %v9493_v1  ;;  %v3893_v23 = vpop.f32.mrf.mxu2  ;;  %v3876_v47 = vpop.f32.mrf.mxu1  ;;  %v4324_v37 = vpack.c.bf16 %v3766_v20, %v3766_v20 }
 0x22c   : > { %4251 = vmatpush.bf16.msrb.mxu1 %v9877_v43  ;;  %v3912_v55 = vpop.f32.mrf.mxu3  ;;  %v3894_v27 = vadd.f32 %v3893_v23, %v3875_v59  ;;  %v4325_v26 = vpack.c.bf16 %v3768_v25, %v3768_v25 }
 0x22d   : > { %4270 = vmatpush.bf16.msrb.mxu2 %v10261_v40 }
 0x22e   : > { %4289 = vmatpush.bf16.msrb.mxu3 %v10645_v62  ;;  %v3857_v46 = vpop.f32.mrf.mxu0  ;;  %v15422_v30 = vadd.f32 %v3912_v55, %v3894_v27 }
 0x22f   : > { %4233 = vmatpush.bf16.msrb.mxu0 %v9445_v11  ;;  %v3858_v35 = vadd.f32 %v3857_v46, %v15394_v44 }
 0x230   : > { %4252 = vmatpush.bf16.msrb.mxu1 %v9829_v22 }
 0x231   : > { %4271 = vmatpush.bf16.msrb.mxu2 %v10213_v34  ;;  %v3877_v57 = vadd.f32 %v3876_v47, %v3858_v35 }
 0x232   : > { %4290 = vmatpush.bf16.msrb.mxu3 %v10597_v36 }
 0x233   : > { %4337 = vmatpush.bf16.xpose.msra.mxu0 %v4322_v61  ;;  %v3895_v1 = vpop.f32.mrf.mxu2  ;;  %v3879_v50 = vpop.f32.mrf.mxu1  ;;  %v15471_v61 = vld [vmem:[%s14369_s10 + $0x8] sm:$0xf] }
 0x234   : > { %4350 = vmatpush.bf16.xpose.msra.mxu1 %v4323_v58  ;;  %v3914_v43 = vpop.f32.mrf.mxu3  ;;  %v3896_v13 = vadd.f32 %v3895_v1, %v3877_v57  ;;  %4234 = vmatmul.bf16.vlgmr.msrb.gmra.mxu0 %v14487_v0  ;;  %v1454_v58 = vperm.slane %v15471_v61, 0  ;;  %v4310_v57 = vmul.f32 0.088388346, %v14886_v33  ;;  %v4314_v1 = vmul.f32 0.088388346, %v14907_v7 }
 0x235   : > { %4363 = vmatpush.bf16.xpose.msra.mxu2 %v4324_v37  ;;  %v4512_v7 = vpack.c.bf16 %v15325_v14, %v15325_v14 }
 0x236   : > { %4376 = vmatpush.bf16.xpose.msra.mxu3 %v4325_v26  ;;  %v3860_v49 = vpop.f32.mrf.mxu0  ;;  %v15425_v62 = vadd.f32 %v3914_v43, %v3896_v13  ;;  %4253 = vmatmul.bf16.vlgmr.msrb.gmra.mxu1 %v14492_v5 }
 0x237   : > { %v3861_v40 = vadd.f32 %v3860_v49, %v15394_v44  ;;  %4272 = vmatmul.bf16.vlgmr.msrb.gmra.mxu2 %v14494_v6 }
 0x238   : > { %4291 = vmatmul.bf16.vlgmr.msrb.gmra.mxu3 %v14498_v9 }
 0x239   : > { %v3880_v29 = vadd.f32 %v3879_v50, %v3861_v40  ;;  %v4320_v50 = vpack.c.bf16 %v4310_v57, %v4310_v57  ;;  %v4321_v40 = vpack.c.bf16 %v4314_v1, %v4314_v1 }
 0x23b   : > { %v3898_v51 = vpop.f32.mrf.mxu2  ;;  %v15429_v24 = vpop.f32.mrf.mxu1 }
 0x23c   : > { %v3917_v52 = vpop.f32.mrf.mxu3  ;;  %v3899_v31 = vadd.f32 %v3898_v51, %v3880_v29 }
 0x23e   : > { %v15427_v63 = vpop.f32.mrf.mxu0  ;;  %v15435_v4 = vadd.f32 %v3917_v52, %v3899_v31 }
 0x243   : > { %v15440_v41 = vpop.f32.mrf.mxu2  ;;  %v3950_v16 = vpop.f32.mrf.mxu1 }
 0x244   : > { %v15442_v19 = vpop.f32.mrf.mxu3  ;;  %4239 = vmatmul.bf16.gmra.mxu0 %v14531_v60 }
 0x246   : > { %v3931_v38 = vpop.f32.mrf.mxu0  ;;  %4258 = vmatmul.bf16.gmra.mxu1 %v14536_v2 }
 0x247   : > { %v3932_v42 = vadd.f32 %v3931_v38, %v15438_v10  ;;  %4277 = vmatmul.bf16.gmra.mxu2 %v14538_v3  ;;  %v4302_v3 = vmul.f32 0.088388346, %v14838_v12 }
 0x248   : > { %4296 = vmatmul.bf16.gmra.mxu3 %v14542_v8  ;;  %v4306_v8 = vmul.f32 0.088388346, %v14859_v48 }
 0x249   : > { %v3951_v59 = vadd.f32 %v3950_v16, %v3932_v42  ;;  %v4318_v13 = vpack.c.bf16 %v4302_v3, %v4302_v3 }
 0x24a   : > { %v4319_v49 = vpack.c.bf16 %v4306_v8, %v4306_v8 }
 0x24b   : > { %v3969_v11 = vpop.f32.mrf.mxu2  ;;  %v15447_v54 = vpop.f32.mrf.mxu1 }
 0x24c   : > { %v3988_v22 = vpop.f32.mrf.mxu3  ;;  %v3970_v34 = vadd.f32 %v3969_v11, %v3951_v59 }
 0x24e   : > { %v15445_v36 = vpop.f32.mrf.mxu0  ;;  %v15453_v21 = vadd.f32 %v3988_v22, %v3970_v34 }
 0x253   : > { %v15455_v17 = vpop.f32.mrf.mxu2  ;;  %v3955_v23 = vpop.f32.mrf.mxu1 }
 0x254   : > { %v15457_v20 = vpop.f32.mrf.mxu3  ;;  %4338 = vmatmul.bf16.vlgmr.msra.gmra.mxu0 %v4318_v13  ;;  %v15489_v13 = vperm.slane %v15471_v61, 1 }
 0x255   : > { %17658 = vst [vmem:[#allocation51_spill] sm:$0xff] %v15457_v20 }
 0x256   : > { %v3936_v25 = vpop.f32.mrf.mxu0  ;;  %4351 = vmatmul.bf16.vlgmr.msra.gmra.mxu1 %v4319_v49 }
 0x257   : > { %v3937_v55 = vadd.f32 %v3936_v25, %v15438_v10  ;;  %4364 = vmatmul.bf16.vlgmr.msra.gmra.mxu2 %v4320_v50 }
 0x258   : > { %4377 = vmatmul.bf16.vlgmr.msra.gmra.mxu3 %v4321_v40 }
 0x259   : > { %v3956_v27 = vadd.f32 %v3955_v23, %v3937_v55 }
 0x25b   : > { %v3974_v0 = vpop.f32.mrf.mxu2  ;;  %v15466_v46 = vpop.f32.mrf.mxu1 }
 0x25c   : > { %v3993_v5 = vpop.f32.mrf.mxu3  ;;  %v3975_v6 = vadd.f32 %v3974_v0, %v3956_v27  ;;  %v4513_v0 = vpack.c.bf16 %v15343_v15, %v15343_v15  ;;  %v4514_v15 = vpack.c.bf16 %v15378_v56, %v15378_v56 }
 0x25e   : > { %v15464_v9 = vpop.f32.mrf.mxu0  ;;  %v15468_v47 = vadd.f32 %v3993_v5, %v3975_v6 }
 0x263   : > { %v15474_v60 = vpop.f32.mrf.mxu2  ;;  %v4026_v37 = vpop.f32.mrf.mxu1 }
 0x264   : > { %v15476_v2 = vpop.f32.mrf.mxu3 }
 0x265   : > { %17659 = vst [vmem:[#allocation52_spill] sm:$0xff] %v15476_v2 }
 0x266   : > { %v4007_v35 = vpop.f32.mrf.mxu0 }
 0x267   : > { %v4008_v26 = vadd.f32 %v4007_v35, %v1454_v58 }
 0x269   : > { %v4027_v43 = vadd.f32 %v4026_v37, %v4008_v26 }
 0x26b   : > { %v4045_v29 = vpop.f32.mrf.mxu2  ;;  %v4028_v31 = vpop.f32.mrf.mxu1 }
 0x26c   : > { %v4064_v51 = vpop.f32.mrf.mxu3  ;;  %v4046_v52 = vadd.f32 %v4045_v29, %v4027_v43 }
 0x26e   : > { %v4009_v12 = vpop.f32.mrf.mxu0  ;;  %v4065_v38 = vadd.f32 %v4064_v51, %v4046_v52 }
 0x26f   : > { %v4010_v48 = vadd.f32 %v4009_v12, %v1454_v58 }
 0x270   : > { %v4326_v33 = vpack.c.bf16 %v4065_v38, %v4065_v38  ;;  %v4515_v38 = vpack.c.bf16 %v15411_v28, %v15411_v28 }
 0x271   : > { %v4029_v16 = vadd.f32 %v4028_v31, %v4010_v48 }
 0x272   : > { %v4436_v42 = vsel %vm4434_vm0, %v4326_v33, 0 }
 0x273   : > { %v4047_v59 = vpop.f32.mrf.mxu2  ;;  %4445 = vmatpush.bf16.msrb.mxu0 %v4436_v42  ;;  %v4031_v23 = vpop.f32.mrf.mxu1 }
 0x274   : > { %v4066_v11 = vpop.f32.mrf.mxu3  ;;  %v4048_v22 = vadd.f32 %v4047_v59, %v4029_v16 }
 0x276   : > { %v4067_v34 = vadd.f32 %v4066_v11, %v4048_v22  ;;  %v4012_v25 = vpop.f32.mrf.mxu0 }
 0x277   : > { %4527 = vmatpush.bf16.xpose.msra.mxu0 %v4512_v7  ;;  %v4013_v55 = vadd.f32 %v4012_v25, %v1454_v58 }
 0x278   : > { %v4327_v27 = vpack.c.bf16 %v4067_v34, %v4067_v34 }
 0x279   : > { %v4032_v5 = vadd.f32 %v4031_v23, %v4013_v55 }
 0x27a   : > { %v4455_v6 = vsel %vm4434_vm0, %v4327_v27, 0 }
 0x27b   : > { %4464 = vmatpush.bf16.msrb.mxu1 %v4455_v6  ;;  %v4050_v14 = vpop.f32.mrf.mxu2  ;;  %v4033_v8 = vpop.f32.mrf.mxu1 }
 0x27c   : > { %v4069_v35 = vpop.f32.mrf.mxu3  ;;  %v4051_v37 = vadd.f32 %v4050_v14, %v4032_v5 }
 0x27e   : > { %v4014_v3 = vpop.f32.mrf.mxu0  ;;  %v4070_v57 = vadd.f32 %v4069_v35, %v4051_v37  ;;  %v15516_v37 = vperm.slane %v15471_v61, 2 }
 0x27f   : > { %4540 = vmatpush.bf16.xpose.msra.mxu1 %v4513_v0  ;;  %v4015_v26 = vadd.f32 %v4014_v3, %v1454_v58 }
 0x280   : > { %v4328_v1 = vpack.c.bf16 %v4070_v57, %v4070_v57 }
 0x281   : > { %v4034_v43 = vadd.f32 %v4033_v8, %v4015_v26 }
 0x282   : > { %v4474_v49 = vsel %vm4434_vm0, %v4328_v1, 0 }
 0x283   : > { %v4052_v50 = vpop.f32.mrf.mxu2  ;;  %4483 = vmatpush.bf16.msrb.mxu2 %v4474_v49  ;;  %v4102_v52 = vpop.f32.mrf.mxu1 }
 0x284   : > { %v4071_v40 = vpop.f32.mrf.mxu3  ;;  %v4053_v29 = vadd.f32 %v4052_v50, %v4034_v43 }
 0x286   : > { %v4083_v51 = vpop.f32.mrf.mxu0  ;;  %v4072_v12 = vadd.f32 %v4071_v40, %v4053_v29 }
 0x287   : > { %4553 = vmatpush.bf16.xpose.msra.mxu2 %v4514_v15  ;;  %v4084_v58 = vadd.f32 %v4083_v51, %v15489_v13 }
 0x288   : > { %v4329_v48 = vpack.c.bf16 %v4072_v12, %v4072_v12 }
 0x289   : > { %v4103_v31 = vadd.f32 %v4102_v52, %v4084_v58 }
 0x28a   : > { %v4493_v33 = vsel %vm4434_vm0, %v4329_v48, 0 }
 0x28b   : > { %v4121_v56 = vpop.f32.mrf.mxu2  ;;  %4502 = vmatpush.bf16.msrb.mxu3 %v4493_v33  ;;  %v15500_v59 = vpop.f32.mrf.mxu1 }
 0x28c   : > { %v4140_v16 = vpop.f32.mrf.mxu3  ;;  %v4122_v7 = vadd.f32 %v4121_v56, %v4103_v31 }
 0x28e   : > { %v15498_v42 = vpop.f32.mrf.mxu0  ;;  %v15502_v11 = vadd.f32 %v4140_v16, %v4122_v7 }
 0x28f   : > { %4566 = vmatpush.bf16.xpose.msra.mxu3 %v4515_v38 }
 0x293   : > { %v15504_v22 = vpop.f32.mrf.mxu2  ;;  %v4107_v23 = vpop.f32.mrf.mxu1 }
 0x294   : > { %v15506_v34 = vpop.f32.mrf.mxu3 }
 0x296   : > { %v4088_v25 = vpop.f32.mrf.mxu0 }
 0x297   : > { %v4089_v28 = vadd.f32 %v4088_v25, %v15489_v13 }
 0x299   : > { %v4108_v55 = vadd.f32 %v4107_v23, %v4089_v28  ;;  %v15541_v28 = vperm.slane %v15471_v61, 3 }
 0x29b   : > { %v4126_v27 = vpop.f32.mrf.mxu2  ;;  %v15511_v14 = vpop.f32.mrf.mxu1  ;;  %17660 = vst [vmem:[#allocation53_spill] sm:$0xff] %v15541_v28 }
 0x29c   : > { %v4145_v0 = vpop.f32.mrf.mxu3  ;;  %v4127_v5 = vadd.f32 %v4126_v27, %v4108_v55 }
 0x29e   : > { %v15509_v6 = vpop.f32.mrf.mxu0  ;;  %v15513_v35 = vadd.f32 %v4145_v0, %v4127_v5 }
 0x2a3   : > { %v15518_v3 = vpop.f32.mrf.mxu2  ;;  %v4178_v57 = vpop.f32.mrf.mxu1 }
 0x2a4   : > { %v15520_v8 = vpop.f32.mrf.mxu3 }
 0x2a6   : > { %v4159_v26 = vpop.f32.mrf.mxu0 }
 0x2a7   : > { %v4160_v1 = vadd.f32 %v4159_v26, %v15516_v37 }
 0x2a9   : > { %v4179_v43 = vadd.f32 %v4178_v57, %v4160_v1 }
 0x2ab   : > { %v4197_v15 = vpop.f32.mrf.mxu2  ;;  %v15525_v29 = vpop.f32.mrf.mxu1 }
 0x2ac   : > { %v4216_v49 = vpop.f32.mrf.mxu3  ;;  %v4198_v50 = vadd.f32 %v4197_v15, %v4179_v43 }
 0x2ae   : > { %v15523_v40 = vpop.f32.mrf.mxu0  ;;  %v15527_v51 = vadd.f32 %v4216_v49, %v4198_v50 }
 0x2b3   : > { %v15529_v52 = vpop.f32.mrf.mxu2  ;;  %v4183_v31 = vpop.f32.mrf.mxu1 }
 0x2b4   : > { %v15531_v58 = vpop.f32.mrf.mxu3 }
 0x2b6   : > { %v4164_v12 = vpop.f32.mrf.mxu0 }
 0x2b7   : > { %v4165_v48 = vadd.f32 %v4164_v12, %v15516_v37 }
 0x2b9   : > { %v4184_v38 = vadd.f32 %v4183_v31, %v4165_v48 }
 0x2bb   : > { %v4202_v33 = vpop.f32.mrf.mxu2  ;;  %v15536_v25 = vpop.f32.mrf.mxu1 }
 0x2bc   : > { %v4221_v56 = vpop.f32.mrf.mxu3  ;;  %v4203_v16 = vadd.f32 %v4202_v33, %v4184_v38 }
 0x2be   : > { %v15534_v7 = vpop.f32.mrf.mxu0  ;;  %v15538_v23 = vadd.f32 %v4221_v56, %v4203_v16 }
 0x2c3   : > { %v15543_v55 = vpop.f32.mrf.mxu2  ;;  %v4254_v5 = vpop.f32.mrf.mxu1 }
 0x2c4   : > { %v15545_v27 = vpop.f32.mrf.mxu3 }
 0x2c6   : > { %v4235_v0 = vpop.f32.mrf.mxu0 }
 0x2c7   : > { %v4236_v26 = vadd.f32 %v4235_v0, %v15541_v28 }
 0x2c9   : > { %v4255_v57 = vadd.f32 %v4254_v5, %v4236_v26 }
 0x2cb   : > { %v4273_v1 = vpop.f32.mrf.mxu2  ;;  %v15550_v50 = vpop.f32.mrf.mxu1 }
 0x2cc   : > { %v4292_v43 = vpop.f32.mrf.mxu3  ;;  %v4274_v15 = vadd.f32 %v4273_v1, %v4255_v57  ;;  %17662 = vst [vmem:[#allocation55_spill] sm:$0xff] %v15550_v50 }
 0x2ce   : > { %v15548_v49 = vpop.f32.mrf.mxu0  ;;  %v15552_v12 = vadd.f32 %v4292_v43, %v4274_v15 }
 0x2cf   : > { %17661 = vst [vmem:[#allocation54_spill] sm:$0xff] %v15548_v49 }
 0x2d0   : > { %17663 = vst [vmem:[#allocation56_spill] sm:$0xff] %v15552_v12 }
 0x2d3   : > { %v15554_v61 = vpop.f32.mrf.mxu2  ;;  %v4259_v38 = vpop.f32.mrf.mxu1 }
 0x2d4   : > { %17664 = vst [vmem:[#allocation57_spill] sm:$0xff] %v15554_v61  ;;  %v15556_v31 = vpop.f32.mrf.mxu3 }
 0x2d5   : > { %17665 = vst [vmem:[#allocation58_spill] sm:$0xff] %v15556_v31 }
 0x2d6   : > { %v4240_v48 = vpop.f32.mrf.mxu0 }
 0x2d7   : > { %v4241_v33 = vadd.f32 %v4240_v48, %v15541_v28 }
 0x2d9   : > { %v4260_v56 = vadd.f32 %v4259_v38, %v4241_v33 }
 0x2db   : > { %v4278_v16 = vpop.f32.mrf.mxu2  ;;  %v15561_v57 = vpop.f32.mrf.mxu1 }
 0x2dc   : > { %v4297_v0 = vpop.f32.mrf.mxu3  ;;  %v4279_v5 = vadd.f32 %v4278_v16, %v4260_v56  ;;  %17667 = vst [vmem:[#allocation60_spill] sm:$0xff] %v15561_v57 }
 0x2de   : > { %v15559_v26 = vpop.f32.mrf.mxu0  ;;  %v15563_v1 = vadd.f32 %v4297_v0, %v4279_v5 }
 0x2df   : > { %17666 = vst [vmem:[#allocation59_spill] sm:$0xff] %v15559_v26 }
 0x2e0   : > { %17668 = vst [vmem:[#allocation61_spill] sm:$0xff] %v15563_v1 }
 0x2e3   : > { %v15565_v43 = vpop.f32.mrf.mxu2  ;;  %v4352_v61 = vpop.f32.mrf.mxu1 }
 0x2e4   : > { %17669 = vst [vmem:[#allocation62_spill] sm:$0xff] %v15565_v43  ;;  %v15567_v15 = vpop.f32.mrf.mxu3  ;;  %v4386_v0 = vsel %vm4382_vm1, %v4352_v61, -inf }
 0x2e5   : > { %17670 = vst [vmem:[#allocation63_spill] sm:$0xff] %v15567_v15 }
 0x2e6   : > { %v4339_v31 = vpop.f32.mrf.mxu0 }
 0x2e7   : > { %v4383_v50 = vsel %vm4382_vm1, %v4339_v31, -inf }
 0x2e8   : > { %4384 = vmax.xlane.f32.xlu1 %v4383_v50 }
 0x2eb   : > { %v4365_v48 = vpop.f32.mrf.mxu2  ;;  %v4354_v16 = vpop.f32.mrf.mxu1 }
 0x2ec   : > { %v4378_v38 = vpop.f32.mrf.mxu3  ;;  %v4389_v33 = vsel %vm4382_vm1, %v4365_v48, -inf }
 0x2ed   : > { %4390 = vmax.xlane.f32.xlu0 %v4389_v33  ;;  %v4392_v43 = vsel %vm4382_vm1, %v4378_v38, -inf }
 0x2ee   : > { %v4341_v56 = vpop.f32.mrf.mxu0 }
 0x2f0   : > { %4387 = vmax.xlane.f32.xlu1 %v4386_v0 }
 0x2f3   : > { %v4367_v5 = vpop.f32.mrf.mxu2 }
 0x2f4   : > { %v4380_v1 = vpop.f32.mrf.mxu3 }
 0x2f5   : > { %4393 = vmax.xlane.f32.xlu0 %v4392_v43 }
 0x35b   : > { %v4385_v15 = vpop.xlane.xlu1 %4384 }
 0x35c   : > { %v4395_v57 = vsub.f32 %v4339_v31, %v4385_v15  ;;  %v4091_v15 = vadd.f32 %v15509_v6, %v15489_v13 }
 0x35e   : > { %v4399_v26 = vmul.f32 1.442695, %v4395_v57 }
 0x360   : > { %13387 = vpow2.f32 %v4399_v26  ;;  %v4391_v50 = vpop.xlane.xlu0 %4390 }
 0x361   : > { %v4397_v49 = vsub.f32 %v4365_v48, %v4391_v50 }
 0x363   : > { %v4388_v28 = vpop.xlane.xlu1 %4387  ;;  %v4403_v20 = vmul.f32 1.442695, %v4397_v49 }
 0x364   : > { %v4396_v12 = vsub.f32 %v4352_v61, %v4388_v28 }
 0x365   : > { %13389 = vpow2.f32 %v4403_v20  ;;  %v4086_v20 = vadd.f32 %v15498_v42, %v15489_v13  ;;  %v4110_v42 = vadd.f32 %v15511_v14, %v4091_v15  ;;  %v3863_v15 = vadd.f32 %v15427_v63, %v15394_v44 }
 0x366   : > { %v13388_v56 = vpop.eup %13387  ;;  %v4401_v16 = vmul.f32 1.442695, %v4396_v12  ;;  %v4702_v44 = vpack.c.bf16 %v15435_v4, %v15435_v4  ;;  %v4701_v63 = vpack.c.bf16 %v15425_v62, %v15425_v62 }
 0x367   : > { %v4407_v33 = vsel %vm4382_vm1, %v13388_v56, 0.0  ;;  %v4105_v61 = vadd.f32 %v15500_v59, %v4086_v20 }
 0x368   : > { %13391 = vpow2.f32 %v4401_v16  ;;  %4408 = vadd.xlane.f32.xlu0 %v4407_v33  ;;  %v4394_v1 = vpop.xlane.xlu0 %4393 }
 0x369   : > { %v4398_v0 = vsub.f32 %v4378_v38, %v4394_v1  ;;  %v4516_v38 = vpack.c.bf16 %v15502_v11, %v15502_v11  ;;  %v4124_v50 = vadd.f32 %v15504_v22, %v4105_v61  ;;  %v4518_v11 = vpack.c.bf16 %v15513_v35, %v15513_v35 }
 0x36a   : > { %v4129_v22 = vadd.f32 %v15518_v3, %v4110_v42 }
 0x36b   : > { %v13390_v5 = vpop.eup %13389  ;;  %v4405_v43 = vmul.f32 1.442695, %v4398_v0  ;;  %v4624_v0 = vsel %vm4434_vm0, %v4516_v38, 0  ;;  %v4143_v59 = vadd.f32 %v15506_v34, %v4124_v50  ;;  %v4662_v20 = vsel %vm4434_vm0, %v4518_v11, 0 }
 0x36c   : > { %v4413_v31 = vsel %vm4382_vm1, %v13390_v5, 0.0  ;;  %v4148_v34 = vadd.f32 %v15520_v8, %v4129_v22  ;;  %v4700_v8 = vpack.c.bf16 %v15422_v30, %v15422_v30  ;;  %v4311_v38 = vmul.f32 0.088388346, %v14976_v18 }
 0x36d   : > { %13393 = vpow2.f32 %v4405_v43  ;;  %4414 = vadd.xlane.f32.xlu2 %v4413_v31  ;;  %v4517_v31 = vpack.c.bf16 %v4143_v59, %v4143_v59  ;;  %v4315_v18 = vmul.f32 0.088388346, %v14999_v53 }
 0x36e   : > { %v13392_v2 = vpop.eup %13391  ;;  %v4510_v50 = vpack.c.bf16 %v4311_v38, %v4311_v38 }
 0x36f   : > { %v4410_v26 = vsel %vm4382_vm1, %v13392_v2, 0.0  ;;  %v4643_v35 = vsel %vm4434_vm0, %v4517_v31, 0 }
 0x370   : > { %4411 = vadd.xlane.f32.xlu1 %v4410_v26 }
 0x373   : > { %v13394_v28 = vpop.eup %13393 }
 0x374   : > { %v4416_v49 = vsel %vm4382_vm1, %v13394_v28, 0.0 }
 0x375   : > { %4417 = vadd.xlane.f32.xlu2 %v4416_v49 }
 0x3db   : > { %v4409_v12 = vpop.xlane.xlu0 %4408 }
 0x3dc   : > { %13395 = vrcp.f32 %v4409_v12  ;;  %v4519_v12 = vpack.c.bf16 %v4148_v34, %v4148_v34 }
 0x3e0   : > { %v4415_v48 = vpop.xlane.xlu2 %4414 }
 0x3e1   : > { %13397 = vrcp.f32 %v4415_v48  ;;  %v4681_v48 = vsel %vm4434_vm0, %v4519_v12, 0 }
 0x3e2   : > { %v13396_v57 = vpop.eup %13395 }
 0x3e3   : > { %v4423_v16 = vmul.f32 %v13396_v57, %v13388_v56  ;;  %v4412_v33 = vpop.xlane.xlu1 %4411 }
 0x3e4   : > { %13399 = vrcp.f32 %v4412_v33  ;;  %v4511_v33 = vpack.c.bf16 %v4315_v18, %v4315_v18 }
 0x3e5   : > { %v4427_v1 = vpack.c.bf16 %v4423_v16, %v4423_v16 }
 0x3e7   : > { %10934 = vmatmul.msk.bf16.vlgmr.msrb.gmra.mxu0 %vm4382_vm1, %v4427_v1  ;;  %v13398_v13 = vpop.eup %13397 }
 0x3e8   : > { %4633 = vmatpush.bf16.msrb.mxu0 %v4624_v0  ;;  %v4425_v56 = vmul.f32 %v13398_v13, %v13390_v5  ;;  %v4418_v43 = vpop.xlane.xlu2 %4417  ;;  %v4303_v5 = vmul.f32 0.088388346, %v14931_v45  ;;  %v4307_v45 = vmul.f32 0.088388346, %v14955_v32 }
 0x3e9   : > { %13401 = vrcp.f32 %v4418_v43 }
 0x3ea   : > { %v13400_v6 = vpop.eup %13399  ;;  %v4429_v14 = vpack.c.bf16 %v4425_v56, %v4425_v56  ;;  %v4508_v57 = vpack.c.bf16 %v4303_v5, %v4303_v5  ;;  %v4509_v16 = vpack.c.bf16 %v4307_v45, %v4307_v45 }
 0x3eb   : > { %v4424_v26 = vmul.f32 %v13400_v6, %v13392_v2 }
 0x3ec   : > { %10936 = vmatmul.msk.bf16.vlgmr.msrb.gmra.mxu2 %vm4382_vm1, %v4429_v14 }
 0x3ed   : > { %v4428_v49 = vpack.c.bf16 %v4424_v26, %v4424_v26  ;;  %4671 = vmatpush.bf16.msrb.mxu2 %v4662_v20 }
 0x3ef   : > { %10935 = vmatmul.msk.bf16.vlgmr.msrb.gmra.mxu1 %vm4382_vm1, %v4428_v49  ;;  %v13402_v3 = vpop.eup %13401 }
 0x3f0   : > { %4652 = vmatpush.bf16.msrb.mxu1 %v4643_v35  ;;  %v4426_v2 = vmul.f32 %v13402_v3, %v13394_v28  ;;  %v3882_v28 = vadd.f32 %v15429_v24, %v3863_v15 }
 0x3f2   : > { %v4430_v61 = vpack.c.bf16 %v4426_v2, %v4426_v2  ;;  %v3901_v30 = vadd.f32 %v15440_v41, %v3882_v28 }
 0x3f4   : > { %10937 = vmatmul.msk.bf16.vlgmr.msrb.gmra.mxu3 %vm4382_vm1, %v4430_v61  ;;  %v3920_v32 = vadd.f32 %v15442_v19, %v3901_v30 }
 0x3f5   : > { %4690 = vmatpush.bf16.msrb.mxu3 %v4681_v48 }
 0x3f6   : > { %v4703_v24 = vpack.c.bf16 %v3920_v32, %v3920_v32 }
 0x3f7   : > { %4528 = vmatmul.bf16.vlgmr.msra.gmra.mxu0 %v4508_v57 }
 0x3f8   : > { %4715 = vmatpush.bf16.xpose.msra.mxu0 %v4700_v8 }
 0x3fc   : > { %4554 = vmatmul.bf16.vlgmr.msra.gmra.mxu2 %v4510_v50 }
 0x3fd   : > { %4741 = vmatpush.bf16.xpose.msra.mxu2 %v4702_v44 }
 0x3ff   : > { %4541 = vmatmul.bf16.vlgmr.msra.gmra.mxu1 %v4509_v16 }
 0x400   : > { %4728 = vmatpush.bf16.xpose.msra.mxu1 %v4701_v63 }
 0x404   : > { %4567 = vmatmul.bf16.vlgmr.msra.gmra.mxu3 %v4511_v33 }
 0x405   : > { %4754 = vmatpush.bf16.xpose.msra.mxu3 %v4703_v24 }
 0x464   : > { %v4447_v1 = vpop.f32.mrf.mxu0 }
 0x46c   : > { %v4449_v42 = vpop.f32.mrf.mxu0  ;;  %v4466_v4 = vpop.f32.mrf.mxu1 }
 0x46d   : > { %v15614_v0 = vpack.c.bf16 %v4466_v4, %v4447_v1  ;;  %v4704_v42 = vpack.c.bf16 %v15527_v51, %v15527_v51 }
 0x46f   : > { %v4485_v41 = vpop.f32.mrf.mxu2 }
 0x474   : > { %v4468_v59 = vpop.f32.mrf.mxu1  ;;  %v4529_v62 = vpop.f32.mrf.mxu0 }
 0x475   : > { %v4572_v13 = vsel %vm4382_vm1, %v4529_v62, -inf  ;;  %v4812_v59 = vsel %vm4434_vm0, %v4704_v42, 0 }
 0x476   : > { %4573 = vmax.xlane.f32.xlu1 %v4572_v13 }
 0x477   : > { %v4487_v6 = vpop.f32.mrf.mxu2  ;;  %v4504_v53 = vpop.f32.mrf.mxu3 }
 0x478   : > { %v15617_v11 = vpack.c.bf16 %v4504_v53, %v4485_v41  ;;  %v4162_v6 = vadd.f32 %v15523_v40, %v15516_v37 }
 0x47c   : > { %v4531_v19 = vpop.f32.mrf.mxu0  ;;  %v4542_v22 = vpop.f32.mrf.mxu1 }
 0x47d   : > { %v4575_v34 = vsel %vm4382_vm1, %v4542_v22, -inf  ;;  %v4181_v19 = vadd.f32 %v15525_v29, %v4162_v6 }
 0x47f   : > { %v4506_v56 = vpop.f32.mrf.mxu3  ;;  %v4555_v43 = vpop.f32.mrf.mxu2 }
 0x480   : > { %v4578_v31 = vsel %vm4382_vm1, %v4555_v43, -inf }
 0x481   : > { %4579 = vmax.xlane.f32.xlu2 %v4578_v31 }
 0x484   : > { %v4544_v26 = vpop.f32.mrf.mxu1 }
 0x485   : > { %v4200_v26 = vadd.f32 %v15529_v52, %v4181_v19 }
 0x487   : > { %v4557_v14 = vpop.f32.mrf.mxu2  ;;  %v4568_v49 = vpop.f32.mrf.mxu3 }
 0x488   : > { %v4581_v20 = vsel %vm4382_vm1, %v4568_v49, -inf }
 0x489   : > { %4582 = vmax.xlane.f32.xlu0 %v4581_v20  ;;  %4576 = vmax.xlane.f32.xlu2 %v4575_v34 }
 0x48f   : > { %v4570_v35 = vpop.f32.mrf.mxu3 }
 0x4e9   : > { %v4574_v3 = vpop.xlane.xlu1 %4573 }
 0x4ea   : > { %v4584_v5 = vsub.f32 %v4529_v62, %v4574_v3  ;;  %v4167_v62 = vadd.f32 %v15534_v7, %v15516_v37  ;;  %v4304_v7 = vmul.f32 0.088388346, %v15026_v39 }
 0x4ec   : > { %v4588_v12 = vmul.f32 1.442695, %v4584_v5  ;;  %v4186_v53 = vadd.f32 %v15536_v25, %v4167_v62  ;;  %v4696_v25 = vpack.c.bf16 %v4304_v7, %v4304_v7 }
 0x4ee   : > { %13403 = vpow2.f32 %v4588_v12  ;;  %v4205_v56 = vadd.f32 %v15543_v55, %v4186_v53  ;;  %v4888_v55 = vpack.c.bf16 %v15453_v21, %v15453_v21 }
 0x4f0   : > { %v4224_v29 = vadd.f32 %v15545_v27, %v4205_v56  ;;  %v3939_v27 = vadd.f32 %v15464_v9, %v15438_v10 }
 0x4f4   : > { %v13404_v2 = vpop.eup %13403  ;;  %v4580_v57 = vpop.xlane.xlu2 %4579 }
 0x4f5   : > { %v4596_v61 = vsel %vm4382_vm1, %v13404_v2, 0.0  ;;  %v4586_v15 = vsub.f32 %v4555_v43, %v4580_v57  ;;  %v3958_v57 = vadd.f32 %v15466_v46, %v3939_v27 }
 0x4f6   : > { %4597 = vadd.xlane.f32.xlu2 %v4596_v61 }
 0x4f7   : > { %v4592_v8 = vmul.f32 1.442695, %v4586_v15 }
 0x4f9   : > { %13405 = vpow2.f32 %v4592_v8 }
 0x4fc   : > { %v4583_v48 = vpop.xlane.xlu0 %4582  ;;  %v4577_v38 = vpop.xlane.xlu2 %4576 }
 0x4fd   : > { %v4587_v45 = vsub.f32 %v4568_v49, %v4583_v48  ;;  %v4585_v28 = vsub.f32 %v4542_v22, %v4577_v38  ;;  %v4706_v22 = vpack.c.bf16 %v15538_v23, %v15538_v23  ;;  %v4219_v23 = vadd.f32 %v15531_v58, %v4200_v26  ;;  %v17672_v48 = vld [vmem:[#allocation46_spill] sm:$0xff] }
 0x4fe   : > { %v4707_v49 = vpack.c.bf16 %v4224_v29, %v4224_v29  ;;  %v3934_v58 = vadd.f32 %v15445_v36, %v15438_v10  ;;  %v4890_v10 = vpack.c.bf16 %v15468_v47, %v15468_v47  ;;  %v3977_v36 = vadd.f32 %v15474_v60, %v3958_v57  ;;  %v17676_v57 = vld [vmem:[#allocation56_spill] sm:$0xff] }
 0x4ff   : > { %v13406_v50 = vpop.eup %13405  ;;  %v4594_v16 = vmul.f32 1.442695, %v4587_v45  ;;  %v4590_v44 = vmul.f32 1.442695, %v4585_v28  ;;  %v4850_v40 = vsel %vm4434_vm0, %v4706_v22, 0  ;;  %v4705_v34 = vpack.c.bf16 %v4219_v23, %v4219_v23  ;;  %v17673_v45 = vld [vmem:[#allocation44_spill] sm:$0xff] }
 0x500   : > { %v4602_v30 = vsel %vm4382_vm1, %v13406_v50, 0.0  ;;  %v4869_v21 = vsel %vm4434_vm0, %v4707_v49, 0  ;;  %v3953_v9 = vadd.f32 %v15447_v54, %v3934_v58  ;;  %v4316_v38 = vmul.f32 0.088388346, %v17672_v48  ;;  %v17678_v48 = vld [vmem:[#allocation54_spill] sm:$0xff] }
 0x501   : > { %13407 = vpow2.f32 %v4594_v16  ;;  %4603 = vadd.xlane.f32.xlu0 %v4602_v30  ;;  %v4831_v12 = vsel %vm4434_vm0, %v4705_v34, 0  ;;  %v4308_v28 = vmul.f32 0.088388346, %v17673_v45  ;;  %v17679_v45 = vld [vmem:[#allocation55_spill] sm:$0xff] }
 0x502   : > { %13409 = vpow2.f32 %v4590_v44  ;;  %v3972_v8 = vadd.f32 %v15455_v17, %v3953_v9  ;;  %v17675_v44 = vld [vmem:[#allocation51_spill] sm:$0xff]  ;;  %v4699_v30 = vpack.c.bf16 %v4316_v38, %v4316_v38  ;;  %v4892_v9 = vpack.c.bf16 %v17676_v57, %v17676_v57 }
 0x503   : > { %v4697_v54 = vpack.c.bf16 %v4308_v28, %v4308_v28 }
 0x504   : > { %v3991_v46 = vadd.f32 %v17675_v44, %v3972_v8  ;;  %v17677_v8 = vld [vmem:[#allocation53_spill] sm:$0xff] }
 0x505   : > { %v4238_v38 = vadd.f32 %v17678_v48, %v17677_v8 }
 0x507   : > { %v13408_v63 = vpop.eup %13407  ;;  %v4257_v28 = vadd.f32 %v17679_v45, %v4238_v38 }
 0x508   : > { %v13410_v18 = vpop.eup %13409  ;;  %v4605_v32 = vsel %vm4382_vm1, %v13408_v63, 0.0 }
 0x509   : > { %v4599_v33 = vsel %vm4382_vm1, %v13410_v18, 0.0  ;;  %4606 = vadd.xlane.f32.xlu1 %v4605_v32 }
 0x50a   : > { %4600 = vadd.xlane.f32.xlu0 %v4599_v33 }
 0x569   : > { %v4598_v24 = vpop.xlane.xlu2 %4597 }
 0x56a   : > { %13411 = vrcp.f32 %v4598_v24 }
 0x570   : > { %v13412_v1 = vpop.eup %13411 }
 0x571   : > { %v4612_v4 = vmul.f32 %v13412_v1, %v13404_v2  ;;  %v17671_v2 = vld [vmem:[#allocation45_spill] sm:$0xff] }
 0x572   : > { %v4312_v61 = vmul.f32 0.088388346, %v17671_v2 }
 0x573   : > { %v4616_v41 = vpack.c.bf16 %v4612_v4, %v4612_v4 }
 0x574   : > { %v4604_v13 = vpop.xlane.xlu0 %4603  ;;  %v4698_v15 = vpack.c.bf16 %v4312_v61, %v4312_v61 }
 0x575   : > { %10938 = vmatmul.msk.bf16.vlgmr.msrb.gmra.mxu0 %vm4382_vm1, %v4616_v41  ;;  %13413 = vrcp.f32 %v4604_v13 }
 0x576   : > { %4821 = vmatpush.bf16.msrb.mxu0 %v4812_v59 }
 0x57b   : > { %v13414_v51 = vpop.eup %13413 }
 0x57c   : > { %v4614_v43 = vmul.f32 %v13414_v51, %v13406_v50  ;;  %v4607_v31 = vpop.xlane.xlu1 %4606  ;;  %v17674_v50 = vld [vmem:[#allocation52_spill] sm:$0xff] }
 0x57d   : > { %v4601_v14 = vpop.xlane.xlu0 %4600  ;;  %13415 = vrcp.f32 %v4607_v31  ;;  %v3996_v16 = vadd.f32 %v17674_v50, %v3977_v36  ;;  %v5000_v36 = vsel %vm4434_vm0, %v4892_v9, 0  ;;  %v17680_v50 = vld [vmem:[#allocation59_spill] sm:$0xff] }
 0x57e   : > { %v4618_v37 = vpack.c.bf16 %v4614_v43, %v4614_v43  ;;  %13417 = vrcp.f32 %v4601_v14 }
 0x580   : > { %10940 = vmatmul.msk.bf16.vlgmr.msrb.gmra.mxu2 %vm4382_vm1, %v4618_v37 }
 0x581   : > { %4859 = vmatpush.bf16.msrb.mxu2 %v4850_v40 }
 0x583   : > { %v13416_v39 = vpop.eup %13415 }
 0x584   : > { %v13418_v52 = vpop.eup %13417  ;;  %v4615_v20 = vmul.f32 %v13416_v39, %v13408_v63  ;;  %v4891_v63 = vpack.c.bf16 %v3996_v16, %v3996_v16  ;;  %v4243_v16 = vadd.f32 %v17680_v50, %v17677_v8 }
 0x585   : > { %4716 = vmatmul.bf16.vlgmr.msra.gmra.mxu0 %v4696_v25  ;;  %v4613_v35 = vmul.f32 %v13418_v52, %v13410_v18  ;;  %v4889_v18 = vpack.c.bf16 %v3991_v46, %v3991_v46  ;;  %v17681_v46 = vld [vmem:[#allocation47_spill] sm:$0xff] }
 0x586   : > { %4903 = vmatpush.bf16.xpose.msra.mxu0 %v4888_v55  ;;  %v4619_v3 = vpack.c.bf16 %v4615_v20, %v4615_v20 }
 0x587   : > { %v4617_v5 = vpack.c.bf16 %v4613_v35, %v4613_v35 }
 0x588   : > { %10941 = vmatmul.msk.bf16.vlgmr.msrb.gmra.mxu3 %vm4382_vm1, %v4619_v3 }
 0x589   : > { %10939 = vmatmul.msk.bf16.vlgmr.msrb.gmra.mxu1 %vm4382_vm1, %v4617_v5  ;;  %4878 = vmatpush.bf16.msrb.mxu3 %v4869_v21 }
 0x58a   : > { %4840 = vmatpush.bf16.msrb.mxu1 %v4831_v12 }
 0x590   : > { %4742 = vmatmul.bf16.vlgmr.msra.gmra.mxu2 %v4698_v15 }
 0x591   : > { %4929 = vmatpush.bf16.xpose.msra.mxu2 %v4890_v10 }
 0x598   : > { %4755 = vmatmul.bf16.vlgmr.msra.gmra.mxu3 %v4699_v30  ;;  %v4305_v30 = vmul.f32 0.088388346, %v17681_v46 }
 0x599   : > { %4729 = vmatmul.bf16.vlgmr.msra.gmra.mxu1 %v4697_v54  ;;  %4942 = vmatpush.bf16.xpose.msra.mxu3 %v4891_v63  ;;  %v17682_v54 = vld [vmem:[#allocation57_spill] sm:$0xff] }
 0x59a   : > { %4916 = vmatpush.bf16.xpose.msra.mxu1 %v4889_v18  ;;  %v4276_v63 = vadd.f32 %v17682_v54, %v4257_v28 }
 0x5f2   : > { %v4635_v47 = vpop.f32.mrf.mxu0 }
 0x5fa   : > { %v4637_v17 = vpop.f32.mrf.mxu0 }
 0x602   : > { %v4717_v60 = vpop.f32.mrf.mxu0 }
 0x603   : > { %v4760_v32 = vsel %vm4382_vm1, %v4717_v60, -inf  ;;  %v4673_v33 = vpop.f32.mrf.mxu2 }
 0x604   : > { %4761 = vmax.xlane.f32.xlu1 %v4760_v32  ;;  %v4884_v32 = vpack.c.bf16 %v4305_v30, %v4305_v30 }
 0x606   : > { %v4654_v24 = vpop.f32.mrf.mxu1 }
 0x607   : > { %v15667_v1 = vpack.c.bf16 %v4654_v24, %v4635_v47  ;;  %v17683_v47 = vld [vmem:[#allocation60_spill] sm:$0xff] }
 0x608   : > { %v4262_v17 = vadd.f32 %v17683_v47, %v4243_v16 }
 0x60a   : > { %v4719_v42 = vpop.f32.mrf.mxu0 }
 0x60b   : > { %v4675_v4 = vpop.f32.mrf.mxu2  ;;  %v4692_v41 = vpop.f32.mrf.mxu3  ;;  %v17685_v42 = vld [vmem:[#allocation61_spill] sm:$0xff] }
 0x60c   : > { %v15669_v59 = vpack.c.bf16 %v4692_v41, %v4673_v33  ;;  %v17684_v33 = vld [vmem:[#allocation58_spill] sm:$0xff]  ;;  %v4894_v4 = vpack.c.bf16 %v17685_v42, %v17685_v42 }
 0x60d   : > { %v4295_v24 = vadd.f32 %v17684_v33, %v4276_v63  ;;  %v17686_v41 = vld [vmem:[#allocation62_spill] sm:$0xff] }
 0x60e   : > { %v4656_v62 = vpop.f32.mrf.mxu1 }
 0x60f   : > { %v4281_v62 = vadd.f32 %v17686_v41, %v4262_v17 }
 0x613   : > { %v4694_v13 = vpop.f32.mrf.mxu3  ;;  %v4743_v6 = vpop.f32.mrf.mxu2 }
 0x614   : > { %v4766_v53 = vsel %vm4382_vm1, %v4743_v6, -inf }
 0x615   : > { %4767 = vmax.xlane.f32.xlu0 %v4766_v53 }
 0x616   : > { %v4730_v19 = vpop.f32.mrf.mxu1 }
 0x617   : > { %v4763_v51 = vsel %vm4382_vm1, %v4730_v19, -inf }
 0x618   : > { %4764 = vmax.xlane.f32.xlu2 %v4763_v51  ;;  %v4893_v51 = vpack.c.bf16 %v4295_v24, %v4295_v24 }
 0x61b   : > { %v4745_v22 = vpop.f32.mrf.mxu2  ;;  %v4756_v56 = vpop.f32.mrf.mxu3 }
 0x61c   : > { %v4769_v43 = vsel %vm4382_vm1, %v4756_v56, -inf }
 0x61d   : > { %4770 = vmax.xlane.f32.xlu1 %v4769_v43  ;;  %v17687_v43 = vld [vmem:[#allocation63_spill] sm:$0xff] }
 0x61e   : > { %v4732_v31 = vpop.f32.mrf.mxu1 }
 0x61f   : > { %v4300_v31 = vadd.f32 %v17687_v43, %v4281_v62 }
 0x623   : > { %v4758_v7 = vpop.f32.mrf.mxu3 }
 0x677   : > { %v4762_v26 = vpop.xlane.xlu1 %4761 }
 0x678   : > { %v4772_v14 = vsub.f32 %v4717_v60, %v4762_v26 }
 0x67a   : > { %v4776_v37 = vmul.f32 1.442695, %v4772_v14  ;;  %v5019_v14 = vsel %vm4434_vm0, %v4893_v51, 0 }
 0x67c   : > { %13419 = vpow2.f32 %v4776_v37  ;;  %v4895_v37 = vpack.c.bf16 %v4300_v31, %v4300_v31 }
 0x682   : > { %v13420_v40 = vpop.eup %13419 }
 0x683   : > { %v4784_v29 = vsel %vm4382_vm1, %v13420_v40, 0.0 }
 0x684   : > { %4785 = vadd.xlane.f32.xlu2 %v4784_v29 }
 0x688   : > { %v4768_v25 = vpop.xlane.xlu0 %4767 }
 0x689   : > { %v4774_v23 = vsub.f32 %v4743_v6, %v4768_v25  ;;  %v5057_v25 = vsel %vm4434_vm0, %v4895_v37, 0 }
 0x68b   : > { %v4780_v55 = vmul.f32 1.442695, %v4774_v23  ;;  %v4765_v39 = vpop.xlane.xlu2 %4764  ;;  %v17688_v23 = vld [vmem:[#allocation49_spill] sm:$0xff] }
 0x68c   : > { %v4773_v52 = vsub.f32 %v4730_v19, %v4765_v39  ;;  %v17689_v39 = vld [vmem:[#allocation48_spill] sm:$0xff] }
 0x68d   : > { %13421 = vpow2.f32 %v4780_v55  ;;  %v4313_v55 = vmul.f32 0.088388346, %v17688_v23  ;;  %v11016_v23 = vld [vmem:[%s14372_s21 + $0x80] sm:$0xf] }
 0x68e   : > { %v4778_v49 = vmul.f32 1.442695, %v4773_v52  ;;  %v4309_v52 = vmul.f32 0.088388346, %v17689_v39 }
 0x690   : > { %13423 = vpow2.f32 %v4778_v49  ;;  %v4771_v20 = vpop.xlane.xlu1 %4770  ;;  %v4886_v49 = vpack.c.bf16 %v4313_v55, %v4313_v55  ;;  %v12896_v55 = vld [vmem:[%s14372_s21 + $0x8c] sm:$0xf0] }
 0x691   : > { %v4775_v34 = vsub.f32 %v4756_v56, %v4771_v20  ;;  %v5038_v56 = vsel %vm4434_vm0, %v4894_v4, 0  ;;  %v4885_v20 = vpack.c.bf16 %v4309_v52, %v4309_v52  ;;  %v11017_v39 = vor.u32 %v12896_v55, %v11016_v23  ;;  %v11000_v52 = vld [vmem:[%s14372_s21 + $0x60] sm:$0xf]  ;;  %v12916_v55 = vld [vmem:[%s14372_s21 + $0x12c] sm:$0xf0] }
 0x692   : > { %v11096_v23 = vld [vmem:[%s14372_s21 + $0x120] sm:$0xf] }
 0x693   : > { %v13422_v35 = vpop.eup %13421  ;;  %v4782_v3 = vmul.f32 1.442695, %v4775_v34  ;;  %v17690_v34 = vld [vmem:[#allocation50_spill] sm:$0xff] }
 0x694   : > { %v4790_v27 = vsel %vm4382_vm1, %v13422_v35, 0.0 }
 0x695   : > { %13425 = vpow2.f32 %v4782_v3  ;;  %4791 = vadd.xlane.f32.xlu1 %v4790_v27 }
 0x696   : > { %v13424_v5 = vpop.eup %13423 }
 0x697   : > { %v4787_v58 = vsel %vm4382_vm1, %v13424_v5, 0.0 }
 0x698   : > { %4788 = vadd.xlane.f32.xlu0 %v4787_v58 }
 0x69b   : > { %v13426_v21 = vpop.eup %13425 }
 0x69c   : > { %v4793_v12 = vsel %vm4382_vm1, %v13426_v21, 0.0 }
 0x69d   : > { %4794 = vadd.xlane.f32.xlu2 %v4793_v12 }
 0x6f7   : > { %v4786_v2 = vpop.xlane.xlu2 %4785 }
 0x6f8   : > { %13427 = vrcp.f32 %v4786_v2 }
 0x6fe   : > { %v13428_v61 = vpop.eup %13427 }
 0x6ff   : > { %v4800_v15 = vmul.f32 %v13428_v61, %v13420_v40 }
 0x701   : > { %v4804_v10 = vpack.c.bf16 %v4800_v15, %v4800_v15 }
 0x703   : > { %10942 = vmatmul.msk.bf16.vlgmr.msrb.gmra.mxu0 %vm4382_vm1, %v4804_v10 }
 0x704   : > { %5009 = vmatpush.bf16.msrb.mxu0 %v5000_v36 }
 0x708   : > { %v4792_v44 = vpop.xlane.xlu1 %4791 }
 0x709   : > { %13429 = vrcp.f32 %v4792_v44 }
 0x70b   : > { %v4789_v18 = vpop.xlane.xlu0 %4788 }
 0x70c   : > { %13431 = vrcp.f32 %v4789_v18 }
 0x70f   : > { %v13430_v60 = vpop.eup %13429 }
 0x710   : > { %v4802_v13 = vmul.f32 %v13430_v60, %v13422_v35  ;;  %v4795_v6 = vpop.xlane.xlu2 %4794  ;;  %v4317_v35 = vmul.f32 0.088388346, %v17690_v34  ;;  %v11064_v60 = vld [vmem:[%s14372_s21 + $0xe0] sm:$0xf] }
 0x711   : > { %13433 = vrcp.f32 %v4795_v6 }
 0x712   : > { %v13432_v53 = vpop.eup %13431  ;;  %v4806_v19 = vpack.c.bf16 %v4802_v13, %v4802_v13  ;;  %v4887_v3 = vpack.c.bf16 %v4317_v35, %v4317_v35  ;;  %v12888_v35 = vld [vmem:[%s14372_s21 + $0x4c] sm:$0xf0] }
 0x713   : > { %4904 = vmatmul.bf16.vlgmr.msra.gmra.mxu0 %v4884_v32  ;;  %v4801_v22 = vmul.f32 %v13432_v53, %v13424_v5  ;;  %v12908_v32 = vld [vmem:[%s14372_s21 + $0xec] sm:$0xf0] }
 0x714   : > { %10944 = vmatmul.msk.bf16.vlgmr.msrb.gmra.mxu2 %vm4382_vm1, %v4806_v19  ;;  %v11065_v33 = vor.u32 %v12908_v32, %v11064_v60  ;;  %v12964_v32 = vld [vmem:[%s14372_s21 + $0x2ac] sm:$0xf0] }
 0x715   : > { %v4805_v7 = vpack.c.bf16 %v4801_v22, %v4801_v22  ;;  %5047 = vmatpush.bf16.msrb.mxu2 %v5038_v56 }
 0x716   : > { %5858 = vmatpush.bf16.msra.mxu0 %v11065_v33 }
 0x717   : > { %v13434_v26 = vpop.eup %13433  ;;  %10943 = vmatmul.msk.bf16.vlgmr.msrb.gmra.mxu1 %vm4382_vm1, %v4805_v7 }
 0x718   : > { %v4803_v40 = vmul.f32 %v13434_v26, %v13426_v21  ;;  %5028 = vmatpush.bf16.msrb.mxu1 %v5019_v14  ;;  %v11048_v26 = vld [vmem:[%s14372_s21 + $0xc0] sm:$0xf]  ;;  %v12904_v14 = vld [vmem:[%s14372_s21 + $0xcc] sm:$0xf0] }
 0x719   : > { %v11049_v37 = vor.u32 %v12904_v14, %v11048_v26  ;;  %v12956_v14 = vld [vmem:[%s14372_s21 + $0x26c] sm:$0xf0] }
 0x71a   : > { %v4807_v29 = vpack.c.bf16 %v4803_v40, %v4803_v40  ;;  %v11032_v40 = vld [vmem:[%s14372_s21 + $0xa0] sm:$0xf] }
 0x71b   : > { %5859 = vmatpush.bf16.msra.mxu0 %v11049_v37 }
 0x71c   : > { %10945 = vmatmul.msk.bf16.vlgmr.msrb.gmra.mxu3 %vm4382_vm1, %v4807_v29  ;;  %v12900_v29 = vld [vmem:[%s14372_s21 + $0xac] sm:$0xf0] }
 0x71d   : > { %5066 = vmatpush.bf16.msrb.mxu3 %v5057_v25  ;;  %v11033_v25 = vor.u32 %v12900_v29, %v11032_v40 }
 0x71f   : > { %5860 = vmatpush.bf16.msra.mxu0 %v11033_v25 }
 0x723   : > { %5861 = vmatpush.bf16.msra.mxu0 %v11017_v39  ;;  %v11240_v39 = vld [vmem:[%s14372_s21 + $0x240] sm:$0xf] }
 0x724   : > { %4930 = vmatmul.bf16.vlgmr.msra.gmra.mxu2 %v4886_v49  ;;  %v12892_v49 = vld [vmem:[%s14372_s21 + $0x6c] sm:$0xf0] }
 0x725   : > { %v11001_v34 = vor.u32 %v12892_v49, %v11000_v52  ;;  %v12902_v49 = vld [vmem:[%s14372_s21 + $0xc4] sm:$0xf] }
 0x727   : > { %4917 = vmatmul.bf16.vlgmr.msra.gmra.mxu1 %v4885_v20  ;;  %v10984_v20 = vld [vmem:[%s14372_s21 + $0x40] sm:$0xf]  ;;  %5862 = vmatpush.bf16.msra.mxu0 %v11001_v34  ;;  %v11097_v34 = vor.u32 %v12916_v55, %v11096_v23  ;;  %v12909_v23 = vld [vmem:[%s14372_s21 + $0xf4] sm:$0xf0]  ;;  %v12930_v55 = vld [vmem:[%s14372_s21 + $0x1a4] sm:$0xf] }
 0x72c   : > { %4943 = vmatmul.bf16.vlgmr.msra.gmra.mxu3 %v4887_v3  ;;  %v11192_v3 = vld [vmem:[%s14372_s21 + $0x1e0] sm:$0xf] }
 0x780   : > { %v4823_v27 = vpop.f32.mrf.mxu0 }
 0x788   : > { %v4825_v5 = vpop.f32.mrf.mxu0 }
 0x790   : > { %v4905_v58 = vpop.f32.mrf.mxu0 }
 0x791   : > { %v4948_v21 = vsel %vm4382_vm1, %v4905_v58, -inf }
 0x792   : > { %4949 = vmax.xlane.f32.xlu0 %v4948_v21  ;;  %v10968_v21 = vld [vmem:[%s14372_s21 + $0x20] sm:$0xf] }
 0x794   : > { %v4842_v12 = vpop.f32.mrf.mxu1 }
 0x795   : > { %v15705_v2 = vpack.c.bf16 %v4842_v12, %v4823_v27  ;;  %v12940_v27 = vld [vmem:[%s14372_s21 + $0x1ec] sm:$0xf0] }
 0x796   : > { %v11193_v5 = vor.u32 %v12940_v27, %v11192_v3  ;;  %v12884_v12 = vld [vmem:[%s14372_s21 + $0x2c] sm:$0xf0]  ;;  %v11080_v27 = vld [vmem:[%s14372_s21 + $0x100] sm:$0xf] }
 0x797   : > { %v4861_v57 = vpop.f32.mrf.mxu2 }
 0x798   : > { %v4907_v61 = vpop.f32.mrf.mxu0  ;;  %5877 = vmatpush.bf16.msra.mxu1 %v11193_v5  ;;  %v12912_v5 = vld [vmem:[%s14372_s21 + $0x10c] sm:$0xf0] }
 0x799   : > { %v11176_v61 = vld [vmem:[%s14372_s21 + $0x1c0] sm:$0xf] }
 0x79c   : > { %v4844_v9 = vpop.f32.mrf.mxu1 }
 0x79d   : > { %v12936_v9 = vld [vmem:[%s14372_s21 + $0x1cc] sm:$0xf0] }
 0x79f   : > { %v4863_v15 = vpop.f32.mrf.mxu2  ;;  %v4880_v10 = vpop.f32.mrf.mxu3 }
 0x7a0   : > { %v15707_v36 = vpack.c.bf16 %v4880_v10, %v4861_v57  ;;  %v10969_v57 = vor.u32 %v12884_v12, %v10968_v21  ;;  %v11320_v15 = vld [vmem:[%s14372_s21 + $0x2e0] sm:$0xf]  ;;  %v12972_v10 = vld [vmem:[%s14372_s21 + $0x2ec] sm:$0xf0]  ;;  %v12898_v21 = vld [vmem:[%s14372_s21 + $0xa4] sm:$0xf] }
 0x7a1   : > { %v11034_v12 = vld [vmem:[%s14372_s21 + $0xb0] sm:$0xf0] }
 0x7a4   : > { %v4918_v8 = vpop.f32.mrf.mxu1 }
 0x7a5   : > { %v4951_v48 = vsel %vm4382_vm1, %v4918_v8, -inf }
 0x7a6   : > { %4952 = vmax.xlane.f32.xlu1 %v4951_v48  ;;  %v11321_v48 = vor.u32 %v12972_v10, %v11320_v15  ;;  %v11037_v15 = vor.u32 %v12898_v21, %v11034_v12  ;;  %v11208_v10 = vld [vmem:[%s14372_s21 + $0x200] sm:$0xf]  ;;  %v11146_v21 = vld [vmem:[%s14372_s21 + $0x190] sm:$0xf0] }
 0x7a7   : > { %v4882_v38 = vpop.f32.mrf.mxu3  ;;  %v4931_v45 = vpop.f32.mrf.mxu2 }
 0x7a8   : > { %v4954_v28 = vsel %vm4382_vm1, %v4931_v45, -inf  ;;  %5896 = vmatpush.bf16.msra.mxu2 %v11321_v48  ;;  %v10952_v38 = vld [vmem:[%s14372_s21] sm:$0xf]  ;;  %v12894_v48 = vld [vmem:[%s14372_s21 + $0x84] sm:$0xf] }
 0x7a9   : > { %4955 = vmax.xlane.f32.xlu2 %v4954_v28  ;;  %v11160_v28 = vld [vmem:[%s14372_s21 + $0x1a0] sm:$0xf] }
 0x7ac   : > { %v4920_v50 = vpop.f32.mrf.mxu1 }
 0x7af   : > { %v4933_v16 = vpop.f32.mrf.mxu2  ;;  %v4944_v44 = vpop.f32.mrf.mxu3 }
 0x7b0   : > { %v4957_v46 = vsel %vm4382_vm1, %v4944_v44, -inf  ;;  %v12932_v16 = vld [vmem:[%s14372_s21 + $0x1ac] sm:$0xf0] }
 0x7b1   : > { %4958 = vmax.xlane.f32.xlu0 %v4957_v46  ;;  %v12968_v46 = vld [vmem:[%s14372_s21 + $0x2cc] sm:$0xf0] }
 0x7b7   : > { %v4946_v30 = vpop.f32.mrf.mxu3 }
 0x7b8   : > { %v11161_v30 = vor.u32 %v12932_v16, %v11160_v28  ;;  %v12890_v16 = vld [vmem:[%s14372_s21 + $0x64] sm:$0xf] }
 0x805   : > { %v4950_v54 = vpop.xlane.xlu0 %4949 }
 0x806   : > { %v4960_v63 = vsub.f32 %v4905_v58, %v4950_v54  ;;  %v10985_v58 = vor.u32 %v12888_v35, %v10984_v20  ;;  %v11050_v20 = vld [vmem:[%s14372_s21 + $0xd0] sm:$0xf0]  ;;  %v12952_v35 = vld [vmem:[%s14372_s21 + $0x24c] sm:$0xf0] }
 0x807   : > { %v11241_v3 = vor.u32 %v12952_v35, %v11240_v39  ;;  %v11162_v39 = vld [vmem:[%s14372_s21 + $0x1b0] sm:$0xf0] }
 0x808   : > { %v4964_v18 = vmul.f32 1.442695, %v4960_v63  ;;  %5863 = vmatpush.bf16.msra.mxu0 %v10985_v58  ;;  %v11144_v63 = vld [vmem:[%s14372_s21 + $0x180] sm:$0xf]  ;;  %v11165_v35 = vor.u32 %v12930_v55, %v11162_v39  ;;  %v10976_v55 = vld [vmem:[%s14372_s21 + $0x28] sm:$0xf] }
 0x809   : > { %v11224_v58 = vld [vmem:[%s14372_s21 + $0x220] sm:$0xf] }
 0x80a   : > { %13435 = vpow2.f32 %v4964_v18  ;;  %v12928_v18 = vld [vmem:[%s14372_s21 + $0x18c] sm:$0xf0] }
 0x80b   : > { %v11145_v60 = vor.u32 %v12928_v18, %v11144_v63  ;;  %v10986_v63 = vld [vmem:[%s14372_s21 + $0x50] sm:$0xf0]  ;;  %v12938_v18 = vld [vmem:[%s14372_s21 + $0x1e4] sm:$0xf] }
 0x80c   : > { %5864 = vmatpush.bf16.msra.mxu0 %v10969_v57  ;;  %v12948_v57 = vld [vmem:[%s14372_s21 + $0x22c] sm:$0xf0] }
 0x810   : > { %v15712_v47 = vpop.eup %13435 }
 0x811   : > { %v4972_v17 = vsel %vm4382_vm1, %v15712_v47, 0.0 }
 0x812   : > { %4973 = vadd.xlane.f32.xlu1 %v4972_v17  ;;  %v11288_v17 = vld [vmem:[%s14372_s21 + $0x2a0] sm:$0xf] }
 0x813   : > { %v11289_v33 = vor.u32 %v12964_v32, %v11288_v17  ;;  %v11194_v17 = vld [vmem:[%s14372_s21 + $0x1f0] sm:$0xf0] }
 0x819   : > { %v4953_v24 = vpop.xlane.xlu1 %4952 }
 0x81a   : > { %v4961_v42 = vsub.f32 %v4918_v8, %v4953_v24  ;;  %v11177_v8 = vor.u32 %v12936_v9, %v11176_v61  ;;  %v11081_v61 = vor.u32 %v12912_v5, %v11080_v27  ;;  %v11225_v9 = vor.u32 %v12948_v57, %v11224_v58  ;;  %v12905_v27 = vld [vmem:[%s14372_s21 + $0xd4] sm:$0xf0]  ;;  %v12926_v58 = vld [vmem:[%s14372_s21 + $0x184] sm:$0xf] }
 0x81c   : > { %v4966_v4 = vmul.f32 1.442695, %v4961_v42  ;;  %v4956_v41 = vpop.xlane.xlu2 %4955  ;;  %5878 = vmatpush.bf16.msra.mxu1 %v11177_v8  ;;  %v11128_v42 = vld [vmem:[%s14372_s21 + $0x160] sm:$0xf]  ;;  %v12944_v8 = vld [vmem:[%s14372_s21 + $0x20c] sm:$0xf0] }
 0x81d   : > { %v4962_v62 = vsub.f32 %v4931_v45, %v4956_v41  ;;  %v12880_v45 = vld [vmem:[%s14372_s21 + $0xc] sm:$0xf0]  ;;  %v11272_v41 = vld [vmem:[%s14372_s21 + $0x280] sm:$0xf] }
 0x81e   : > { %13437 = vpow2.f32 %v4966_v4  ;;  %v10953_v50 = vor.u32 %v12880_v45, %v10952_v38  ;;  %v12924_v4 = vld [vmem:[%s14372_s21 + $0x16c] sm:$0xf0]  ;;  %v11018_v38 = vld [vmem:[%s14372_s21 + $0x90] sm:$0xf0]  ;;  %v11209_v45 = vor.u32 %v12944_v8, %v11208_v10  ;;  %v12922_v10 = vld [vmem:[%s14372_s21 + $0x164] sm:$0xf] }
 0x81f   : > { %v4968_v13 = vmul.f32 1.442695, %v4962_v62  ;;  %v11129_v62 = vor.u32 %v12924_v4, %v11128_v42  ;;  %v11021_v28 = vor.u32 %v12894_v48, %v11018_v38  ;;  %v10970_v42 = vld [vmem:[%s14372_s21 + $0x30] sm:$0xf0]  ;;  %v11197_v4 = vor.u32 %v12938_v18, %v11194_v17  ;;  %v12958_v8 = vld [vmem:[%s14372_s21 + $0x284] sm:$0xf] }
 0x820   : > { %5865 = vmatpush.bf16.msra.mxu0 %v10953_v50  ;;  %5879 = vmatpush.bf16.msra.mxu1 %v11161_v30  ;;  %v11274_v48 = vld [vmem:[%s14372_s21 + $0x290] sm:$0xf0]  ;;  %v11040_v38 = vld [vmem:[%s14372_s21 + $0xa8] sm:$0xf]  ;;  %v12897_v18 = vld [vmem:[%s14372_s21 + $0x94] sm:$0xf0] }
 0x821   : > { %13439 = vpow2.f32 %v4968_v13  ;;  %v12960_v13 = vld [vmem:[%s14372_s21 + $0x28c] sm:$0xf0] }
 0x824   : > { %v15718_v6 = vpop.eup %13437  ;;  %v4959_v53 = vpop.xlane.xlu0 %4958  ;;  %5880 = vmatpush.bf16.msra.mxu1 %v11145_v60 }
 0x825   : > { %v4963_v19 = vsub.f32 %v4944_v44, %v4959_v53  ;;  %v4975_v51 = vsel %vm4382_vm1, %v15718_v6, 0.0  ;;  %v11304_v44 = vld [vmem:[%s14372_s21 + $0x2c0] sm:$0xf]  ;;  %v11273_v53 = vor.u32 %v12960_v13, %v11272_v41  ;;  %v12970_v41 = vld [vmem:[%s14372_s21 + $0x2e4] sm:$0xf] }
 0x826   : > { %4976 = vadd.xlane.f32.xlu2 %v4975_v51  ;;  %v11305_v54 = vor.u32 %v12968_v46, %v11304_v44  ;;  %v12920_v51 = vld [vmem:[%s14372_s21 + $0x14c] sm:$0xf0]  ;;  %v11002_v44 = vld [vmem:[%s14372_s21 + $0x70] sm:$0xf0] }
 0x827   : > { %v15722_v22 = vpop.eup %13439  ;;  %v4970_v56 = vmul.f32 1.442695, %v4963_v19  ;;  %v11112_v19 = vld [vmem:[%s14372_s21 + $0x140] sm:$0xf]  ;;  %v11005_v30 = vor.u32 %v12890_v16, %v11002_v44  ;;  %v12918_v16 = vld [vmem:[%s14372_s21 + $0x144] sm:$0xf] }
 0x828   : > { %v4978_v43 = vsel %vm4382_vm1, %v15722_v22, 0.0  ;;  %5897 = vmatpush.bf16.msra.mxu2 %v11305_v54  ;;  %5881 = vmatpush.bf16.msra.mxu1 %v11129_v62  ;;  %v11113_v26 = vor.u32 %v12920_v51, %v11112_v19  ;;  %v12886_v54 = vld [vmem:[%s14372_s21 + $0x44] sm:$0xf]  ;;  %v11322_v62 = vld [vmem:[%s14372_s21 + $0x2f0] sm:$0xf0] }
 0x829   : > { %13441 = vpow2.f32 %v4970_v56  ;;  %4979 = vadd.xlane.f32.xlu0 %v4978_v43  ;;  %v11256_v56 = vld [vmem:[%s14372_s21 + $0x260] sm:$0xf]  ;;  %v12906_v43 = vld [vmem:[%s14372_s21 + $0xe4] sm:$0xf]  ;;  %v10989_v32 = vor.u32 %v12886_v54, %v10986_v63  ;;  %v11178_v51 = vld [vmem:[%s14372_s21 + $0x1d0] sm:$0xf0] }
 0x82a   : > { %v11257_v40 = vor.u32 %v12956_v14, %v11256_v56  ;;  %v12934_v19 = vld [vmem:[%s14372_s21 + $0x1c4] sm:$0xf]  ;;  %v10954_v14 = vld [vmem:[%s14372_s21 + $0x10] sm:$0xf0]  ;;  %v11024_v63 = vld [vmem:[%s14372_s21 + $0x88] sm:$0xf] }
 0x82b   : > { %v12954_v44 = vld [vmem:[%s14372_s21 + $0x264] sm:$0xf]  ;;  %v11114_v54 = vld [vmem:[%s14372_s21 + $0x150] sm:$0xf0] }
 0x82c   : > { %5898 = vmatpush.bf16.msra.mxu2 %v11289_v33  ;;  %5882 = vmatpush.bf16.msra.mxu1 %v11113_v26  ;;  %v12878_v26 = vld [vmem:[%s14372_s21 + $0x4] sm:$0xf] }
 0x82f   : > { %v15726_v31 = vpop.eup %13441 }
 0x830   : > { %v4981_v7 = vsel %vm4382_vm1, %v15726_v31, 0.0  ;;  %5899 = vmatpush.bf16.msra.mxu2 %v11273_v53  ;;  %5883 = vmatpush.bf16.msra.mxu1 %v11097_v34 }
 0x831   : > { %4982 = vadd.xlane.f32.xlu1 %v4981_v7  ;;  %v11066_v7 = vld [vmem:[%s14372_s21 + $0xf0] sm:$0xf0] }
 0x832   : > { %v11069_v25 = vor.u32 %v12906_v43, %v11066_v7  ;;  %v11325_v7 = vor.u32 %v12970_v41, %v11322_v62  ;;  %v11008_v41 = vld [vmem:[%s14372_s21 + $0x68] sm:$0xf]  ;;  %v12893_v62 = vld [vmem:[%s14372_s21 + $0x74] sm:$0xf0] }
 0x834   : > { %5900 = vmatpush.bf16.msra.mxu2 %v11257_v40  ;;  %5884 = vmatpush.bf16.msra.mxu1 %v11081_v61 }
 0x838   : > { %5901 = vmatpush.bf16.msra.mxu2 %v11241_v3  ;;  %v11290_v3 = vld [vmem:[%s14372_s21 + $0x2b0] sm:$0xf0] }
 0x83c   : > { %5902 = vmatpush.bf16.msra.mxu2 %v11225_v9 }
 0x840   : > { %5903 = vmatpush.bf16.msra.mxu2 %v11209_v45  ;;  %v12901_v45 = vld [vmem:[%s14372_s21 + $0xb4] sm:$0xf0] }
 0x885   : > { %v4974_v24 = vpop.xlane.xlu1 %4973 }
 0x886   : > { %13443 = vrcp.f32 %v4974_v24  ;;  %v12882_v24 = vld [vmem:[%s14372_s21 + $0x24] sm:$0xf] }
 0x88c   : > { %v13444_v37 = vpop.eup %13443 }
 0x88d   : > { %v4988_v29 = vmul.f32 %v13444_v37, %v15712_v47  ;;  %v11053_v47 = vor.u32 %v12902_v49, %v11050_v20  ;;  %v12966_v37 = vld [vmem:[%s14372_s21 + $0x2c4] sm:$0xf] }
 0x88e   : > { %v12962_v20 = vld [vmem:[%s14372_s21 + $0x2a4] sm:$0xf] }
 0x88f   : > { %v4992_v52 = vpack.c.bf16 %v4988_v29, %v4988_v29  ;;  %v11181_v29 = vor.u32 %v12934_v19, %v11178_v51  ;;  %v11293_v61 = vor.u32 %v12962_v20, %v11290_v3  ;;  %v12910_v19 = vld [vmem:[%s14372_s21 + $0x104] sm:$0xf]  ;;  %v12973_v20 = vld [vmem:[%s14372_s21 + $0x2f4] sm:$0xf0] }
 0x890   : > { %v12946_v51 = vld [vmem:[%s14372_s21 + $0x224] sm:$0xf] }
 0x891   : > { %10946 = vmatmul.msk.bf16.vlgmr.msrb.gmra.mxu0 %vm4382_vm1, %v4992_v52  ;;  %v10957_v52 = vor.u32 %v12878_v26, %v10954_v14  ;;  %v12889_v26 = vld [vmem:[%s14372_s21 + $0x54] sm:$0xf0]  ;;  %v11200_v14 = vld [vmem:[%s14372_s21 + $0x1e8] sm:$0xf] }
 0x892   : > { %5934 = vmatpush.bf16.msrb.mxu0 %v11069_v25  ;;  %v11306_v25 = vld [vmem:[%s14372_s21 + $0x2d0] sm:$0xf0] }
 0x893   : > { %v11309_v49 = vor.u32 %v12966_v37, %v11306_v25  ;;  %v12941_v37 = vld [vmem:[%s14372_s21 + $0x1f4] sm:$0xf0]  ;;  %v12942_v25 = vld [vmem:[%s14372_s21 + $0x204] sm:$0xf] }
 0x894   : > { %v11201_v39 = vor.u32 %v12941_v37, %v11200_v14  ;;  %v11104_v14 = vld [vmem:[%s14372_s21 + $0x128] sm:$0xf]  ;;  %v12917_v37 = vld [vmem:[%s14372_s21 + $0x134] sm:$0xf0] }
 0x896   : > { %5935 = vmatpush.bf16.msrb.mxu0 %v11053_v47  ;;  %v11056_v47 = vld [vmem:[%s14372_s21 + $0xc8] sm:$0xf] }
 0x897   : > { %v11057_v57 = vor.u32 %v12905_v27, %v11056_v47 }
 0x899   : > { %v4977_v50 = vpop.xlane.xlu2 %4976 }
 0x89a   : > { %5936 = vmatpush.bf16.msrb.mxu0 %v11037_v15  ;;  %13445 = vrcp.f32 %v4977_v50  ;;  %v11149_v15 = vor.u32 %v12926_v58, %v11146_v21  ;;  %v12881_v58 = vld [vmem:[%s14372_s21 + $0x14] sm:$0xf0] }
 0x89c   : > { %v4980_v46 = vpop.xlane.xlu0 %4979 }
 0x89d   : > { %13447 = vrcp.f32 %v4980_v46  ;;  %v11258_v46 = vld [vmem:[%s14372_s21 + $0x270] sm:$0xf0] }
 0x89e   : > { %5937 = vmatpush.bf16.msrb.mxu0 %v11021_v28  ;;  %v11277_v28 = vor.u32 %v12958_v8, %v11274_v48  ;;  %v11261_v17 = vor.u32 %v12954_v44, %v11258_v46  ;;  %v12903_v44 = vld [vmem:[%s14372_s21 + $0xcc] sm:$0xf]  ;;  %v11058_v46 = vld [vmem:[%s14372_s21 + $0xd8] sm:$0xf0] }
 0x8a0   : > { %v13446_v60 = vpop.eup %13445 }
 0x8a1   : > { %5866 = vmatmul.bf16.vlgmr.msra.gmra.mxu0 %v15614_v0  ;;  %v4989_v33 = vmul.f32 %v13446_v60, %v15718_v6  ;;  %v10973_v6 = vor.u32 %v12882_v24, %v10970_v42  ;;  %v11117_v60 = vor.u32 %v12918_v16, %v11114_v54  ;;  %v11242_v24 = vld [vmem:[%s14372_s21 + $0x250] sm:$0xf0]  ;;  %v11025_v42 = vor.u32 %v12897_v18, %v11024_v63  ;;  %v12929_v16 = vld [vmem:[%s14372_s21 + $0x194] sm:$0xf0]  ;;  %v11280_v63 = vld [vmem:[%s14372_s21 + $0x288] sm:$0xf] }
 0x8a2   : > { %5938 = vmatpush.bf16.msrb.mxu0 %v11005_v30  ;;  %v11041_v30 = vor.u32 %v12901_v45, %v11040_v38  ;;  %v11296_v38 = vld [vmem:[%s14372_s21 + $0x2a8] sm:$0xf]  ;;  %v12965_v45 = vld [vmem:[%s14372_s21 + $0x2b4] sm:$0xf0] }
 0x8a3   : > { %v13448_v13 = vpop.eup %13447  ;;  %v4993_v53 = vpack.c.bf16 %v4989_v33, %v4989_v33  ;;  %v12950_v33 = vld [vmem:[%s14372_s21 + $0x244] sm:$0xf]  ;;  %v12961_v18 = vld [vmem:[%s14372_s21 + $0x294] sm:$0xf0] }
 0x8a4   : > { %v4990_v56 = vmul.f32 %v13448_v13, %v15722_v22  ;;  %v4983_v43 = vpop.xlane.xlu1 %4982  ;;  %v11072_v22 = vld [vmem:[%s14372_s21 + $0xe8] sm:$0xf]  ;;  %v11245_v13 = vor.u32 %v12950_v33, %v11242_v24  ;;  %v12899_v33 = vld [vmem:[%s14372_s21 + $0xac] sm:$0xf]  ;;  %v11042_v24 = vld [vmem:[%s14372_s21 + $0xb8] sm:$0xf0] }
 0x8a5   : > { %10947 = vmatmul.msk.bf16.vlgmr.msrb.gmra.mxu1 %vm4382_vm1, %v4993_v53  ;;  %13449 = vrcp.f32 %v4983_v43  ;;  %v11073_v34 = vor.u32 %v12909_v23, %v11072_v22  ;;  %v11009_v43 = vor.u32 %v12893_v62, %v11008_v41  ;;  %v11210_v22 = vld [vmem:[%s14372_s21 + $0x210] sm:$0xf0]  ;;  %v11264_v41 = vld [vmem:[%s14372_s21 + $0x268] sm:$0xf]  ;;  %v12957_v62 = vld [vmem:[%s14372_s21 + $0x274] sm:$0xf0] }
 0x8a6   : > { %5939 = vmatpush.bf16.msrb.mxu0 %v10989_v32  ;;  %v4994_v40 = vpack.c.bf16 %v4990_v56, %v4990_v56  ;;  %5953 = vmatpush.bf16.msrb.mxu1 %v11197_v4  ;;  %v12914_v32 = vld [vmem:[%s14372_s21 + $0x124] sm:$0xf]  ;;  %v11098_v4 = vld [vmem:[%s14372_s21 + $0x130] sm:$0xf0]  ;;  %v11213_v3 = vor.u32 %v12942_v25, %v11210_v22  ;;  %v11010_v25 = vld [vmem:[%s14372_s21 + $0x78] sm:$0xf0] }
 0x8a7   : > { %v11101_v53 = vor.u32 %v12914_v32, %v11098_v4  ;;  %v11226_v56 = vld [vmem:[%s14372_s21 + $0x230] sm:$0xf0]  ;;  %v11061_v32 = vor.u32 %v12903_v44, %v11058_v46  ;;  %v12879_v44 = vld [vmem:[%s14372_s21 + $0xc] sm:$0xf]  ;;  %v10962_v46 = vld [vmem:[%s14372_s21 + $0x18] sm:$0xf0] }
 0x8a8   : > { %10948 = vmatmul.msk.bf16.vlgmr.msrb.gmra.mxu2 %vm4382_vm1, %v4994_v40  ;;  %v11229_v40 = vor.u32 %v12946_v51, %v11226_v56  ;;  %v12895_v51 = vld [vmem:[%s14372_s21 + $0x8c] sm:$0xf]  ;;  %v11026_v56 = vld [vmem:[%s14372_s21 + $0x98] sm:$0xf0] }
 0x8a9   : > { %5972 = vmatpush.bf16.msrb.mxu2 %v11325_v7  ;;  %v10992_v7 = vld [vmem:[%s14372_s21 + $0x48] sm:$0xf] }
 0x8aa   : > { %5940 = vmatpush.bf16.msrb.mxu0 %v10973_v6  ;;  %5954 = vmatpush.bf16.msrb.mxu1 %v11181_v29  ;;  %v11082_v6 = vld [vmem:[%s14372_s21 + $0x110] sm:$0xf0]  ;;  %v10993_v23 = vor.u32 %v12889_v26, %v10992_v7  ;;  %v11248_v7 = vld [vmem:[%s14372_s21 + $0x248] sm:$0xf]  ;;  %v12953_v26 = vld [vmem:[%s14372_s21 + $0x254] sm:$0xf0] }
 0x8ab   : > { %v13450_v5 = vpop.eup %13449  ;;  %v11085_v29 = vor.u32 %v12910_v19, %v11082_v6  ;;  %v11045_v19 = vor.u32 %v12899_v33, %v11042_v24  ;;  %v11249_v22 = vor.u32 %v12953_v26, %v11248_v7  ;;  %v13004_v33 = vld [vmem:[%s14372_s21 + $0x3ec] sm:$0xf0]  ;;  %v11138_v7 = vld [vmem:[%s14372_s21 + $0x178] sm:$0xf0] }
 0x8ac   : > { %v4991_v12 = vmul.f32 %v13450_v5, %v15726_v31  ;;  %v11130_v31 = vld [vmem:[%s14372_s21 + $0x170] sm:$0xf0]  ;;  %v10960_v5 = vld [vmem:[%s14372_s21 + $0x8] sm:$0xf] }
 0x8ad   : > { %5973 = vmatpush.bf16.msrb.mxu2 %v11309_v49  ;;  %v11133_v50 = vor.u32 %v12922_v10, %v11130_v31  ;;  %v11328_v49 = vld [vmem:[%s14372_s21 + $0x2e8] sm:$0xf]  ;;  %v11074_v10 = vld [vmem:[%s14372_s21 + $0xf8] sm:$0xf0]  ;;  %v10961_v8 = vor.u32 %v12881_v58, %v10960_v5 }
 0x8ae   : > { %5941 = vmatpush.bf16.msrb.mxu0 %v10957_v52  ;;  %v4995_v9 = vpack.c.bf16 %v4991_v12, %v4991_v12  ;;  %5955 = vmatpush.bf16.msrb.mxu1 %v11165_v35  ;;  %v12885_v52 = vld [vmem:[%s14372_s21 + $0x34] sm:$0xf0]  ;;  %v11329_v27 = vor.u32 %v12973_v20, %v11328_v49  ;;  %v11168_v12 = vld [vmem:[%s14372_s21 + $0x1a8] sm:$0xf] }
 0x8af   : > { %v12937_v35 = vld [vmem:[%s14372_s21 + $0x1d4] sm:$0xf0]  ;;  %v10977_v47 = vor.u32 %v12885_v52, %v10976_v55  ;;  %v11232_v55 = vld [vmem:[%s14372_s21 + $0x228] sm:$0xf] }
 0x8b0   : > { %10949 = vmatmul.msk.bf16.vlgmr.msrb.gmra.mxu3 %vm4382_vm1, %v4995_v9  ;;  %v12933_v9 = vld [vmem:[%s14372_s21 + $0x1b4] sm:$0xf0]  ;;  %v11088_v52 = vld [vmem:[%s14372_s21 + $0x108] sm:$0xf] }
 0x8b1   : > { %5871 = vmatmul.bf16.gmra.mxu0 %v15617_v11  ;;  %5974 = vmatpush.bf16.msrb.mxu2 %v11293_v61  ;;  %v11312_v61 = vld [vmem:[%s14372_s21 + $0x2c8] sm:$0xf]  ;;  %v11169_v31 = vor.u32 %v12933_v9, %v11168_v12  ;;  %v12913_v49 = vld [vmem:[%s14372_s21 + $0x114] sm:$0xf0]  ;;  %v12971_v9 = vld [vmem:[%s14372_s21 + $0x2ec] sm:$0xf] }
 0x8b2   : > { %6010 = vmatpush.bf16.msra.mxu0 %v11073_v34  ;;  %5956 = vmatpush.bf16.msrb.mxu1 %v11149_v15  ;;  %v11184_v34 = vld [vmem:[%s14372_s21 + $0x1c8] sm:$0xf]  ;;  %v12907_v15 = vld [vmem:[%s14372_s21 + $0xec] sm:$0xf]  ;;  %v11089_v5 = vor.u32 %v12913_v49, %v11088_v52  ;;  %v11400_v52 = vld [vmem:[%s14372_s21 + $0x380] sm:$0xf] }
 0x8b3   : > { %v11185_v21 = vor.u32 %v12937_v35, %v11184_v34  ;;  %v12887_v34 = vld [vmem:[%s14372_s21 + $0x4c] sm:$0xf]  ;;  %v10994_v35 = vld [vmem:[%s14372_s21 + $0x58] sm:$0xf0]  ;;  %v11216_v58 = vld [vmem:[%s14372_s21 + $0x208] sm:$0xf] }
 0x8b4   : > { %v10997_v12 = vor.u32 %v12887_v34, %v10994_v35  ;;  %v12992_v49 = vld [vmem:[%s14372_s21 + $0x38c] sm:$0xf0]  ;;  %v11250_v34 = vld [vmem:[%s14372_s21 + $0x258] sm:$0xf0] }
 0x8b5   : > { %5885 = vmatmul.bf16.vlgmr.msra.gmra.mxu1 %v15667_v1  ;;  %5975 = vmatpush.bf16.msrb.mxu2 %v11277_v28  ;;  %v11077_v28 = vor.u32 %v12907_v15, %v11074_v10  ;;  %v11330_v15 = vld [vmem:[%s14372_s21 + $0x2f8] sm:$0xf0]  ;;  %v11401_v35 = vor.u32 %v12992_v49, %v11400_v52  ;;  %v15991_v52 = vld [vmem:[%s807_s0] sm:$0xf] }
 0x8b6   : > { %6011 = vmatpush.bf16.msra.mxu0 %v11057_v57  ;;  %5957 = vmatpush.bf16.msrb.mxu1 %v11133_v50  ;;  %v12969_v57 = vld [vmem:[%s14372_s21 + $0x2d4] sm:$0xf0]  ;;  %v11152_v50 = vld [vmem:[%s14372_s21 + $0x188] sm:$0xf]  ;;  %v10978_v10 = vld [vmem:[%s14372_s21 + $0x38] sm:$0xf0] }
 0x8b7   : > { %v11313_v48 = vor.u32 %v12969_v57, %v11312_v61  ;;  %v11153_v54 = vor.u32 %v12929_v16, %v11152_v50  ;;  %v12883_v57 = vld [vmem:[%s14372_s21 + $0x2c] sm:$0xf]  ;;  %v11314_v16 = vld [vmem:[%s14372_s21 + $0x2d8] sm:$0xf0] }
 0x8b8   : > { %5904 = vmatmul.bf16.vlgmr.msra.gmra.mxu2 %v15705_v2  ;;  %v12967_v50 = vld [vmem:[%s14372_s21 + $0x2cc] sm:$0xf] }
 0x8b9   : > { %5976 = vmatpush.bf16.msrb.mxu2 %v11261_v17  ;;  %v11136_v17 = vld [vmem:[%s14372_s21 + $0x168] sm:$0xf] }
 0x8ba   : > { %6012 = vmatpush.bf16.msra.mxu0 %v11041_v30  ;;  %5958 = vmatpush.bf16.msrb.mxu1 %v11117_v60  ;;  %v11297_v30 = vor.u32 %v12965_v45, %v11296_v38  ;;  %v12925_v60 = vld [vmem:[%s14372_s21 + $0x174] sm:$0xf0]  ;;  %v11333_v38 = vor.u32 %v12971_v9, %v11330_v15  ;;  %v10981_v45 = vor.u32 %v12883_v57, %v10978_v10  ;;  %v12911_v15 = vld [vmem:[%s14372_s21 + $0x10c] sm:$0xf]  ;;  %v11090_v10 = vld [vmem:[%s14372_s21 + $0x118] sm:$0xf0] }
 0x8bb   : > { %v11137_v4 = vor.u32 %v12925_v60, %v11136_v17  ;;  %v10965_v17 = vor.u32 %v12879_v44, %v10962_v46  ;;  %v11298_v60 = vld [vmem:[%s14372_s21 + $0x2b8] sm:$0xf0]  ;;  %v11352_v44 = vld [vmem:[%s14372_s21 + $0x320] sm:$0xf]  ;;  %v12980_v46 = vld [vmem:[%s14372_s21 + $0x32c] sm:$0xf0] }
 0x8bd   : > { %5977 = vmatpush.bf16.msrb.mxu2 %v11245_v13  ;;  %v11120_v13 = vld [vmem:[%s14372_s21 + $0x148] sm:$0xf] }
 0x8be   : > { %6013 = vmatpush.bf16.msra.mxu0 %v11025_v42  ;;  %5959 = vmatpush.bf16.msrb.mxu1 %v11101_v53  ;;  %v11281_v42 = vor.u32 %v12961_v18, %v11280_v63  ;;  %v12921_v53 = vld [vmem:[%s14372_s21 + $0x154] sm:$0xf0]  ;;  %v11317_v63 = vor.u32 %v12967_v50, %v11314_v16  ;;  %v12963_v18 = vld [vmem:[%s14372_s21 + $0x2ac] sm:$0xf]  ;;  %v11093_v50 = vor.u32 %v12911_v15, %v11090_v10 }
 0x8bf   : > { %v11121_v6 = vor.u32 %v12921_v53, %v11120_v13  ;;  %v12959_v13 = vld [vmem:[%s14372_s21 + $0x28c] sm:$0xf]  ;;  %v11282_v53 = vld [vmem:[%s14372_s21 + $0x298] sm:$0xf0] }
 0x8c0   : > { %v11285_v26 = vor.u32 %v12959_v13, %v11282_v53  ;;  %v12990_v13 = vld [vmem:[%s14372_s21 + $0x384] sm:$0xf]  ;;  %v11402_v53 = vld [vmem:[%s14372_s21 + $0x390] sm:$0xf0] }
 0x8c1   : > { %5942 = vmatmul.bf16.vlgmr.msrb.gmra.mxu0 %v15614_v0  ;;  %5978 = vmatpush.bf16.msrb.mxu2 %v11229_v40  ;;  %v11029_v40 = vor.u32 %v12895_v51, %v11026_v56  ;;  %v13000_v51 = vld [vmem:[%s14372_s21 + $0x3cc] sm:$0xf0] }
 0x8c2   : > { %6014 = vmatpush.bf16.msra.mxu0 %v11009_v43  ;;  %5960 = vmatpush.bf16.msrb.mxu1 %v11085_v29  ;;  %v11265_v43 = vor.u32 %v12957_v62, %v11264_v41  ;;  %v12891_v29 = vld [vmem:[%s14372_s21 + $0x6c] sm:$0xf]  ;;  %v11154_v41 = vld [vmem:[%s14372_s21 + $0x198] sm:$0xf0]  ;;  %v11301_v62 = vor.u32 %v12963_v18, %v11298_v60  ;;  %v11450_v60 = vld [vmem:[%s14372_s21 + $0x3f0] sm:$0xf0] }
 0x8c3   : > { %v11013_v20 = vor.u32 %v12891_v29, %v11010_v25  ;;  %v12996_v29 = vld [vmem:[%s14372_s21 + $0x3ac] sm:$0xf0] }
 0x8c5   : > { %5890 = vmatmul.bf16.gmra.mxu1 %v15669_v59  ;;  %5979 = vmatpush.bf16.msrb.mxu2 %v11213_v3  ;;  %v12939_v3 = vld [vmem:[%s14372_s21 + $0x1ec] sm:$0xf] }
 0x8c6   : > { %6015 = vmatpush.bf16.msra.mxu0 %v10993_v23  ;;  %6029 = vmatpush.bf16.msra.mxu1 %v11201_v39  ;;  %v11105_v23 = vor.u32 %v12917_v37, %v11104_v14  ;;  %v12949_v39 = vld [vmem:[%s14372_s21 + $0x234] sm:$0xf0]  ;;  %v12955_v14 = vld [vmem:[%s14372_s21 + $0x26c] sm:$0xf]  ;;  %v11266_v37 = vld [vmem:[%s14372_s21 + $0x278] sm:$0xf0] }
 0x8c8   : > { %5909 = vmatmul.bf16.gmra.mxu2 %v15707_v36 }
 0x8c9   : > { %6048 = vmatpush.bf16.msra.mxu2 %v11329_v27  ;;  %v11233_v27 = vor.u32 %v12949_v39, %v11232_v55  ;;  %v11122_v55 = vld [vmem:[%s14372_s21 + $0x158] sm:$0xf0]  ;;  %v11269_v39 = vor.u32 %v12955_v14, %v11266_v37  ;;  %v12978_v14 = vld [vmem:[%s14372_s21 + $0x324] sm:$0xf]  ;;  %v11354_v37 = vld [vmem:[%s14372_s21 + $0x330] sm:$0xf0] }
 0x8ca   : > { %6016 = vmatpush.bf16.msra.mxu0 %v10977_v47  ;;  %6030 = vmatpush.bf16.msra.mxu1 %v11185_v21  ;;  %v11202_v47 = vld [vmem:[%s14372_s21 + $0x1f8] sm:$0xf0]  ;;  %v12945_v21 = vld [vmem:[%s14372_s21 + $0x214] sm:$0xf0] }
 0x8cb   : > { %v11205_v61 = vor.u32 %v12939_v3, %v11202_v47  ;;  %v12915_v47 = vld [vmem:[%s14372_s21 + $0x12c] sm:$0xf] }
 0x8cd   : > { %6049 = vmatpush.bf16.msra.mxu2 %v11313_v48  ;;  %v11186_v48 = vld [vmem:[%s14372_s21 + $0x1d8] sm:$0xf0] }
 0x8ce   : > { %6017 = vmatpush.bf16.msra.mxu0 %v10961_v8  ;;  %6031 = vmatpush.bf16.msra.mxu1 %v11169_v31  ;;  %v12935_v8 = vld [vmem:[%s14372_s21 + $0x1cc] sm:$0xf]  ;;  %v11217_v31 = vor.u32 %v12945_v21, %v11216_v58  ;;  %v11234_v21 = vld [vmem:[%s14372_s21 + $0x238] sm:$0xf0] }
 0x8cf   : > { %v12947_v58 = vld [vmem:[%s14372_s21 + $0x22c] sm:$0xf] }
 0x8d1   : > { %6050 = vmatpush.bf16.msra.mxu2 %v11297_v30  ;;  %5947 = vmatmul.bf16.gmra.mxu0 %v15617_v11  ;;  %v12931_v30 = vld [vmem:[%s14372_s21 + $0x1ac] sm:$0xf] }
 0x8d2   : > { %6086 = vmatpush.bf16.msrb.mxu0 %v11077_v28  ;;  %6032 = vmatpush.bf16.msra.mxu1 %v11153_v54  ;;  %v11189_v28 = vor.u32 %v12935_v8, %v11186_v48  ;;  %v11170_v54 = vld [vmem:[%s14372_s21 + $0x1b8] sm:$0xf0]  ;;  %v11237_v8 = vor.u32 %v12947_v58, %v11234_v21  ;;  %v12943_v48 = vld [vmem:[%s14372_s21 + $0x20c] sm:$0xf] }
 0x8d3   : > { %v11173_v24 = vor.u32 %v12931_v30, %v11170_v54  ;;  %v11353_v30 = vor.u32 %v12980_v46, %v11352_v44  ;;  %v11336_v54 = vld [vmem:[%s14372_s21 + $0x300] sm:$0xf] }
 0x8d5   : > { %6051 = vmatpush.bf16.msra.mxu2 %v11281_v42  ;;  %5961 = vmatmul.bf16.vlgmr.msrb.gmra.mxu1 %v15667_v1 }
 0x8d6   : > { %6087 = vmatpush.bf16.msrb.mxu0 %v11061_v32  ;;  %6033 = vmatpush.bf16.msra.mxu1 %v11137_v4  ;;  %v11448_v32 = vld [vmem:[%s14372_s21 + $0x3e0] sm:$0xf]  ;;  %v12927_v4 = vld [vmem:[%s14372_s21 + $0x18c] sm:$0xf] }
 0x8d7   : > { %v11449_v42 = vor.u32 %v13004_v33, %v11448_v32  ;;  %v11157_v56 = vor.u32 %v12927_v4, %v11154_v41  ;;  %v12998_v33 = vld [vmem:[%s14372_s21 + $0x3c4] sm:$0xf]  ;;  %v11418_v41 = vld [vmem:[%s14372_s21 + $0x3b0] sm:$0xf0] }
 0x8d8   : > { %5980 = vmatmul.bf16.vlgmr.msrb.gmra.mxu2 %v15705_v2  ;;  %v12994_v4 = vld [vmem:[%s14372_s21 + $0x3a4] sm:$0xf] }
 0x8d9   : > { %6052 = vmatpush.bf16.msra.mxu2 %v11265_v43  ;;  %5915 = vmatpush.bf16.msra.mxu3 %v11449_v42 }
 0x8da   : > { %6088 = vmatpush.bf16.msrb.mxu0 %v11045_v19  ;;  %6034 = vmatpush.bf16.msra.mxu1 %v11121_v6  ;;  %v11432_v19 = vld [vmem:[%s14372_s21 + $0x3c0] sm:$0xf]  ;;  %v12923_v6 = vld [vmem:[%s14372_s21 + $0x16c] sm:$0xf] }
 0x8db   : > { %v11433_v43 = vor.u32 %v13000_v51, %v11432_v19  ;;  %v11141_v25 = vor.u32 %v12923_v6, %v11138_v7  ;;  %v11405_v19 = vor.u32 %v12990_v13, %v11402_v53  ;;  %v12982_v7 = vld [vmem:[%s14372_s21 + $0x344] sm:$0xf]  ;;  %v11458_v13 = vld [vmem:[%s14372_s21 + $0x3f8] sm:$0xf0] }
 0x8dd   : > { %6053 = vmatpush.bf16.msra.mxu2 %v11249_v22  ;;  %5916 = vmatpush.bf16.msra.mxu3 %v11433_v43  ;;  %v11386_v43 = vld [vmem:[%s14372_s21 + $0x370] sm:$0xf0] }
 0x8de   : > { %6089 = vmatpush.bf16.msrb.mxu0 %v11029_v40  ;;  %6035 = vmatpush.bf16.msra.mxu1 %v11105_v23  ;;  %v11416_v40 = vld [vmem:[%s14372_s21 + $0x3a0] sm:$0xf]  ;;  %v12919_v23 = vld [vmem:[%s14372_s21 + $0x14c] sm:$0xf] }
 0x8df   : > { %v11417_v22 = vor.u32 %v12996_v29, %v11416_v40  ;;  %v11125_v3 = vor.u32 %v12919_v23, %v11122_v55  ;;  %v11357_v40 = vor.u32 %v12978_v14, %v11354_v37  ;;  %v12974_v29 = vld [vmem:[%s14372_s21 + $0x304] sm:$0xf]  ;;  %v11456_v23 = vld [vmem:[%s14372_s21 + $0x3e8] sm:$0xf]  ;;  %v13005_v55 = vld [vmem:[%s14372_s21 + $0x3f4] sm:$0xf0] }
 0x8e0   : > { %v12991_v14 = vld [vmem:[%s14372_s21 + $0x38c] sm:$0xf]  ;;  %v11410_v37 = vld [vmem:[%s14372_s21 + $0x398] sm:$0xf0] }
 0x8e1   : > { %6054 = vmatpush.bf16.msra.mxu2 %v11233_v27  ;;  %6018 = vmatmul.bf16.vlgmr.msra.gmra.mxu0 %v15614_v0  ;;  %v11106_v27 = vld [vmem:[%s14372_s21 + $0x138] sm:$0xf0] }
 0x8e2   : > { %6090 = vmatpush.bf16.msrb.mxu0 %v11013_v20  ;;  %6036 = vmatpush.bf16.msra.mxu1 %v11089_v5  ;;  %v12951_v20 = vld [vmem:[%s14372_s21 + $0x24c] sm:$0xf]  ;;  %v11109_v9 = vor.u32 %v12915_v47, %v11106_v27  ;;  %v15996_v47 = vperm.slane %v15991_v52, 0  ;;  %v11424_v27 = vld [vmem:[%s14372_s21 + $0x3a8] sm:$0xf] }
 0x8e3   : > { %5917 = vmatpush.bf16.msra.mxu3 %v11417_v22  ;;  %v11253_v5 = vor.u32 %v12951_v20, %v11250_v34  ;;  %v11440_v34 = vld [vmem:[%s14372_s21 + $0x3c8] sm:$0xf] }
 0x8e5   : > { %6055 = vmatpush.bf16.msra.mxu2 %v11217_v31  ;;  %5966 = vmatmul.bf16.gmra.mxu1 %v15669_v59  ;;  %v11218_v31 = vld [vmem:[%s14372_s21 + $0x218] sm:$0xf0] }
 0x8e6   : > { %6091 = vmatpush.bf16.msrb.mxu0 %v10997_v12  ;;  %6105 = vmatpush.bf16.msrb.mxu1 %v11205_v61  ;;  %v11384_v12 = vld [vmem:[%s14372_s21 + $0x360] sm:$0xf]  ;;  %v12988_v61 = vld [vmem:[%s14372_s21 + $0x36c] sm:$0xf0]  ;;  %v11221_v16 = vor.u32 %v12943_v48, %v11218_v31  ;;  %v11392_v31 = vld [vmem:[%s14372_s21 + $0x368] sm:$0xf] }
 0x8e7   : > { %5918 = vmatpush.bf16.msra.mxu3 %v11401_v35  ;;  %v11385_v57 = vor.u32 %v12988_v61, %v11384_v12  ;;  %v13001_v35 = vld [vmem:[%s14372_s21 + $0x3d4] sm:$0xf0]  ;;  %v11408_v12 = vld [vmem:[%s14372_s21 + $0x388] sm:$0xf] }
 0x8e8   : > { %5985 = vmatmul.bf16.gmra.mxu2 %v15707_v36  ;;  %v12993_v61 = vld [vmem:[%s14372_s21 + $0x394] sm:$0xf0] }
 0x8e9   : > { %6124 = vmatpush.bf16.msrb.mxu2 %v11333_v38  ;;  %v11368_v38 = vld [vmem:[%s14372_s21 + $0x340] sm:$0xf]  ;;  %v11409_v10 = vor.u32 %v12993_v61, %v11408_v12 }
 0x8ea   : > { %6092 = vmatpush.bf16.msrb.mxu0 %v10981_v45  ;;  %6106 = vmatpush.bf16.msrb.mxu1 %v11189_v28  ;;  %v12984_v45 = vld [vmem:[%s14372_s21 + $0x34c] sm:$0xf0] }
 0x8eb   : > { %5919 = vmatpush.bf16.msra.mxu3 %v11385_v57  ;;  %v11369_v28 = vor.u32 %v12984_v45, %v11368_v38  ;;  %v12989_v38 = vld [vmem:[%s14372_s21 + $0x374] sm:$0xf0] }
 0x8ec   : > { %v11393_v45 = vor.u32 %v12989_v38, %v11392_v31 }
 0x8ed   : > { %6125 = vmatpush.bf16.msrb.mxu2 %v11317_v63  ;;  %v12976_v63 = vld [vmem:[%s14372_s21 + $0x30c] sm:$0xf0] }
 0x8ee   : > { %6093 = vmatpush.bf16.msrb.mxu0 %v10965_v17  ;;  %6107 = vmatpush.bf16.msrb.mxu1 %v11173_v24  ;;  %v11337_v18 = vor.u32 %v12976_v63, %v11336_v54  ;;  %v13002_v17 = vld [vmem:[%s14372_s21 + $0x3e4] sm:$0xf]  ;;  %v11360_v63 = vld [vmem:[%s14372_s21 + $0x328] sm:$0xf] }
 0x8ef   : > { %5920 = vmatpush.bf16.msra.mxu3 %v11369_v28  ;;  %v11453_v32 = vor.u32 %v13002_v17, %v11450_v60 }
 0x8f1   : > { %6126 = vmatpush.bf16.msrb.mxu2 %v11301_v62  ;;  %6023 = vmatmul.bf16.gmra.mxu0 %v15617_v11  ;;  %v11421_v62 = vor.u32 %v12994_v4, %v11418_v41 }
 0x8f2   : > { %6108 = vmatpush.bf16.msrb.mxu1 %v11157_v56  ;;  %v12986_v56 = vld [vmem:[%s14372_s21 + $0x364] sm:$0xf] }
 0x8f3   : > { %5921 = vmatpush.bf16.msra.mxu3 %v11353_v30  ;;  %v11389_v6 = vor.u32 %v12986_v56, %v11386_v43 }
 0x8f5   : > { %6127 = vmatpush.bf16.msrb.mxu2 %v11285_v26  ;;  %6037 = vmatmul.bf16.vlgmr.msra.gmra.mxu1 %v15667_v1 }
 0x8f6   : > { %6109 = vmatpush.bf16.msrb.mxu1 %v11141_v25  ;;  %v11338_v25 = vld [vmem:[%s14372_s21 + $0x310] sm:$0xf0] }
 0x8f7   : > { %5922 = vmatpush.bf16.msra.mxu3 %v11337_v18  ;;  %v12981_v18 = vld [vmem:[%s14372_s21 + $0x334] sm:$0xf0] }
 0x8f8   : > { %6056 = vmatmul.bf16.vlgmr.msra.gmra.mxu2 %v15705_v2  ;;  %v11361_v60 = vor.u32 %v12981_v18, %v11360_v63 }
 0x8f9   : > { %6128 = vmatpush.bf16.msrb.mxu2 %v11269_v39  ;;  %v11457_v39 = vor.u32 %v13005_v55, %v11456_v23  ;;  %v11378_v23 = vld [vmem:[%s14372_s21 + $0x358] sm:$0xf0] }
 0x8fa   : > { %6110 = vmatpush.bf16.msrb.mxu1 %v11125_v3 }
 0x8fb   : > { %5991 = vmatpush.bf16.msrb.mxu3 %v11453_v32 }
 0x8fd   : > { %6129 = vmatpush.bf16.msrb.mxu2 %v11253_v5  ;;  %v12997_v5 = vld [vmem:[%s14372_s21 + $0x3b4] sm:$0xf0] }
 0x8fe   : > { %6111 = vmatpush.bf16.msrb.mxu1 %v11109_v9 }
 0x901   : > { %6130 = vmatpush.bf16.msrb.mxu2 %v11237_v8  ;;  %6094 = vmatmul.bf16.vlgmr.msrb.gmra.mxu0 %v15614_v0  ;;  %v11434_v0 = vld [vmem:[%s14372_s21 + $0x3d0] sm:$0xf0] }
 0x902   : > { %6112 = vmatpush.bf16.msrb.mxu1 %v11093_v50  ;;  %v11437_v24 = vor.u32 %v12998_v33, %v11434_v0  ;;  %v11376_v50 = vld [vmem:[%s14372_s21 + $0x348] sm:$0xf] }
 0x903   : > { %v11344_v0 = vld [vmem:[%s14372_s21 + $0x308] sm:$0xf] }
 0x904   : > { %5992 = vmatpush.bf16.msrb.mxu3 %v11437_v24  ;;  %v12977_v24 = vld [vmem:[%s14372_s21 + $0x314] sm:$0xf0] }
 0x905   : > { %6131 = vmatpush.bf16.msrb.mxu2 %v11221_v16  ;;  %6042 = vmatmul.bf16.gmra.mxu1 %v15669_v59  ;;  %v12985_v16 = vld [vmem:[%s14372_s21 + $0x354] sm:$0xf0]  ;;  %v11345_v41 = vor.u32 %v12977_v24, %v11344_v0 }
 0x906   : > { %v11377_v30 = vor.u32 %v12985_v16, %v11376_v50 }
 0x908   : > { %6061 = vmatmul.bf16.gmra.mxu2 %v15707_v36  ;;  %5993 = vmatpush.bf16.msrb.mxu3 %v11421_v62  ;;  %v13003_v62 = vld [vmem:[%s14372_s21 + $0x3ec] sm:$0xf] }
 0x909   : > { %v11461_v53 = vor.u32 %v13003_v62, %v11458_v13 }
 0x90c   : > { %5994 = vmatpush.bf16.msrb.mxu3 %v11405_v19  ;;  %v12999_v19 = vld [vmem:[%s14372_s21 + $0x3cc] sm:$0xf] }
 0x90e   : > { %v5011_v42 = vpop.f32.mrf.mxu0 }
 0x910   : > { %5995 = vmatpush.bf16.msrb.mxu3 %v11389_v6 }
 0x911   : > { %6099 = vmatmul.bf16.gmra.mxu0 %v15617_v11  ;;  %v11370_v11 = vld [vmem:[%s14372_s21 + $0x350] sm:$0xf0] }
 0x912   : > { %v11373_v26 = vor.u32 %v12982_v7, %v11370_v11  ;;  %v12995_v7 = vld [vmem:[%s14372_s21 + $0x3ac] sm:$0xf]  ;;  %v11426_v11 = vld [vmem:[%s14372_s21 + $0x3b8] sm:$0xf0] }
 0x914   : > { %5996 = vmatpush.bf16.msrb.mxu3 %v11373_v26  ;;  %v11429_v26 = vor.u32 %v12995_v7, %v11426_v11  ;;  %v16089_v7 = vperm.slane %v15991_v52, 2 }
 0x915   : > { %6113 = vmatmul.bf16.vlgmr.msrb.gmra.mxu1 %v15667_v1 }
 0x916   : > { %v5013_v51 = vpop.f32.mrf.mxu0 }
 0x917   : > { %v11442_v51 = vld [vmem:[%s14372_s21 + $0x3d8] sm:$0xf0] }
 0x918   : > { %6132 = vmatmul.bf16.vlgmr.msrb.gmra.mxu2 %v15705_v2  ;;  %5997 = vmatpush.bf16.msrb.mxu3 %v11357_v40  ;;  %v11341_v2 = vor.u32 %v12974_v29, %v11338_v25  ;;  %v11445_v43 = vor.u32 %v12999_v19, %v11442_v51  ;;  %v11413_v40 = vor.u32 %v12991_v14, %v11410_v37  ;;  %v11394_v29 = vld [vmem:[%s14372_s21 + $0x378] sm:$0xf0] }
 0x91c   : > { %5998 = vmatpush.bf16.msrb.mxu3 %v11341_v2  ;;  %v12983_v2 = vld [vmem:[%s14372_s21 + $0x34c] sm:$0xf] }
 0x91d   : > { %v11381_v55 = vor.u32 %v12983_v2, %v11378_v23  ;;  %v16094_v2 = vperm.slane %v15991_v52, 3 }
 0x91e   : > { %v5867_v49 = vpop.f32.mrf.mxu0 }
 0x91f   : > { %v5868_v58 = vadd.f32 %v5867_v49, %v15996_v47  ;;  %v11362_v49 = vld [vmem:[%s14372_s21 + $0x338] sm:$0xf0] }
 0x922   : > { %v5030_v1 = vpop.f32.mrf.mxu1 }
 0x923   : > { %v15982_v22 = vpack.c.bf16 %v5030_v1, %v5011_v42  ;;  %v12987_v1 = vld [vmem:[%s14372_s21 + $0x36c] sm:$0xf] }
 0x924   : > { %v11397_v25 = vor.u32 %v12987_v1, %v11394_v29 }
 0x925   : > { %5923 = vmatmul.bf16.vlgmr.msra.gmra.mxu3 %v15982_v22  ;;  %6118 = vmatmul.bf16.gmra.mxu1 %v15669_v59  ;;  %v11441_v59 = vor.u32 %v13001_v35, %v11440_v34  ;;  %v12975_v34 = vld [vmem:[%s14372_s21 + $0x30c] sm:$0xf]  ;;  %v11346_v35 = vld [vmem:[%s14372_s21 + $0x318] sm:$0xf0] }
 0x926   : > { %6067 = vmatpush.bf16.msra.mxu3 %v11457_v39  ;;  %v16003_v8 = vpop.f32.mrf.mxu0  ;;  %v12979_v39 = vld [vmem:[%s14372_s21 + $0x32c] sm:$0xf] }
 0x928   : > { %6137 = vmatmul.bf16.gmra.mxu2 %v15707_v36  ;;  %v11425_v36 = vor.u32 %v12997_v5, %v11424_v27 }
 0x92a   : > { %v5032_v20 = vpop.f32.mrf.mxu1  ;;  %6068 = vmatpush.bf16.msra.mxu3 %v11441_v59 }
 0x92b   : > { %v5049_v3 = vpop.f32.mrf.mxu2  ;;  %v11365_v20 = vor.u32 %v12979_v39, %v11362_v49 }
 0x92e   : > { %6069 = vmatpush.bf16.msra.mxu3 %v11425_v36  ;;  %v5872_v17 = vpop.f32.mrf.mxu0 }
 0x92f   : > { %v5873_v32 = vadd.f32 %v5872_v17, %v15996_v47 }
 0x932   : > { %v5886_v21 = vpop.f32.mrf.mxu1  ;;  %6070 = vmatpush.bf16.msra.mxu3 %v11409_v10 }
 0x933   : > { %v5887_v57 = vadd.f32 %v5886_v21, %v5868_v58  ;;  %v5051_v9 = vpop.f32.mrf.mxu2  ;;  %v5068_v15 = vpop.f32.mrf.mxu3 }
 0x934   : > { %v16005_v48 = vpack.c.bf16 %v5068_v15, %v5049_v3  ;;  %v11349_v3 = vor.u32 %v12975_v34, %v11346_v35 }
 0x936   : > { %5928 = vmatmul.bf16.gmra.mxu3 %v16005_v48  ;;  %v16043_v59 = vpop.f32.mrf.mxu0 }
 0x937   : > { %6071 = vmatpush.bf16.msra.mxu3 %v11393_v45 }
 0x93a   : > { %v16010_v28 = vpop.f32.mrf.mxu1 }
 0x93b   : > { %v5070_v44 = vpop.f32.mrf.mxu3  ;;  %v5905_v46 = vpop.f32.mrf.mxu2  ;;  %6072 = vmatpush.bf16.msra.mxu3 %v11377_v30 }
 0x93c   : > { %v5906_v54 = vadd.f32 %v5905_v46, %v5887_v57 }
 0x93e   : > { %v5943_v21 = vpop.f32.mrf.mxu0 }
 0x93f   : > { %6073 = vmatpush.bf16.msra.mxu3 %v11361_v60 }
 0x942   : > { %v5891_v33 = vpop.f32.mrf.mxu1 }
 0x943   : > { %v5892_v42 = vadd.f32 %v5891_v33, %v5873_v32  ;;  %v16019_v4 = vpop.f32.mrf.mxu2  ;;  %6074 = vmatpush.bf16.msra.mxu3 %v11345_v41 }
 0x946   : > { %5999 = vmatmul.bf16.vlgmr.msrb.gmra.mxu3 %v15982_v22  ;;  %v5945_v9 = vpop.f32.mrf.mxu0 }
 0x947   : > { %6143 = vmatpush.bf16.msrb.mxu3 %v11461_v53 }
 0x94a   : > { %v16045_v27 = vpop.f32.mrf.mxu1 }
 0x94b   : > { %v5910_v56 = vpop.f32.mrf.mxu2  ;;  %6144 = vmatpush.bf16.msrb.mxu3 %v11445_v43  ;;  %v16084_v43 = vperm.slane %v15991_v52, 1 }
 0x94c   : > { %v5911_v6 = vadd.f32 %v5910_v56, %v5892_v42 }
 0x94d   : > { %v5946_v49 = vadd.f32 %v5945_v9, %v16084_v43 }
 0x94f   : > { %6145 = vmatpush.bf16.msrb.mxu3 %v11429_v26  ;;  %v5944_v26 = vadd.f32 %v5943_v21, %v16084_v43 }
 0x952   : > { %v5962_v12 = vpop.f32.mrf.mxu1 }
 0x953   : > { %6146 = vmatpush.bf16.msrb.mxu3 %v11413_v40  ;;  %v16047_v5 = vpop.f32.mrf.mxu2  ;;  %v5963_v37 = vadd.f32 %v5962_v12, %v5944_v26 }
 0x956   : > { %6004 = vmatmul.bf16.gmra.mxu3 %v16005_v48 }
 0x957   : > { %6147 = vmatpush.bf16.msrb.mxu3 %v11397_v25 }
 0x95a   : > { %v5964_v15 = vpop.f32.mrf.mxu1 }
 0x95b   : > { %6148 = vmatpush.bf16.msrb.mxu3 %v11381_v55  ;;  %v5981_v61 = vpop.f32.mrf.mxu2 }
 0x95c   : > { %v5982_v29 = vadd.f32 %v5981_v61, %v5963_v37  ;;  %v13471_v61 = vld [vmem:[#allocation2] sm:$0xff] }
 0x95f   : > { %6149 = vmatpush.bf16.msrb.mxu3 %v11365_v20 }
 0x962   : > { %v16057_v38 = vpop.f32.mrf.mxu1 }
 0x963   : > { %6150 = vmatpush.bf16.msrb.mxu3 %v11349_v3  ;;  %v5983_v10 = vpop.f32.mrf.mxu2  ;;  %v5870_v3 = vadd.f32 %v16003_v8, %v15996_v47 }
 0x966   : > { %6075 = vmatmul.bf16.vlgmr.msra.gmra.mxu3 %v15982_v22 }
 0x96a   : > { %v16065_v46 = vpop.f32.mrf.mxu1 }
 0x96b   : > { %v16061_v50 = vpop.f32.mrf.mxu2 }
 0x972   : > { %v6038_v18 = vpop.f32.mrf.mxu1 }
 0x973   : > { %v16067_v30 = vpop.f32.mrf.mxu2 }
 0x976   : > { %6080 = vmatmul.bf16.gmra.mxu3 %v16005_v48 }
 0x97a   : > { %v6040_v33 = vpop.f32.mrf.mxu1 }
 0x97b   : > { %v6057_v17 = vpop.f32.mrf.mxu2 }
 0x982   : > { %v16073_v41 = vpop.f32.mrf.mxu1 }
 0x983   : > { %v6059_v0 = vpop.f32.mrf.mxu2 }
 0x986   : > { %6151 = vmatmul.bf16.vlgmr.msrb.gmra.mxu3 %v15982_v22 }
 0x98a   : > { %v16079_v51 = vpop.f32.mrf.mxu1 }
 0x98b   : > { %v16075_v13 = vpop.f32.mrf.mxu2 }
 0x992   : > { %v6114_v14 = vpop.f32.mrf.mxu1 }
 0x993   : > { %v16081_v56 = vpop.f32.mrf.mxu2 }
 0x996   : > { %6156 = vmatmul.bf16.gmra.mxu3 %v16005_v48  ;;  %v16055_v48 = vpop.f32.mrf.mxu0 }
 0x99b   : > { %v6133_v1 = vpop.f32.mrf.mxu2 }
 0x99e   : > { %v16063_v16 = vpop.f32.mrf.mxu0 }
 0x9a6   : > { %v6019_v63 = vpop.f32.mrf.mxu0 }
 0x9a7   : > { %v6020_v40 = vadd.f32 %v6019_v63, %v16089_v7 }
 0x9a8   : > { %v5924_v36 = vpop.f32.mrf.mxu3 }
 0x9a9   : > { %v16049_v58 = vadd.f32 %v5924_v36, %v5906_v54  ;;  %v6039_v25 = vadd.f32 %v6038_v18, %v6020_v40  ;;  %v5965_v36 = vadd.f32 %v5964_v15, %v5946_v49  ;;  %v6135_v15 = vpop.f32.mrf.mxu2  ;;  %v13475_v49 = vld [vmem:[#allocation2 + $0x68] sm:$0xff] }
 0x9ab   : > { %v6058_v55 = vadd.f32 %v6057_v17, %v6039_v25  ;;  %v5984_v63 = vadd.f32 %v5983_v10, %v5965_v36  ;;  %v13472_v17 = vld [vmem:[#allocation2 + $0x30] sm:$0xff]  ;;  %v13477_v36 = vld [vmem:[#allocation2 + $0x8] sm:$0xff] }
 0x9ae   : > { %v6021_v32 = vpop.f32.mrf.mxu0 }
 0x9af   : > { %v6022_v21 = vadd.f32 %v6021_v32, %v16089_v7 }
 0x9b0   : > { %v16051_v57 = vpop.f32.mrf.mxu3 }
 0x9b1   : > { %v6041_v18 = vadd.f32 %v6040_v33, %v6022_v21  ;;  %v5949_v33 = vadd.f32 %v16055_v48, %v16084_v43 }
 0x9b6   : > { %v6024_v42 = vpop.f32.mrf.mxu0 }
 0x9b9   : > { %v5929_v22 = vpop.f32.mrf.mxu3 }
 0x9ba   : > { %v16053_v31 = vadd.f32 %v5929_v22, %v5911_v6  ;;  %v5889_v22 = vadd.f32 %v16010_v28, %v5870_v3 }
 0x9bc   : > { %v5908_v8 = vadd.f32 %v16019_v4, %v5889_v22 }
 0x9be   : > { %v16077_v53 = vpop.f32.mrf.mxu0 }
 0x9c1   : > { %v16059_v45 = vpop.f32.mrf.mxu3 }
 0x9c6   : > { %v6095_v11 = vpop.f32.mrf.mxu0 }
 0x9c7   : > { %v6096_v20 = vadd.f32 %v6095_v11, %v16094_v2  ;;  %v16107_v11 = vadd.f32 %v13472_v17, %v16049_v58  ;;  %v5927_v58 = vadd.f32 %v16051_v57, %v5908_v8  ;;  %v6027_v8 = vadd.f32 %v16077_v53, %v16089_v7 }
 0x9c9   : > { %v6000_v44 = vpop.f32.mrf.mxu3  ;;  %v6115_v12 = vadd.f32 %v6114_v14, %v6096_v20  ;;  %v6060_v14 = vadd.f32 %v6059_v0, %v6041_v18  ;;  %v5968_v0 = vadd.f32 %v16057_v38, %v5949_v33 }
 0x9ca   : > { %v6001_v39 = vadd.f32 %v6000_v44, %v5982_v29  ;;  %v6116_v44 = vpop.f32.mrf.mxu1  ;;  %v13474_v29 = vld [vmem:[#allocation2 + $0x18] sm:$0xff] }
 0x9cb   : > { %v6134_v9 = vadd.f32 %v6133_v1, %v6115_v12 }
 0x9cc   : > { %v16103_v52 = vadd.f32 %v13471_v61, %v6001_v39 }
 0x9ce   : > { %v6097_v34 = vpop.f32.mrf.mxu0  ;;  %v6180_v37 = vadd.f32 %v16103_v52, %v16107_v11 }
 0x9cf   : > { %v6098_v40 = vadd.f32 %v6097_v34, %v16094_v2  ;;  %v5987_v34 = vadd.f32 %v16061_v50, %v5968_v0 }
 0x9d1   : > { %v6002_v54 = vpop.f32.mrf.mxu3 }
 0x9d2   : > { %v6003_v28 = vadd.f32 %v6002_v54, %v5984_v63  ;;  %v6117_v54 = vadd.f32 %v6116_v44, %v6098_v40  ;;  %v6119_v38 = vpop.f32.mrf.mxu1  ;;  %v6138_v63 = vpop.f32.mrf.mxu2 }
 0x9d4   : > { %v16123_v20 = vadd.f32 %v13475_v49, %v6003_v28 }
 0x9d6   : > { %v6100_v39 = vpop.f32.mrf.mxu0 }
 0x9d7   : > { %v6101_v44 = vadd.f32 %v6100_v39, %v16094_v2  ;;  %v13483_v39 = vld [vmem:[#allocation2 + $0x70] sm:$0xff] }
 0x9d9   : > { %v16069_v60 = vpop.f32.mrf.mxu3 }
 0x9da   : > { %v6006_v61 = vadd.f32 %v16069_v60, %v5987_v34  ;;  %v5875_v60 = vadd.f32 %v16043_v59, %v15996_v47  ;;  %v13480_v47 = vld [vmem:[#allocation2 + $0x40] sm:$0xff]  ;;  %v13485_v34 = vld [vmem:[#allocation2 + $0x78] sm:$0xff] }
 0x9db   : > { %v16155_v59 = vadd.f32 %v13480_v47, %v16053_v31 }
 0x9de   : > { %v6102_v28 = vpop.f32.mrf.mxu0 }
 0x9e1   : > { %v16071_v24 = vpop.f32.mrf.mxu3 }
 0x9e9   : > { %v6076_v62 = vpop.f32.mrf.mxu3 }
 0x9ea   : > { %v6077_v35 = vadd.f32 %v6076_v62, %v6058_v55  ;;  %v13473_v62 = vld [vmem:[#allocation2 + $0x58] sm:$0xff]  ;;  %v6025_v55 = vadd.f32 %v6024_v42, %v16089_v7 }
 0x9ec   : > { %v16109_v26 = vadd.f32 %v13473_v62, %v6077_v35  ;;  %v6044_v57 = vadd.f32 %v16073_v41, %v6025_v55  ;;  %v13476_v35 = vld [vmem:[#allocation2 + $0x50] sm:$0xff]  ;;  %v5951_v41 = vadd.f32 %v16063_v16, %v16084_v43  ;;  %v13479_v16 = vld [vmem:[#allocation2 + $0x20] sm:$0xff]  ;;  %v6140_v55 = vpop.f32.mrf.mxu2 }
 0x9ed   : > { %v16128_v3 = vadd.f32 %v13476_v35, %v5927_v58  ;;  %v16148_v43 = vadd.f32 %v13479_v16, %v6006_v61  ;;  %v6103_v58 = vadd.f32 %v6102_v28, %v16094_v2  ;;  %v13486_v35 = vld [vmem:[#allocation2 + $0x28] sm:$0xff] }
 0x9ee   : > { %v6181_v4 = vadd.f32 %v6180_v37, %v16109_v26  ;;  %v6063_v12 = vadd.f32 %v16075_v13, %v6044_v57  ;;  %v5970_v13 = vadd.f32 %v16065_v46, %v5951_v41  ;;  %v6046_v37 = vadd.f32 %v16079_v51, %v6027_v8  ;;  %v13481_v46 = vld [vmem:[#allocation2 + $0x10] sm:$0xff] }
 0x9ef   : > { %v6185_v50 = vadd.f32 %v16123_v20, %v16128_v3 }
 0x9f0   : > { %v6065_v40 = vadd.f32 %v16081_v56, %v6046_v37 }
 0x9f1   : > { %v6078_v19 = vpop.f32.mrf.mxu3 }
 0x9f2   : > { %v6079_v1 = vadd.f32 %v6078_v19, %v6060_v14  ;;  %v6136_v19 = vadd.f32 %v6135_v15, %v6117_v54  ;;  %v6120_v15 = vadd.f32 %v6119_v38, %v6101_v44  ;;  %v5989_v14 = vadd.f32 %v16067_v30, %v5970_v13 }
 0x9f4   : > { %v16130_v21 = vadd.f32 %v13477_v36, %v6079_v1  ;;  %v6008_v30 = vadd.f32 %v16071_v24, %v5989_v14  ;;  %v6121_v1 = vpop.f32.mrf.mxu1 }
 0x9f5   : > { %v6122_v56 = vadd.f32 %v6121_v1, %v6103_v58 }
 0x9f6   : > { %v6186_v62 = vadd.f32 %v6185_v50, %v16130_v21  ;;  %v16170_v54 = vadd.f32 %v13483_v39, %v6008_v30 }
 0x9f7   : > { %v6141_v49 = vadd.f32 %v6140_v55, %v6122_v56 }
 0x9f9   : > { %v16086_v6 = vpop.f32.mrf.mxu3 }
 0x9fa   : > { %v6082_v18 = vadd.f32 %v16086_v6, %v6063_v12  ;;  %v5894_v6 = vadd.f32 %v16045_v27, %v5875_v60  ;;  %v6190_v27 = vadd.f32 %v16148_v43, %v16155_v59  ;;  %v14042_v12 = vmov 512.0  }
 0x9fb   : > { %13451 = vrcp.f32 %v14042_v12  ;;  %v11704_v12 = vld [vmem:[%s14389_s16 + $0x1e0] sm:$0xf] }
 0x9fc   : > { %v16157_v53 = vadd.f32 %v13481_v46, %v6082_v18  ;;  %v5913_v7 = vadd.f32 %v16047_v5, %v5894_v6 }
 0x9fe   : > { %v5932_v31 = vadd.f32 %v16059_v45, %v5913_v7  ;;  %v6191_v5 = vadd.f32 %v6190_v27, %v16157_v53 }
 0xa01   : > { %v16096_v23 = vpop.f32.mrf.mxu3  ;;  %v13452_v61 = vpop.eup %13451 }
 0xa02   : > { %vm6205_vm2 = vweird.f32 %v13452_v61 }
 0xa09   : > { %v6152_v32 = vpop.f32.mrf.mxu3 }
 0xa0a   : > { %v6153_v10 = vadd.f32 %v6152_v32, %v6134_v9  ;;  %v13478_v9 = vld [vmem:[#allocation2 + $0x48] sm:$0xff] }
 0xa0c   : > { %v16118_v25 = vadd.f32 %v13474_v29, %v6153_v10  ;;  %v6139_v10 = vadd.f32 %v6138_v63, %v6120_v15  ;;  %v6084_v29 = vadd.f32 %v16096_v23, %v6065_v40 }
 0xa0e   : > { %v6182_v48 = vadd.f32 %v6181_v4, %v16118_v25  ;;  %v13482_v4 = vld [vmem:[#allocation2 + $0x38] sm:$0xff]  ;;  %v16175_v45 = vadd.f32 %v13485_v34, %v6084_v29 }
 0xa10   : > { %6183 = vadd.xlane.f32.xlu2 %v6182_v48  ;;  %v13484_v48 = vld [vmem:[#allocation2 + $0x60] sm:$0xff] }
 0xa11   : > { %v6154_v42 = vpop.f32.mrf.mxu3  ;;  %v16173_v2 = vadd.f32 %v13484_v48, %v5932_v31 }
 0xa12   : > { %v6155_v22 = vadd.f32 %v6154_v42, %v6136_v19 }
 0xa13   : > { %v6195_v19 = vadd.f32 %v16170_v54, %v16173_v2 }
 0xa14   : > { %v16140_v17 = vadd.f32 %v13478_v9, %v6155_v22  ;;  %v6201_v22 = vmul.f32 512.0, %v13452_v61 }
 0xa15   : > { %v6196_v38 = vadd.f32 %v6195_v19, %v16175_v45  ;;  %v11832_v19 = vld [vmem:[%s14389_s16 + $0x2e0] sm:$0xf] }
 0xa16   : > { %v6187_v32 = vadd.f32 %v6186_v62, %v16140_v17  ;;  %v6202_v50 = vsub.f32 1.0, %v6201_v22 }
 0xa18   : > { %6188 = vadd.xlane.f32.xlu0 %v6187_v32  ;;  %v6203_v41 = vmul.f32 %v13452_v61, %v6202_v50 }
 0xa19   : > { %v6157_v33 = vpop.f32.mrf.mxu3 }
 0xa1a   : > { %v6158_v51 = vadd.f32 %v6157_v33, %v6139_v10  ;;  %v6204_v63 = vadd.f32 %v13452_v61, %v6203_v41  ;;  %v11960_v41 = vld [vmem:[%s14389_s16 + $0x3e0] sm:$0xf] }
 0xa1c   : > { %v16167_v0 = vadd.f32 %v13482_v4, %v6158_v51  ;;  %v16180_v44 = vsel %vm6205_vm2, %v13452_v61, %v6204_v63  ;;  %v13068_v61 = vld [vmem:[%s14389_s16 + $0x1ec] sm:$0xf0] }
 0xa1d   : > { %17691 = vst [vmem:[#allocation45_spill] sm:$0xff] %v16180_v44  ;;  %v11705_v50 = vor.u32 %v13068_v61, %v11704_v12  ;;  %v13132_v63 = vld [vmem:[%s14389_s16 + $0x3ec] sm:$0xf0]  ;;  %v11640_v61 = vld [vmem:[%s14389_s16 + $0x160] sm:$0xf] }
 0xa1e   : > { %v6192_v24 = vadd.f32 %v6191_v5, %v16167_v0  ;;  %v13020_v12 = vld [vmem:[%s14389_s16 + $0x6c] sm:$0xf0] }
 0xa1f   : > { %7182 = vmatpush.bf16.msra.mxu1 %v11705_v50 }
 0xa20   : > { %6193 = vadd.xlane.f32.xlu1 %v6192_v24 }
 0xa21   : > { %v6159_v23 = vpop.f32.mrf.mxu3 }
 0xa22   : > { %v6160_v57 = vadd.f32 %v6159_v23, %v6141_v49 }
 0xa24   : > { %v6177_v36 = vadd.f32 %v13486_v35, %v6160_v57  ;;  %v13100_v35 = vld [vmem:[%s14389_s16 + $0x2ec] sm:$0xf0] }
 0xa26   : > { %v6197_v42 = vadd.f32 %v6196_v38, %v6177_v36  ;;  %v11833_v38 = vor.u32 %v13100_v35, %v11832_v19  ;;  %v11768_v35 = vld [vmem:[%s14389_s16 + $0x260] sm:$0xf] }
 0xa28   : > { %6198 = vadd.xlane.f32.xlu2 %v6197_v42  ;;  %v13036_v42 = vld [vmem:[%s14389_s16 + $0xec] sm:$0xf0]  ;;  %7201 = vmatpush.bf16.msra.mxu2 %v11833_v38  ;;  %v11512_v38 = vld [vmem:[%s14389_s16 + $0x60] sm:$0xf] }
 0xa29   : > { %v11513_v50 = vor.u32 %v13020_v12, %v11512_v38  ;;  %v13098_v12 = vld [vmem:[%s14389_s16 + $0x2e4] sm:$0xf] }
 0xa83   : > { %v6184_v18 = vpop.xlane.xlu2 %6183 }
 0xa84   : > { %v6207_v9 = vmul.f32 %v16180_v44, %v6184_v18  ;;  %v11961_v18 = vor.u32 %v13132_v63, %v11960_v41  ;;  %v11896_v63 = vld [vmem:[%s14389_s16 + $0x360] sm:$0xf] }
 0xa86   : > { %v16184_v62 = vsub.f32 %v16107_v11, %v6207_v9  ;;  %v16187_v60 = vsub.f32 %v16103_v52, %v6207_v9  ;;  %v16190_v13 = vsub.f32 %v16109_v26, %v6207_v9  ;;  %v16193_v8 = vsub.f32 %v16118_v25, %v6207_v9  ;;  %v11816_v9 = vld [vmem:[%s14389_s16 + $0x2c0] sm:$0xf]  ;;  %7220 = vmatpush.bf16.msra.mxu3 %v11961_v18  ;;  %v13116_v18 = vld [vmem:[%s14389_s16 + $0x36c] sm:$0xf0] }
 0xa88   : > { %v6227_v15 = vmul.f32 %v16184_v62, %v16184_v62  ;;  %v6228_v16 = vmul.f32 %v16187_v60, %v16187_v60  ;;  %v6229_v32 = vmul.f32 %v16190_v13, %v16190_v13  ;;  %v6230_v26 = vmul.f32 %v16193_v8, %v16193_v8 }
 0xa8a   : > { %v6243_v11 = vadd.f32 %v6228_v16, %v6227_v15  ;;  %v13096_v15 = vld [vmem:[%s14389_s16 + $0x2cc] sm:$0xf0]  ;;  %v11560_v16 = vld [vmem:[%s14389_s16 + $0xc0] sm:$0xf] }
 0xa8b   : > { %v6189_v6 = vpop.xlane.xlu0 %6188 }
 0xa8c   : > { %v6208_v52 = vmul.f32 %v16180_v44, %v6189_v6  ;;  %v6244_v14 = vadd.f32 %v6243_v11, %v6229_v32  ;;  %v11817_v32 = vor.u32 %v13096_v15, %v11816_v9  ;;  %v13032_v11 = vld [vmem:[%s14389_s16 + $0xcc] sm:$0xf0]  ;;  %v11688_v6 = vld [vmem:[%s14389_s16 + $0x1c0] sm:$0xf]  ;;  %v11897_v9 = vor.u32 %v13116_v18, %v11896_v63  ;;  %v11578_v63 = vld [vmem:[%s14389_s16 + $0xf0] sm:$0xf0] }
 0xa8d   : > { %v11752_v15 = vld [vmem:[%s14389_s16 + $0x240] sm:$0xf]  ;;  %v13066_v18 = vld [vmem:[%s14389_s16 + $0x1e4] sm:$0xf] }
 0xa8e   : > { %v16205_v25 = vsub.f32 %v16128_v3, %v6208_v52  ;;  %v16208_v37 = vsub.f32 %v16123_v20, %v6208_v52  ;;  %v6245_v28 = vadd.f32 %v6244_v14, %v6230_v26  ;;  %v16211_v10 = vsub.f32 %v16130_v21, %v6208_v52  ;;  %7202 = vmatpush.bf16.msra.mxu2 %v11817_v32  ;;  %v11496_v32 = vld [vmem:[%s14389_s16 + $0x40] sm:$0xf] }
 0xa8f   : > { %v16214_v47 = vsub.f32 %v16140_v17, %v6208_v52  ;;  %v13064_v52 = vld [vmem:[%s14389_s16 + $0x1cc] sm:$0xf0]  ;;  %v11561_v26 = vor.u32 %v13032_v11, %v11560_v16 }
 0xa90   : > { %6246 = vadd.xlane.f32.xlu0 %v6245_v28  ;;  %v6231_v46 = vmul.f32 %v16205_v25, %v16205_v25  ;;  %v6232_v7 = vmul.f32 %v16208_v37, %v16208_v37  ;;  %v6233_v3 = vmul.f32 %v16211_v10, %v16211_v10  ;;  %v11689_v14 = vor.u32 %v13064_v52, %v11688_v6  ;;  %v11944_v28 = vld [vmem:[%s14389_s16 + $0x3c0] sm:$0xf]  ;;  %v13080_v16 = vld [vmem:[%s14389_s16 + $0x24c] sm:$0xf0] }
 0xa91   : > { %v6234_v21 = vmul.f32 %v16214_v47, %v16214_v47  ;;  %v11753_v11 = vor.u32 %v13080_v16, %v11752_v15  ;;  %v13016_v6 = vld [vmem:[%s14389_s16 + $0x4c] sm:$0xf0]  ;;  %v11624_v52 = vld [vmem:[%s14389_s16 + $0x140] sm:$0xf] }
 0xa92   : > { %v6248_v33 = vadd.f32 %v6232_v7, %v6231_v46  ;;  %v13128_v46 = vld [vmem:[%s14389_s16 + $0x3cc] sm:$0xf0]  ;;  %7183 = vmatpush.bf16.msra.mxu1 %v11689_v14  ;;  %v11497_v14 = vor.u32 %v13016_v6, %v11496_v32  ;;  %v11962_v6 = vld [vmem:[%s14389_s16 + $0x3f0] sm:$0xf0] }
 0xa93   : > { %v6194_v20 = vpop.xlane.xlu1 %6193  ;;  %v11945_v7 = vor.u32 %v13128_v46, %v11944_v28  ;;  %v11880_v46 = vld [vmem:[%s14389_s16 + $0x340] sm:$0xf] }
 0xa94   : > { %v6209_v40 = vmul.f32 %v16180_v44, %v6194_v20  ;;  %v6249_v27 = vadd.f32 %v6248_v33, %v6233_v3  ;;  %v11800_v3 = vld [vmem:[%s14389_s16 + $0x2a0] sm:$0xf]  ;;  %v13092_v33 = vld [vmem:[%s14389_s16 + $0x2ac] sm:$0xf0] }
 0xa95   : > { %v11544_v20 = vld [vmem:[%s14389_s16 + $0xa0] sm:$0xf]  ;;  %7221 = vmatpush.bf16.msra.mxu3 %v11945_v7  ;;  %v13112_v7 = vld [vmem:[%s14389_s16 + $0x34c] sm:$0xf0] }
 0xa96   : > { %v16226_v17 = vsub.f32 %v16155_v59, %v6209_v40  ;;  %v16229_v30 = vsub.f32 %v16148_v43, %v6209_v40  ;;  %v6250_v51 = vadd.f32 %v6249_v27, %v6234_v21  ;;  %v16232_v58 = vsub.f32 %v16157_v53, %v6209_v40  ;;  %v13028_v21 = vld [vmem:[%s14389_s16 + $0xac] sm:$0xf0]  ;;  %v11672_v27 = vld [vmem:[%s14389_s16 + $0x1a0] sm:$0xf] }
 0xa97   : > { %v16235_v1 = vsub.f32 %v16167_v0, %v6209_v40  ;;  %v11801_v40 = vor.u32 %v13092_v33, %v11800_v3  ;;  %v11881_v3 = vor.u32 %v13112_v7, %v11880_v46  ;;  %v11736_v33 = vld [vmem:[%s14389_s16 + $0x220] sm:$0xf]  ;;  %v13094_v46 = vld [vmem:[%s14389_s16 + $0x2c4] sm:$0xf]  ;;  %v11818_v7 = vld [vmem:[%s14389_s16 + $0x2d0] sm:$0xf0] }
 0xa98   : > { %6251 = vadd.xlane.f32.xlu1 %v6250_v51  ;;  %v6235_v31 = vmul.f32 %v16226_v17, %v16226_v17  ;;  %v6236_v29 = vmul.f32 %v16229_v30, %v16229_v30  ;;  %v6237_v59 = vmul.f32 %v16232_v58, %v16232_v58  ;;  %v13060_v51 = vld [vmem:[%s14389_s16 + $0x1ac] sm:$0xf0] }
 0xa99   : > { %v6238_v53 = vmul.f32 %v16235_v1, %v16235_v1  ;;  %7203 = vmatpush.bf16.msra.mxu2 %v11801_v40  ;;  %v11480_v40 = vld [vmem:[%s14389_s16 + $0x20] sm:$0xf] }
 0xa9a   : > { %v6253_v4 = vadd.f32 %v6236_v29, %v6235_v31  ;;  %v11545_v31 = vor.u32 %v13028_v21, %v11544_v20  ;;  %v11673_v29 = vor.u32 %v13060_v51, %v11672_v27  ;;  %v13076_v20 = vld [vmem:[%s14389_s16 + $0x22c] sm:$0xf0] }
 0xa9b   : > { %v6199_v43 = vpop.xlane.xlu2 %6198  ;;  %v11737_v27 = vor.u32 %v13076_v20, %v11736_v33  ;;  %v13012_v51 = vld [vmem:[%s14389_s16 + $0x2c] sm:$0xf0]  ;;  %v11821_v33 = vor.u32 %v13094_v46, %v11818_v7  ;;  %v13030_v20 = vld [vmem:[%s14389_s16 + $0xc4] sm:$0xf] }
 0xa9c   : > { %v6210_v5 = vmul.f32 %v16180_v44, %v6199_v43  ;;  %v6254_v55 = vadd.f32 %v6253_v4, %v6237_v59  ;;  %v11928_v59 = vld [vmem:[%s14389_s16 + $0x3a0] sm:$0xf]  ;;  %v13124_v4 = vld [vmem:[%s14389_s16 + $0x3ac] sm:$0xf0]  ;;  %7184 = vmatpush.bf16.msra.mxu1 %v11673_v29  ;;  %v13054_v7 = vld [vmem:[%s14389_s16 + $0x184] sm:$0xf] }
 0xa9d   : > { %v11929_v43 = vor.u32 %v13124_v4, %v11928_v59  ;;  %v13044_v29 = vld [vmem:[%s14389_s16 + $0x12c] sm:$0xf0]  ;;  %v11481_v4 = vor.u32 %v13012_v51, %v11480_v40  ;;  %v11562_v40 = vld [vmem:[%s14389_s16 + $0xd0] sm:$0xf0] }
 0xa9e   : > { %v16247_v0 = vsub.f32 %v16173_v2, %v6210_v5  ;;  %v16250_v56 = vsub.f32 %v16170_v54, %v6210_v5  ;;  %v6255_v39 = vadd.f32 %v6254_v55, %v6238_v53  ;;  %v16253_v24 = vsub.f32 %v16175_v45, %v6210_v5  ;;  %v13088_v53 = vld [vmem:[%s14389_s16 + $0x28c] sm:$0xf0]  ;;  %v11528_v55 = vld [vmem:[%s14389_s16 + $0x80] sm:$0xf]  ;;  %v11690_v51 = vld [vmem:[%s14389_s16 + $0x1d0] sm:$0xf0] }
 0xa9f   : > { %v16255_v49 = vsub.f32 %v6177_v36, %v6210_v5  ;;  %v11576_v36 = vld [vmem:[%s14389_s16 + $0xe0] sm:$0xf]  ;;  %7222 = vmatpush.bf16.msra.mxu3 %v11929_v43 }
 0xaa0   : > { %6256 = vadd.xlane.f32.xlu2 %v6255_v39  ;;  %v6239_v48 = vmul.f32 %v16247_v0, %v16247_v0  ;;  %v6240_v2 = vmul.f32 %v16250_v56, %v16250_v56  ;;  %v6241_v54 = vmul.f32 %v16253_v24, %v16253_v24  ;;  %v11577_v22 = vor.u32 %v13036_v42, %v11576_v36  ;;  %v11784_v5 = vld [vmem:[%s14389_s16 + $0x280] sm:$0xf]  ;;  %v13084_v36 = vld [vmem:[%s14389_s16 + $0x26c] sm:$0xf0] }
 0xaa1   : > { %v6242_v45 = vmul.f32 %v16255_v49, %v16255_v49  ;;  %v11785_v39 = vor.u32 %v13088_v53, %v11784_v5  ;;  %v11769_v42 = vor.u32 %v13084_v36, %v11768_v35  ;;  %v11864_v5 = vld [vmem:[%s14389_s16 + $0x320] sm:$0xf]  ;;  %v13108_v53 = vld [vmem:[%s14389_s16 + $0x32c] sm:$0xf0] }
 0xaa2   : > { %v6258_v34 = vadd.f32 %v6240_v2, %v6239_v48  ;;  %7163 = vmatpush.bf16.msra.mxu0 %v11577_v22  ;;  %v13024_v48 = vld [vmem:[%s14389_s16 + $0x8c] sm:$0xf0]  ;;  %v11656_v2 = vld [vmem:[%s14389_s16 + $0x180] sm:$0xf] }
 0xaa3   : > { %7204 = vmatpush.bf16.msra.mxu2 %v11785_v39  ;;  %v13052_v22 = vld [vmem:[%s14389_s16 + $0x16c] sm:$0xf0]  ;;  %v11848_v35 = vld [vmem:[%s14389_s16 + $0x300] sm:$0xf] }
 0xaa4   : > { %v6259_v23 = vadd.f32 %v6258_v34, %v6241_v54  ;;  %v13056_v54 = vld [vmem:[%s14389_s16 + $0x18c] sm:$0xf0]  ;;  %v11529_v34 = vor.u32 %v13024_v48, %v11528_v55  ;;  %v11641_v41 = vor.u32 %v13052_v22, %v11640_v61  ;;  %v11865_v55 = vor.u32 %v13108_v53, %v11864_v5  ;;  %v11720_v48 = vld [vmem:[%s14389_s16 + $0x200] sm:$0xf]  ;;  %v11834_v61 = vld [vmem:[%s14389_s16 + $0x2f0] sm:$0xf0] }
 0xaa5   : > { %v13104_v36 = vld [vmem:[%s14389_s16 + $0x30c] sm:$0xf0]  ;;  %v13034_v22 = vld [vmem:[%s14389_s16 + $0xe4] sm:$0xf]  ;;  %v11946_v5 = vld [vmem:[%s14389_s16 + $0x3d0] sm:$0xf0] }
 0xaa6   : > { %v6260_v57 = vadd.f32 %v6259_v23, %v6242_v45  ;;  %7164 = vmatpush.bf16.msra.mxu0 %v11561_v26  ;;  %v11657_v45 = vor.u32 %v13056_v54, %v11656_v2  ;;  %v11912_v23 = vld [vmem:[%s14389_s16 + $0x380] sm:$0xf]  ;;  %v13048_v26 = vld [vmem:[%s14389_s16 + $0x14c] sm:$0xf0]  ;;  %v11581_v16 = vor.u32 %v13034_v22, %v11578_v63  ;;  %v13086_v63 = vld [vmem:[%s14389_s16 + $0x284] sm:$0xf] }
 0xaa7   : > { %7205 = vmatpush.bf16.msra.mxu2 %v11769_v42  ;;  %v11625_v28 = vor.u32 %v13048_v26, %v11624_v52  ;;  %v13072_v2 = vld [vmem:[%s14389_s16 + $0x20c] sm:$0xf0]  ;;  %v11849_v42 = vor.u32 %v13104_v36, %v11848_v35  ;;  %v13058_v35 = vld [vmem:[%s14389_s16 + $0x1a4] sm:$0xf] }
 0xaa8   : > { %6261 = vadd.xlane.f32.xlu0 %v6260_v57  ;;  %v13120_v57 = vld [vmem:[%s14389_s16 + $0x38c] sm:$0xf0]  ;;  %7185 = vmatpush.bf16.msra.mxu1 %v11657_v45  ;;  %v11721_v54 = vor.u32 %v13072_v2, %v11720_v48  ;;  %v11802_v48 = vld [vmem:[%s14389_s16 + $0x2b0] sm:$0xf0]  ;;  %v13026_v2 = vld [vmem:[%s14389_s16 + $0xa4] sm:$0xf] }
 0xaa9   : > { %v11913_v19 = vor.u32 %v13120_v57, %v11912_v23  ;;  %v13008_v45 = vld [vmem:[%s14389_s16 + $0xc] sm:$0xf0]  ;;  %v11592_v23 = vld [vmem:[%s14389_s16 + $0x100] sm:$0xf] }
 0xaaa   : > { %7165 = vmatpush.bf16.msra.mxu0 %v11545_v31  ;;  %v11608_v31 = vld [vmem:[%s14389_s16 + $0x120] sm:$0xf]  ;;  %v16344_v52 = vld [vmem:[%s817_s1] sm:$0xf] }
 0xaab   : > { %7223 = vmatpush.bf16.msra.mxu3 %v11913_v19  ;;  %7206 = vmatpush.bf16.msra.mxu2 %v11753_v11  ;;  %v11609_v43 = vor.u32 %v13044_v29, %v11608_v31  ;;  %v13040_v19 = vld [vmem:[%s14389_s16 + $0x10c] sm:$0xf0]  ;;  %v13130_v11 = vld [vmem:[%s14389_s16 + $0x3e4] sm:$0xf]  ;;  %v16361_v29 = vperm.slane %v16344_v52, 0 }
 0xaac   : > { %7186 = vmatpush.bf16.msra.mxu1 %v11641_v41  ;;  %v11593_v38 = vor.u32 %v13040_v19, %v11592_v23  ;;  %v11837_v41 = vor.u32 %v13098_v12, %v11834_v61  ;;  %v11965_v26 = vor.u32 %v13130_v11, %v11962_v6  ;;  %v13126_v31 = vld [vmem:[%s14389_s16 + $0x3c4] sm:$0xf]  ;;  %v6179_v23 = vld [vmem:[%s827_s28] sm:$0xf]  ;;  %v11546_v19 = vld [vmem:[%s14389_s16 + $0xb0] sm:$0xf0] }
 0xaad   : > { %v11949_v53 = vor.u32 %v13126_v31, %v11946_v5  ;;  %v13122_v12 = vld [vmem:[%s14389_s16 + $0x3a4] sm:$0xf]  ;;  %v11930_v61 = vld [vmem:[%s14389_s16 + $0x3b0] sm:$0xf0]  ;;  %v16409_v31 = vperm.slane %v6179_v23, 1 }
 0xaae   : > { %7166 = vmatpush.bf16.msra.mxu0 %v11529_v34  ;;  %v11464_v34 = vld [vmem:[%s14389_s16] sm:$0xf]  ;;  %v11530_v11 = vld [vmem:[%s14389_s16 + $0x90] sm:$0xf0] }
 0xaaf   : > { %7224 = vmatpush.bf16.msra.mxu3 %v11897_v9  ;;  %7207 = vmatpush.bf16.msra.mxu2 %v11737_v27  ;;  %v11465_v57 = vor.u32 %v13008_v45, %v11464_v34  ;;  %v11706_v9 = vld [vmem:[%s14389_s16 + $0x1f0] sm:$0xf0]  ;;  %v11565_v27 = vor.u32 %v13030_v20, %v11562_v40  ;;  %v16399_v20 = vperm.slane %v16344_v52, 3  ;;  %v16404_v40 = vperm.slane %v6179_v23, 0 }
 0xab0   : > { %7187 = vmatpush.bf16.msra.mxu1 %v11625_v28  ;;  %v11709_v32 = vor.u32 %v13066_v18, %v11706_v9  ;;  %v11786_v18 = vld [vmem:[%s14389_s16 + $0x290] sm:$0xf0] }
 0xab2   : > { %7167 = vmatpush.bf16.msra.mxu0 %v11513_v50 }
 0xab3   : > { %7225 = vmatpush.bf16.msra.mxu3 %v11881_v3  ;;  %7208 = vmatpush.bf16.msra.mxu2 %v11721_v54  ;;  %v16372_v54 = vperm.slane %v16344_v52, 2 }
 0xab4   : > { %7188 = vmatpush.bf16.msra.mxu1 %v11609_v43 }
 0xab6   : > { %7168 = vmatpush.bf16.msra.mxu0 %v11497_v14 }
 0xab7   : > { %7226 = vmatpush.bf16.msra.mxu3 %v11865_v55  ;;  %7277 = vmatpush.bf16.msrb.mxu2 %v11837_v41  ;;  %v13090_v55 = vld [vmem:[%s14389_s16 + $0x2a4] sm:$0xf]  ;;  %v11933_v41 = vor.u32 %v13122_v12, %v11930_v61 }
 0xab8   : > { %7189 = vmatpush.bf16.msra.mxu1 %v11593_v38  ;;  %v11549_v38 = vor.u32 %v13026_v2, %v11546_v19  ;;  %v16417_v2 = vperm.slane %v6179_v23, 3 }
 0xaba   : > { %7169 = vmatpush.bf16.msra.mxu0 %v11481_v4 }
 0xabb   : > { %7227 = vmatpush.bf16.msra.mxu3 %v11849_v42  ;;  %7278 = vmatpush.bf16.msrb.mxu2 %v11821_v33  ;;  %v11674_v42 = vld [vmem:[%s14389_s16 + $0x1b0] sm:$0xf0]  ;;  %v13118_v33 = vld [vmem:[%s14389_s16 + $0x384] sm:$0xf] }
 0xabc   : > { %7258 = vmatpush.bf16.msrb.mxu1 %v11709_v32  ;;  %v13022_v32 = vld [vmem:[%s14389_s16 + $0x84] sm:$0xf] }
 0xabd   : > { %v11533_v46 = vor.u32 %v13022_v32, %v11530_v11  ;;  %v11498_v11 = vld [vmem:[%s14389_s16 + $0x50] sm:$0xf0] }
 0xabe   : > { %7170 = vmatpush.bf16.msra.mxu0 %v11465_v57  ;;  %v11805_v57 = vor.u32 %v13090_v55, %v11802_v48 }
 0xabf   : > { %7296 = vmatpush.bf16.msrb.mxu3 %v11965_v26 }
 0xac0   : > { %7279 = vmatpush.bf16.msrb.mxu2 %v11805_v57 }
 0xac2   : > { %7239 = vmatpush.bf16.msrb.mxu0 %v11581_v16  ;;  %v11789_v16 = vor.u32 %v13086_v63, %v11786_v18 }
 0xac3   : > { %7297 = vmatpush.bf16.msrb.mxu3 %v11949_v53  ;;  %v16414_v53 = vperm.slane %v6179_v23, 2 }
 0xac4   : > { %7280 = vmatpush.bf16.msrb.mxu2 %v11789_v16 }
 0xac6   : > { %7240 = vmatpush.bf16.msrb.mxu0 %v11565_v27 }
 0xac7   : > { %7298 = vmatpush.bf16.msrb.mxu3 %v11933_v41  ;;  %v11754_v41 = vld [vmem:[%s14389_s16 + $0x250] sm:$0xf0] }
 0xaca   : > { %7241 = vmatpush.bf16.msrb.mxu0 %v11549_v38  ;;  %v13114_v38 = vld [vmem:[%s14389_s16 + $0x364] sm:$0xf] }
 0xace   : > { %7242 = vmatpush.bf16.msrb.mxu0 %v11533_v46 }
 0xb03   : > { %v6247_v21 = vpop.xlane.xlu0 %6246 }
 0xb04   : > { %v6263_v59 = vmul.f32 %v6247_v21, %v16180_v44  ;;  %v13062_v21 = vld [vmem:[%s14389_s16 + $0x1c4] sm:$0xf] }
 0xb05   : > { %v11693_v43 = vor.u32 %v13062_v21, %v11690_v51  ;;  %v11914_v21 = vld [vmem:[%s14389_s16 + $0x390] sm:$0xf0] }
 0xb06   : > { %v16322_v39 = vadd.f32 1e-05, %v6263_v59  ;;  %v16364_v59 = vperm.slane %v16344_v52, 1  ;;  %v11917_v52 = vor.u32 %v13118_v33, %v11914_v21  ;;  %v11626_v33 = vld [vmem:[%s14389_s16 + $0x150] sm:$0xf0] }
 0xb07   : > { %7259 = vmatpush.bf16.msrb.mxu1 %v11693_v43 }
 0xb08   : > { %13453 = vrsqrt.f32 %v16322_v39  ;;  %vm6277_vm4 = vweird.f32 %v16322_v39  ;;  %7299 = vmatpush.bf16.msrb.mxu3 %v11917_v52  ;;  %v11882_v52 = vld [vmem:[%s14389_s16 + $0x350] sm:$0xf0] }
 0xb0b   : > { %v6252_v50 = vpop.xlane.xlu1 %6251 }
 0xb0c   : > { %v6264_v15 = vmul.f32 %v6252_v50, %v16180_v44  ;;  %v11677_v50 = vor.u32 %v13058_v35, %v11674_v42 }
 0xb0e   : > { %v16346_v14 = vpop.eup %13453  ;;  %v16348_v28 = vadd.f32 1e-05, %v6264_v15  ;;  %7260 = vmatpush.bf16.msrb.mxu1 %v11677_v50  ;;  %v13078_v50 = vld [vmem:[%s14389_s16 + $0x244] sm:$0xf] }
 0xb0f   : > { %v6272_v3 = vmul.f32 %v16346_v14, %v16322_v39  ;;  %vm6278_vm3 = vweird.f32 %v16346_v14  ;;  %v11757_v46 = vor.u32 %v13078_v50, %v11754_v41  ;;  %v11866_v41 = vld [vmem:[%s14389_s16 + $0x330] sm:$0xf0] }
 0xb10   : > { %13455 = vrsqrt.f32 %v16348_v28  ;;  %vm6279_vm5 = vmor %vm6277_vm4, %vm6278_vm3  ;;  %vm6287_vm7 = vweird.f32 %v16348_v28 }
 0xb11   : > { %v6273_v4 = vmul.f32 %v16346_v14, %v6272_v3  ;;  %v11658_v3 = vld [vmem:[%s14389_s16 + $0x190] sm:$0xf0] }
 0xb12   : > { %v11661_v39 = vor.u32 %v13054_v7, %v11658_v3  ;;  %v13046_v3 = vld [vmem:[%s14389_s16 + $0x144] sm:$0xf] }
 0xb13   : > { %v6274_v34 = vmul.f32 0.5, %v6273_v4  ;;  %v6257_v45 = vpop.xlane.xlu2 %6256 }
 0xb14   : > { %v6265_v36 = vmul.f32 %v6257_v45, %v16180_v44  ;;  %7261 = vmatpush.bf16.msrb.mxu1 %v11661_v39 }
 0xb15   : > { %v6275_v22 = vsub.f32 1.5, %v6274_v34  ;;  %v13082_v34 = vld [vmem:[%s14389_s16 + $0x264] sm:$0xf] }
 0xb16   : > { %v16385_v9 = vpop.eup %13455  ;;  %v16387_v15 = vadd.f32 1e-05, %v6265_v36  ;;  %v11642_v36 = vld [vmem:[%s14389_s16 + $0x170] sm:$0xf0] }
 0xb17   : > { %v6276_v6 = vmul.f32 %v16346_v14, %v6275_v22  ;;  %v6282_v26 = vmul.f32 %v16385_v9, %v16348_v28  ;;  %vm6288_vm6 = vweird.f32 %v16385_v9  ;;  %v11898_v22 = vld [vmem:[%s14389_s16 + $0x370] sm:$0xf0]  ;;  %v13014_v28 = vld [vmem:[%s14389_s16 + $0x44] sm:$0xf] }
 0xb18   : > { %13457 = vrsqrt.f32 %v16387_v15  ;;  %vm6289_vm8 = vmor %vm6287_vm7, %vm6288_vm6  ;;  %v11501_v7 = vor.u32 %v13014_v28, %v11498_v11  ;;  %vm6297_vm10 = vweird.f32 %v16387_v15 }
 0xb19   : > { %v6280_v27 = vsel %vm6279_vm5, %v16346_v14, %v6276_v6  ;;  %v6283_v51 = vmul.f32 %v16385_v9, %v6282_v26  ;;  %v11901_v26 = vor.u32 %v13114_v38, %v11898_v22 }
 0xb1a   : > { %v6311_v4 = vmul.f32 %v6280_v27, %v16184_v62  ;;  %v6312_v43 = vmul.f32 %v6280_v27, %v16187_v60  ;;  %v6313_v5 = vmul.f32 %v6280_v27, %v16190_v13  ;;  %v6314_v14 = vmul.f32 %v6280_v27, %v16193_v8  ;;  %v11770_v62 = vld [vmem:[%s14389_s16 + $0x270] sm:$0xf0]  ;;  %v13018_v60 = vld [vmem:[%s14389_s16 + $0x64] sm:$0xf] }
 0xb1b   : > { %v6284_v55 = vmul.f32 0.5, %v6283_v51  ;;  %v6262_v48 = vpop.xlane.xlu0 %6261  ;;  %v11514_v13 = vld [vmem:[%s14389_s16 + $0x70] sm:$0xf0]  ;;  %v13050_v8 = vld [vmem:[%s14389_s16 + $0x164] sm:$0xf]  ;;  %v11773_v35 = vor.u32 %v13082_v34, %v11770_v62  ;;  %7300 = vmatpush.bf16.msrb.mxu3 %v11901_v26 }
 0xb1c   : > { %v6336_v45 = vmul.f32 %v16361_v29, %v6311_v4  ;;  %v6266_v19 = vmul.f32 %v6262_v48, %v16180_v44  ;;  %v11517_v23 = vor.u32 %v13018_v60, %v11514_v13  ;;  %v6337_v12 = vmul.f32 %v16364_v59, %v6312_v43  ;;  %v13110_v51 = vld [vmem:[%s14389_s16 + $0x344] sm:$0xf]  ;;  %v11482_v34 = vld [vmem:[%s14389_s16 + $0x30] sm:$0xf0] }
 0xb1d   : > { %v6285_v57 = vsub.f32 1.5, %v6284_v55  ;;  %v6338_v61 = vmul.f32 %v16372_v54, %v6313_v5  ;;  %v6339_v63 = vmul.f32 %v16399_v20, %v6314_v14  ;;  %7281 = vmatpush.bf16.msrb.mxu2 %v11773_v35  ;;  %v11645_v6 = vor.u32 %v13050_v8, %v11642_v36  ;;  %v13074_v4 = vld [vmem:[%s14389_s16 + $0x224] sm:$0xf]  ;;  %v11722_v26 = vld [vmem:[%s14389_s16 + $0x210] sm:$0xf0] }
 0xb1e   : > { %v16429_v42 = vpop.eup %13457  ;;  %v16441_v32 = vadd.f32 1e-05, %v6266_v19  ;;  %7243 = vmatpush.bf16.msrb.mxu0 %v11517_v23  ;;  %v16453_v27 = vadd.f32 %v16404_v40, %v6336_v45  ;;  %v13010_v48 = vld [vmem:[%s14389_s16 + $0x24] sm:$0xf]  ;;  %v11629_v45 = vor.u32 %v13046_v3, %v11626_v33  ;;  %v11885_v60 = vor.u32 %v13110_v51, %v11882_v52  ;;  %v11610_v23 = vld [vmem:[%s14389_s16 + $0x130] sm:$0xf0] }
 0xb1f   : > { %v6286_v18 = vmul.f32 %v16385_v9, %v6285_v57  ;;  %v6292_v16 = vmul.f32 %v16429_v42, %v16387_v15  ;;  %7262 = vmatpush.bf16.msrb.mxu1 %v11645_v6  ;;  %vm6298_vm9 = vweird.f32 %v16429_v42  ;;  %v16471_v57 = vadd.f32 %v16409_v31, %v6337_v12  ;;  %v13042_v35 = vld [vmem:[%s14389_s16 + $0x124] sm:$0xf]  ;;  %v11466_v3 = vld [vmem:[%s14389_s16 + $0x10] sm:$0xf0] }
 0xb20   : > { %13459 = vrsqrt.f32 %v16441_v32  ;;  %v11485_v19 = vor.u32 %v13010_v48, %v11482_v34  ;;  %v13106_v12 = vld [vmem:[%s14389_s16 + $0x324] sm:$0xf]  ;;  %v16494_v28 = vadd.f32 %v16414_v53, %v6338_v61  ;;  %v16497_v11 = vadd.f32 %v16417_v2, %v6339_v63  ;;  %7301 = vmatpush.bf16.msrb.mxu3 %v11885_v60  ;;  %vm6299_vm11 = vmor %vm6297_vm10, %vm6298_vm9  ;;  %v13101_v48 = vld [vmem:[%s14389_s16 + $0x2f4] sm:$0xf0] }
 0xb21   : > { %v6290_v39 = vsel %vm6289_vm8, %v16385_v9, %v6286_v18  ;;  %v6293_v21 = vmul.f32 %v16429_v42, %v6292_v16  ;;  %v11738_v9 = vld [vmem:[%s14389_s16 + $0x230] sm:$0xf0]  ;;  %7282 = vmatpush.bf16.msrb.mxu2 %v11757_v46  ;;  %v13070_v6 = vld [vmem:[%s14389_s16 + $0x204] sm:$0xf]  ;;  %v11613_v63 = vor.u32 %v13042_v35, %v11610_v23  ;;  %v11869_v51 = vor.u32 %v13106_v12, %v11866_v41  ;;  %v11584_v34 = vld [vmem:[%s14389_s16 + $0xe8] sm:$0xf] }
 0xb22   : > { %v6315_v43 = vmul.f32 %v6290_v39, %v16205_v25  ;;  %v6316_v5 = vmul.f32 %v6290_v39, %v16208_v37  ;;  %v6317_v14 = vmul.f32 %v6290_v39, %v16211_v10  ;;  %v6318_v55 = vmul.f32 %v6290_v39, %v16214_v47  ;;  %7244 = vmatpush.bf16.msrb.mxu0 %v11501_v7  ;;  %v13006_v7 = vld [vmem:[%s14389_s16 + $0x4] sm:$0xf]  ;;  %v11824_v12 = vld [vmem:[%s14389_s16 + $0x2c8] sm:$0xf]  ;;  %v13097_v41 = vld [vmem:[%s14389_s16 + $0x2d4] sm:$0xf0] }
 0xb23   : > { %v6294_v62 = vmul.f32 0.5, %v6293_v21  ;;  %v11741_v13 = vor.u32 %v13074_v4, %v11738_v9  ;;  %7263 = vmatpush.bf16.msrb.mxu1 %v11629_v45  ;;  %v13038_v52 = vld [vmem:[%s14389_s16 + $0x104] sm:$0xf]  ;;  %v11594_v4 = vld [vmem:[%s14389_s16 + $0x110] sm:$0xf0]  ;;  %vm6307_vm13 = vweird.f32 %v16441_v32 }
 0xb24   : > { %v6340_v25 = vmul.f32 %v16361_v29, %v6315_v43  ;;  %v6341_v37 = vmul.f32 %v16364_v59, %v6316_v5  ;;  %v6342_v10 = vmul.f32 %v16372_v54, %v6317_v14  ;;  %v6343_v47 = vmul.f32 %v16399_v20, %v6318_v55  ;;  %v13102_v5 = vld [vmem:[%s14389_s16 + $0x304] sm:$0xf]  ;;  %v11840_v9 = vld [vmem:[%s14389_s16 + $0x2e8] sm:$0xf]  ;;  %7302 = vmatpush.bf16.msrb.mxu3 %v11869_v51 }
 0xb25   : > { %v6295_v8 = vsub.f32 1.5, %v6294_v62  ;;  %7283 = vmatpush.bf16.msrb.mxu2 %v11741_v13  ;;  %v11725_v43 = vor.u32 %v13070_v6, %v11722_v26  ;;  %v11469_v55 = vor.u32 %v13006_v7, %v11466_v3  ;;  %v11597_v13 = vor.u32 %v13038_v52, %v11594_v4  ;;  %v11952_v51 = vld [vmem:[%s14389_s16 + $0x3c8] sm:$0xf]  ;;  %v13129_v52 = vld [vmem:[%s14389_s16 + $0x3d4] sm:$0xf0] }
 0xb26   : > { %v16476_v36 = vadd.f32 %v16404_v40, %v6340_v25  ;;  %v16479_v38 = vadd.f32 %v16409_v31, %v6341_v37  ;;  %v16482_v22 = vadd.f32 %v16414_v53, %v6342_v10  ;;  %v16485_v50 = vadd.f32 %v16417_v2, %v6343_v47  ;;  %v16489_v18 = vpop.eup %13459  ;;  %7245 = vmatpush.bf16.msrb.mxu0 %v11485_v19  ;;  %v13037_v25 = vld [vmem:[%s14389_s16 + $0xf4] sm:$0xf0]  ;;  %v11712_v37 = vld [vmem:[%s14389_s16 + $0x1e8] sm:$0xf] }
 0xb27   : > { %v6296_v16 = vmul.f32 %v16429_v42, %v6295_v8  ;;  %v6302_v46 = vmul.f32 %v16489_v18, %v16441_v32  ;;  %vm6308_vm12 = vweird.f32 %v16489_v18  ;;  %v13069_v10 = vld [vmem:[%s14389_s16 + $0x1f4] sm:$0xf0]  ;;  %7264 = vmatpush.bf16.msrb.mxu1 %v11613_v63  ;;  %v11841_v19 = vor.u32 %v13101_v48, %v11840_v9  ;;  %v11696_v63 = vld [vmem:[%s14389_s16 + $0x1c8] sm:$0xf] }
 0xb28   : > { %v16507_v15 = vpack.c.bf16 %v16476_v36, %v16453_v27  ;;  %v16511_v61 = vpack.c.bf16 %v16479_v38, %v16471_v57  ;;  %v16518_v39 = vpack.c.bf16 %v16482_v22, %v16494_v28  ;;  %v16522_v21 = vpack.c.bf16 %v16485_v50, %v16497_v11  ;;  %vm16552_vm14 = vmor %vm6307_vm13, %vm6308_vm12  ;;  %v11664_v26 = vld [vmem:[%s14389_s16 + $0x188] sm:$0xf] }
 0xb29   : > { %v6300_v33 = vsel %vm6299_vm11, %v16429_v42, %v6296_v16  ;;  %v11850_v42 = vld [vmem:[%s14389_s16 + $0x310] sm:$0xf0]  ;;  %v6303_v14 = vmul.f32 %v16489_v18, %v6302_v46  ;;  %v11585_v35 = vor.u32 %v13037_v25, %v11584_v34  ;;  %7284 = vmatpush.bf16.msrb.mxu2 %v11725_v43  ;;  %v11713_v23 = vor.u32 %v13069_v10, %v11712_v37  ;;  %v11568_v16 = vld [vmem:[%s14389_s16 + $0xc8] sm:$0xf]  ;;  %v13033_v46 = vld [vmem:[%s14389_s16 + $0xd4] sm:$0xf0] }
 0xb2a   : > { %7171 = vmatmul.bf16.vlgmr.msra.gmra.mxu0 %v16507_v15  ;;  %7190 = vmatmul.bf16.vlgmr.msra.gmra.mxu1 %v16511_v61  ;;  %v6319_v62 = vmul.f32 %v6300_v33, %v16226_v17  ;;  %v6320_v45 = vmul.f32 %v6300_v33, %v16229_v30  ;;  %v6321_v60 = vmul.f32 %v6300_v33, %v16232_v58  ;;  %v11968_v17 = vld [vmem:[%s14389_s16 + $0x3e8] sm:$0xf]  ;;  %v13133_v30 = vld [vmem:[%s14389_s16 + $0x3f4] sm:$0xf0] }
 0xb2b   : > { %7209 = vmatmul.bf16.vlgmr.msra.gmra.mxu2 %v16518_v39  ;;  %7228 = vmatmul.bf16.vlgmr.msra.gmra.mxu3 %v16522_v21  ;;  %v6304_v47 = vmul.f32 0.5, %v6303_v14  ;;  %v11853_v8 = vor.u32 %v13102_v5, %v11850_v42  ;;  %v6322_v58 = vmul.f32 %v6300_v33, %v16235_v1  ;;  %v11969_v1 = vor.u32 %v13133_v30, %v11968_v17  ;;  %v13065_v33 = vld [vmem:[%s14389_s16 + $0x1d4] sm:$0xf0]  ;;  %v11808_v42 = vld [vmem:[%s14389_s16 + $0x2a8] sm:$0xf] }
 0xb2c   : > { %7246 = vmatpush.bf16.msrb.mxu0 %v11469_v55  ;;  %v11825_v32 = vor.u32 %v13097_v41, %v11824_v12  ;;  %v6344_v7 = vmul.f32 %v16361_v29, %v6319_v62  ;;  %v11569_v3 = vor.u32 %v13033_v46, %v11568_v16  ;;  %v6345_v43 = vmul.f32 %v16364_v59, %v6320_v45  ;;  %v13093_v14 = vld [vmem:[%s14389_s16 + $0x2b4] sm:$0xf0]  ;;  %v11552_v55 = vld [vmem:[%s14389_s16 + $0xa8] sm:$0xf] }
 0xb2d   : > { %v6305_v6 = vsub.f32 1.5, %v6304_v47  ;;  %7353 = vmatpush.bf16.msra.mxu2 %v11841_v19  ;;  %v6346_v5 = vmul.f32 %v16372_v54, %v6321_v60  ;;  %7265 = vmatpush.bf16.msrb.mxu1 %v11597_v13  ;;  %v6347_v9 = vmul.f32 %v16399_v20, %v6322_v58  ;;  %v11697_v48 = vor.u32 %v13065_v33, %v11696_v63  ;;  %v13029_v34 = vld [vmem:[%s14389_s16 + $0xb4] sm:$0xf0]  ;;  %v11680_v62 = vld [vmem:[%s14389_s16 + $0x1a8] sm:$0xf] }
 0xb2e   : > { %7303 = vmatpush.bf16.msrb.mxu3 %v11853_v8  ;;  %v13061_v25 = vld [vmem:[%s14389_s16 + $0x1b4] sm:$0xf0]  ;;  %v11953_v60 = vor.u32 %v13129_v52, %v11952_v51  ;;  %v11809_v13 = vor.u32 %v13093_v14, %v11808_v42  ;;  %v11553_v37 = vor.u32 %v13029_v34, %v11552_v55  ;;  %v11936_v10 = vld [vmem:[%s14389_s16 + $0x3a8] sm:$0xf]  ;;  %v16584_v58 = vadd.f32 %v16404_v40, %v6344_v7 }
 0xb2f   : > { %v6306_v4 = vmul.f32 %v16489_v18, %v6305_v6  ;;  %v13125_v17 = vld [vmem:[%s14389_s16 + $0x3b4] sm:$0xf0]  ;;  %v11920_v7 = vld [vmem:[%s14389_s16 + $0x388] sm:$0xf] }
 0xb30   : > { %7315 = vmatpush.bf16.msra.mxu0 %v11585_v35  ;;  %v13089_v30 = vld [vmem:[%s14389_s16 + $0x294] sm:$0xf0]  ;;  %v11937_v46 = vor.u32 %v13125_v17, %v11936_v10  ;;  %v11648_v55 = vld [vmem:[%s14389_s16 + $0x168] sm:$0xf] }
 0xb31   : > { %7334 = vmatpush.bf16.msra.mxu1 %v11713_v23  ;;  %v6310_v45 = vsel %vm16552_vm14, %v16489_v18, %v6306_v4  ;;  %7354 = vmatpush.bf16.msra.mxu2 %v11825_v32  ;;  %v11792_v18 = vld [vmem:[%s14389_s16 + $0x288] sm:$0xf]  ;;  %v16587_v23 = vadd.f32 %v16409_v31, %v6345_v43  ;;  %v13025_v6 = vld [vmem:[%s14389_s16 + $0x94] sm:$0xf0]  ;;  %v16601_v32 = vadd.f32 %v16417_v2, %v6347_v9 }
 0xb32   : > { %7372 = vmatpush.bf16.msra.mxu3 %v11969_v1  ;;  %v6323_v47 = vmul.f32 %v6310_v45, %v16247_v0  ;;  %v6324_v8 = vmul.f32 %v6310_v45, %v16250_v56  ;;  %v6325_v19 = vmul.f32 %v6310_v45, %v16253_v24  ;;  %v6326_v35 = vmul.f32 %v6310_v45, %v16255_v49  ;;  %v11536_v24 = vld [vmem:[%s14389_s16 + $0x88] sm:$0xf]  ;;  %v13057_v1 = vld [vmem:[%s14389_s16 + $0x194] sm:$0xf0] }
 0xb33   : > { %v16590_v0 = vadd.f32 %v16414_v53, %v6346_v5  ;;  %v11681_v56 = vor.u32 %v13061_v25, %v11680_v62  ;;  %17694 = vst [vmem:[#allocation46_spill] sm:$0xff] %v16601_v32  ;;  %v11793_v63 = vor.u32 %v13089_v30, %v11792_v18  ;;  %v11537_v33 = vor.u32 %v13025_v6, %v11536_v24  ;;  %v11776_v4 = vld [vmem:[%s14389_s16 + $0x268] sm:$0xf]  ;;  %v13085_v43 = vld [vmem:[%s14389_s16 + $0x274] sm:$0xf0] }
 0xb34   : > { %7316 = vmatpush.bf16.msra.mxu0 %v11569_v3  ;;  %v6348_v12 = vmul.f32 %v16361_v29, %v6323_v47  ;;  %v6349_v49 = vmul.f32 %v16364_v59, %v6324_v8  ;;  %v6350_v41 = vmul.f32 %v16372_v54, %v6325_v19  ;;  %v6351_v16 = vmul.f32 %v16399_v20, %v6326_v35  ;;  %v13121_v3 = vld [vmem:[%s14389_s16 + $0x394] sm:$0xf0]  ;;  %v11520_v5 = vld [vmem:[%s14389_s16 + $0x68] sm:$0xf] }
 0xb35   : > { %7335 = vmatpush.bf16.msra.mxu1 %v11697_v48  ;;  %7355 = vmatpush.bf16.msra.mxu2 %v11809_v13  ;;  %v11665_v51 = vor.u32 %v13057_v1, %v11664_v26  ;;  %v11921_v52 = vor.u32 %v13121_v3, %v11920_v7  ;;  %v11777_v42 = vor.u32 %v13085_v43, %v11776_v4  ;;  %v13021_v14 = vld [vmem:[%s14389_s16 + $0x74] sm:$0xf0]  ;;  %v11904_v48 = vld [vmem:[%s14389_s16 + $0x368] sm:$0xf] }
 0xb36   : > { %7373 = vmatpush.bf16.msra.mxu3 %v11953_v60  ;;  %v16604_v29 = vadd.f32 %v16404_v40, %v6348_v12  ;;  %v16607_v59 = vadd.f32 %v16409_v31, %v6349_v49  ;;  %v16610_v54 = vadd.f32 %v16414_v53, %v6350_v41  ;;  %v16613_v20 = vadd.f32 %v16417_v2, %v6351_v16  ;;  %v13053_v9 = vld [vmem:[%s14389_s16 + $0x174] sm:$0xf0]  ;;  %v11760_v62 = vld [vmem:[%s14389_s16 + $0x248] sm:$0xf] }
 0xb37   : > { %v13117_v34 = vld [vmem:[%s14389_s16 + $0x374] sm:$0xf0]  ;;  %v11521_v25 = vor.u32 %v13021_v14, %v11520_v5  ;;  %v11649_v45 = vor.u32 %v13053_v9, %v11648_v55  ;;  %v11504_v13 = vld [vmem:[%s14389_s16 + $0x48] sm:$0xf] }
 0xb38   : > { %17695 = vst [vmem:[#allocation44_spill] sm:$0xff] %v16604_v29  ;;  %7317 = vmatpush.bf16.msra.mxu0 %v11553_v37  ;;  %v16619_v40 = vpack.c.bf16 %v16604_v29, %v16584_v58  ;;  %v16623_v31 = vpack.c.bf16 %v16607_v59, %v16587_v23  ;;  %v16627_v53 = vpack.c.bf16 %v16610_v54, %v16590_v0  ;;  %v13081_v60 = vld [vmem:[%s14389_s16 + $0x254] sm:$0xf0]  ;;  %v11632_v8 = vld [vmem:[%s14389_s16 + $0x148] sm:$0xf] }
 0xb39   : > { %17696 = vst [vmem:[#allocation52_spill] sm:$0xff] %v16607_v59  ;;  %v16631_v2 = vpack.c.bf16 %v16613_v20, %v16601_v32  ;;  %7336 = vmatpush.bf16.msra.mxu1 %v11681_v56  ;;  %7356 = vmatpush.bf16.msra.mxu2 %v11793_v63  ;;  %v13017_v37 = vld [vmem:[%s14389_s16 + $0x54] sm:$0xf0]  ;;  %v11905_v10 = vor.u32 %v13117_v34, %v11904_v48  ;;  %v11888_v35 = vld [vmem:[%s14389_s16 + $0x348] sm:$0xf] }
 0xb3a   : > { %17697 = vst [vmem:[#allocation51_spill] sm:$0xff] %v16610_v54  ;;  %7374 = vmatpush.bf16.msra.mxu3 %v11937_v46  ;;  %7176 = vmatmul.bf16.gmra.mxu0 %v16619_v40  ;;  %v11761_v47 = vor.u32 %v13081_v60, %v11760_v62  ;;  %v13049_v19 = vld [vmem:[%s14389_s16 + $0x154] sm:$0xf0]  ;;  %v11744_v18 = vld [vmem:[%s14389_s16 + $0x228] sm:$0xf]  ;;  %v11505_v56 = vor.u32 %v13017_v37, %v11504_v13 }
 0xb3b   : > { %17698 = vst [vmem:[#allocation56_spill] sm:$0xff] %v16613_v20  ;;  %7195 = vmatmul.bf16.gmra.mxu1 %v16623_v31  ;;  %7214 = vmatmul.bf16.gmra.mxu2 %v16627_v53  ;;  %v13113_v17 = vld [vmem:[%s14389_s16 + $0x354] sm:$0xf0]  ;;  %v11633_v24 = vor.u32 %v13049_v19, %v11632_v8  ;;  %v11488_v12 = vld [vmem:[%s14389_s16 + $0x28] sm:$0xf] }
 0xb3c   : > { %7233 = vmatmul.bf16.gmra.mxu3 %v16631_v2  ;;  %7318 = vmatpush.bf16.msra.mxu0 %v11537_v33  ;;  %v13077_v30 = vld [vmem:[%s14389_s16 + $0x234] sm:$0xf0]  ;;  %v11889_v41 = vor.u32 %v13113_v17, %v11888_v35  ;;  %v11616_v6 = vld [vmem:[%s14389_s16 + $0x128] sm:$0xf]  ;;  %v13099_v62 = vld [vmem:[%s14389_s16 + $0x2ec] sm:$0xf] }
 0xb3d   : > { %7337 = vmatpush.bf16.msra.mxu1 %v11665_v51  ;;  %7357 = vmatpush.bf16.msra.mxu2 %v11777_v42  ;;  %v13013_v49 = vld [vmem:[%s14389_s16 + $0x34] sm:$0xf0]  ;;  %v11745_v16 = vor.u32 %v13077_v30, %v11744_v18  ;;  %v11872_v1 = vld [vmem:[%s14389_s16 + $0x328] sm:$0xf]  ;;  %v11586_v13 = vld [vmem:[%s14389_s16 + $0xf8] sm:$0xf0] }
 0xb3e   : > { %7375 = vmatpush.bf16.msra.mxu3 %v11921_v52  ;;  %v13045_v26 = vld [vmem:[%s14389_s16 + $0x134] sm:$0xf0]  ;;  %v11728_v63 = vld [vmem:[%s14389_s16 + $0x208] sm:$0xf]  ;;  %v11489_v3 = vor.u32 %v13013_v49, %v11488_v12  ;;  %v13067_v37 = vld [vmem:[%s14389_s16 + $0x1ec] sm:$0xf] }
 0xb3f   : > { %v13109_v46 = vld [vmem:[%s14389_s16 + $0x334] sm:$0xf0]  ;;  %v11617_v33 = vor.u32 %v13045_v26, %v11616_v6  ;;  %v11472_v51 = vld [vmem:[%s14389_s16 + $0x8] sm:$0xf]  ;;  %v13131_v19 = vld [vmem:[%s14389_s16 + $0x3ec] sm:$0xf] }
 0xb40   : > { %7319 = vmatpush.bf16.msra.mxu0 %v11521_v25  ;;  %v13073_v7 = vld [vmem:[%s14389_s16 + $0x214] sm:$0xf0]  ;;  %v11873_v52 = vor.u32 %v13109_v46, %v11872_v1  ;;  %v11600_v5 = vld [vmem:[%s14389_s16 + $0x108] sm:$0xf]  ;;  %v11842_v25 = vld [vmem:[%s14389_s16 + $0x2f8] sm:$0xf0] }
 0xb41   : > { %7338 = vmatpush.bf16.msra.mxu1 %v11649_v45  ;;  %7358 = vmatpush.bf16.msra.mxu2 %v11761_v47  ;;  %v11729_v4 = vor.u32 %v13073_v7, %v11728_v63  ;;  %v13009_v43 = vld [vmem:[%s14389_s16 + $0x14] sm:$0xf0]  ;;  %v11856_v14 = vld [vmem:[%s14389_s16 + $0x308] sm:$0xf]  ;;  %v13035_v45 = vld [vmem:[%s14389_s16 + $0xec] sm:$0xf]  ;;  %v11845_v60 = vor.u32 %v13099_v62, %v11842_v25 }
 0xb42   : > { %7376 = vmatpush.bf16.msra.mxu3 %v11905_v10  ;;  %v13041_v42 = vld [vmem:[%s14389_s16 + $0x114] sm:$0xf0]  ;;  %v11473_v9 = vor.u32 %v13009_v43, %v11472_v51  ;;  %v11714_v10 = vld [vmem:[%s14389_s16 + $0x1f8] sm:$0xf0]  ;;  %v11589_v47 = vor.u32 %v13035_v45, %v11586_v13  ;;  %v13095_v17 = vld [vmem:[%s14389_s16 + $0x2cc] sm:$0xf] }
 0xb43   : > { %v13105_v55 = vld [vmem:[%s14389_s16 + $0x314] sm:$0xf0]  ;;  %v11601_v48 = vor.u32 %v13041_v42, %v11600_v5  ;;  %v11717_v8 = vor.u32 %v13067_v37, %v11714_v10  ;;  %v11970_v35 = vld [vmem:[%s14389_s16 + $0x3f8] sm:$0xf0]  ;;  %v13063_v49 = vld [vmem:[%s14389_s16 + $0x1cc] sm:$0xf] }
 0xb44   : > { %7320 = vmatpush.bf16.msra.mxu0 %v11505_v56  ;;  %v11857_v34 = vor.u32 %v13105_v55, %v11856_v14  ;;  %v11973_v18 = vor.u32 %v13131_v19, %v11970_v35  ;;  %v11826_v30 = vld [vmem:[%s14389_s16 + $0x2d8] sm:$0xf0]  ;;  %v13031_v56 = vld [vmem:[%s14389_s16 + $0xcc] sm:$0xf] }
 0xb45   : > { %7339 = vmatpush.bf16.msra.mxu1 %v11633_v24  ;;  %7359 = vmatpush.bf16.msra.mxu2 %v11745_v16  ;;  %v11570_v24 = vld [vmem:[%s14389_s16 + $0xd8] sm:$0xf0]  ;;  %v11829_v12 = vor.u32 %v13095_v17, %v11826_v30  ;;  %v13127_v16 = vld [vmem:[%s14389_s16 + $0x3cc] sm:$0xf] }
 0xb46   : > { %7377 = vmatpush.bf16.msra.mxu3 %v11889_v41  ;;  %v11698_v41 = vld [vmem:[%s14389_s16 + $0x1d8] sm:$0xf0]  ;;  %v11573_v6 = vor.u32 %v13031_v56, %v11570_v24  ;;  %v13091_v46 = vld [vmem:[%s14389_s16 + $0x2ac] sm:$0xf] }
 0xb47   : > { %v11701_v26 = vor.u32 %v13063_v49, %v11698_v41  ;;  %v11954_v1 = vld [vmem:[%s14389_s16 + $0x3d8] sm:$0xf0]  ;;  %v13059_v51 = vld [vmem:[%s14389_s16 + $0x1ac] sm:$0xf] }
 0xb48   : > { %7321 = vmatpush.bf16.msra.mxu0 %v11489_v3  ;;  %v11810_v63 = vld [vmem:[%s14389_s16 + $0x2b8] sm:$0xf0]  ;;  %v11957_v7 = vor.u32 %v13127_v16, %v11954_v1  ;;  %v13027_v3 = vld [vmem:[%s14389_s16 + $0xac] sm:$0xf] }
 0xb49   : > { %7340 = vmatpush.bf16.msra.mxu1 %v11617_v33  ;;  %7360 = vmatpush.bf16.msra.mxu2 %v11729_v4  ;;  %v11554_v33 = vld [vmem:[%s14389_s16 + $0xb8] sm:$0xf0]  ;;  %v13123_v4 = vld [vmem:[%s14389_s16 + $0x3ac] sm:$0xf]  ;;  %v11813_v5 = vor.u32 %v13091_v46, %v11810_v63 }
 0xb4a   : > { %7378 = vmatpush.bf16.msra.mxu3 %v11873_v52  ;;  %7247 = vmatmul.bf16.vlgmr.msrb.gmra.mxu0 %v16507_v15  ;;  %v11682_v52 = vld [vmem:[%s14389_s16 + $0x1b8] sm:$0xf0]  ;;  %v11557_v42 = vor.u32 %v13027_v3, %v11554_v33  ;;  %v13087_v55 = vld [vmem:[%s14389_s16 + $0x28c] sm:$0xf] }
 0xb4b   : > { %7266 = vmatmul.bf16.vlgmr.msrb.gmra.mxu1 %v16511_v61  ;;  %7285 = vmatmul.bf16.vlgmr.msrb.gmra.mxu2 %v16518_v39  ;;  %v11938_v43 = vld [vmem:[%s14389_s16 + $0x3b8] sm:$0xf0]  ;;  %v11685_v14 = vor.u32 %v13059_v51, %v11682_v52  ;;  %v13055_v45 = vld [vmem:[%s14389_s16 + $0x18c] sm:$0xf] }
 0xb4c   : > { %7304 = vmatmul.bf16.vlgmr.msrb.gmra.mxu3 %v16522_v21  ;;  %7322 = vmatpush.bf16.msra.mxu0 %v11473_v9  ;;  %v11794_v9 = vld [vmem:[%s14389_s16 + $0x298] sm:$0xf0]  ;;  %v13119_v13 = vld [vmem:[%s14389_s16 + $0x38c] sm:$0xf] }
 0xb4d   : > { %7341 = vmatpush.bf16.msra.mxu1 %v11601_v48  ;;  %7429 = vmatpush.bf16.msrb.mxu2 %v11845_v60  ;;  %v11941_v48 = vor.u32 %v13123_v4, %v11938_v43  ;;  %v11797_v62 = vor.u32 %v13087_v55, %v11794_v9  ;;  %v11538_v25 = vld [vmem:[%s14389_s16 + $0x98] sm:$0xf0]  ;;  %v13083_v19 = vld [vmem:[%s14389_s16 + $0x26c] sm:$0xf] }
 0xb4e   : > { %7379 = vmatpush.bf16.msra.mxu3 %v11857_v34  ;;  %v13023_v34 = vld [vmem:[%s14389_s16 + $0x8c] sm:$0xf]  ;;  %v11666_v60 = vld [vmem:[%s14389_s16 + $0x198] sm:$0xf0] }
 0xb4f   : > { %v11922_v37 = vld [vmem:[%s14389_s16 + $0x398] sm:$0xf0]  ;;  %v11541_v10 = vor.u32 %v13023_v34, %v11538_v25  ;;  %v13019_v17 = vld [vmem:[%s14389_s16 + $0x6c] sm:$0xf] }
 0xb50   : > { %7391 = vmatpush.bf16.msrb.mxu0 %v11589_v47  ;;  %v11669_v47 = vor.u32 %v13055_v45, %v11666_v60  ;;  %v11778_v35 = vld [vmem:[%s14389_s16 + $0x278] sm:$0xf0]  ;;  %v13051_v56 = vld [vmem:[%s14389_s16 + $0x16c] sm:$0xf] }
 0xb51   : > { %7410 = vmatpush.bf16.msrb.mxu1 %v11717_v8  ;;  %7430 = vmatpush.bf16.msrb.mxu2 %v11829_v12  ;;  %v11925_v8 = vor.u32 %v13119_v13, %v11922_v37  ;;  %v11522_v30 = vld [vmem:[%s14389_s16 + $0x78] sm:$0xf0]  ;;  %v13115_v12 = vld [vmem:[%s14389_s16 + $0x36c] sm:$0xf] }
 0xb52   : > { %7448 = vmatpush.bf16.msrb.mxu3 %v11973_v18  ;;  %v11781_v18 = vor.u32 %v13083_v19, %v11778_v35  ;;  %v11650_v24 = vld [vmem:[%s14389_s16 + $0x178] sm:$0xf0]  ;;  %v13079_v41 = vld [vmem:[%s14389_s16 + $0x24c] sm:$0xf]  ;;  %v11525_v16 = vor.u32 %v13019_v17, %v11522_v30 }
 0xb53   : > { %v11906_v49 = vld [vmem:[%s14389_s16 + $0x378] sm:$0xf0]  ;;  %v13015_v1 = vld [vmem:[%s14389_s16 + $0x4c] sm:$0xf] }
 0xb54   : > { %7392 = vmatpush.bf16.msrb.mxu0 %v11573_v6  ;;  %v11653_v6 = vor.u32 %v13051_v56, %v11650_v24  ;;  %v11506_v46 = vld [vmem:[%s14389_s16 + $0x58] sm:$0xf0]  ;;  %v11909_v63 = vor.u32 %v13115_v12, %v11906_v49  ;;  %v13047_v3 = vld [vmem:[%s14389_s16 + $0x14c] sm:$0xf] }
 0xb55   : > { %7411 = vmatpush.bf16.msrb.mxu1 %v11701_v26  ;;  %7431 = vmatpush.bf16.msrb.mxu2 %v11813_v5  ;;  %v11762_v26 = vld [vmem:[%s14389_s16 + $0x258] sm:$0xf0]  ;;  %v13111_v51 = vld [vmem:[%s14389_s16 + $0x34c] sm:$0xf]  ;;  %v11509_v5 = vor.u32 %v13015_v1, %v11506_v46  ;;  %v13160_v1 = vld [vmem:[%s14397_s12 + $0xcc] sm:$0xf0] }
 0xb56   : > { %7449 = vmatpush.bf16.msrb.mxu3 %v11957_v7  ;;  %v11765_v7 = vor.u32 %v13079_v41, %v11762_v26  ;;  %v11634_v33 = vld [vmem:[%s14389_s16 + $0x158] sm:$0xf0]  ;;  %v13075_v4 = vld [vmem:[%s14389_s16 + $0x22c] sm:$0xf]  ;;  %v12088_v41 = vld [vmem:[%s14397_s12 + $0xe0] sm:$0xf] }
 0xb57   : > { %v11890_v52 = vld [vmem:[%s14389_s16 + $0x358] sm:$0xf0]  ;;  %v13043_v34 = vld [vmem:[%s14389_s16 + $0x12c] sm:$0xf] }
 0xb58   : > { %7393 = vmatpush.bf16.msrb.mxu0 %v11557_v42  ;;  %v11746_v43 = vld [vmem:[%s14389_s16 + $0x238] sm:$0xf0]  ;;  %v11637_v42 = vor.u32 %v13047_v3, %v11634_v33  ;;  %v11893_v9 = vor.u32 %v13111_v51, %v11890_v52  ;;  %v13107_v25 = vld [vmem:[%s14389_s16 + $0x32c] sm:$0xf]  ;;  %v12040_v33 = vld [vmem:[%s14397_s12 + $0x80] sm:$0xf] }
 0xb59   : > { %7412 = vmatpush.bf16.msrb.mxu1 %v11685_v14  ;;  %7432 = vmatpush.bf16.msrb.mxu2 %v11797_v62  ;;  %v13011_v14 = vld [vmem:[%s14389_s16 + $0x2c] sm:$0xf]  ;;  %v11490_v55 = vld [vmem:[%s14389_s16 + $0x38] sm:$0xf0]  ;;  %v13152_v51 = vld [vmem:[%s14397_s12 + $0x8c] sm:$0xf0] }
 0xb5a   : > { %7450 = vmatpush.bf16.msrb.mxu3 %v11941_v48  ;;  %7252 = vmatmul.bf16.gmra.mxu0 %v16619_v40  ;;  %v11749_v48 = vor.u32 %v13075_v4, %v11746_v43  ;;  %v11618_v62 = vld [vmem:[%s14389_s16 + $0x138] sm:$0xf0]  ;;  %v13071_v60 = vld [vmem:[%s14389_s16 + $0x20c] sm:$0xf]  ;;  %v11493_v37 = vor.u32 %v13011_v14, %v11490_v55  ;;  %v12041_v52 = vor.u32 %v13152_v51, %v12040_v33  ;;  %v12024_v4 = vld [vmem:[%s14397_s12 + $0x60] sm:$0xf] }
 0xb5b   : > { %7271 = vmatmul.bf16.gmra.mxu1 %v16623_v31  ;;  %7290 = vmatmul.bf16.gmra.mxu2 %v16627_v53  ;;  %v11874_v45 = vld [vmem:[%s14389_s16 + $0x338] sm:$0xf0]  ;;  %v13039_v17 = vld [vmem:[%s14389_s16 + $0x10c] sm:$0xf]  ;;  %v13148_v43 = vld [vmem:[%s14397_s12 + $0x6c] sm:$0xf0] }
 0xb5c   : > { %7309 = vmatmul.bf16.gmra.mxu3 %v16631_v2  ;;  %7394 = vmatpush.bf16.msrb.mxu0 %v11541_v10  ;;  %v11730_v13 = vld [vmem:[%s14389_s16 + $0x218] sm:$0xf0]  ;;  %v11621_v10 = vor.u32 %v13043_v34, %v11618_v62  ;;  %v13103_v30 = vld [vmem:[%s14389_s16 + $0x30c] sm:$0xf]  ;;  %v13144_v14 = vld [vmem:[%s14397_s12 + $0x4c] sm:$0xf0] }
 0xb5d   : > { %7413 = vmatpush.bf16.msrb.mxu1 %v11669_v47  ;;  %7433 = vmatpush.bf16.msrb.mxu2 %v11781_v18  ;;  %v13007_v47 = vld [vmem:[%s14389_s16 + $0xc] sm:$0xf]  ;;  %v11733_v19 = vor.u32 %v13071_v60, %v11730_v13  ;;  %v11474_v35 = vld [vmem:[%s14389_s16 + $0x18] sm:$0xf0]  ;;  %v12216_v34 = vld [vmem:[%s14397_s12 + $0x1e0] sm:$0xf] }
 0xb5e   : > { %7451 = vmatpush.bf16.msrb.mxu3 %v11925_v8  ;;  %v11877_v8 = vor.u32 %v13107_v25, %v11874_v45  ;;  %v11602_v18 = vld [vmem:[%s14389_s16 + $0x118] sm:$0xf0]  ;;  %v11477_v24 = vor.u32 %v13007_v47, %v11474_v35  ;;  %v13196_v62 = vld [vmem:[%s14397_s12 + $0x1ec] sm:$0xf0]  ;;  %v13162_v25 = vld [vmem:[%s14397_s12 + $0xe4] sm:$0xf] }
 0xb5f   : > { %v11858_v56 = vld [vmem:[%s14389_s16 + $0x318] sm:$0xf0]  ;;  %v11605_v12 = vor.u32 %v13039_v17, %v11602_v18  ;;  %v12217_v45 = vor.u32 %v13196_v62, %v12216_v34  ;;  %v13192_v13 = vld [vmem:[%s14397_s12 + $0x1cc] sm:$0xf0]  ;;  %v16783_v47 = vld [vmem:[%s847_s17] sm:$0xf] }
 0xb60   : > { %7395 = vmatpush.bf16.msrb.mxu0 %v11525_v16  ;;  %v11861_v49 = vor.u32 %v13103_v30, %v11858_v56  ;;  %v13164_v16 = vld [vmem:[%s14397_s12 + $0xec] sm:$0xf0]  ;;  %v12090_v60 = vld [vmem:[%s14397_s12 + $0xf0] sm:$0xf0]  ;;  %v13154_v17 = vld [vmem:[%s14397_s12 + $0xa4] sm:$0xf] }
 0xb61   : > { %7414 = vmatpush.bf16.msrb.mxu1 %v11653_v6  ;;  %7434 = vmatpush.bf16.msrb.mxu2 %v11765_v7  ;;  %v12072_v6 = vld [vmem:[%s14397_s12 + $0xc0] sm:$0xf]  ;;  %v12089_v26 = vor.u32 %v13164_v16, %v12088_v41  ;;  %v13156_v7 = vld [vmem:[%s14397_s12 + $0xac] sm:$0xf0]  ;;  %v12058_v56 = vld [vmem:[%s14397_s12 + $0xb0] sm:$0xf0] }
 0xb62   : > { %7452 = vmatpush.bf16.msrb.mxu3 %v11909_v63  ;;  %v12073_v46 = vor.u32 %v13160_v1, %v12072_v6  ;;  %v12056_v63 = vld [vmem:[%s14397_s12 + $0xa0] sm:$0xf]  ;;  %v13188_v35 = vld [vmem:[%s14397_s12 + $0x1ac] sm:$0xf0]  ;;  %v13150_v16 = vld [vmem:[%s14397_s12 + $0x84] sm:$0xf] }
 0xb63   : > { %v12057_v3 = vor.u32 %v13156_v7, %v12056_v63  ;;  %v13184_v41 = vld [vmem:[%s14397_s12 + $0x18c] sm:$0xf0]  ;;  %v12152_v33 = vld [vmem:[%s14397_s12 + $0x160] sm:$0xf] }
 0xb64   : > { %7396 = vmatpush.bf16.msrb.mxu0 %v11509_v5  ;;  %v12025_v5 = vor.u32 %v13148_v43, %v12024_v4  ;;  %v13180_v51 = vld [vmem:[%s14397_s12 + $0x16c] sm:$0xf0] }
 0xb65   : > { %7415 = vmatpush.bf16.msrb.mxu1 %v11637_v42  ;;  %7435 = vmatpush.bf16.msrb.mxu2 %v11749_v48  ;;  %v12008_v42 = vld [vmem:[%s14397_s12 + $0x40] sm:$0xf]  ;;  %v12153_v43 = vor.u32 %v13180_v51, %v12152_v33  ;;  %v12218_v51 = vld [vmem:[%s14397_s12 + $0x1f0] sm:$0xf0] }
 0xb66   : > { %7453 = vmatpush.bf16.msrb.mxu3 %v11893_v9  ;;  %v12009_v55 = vor.u32 %v13144_v14, %v12008_v42 }
 0xb68   : > { %7397 = vmatpush.bf16.msrb.mxu0 %v11493_v37  ;;  %v13158_v37 = vld [vmem:[%s14397_s12 + $0xc4] sm:$0xf] }
 0xb69   : > { %7416 = vmatpush.bf16.msrb.mxu1 %v11621_v10  ;;  %7436 = vmatpush.bf16.msrb.mxu2 %v11733_v19  ;;  %v12074_v10 = vld [vmem:[%s14397_s12 + $0xd0] sm:$0xf0]  ;;  %v12184_v19 = vld [vmem:[%s14397_s12 + $0x1a0] sm:$0xf] }
 0xb6a   : > { %7454 = vmatpush.bf16.msrb.mxu3 %v11877_v8  ;;  %7323 = vmatmul.bf16.vlgmr.msra.gmra.mxu0 %v16507_v15  ;;  %v12185_v30 = vor.u32 %v13188_v35, %v12184_v19 }
 0xb6b   : > { %7342 = vmatmul.bf16.vlgmr.msra.gmra.mxu1 %v16511_v61  ;;  %7361 = vmatmul.bf16.vlgmr.msra.gmra.mxu2 %v16518_v39 }
 0xb6c   : > { %7380 = vmatmul.bf16.vlgmr.msra.gmra.mxu3 %v16522_v21  ;;  %7398 = vmatpush.bf16.msrb.mxu0 %v11477_v24  ;;  %v16790_v24 = vperm.slane %v16783_v47, 0 }
 0xb6d   : > { %7417 = vmatpush.bf16.msrb.mxu1 %v11605_v12  ;;  %v12061_v12 = vor.u32 %v13154_v17, %v12058_v56  ;;  %v13168_v56 = vld [vmem:[%s14397_s12 + $0x10c] sm:$0xf0] }
 0xb6e   : > { %7455 = vmatpush.bf16.msrb.mxu3 %v11861_v49  ;;  %v12168_v49 = vld [vmem:[%s14397_s12 + $0x180] sm:$0xf] }
 0xb6f   : > { %v12169_v6 = vor.u32 %v13184_v41, %v12168_v49  ;;  %v13134_v49 = vld [vmem:[%s14397_s12 + $0x4] sm:$0xf]  ;;  %v11978_v41 = vld [vmem:[%s14397_s12 + $0x10] sm:$0xf0] }
 0xb70   : > { %8269 = vmatpush.bf16.msra.mxu0 %v12089_v26  ;;  %v12042_v26 = vld [vmem:[%s14397_s12 + $0x90] sm:$0xf0] }
 0xb71   : > { %8288 = vmatpush.bf16.msra.mxu1 %v12217_v45 }
 0xb74   : > { %8270 = vmatpush.bf16.msra.mxu0 %v12073_v46  ;;  %v12045_v46 = vor.u32 %v13150_v16, %v12042_v26 }
 0xb78   : > { %8271 = vmatpush.bf16.msra.mxu0 %v12057_v3 }
 0xb7a   : > { %7328 = vmatmul.bf16.gmra.mxu0 %v16619_v40 }
 0xb7b   : > { %7347 = vmatmul.bf16.gmra.mxu1 %v16623_v31  ;;  %7366 = vmatmul.bf16.gmra.mxu2 %v16627_v53 }
 0xb7c   : > { %7385 = vmatmul.bf16.gmra.mxu3 %v16631_v2  ;;  %8272 = vmatpush.bf16.msra.mxu0 %v12041_v52  ;;  %v13146_v52 = vld [vmem:[%s14397_s12 + $0x64] sm:$0xf] }
 0xb80   : > { %8273 = vmatpush.bf16.msra.mxu0 %v12025_v5  ;;  %v12026_v5 = vld [vmem:[%s14397_s12 + $0x70] sm:$0xf0] }
 0xb84   : > { %8274 = vmatpush.bf16.msra.mxu0 %v12009_v55  ;;  %v12029_v55 = vor.u32 %v13146_v52, %v12026_v5  ;;  %v12096_v52 = vld [vmem:[%s14397_s12 + $0xe8] sm:$0xf] }
 0xb8a   : > { %7399 = vmatmul.bf16.vlgmr.msrb.gmra.mxu0 %v16507_v15  ;;  %v11992_v15 = vld [vmem:[%s14397_s12 + $0x20] sm:$0xf] }
 0xb8b   : > { %7418 = vmatmul.bf16.vlgmr.msrb.gmra.mxu1 %v16511_v61  ;;  %7437 = vmatmul.bf16.vlgmr.msrb.gmra.mxu2 %v16518_v39  ;;  %v13140_v61 = vld [vmem:[%s14397_s12 + $0x2c] sm:$0xf0]  ;;  %v11976_v39 = vld [vmem:[%s14397_s12] sm:$0xf] }
 0xb8c   : > { %7456 = vmatmul.bf16.vlgmr.msrb.gmra.mxu3 %v16522_v21  ;;  %v11993_v9 = vor.u32 %v13140_v61, %v11992_v15  ;;  %v13136_v21 = vld [vmem:[%s14397_s12 + $0xc] sm:$0xf0]  ;;  %v12136_v61 = vld [vmem:[%s14397_s12 + $0x140] sm:$0xf] }
 0xb8d   : > { %v11977_v48 = vor.u32 %v13136_v21, %v11976_v39  ;;  %v13142_v21 = vld [vmem:[%s14397_s12 + $0x44] sm:$0xf] }
 0xb8e   : > { %8275 = vmatpush.bf16.msra.mxu0 %v11993_v9  ;;  %v13176_v9 = vld [vmem:[%s14397_s12 + $0x14c] sm:$0xf0] }
 0xb8f   : > { %v12137_v39 = vor.u32 %v13176_v9, %v12136_v61  ;;  %v12328_v61 = vld [vmem:[%s14397_s12 + $0x2c0] sm:$0xf]  ;;  %v13224_v9 = vld [vmem:[%s14397_s12 + $0x2cc] sm:$0xf0] }
 0xb92   : > { %8276 = vmatpush.bf16.msra.mxu0 %v11977_v48  ;;  %v12010_v48 = vld [vmem:[%s14397_s12 + $0x50] sm:$0xf0] }
 0xb93   : > { %v12013_v62 = vor.u32 %v13142_v21, %v12010_v48  ;;  %v12329_v21 = vor.u32 %v13224_v9, %v12328_v61  ;;  %v12202_v48 = vld [vmem:[%s14397_s12 + $0x1d0] sm:$0xf0] }
 0xb9a   : > { %7404 = vmatmul.bf16.gmra.mxu0 %v16619_v40  ;;  %v12093_v40 = vor.u32 %v13162_v25, %v12090_v60 }
 0xb9b   : > { %7423 = vmatmul.bf16.gmra.mxu1 %v16623_v31  ;;  %7442 = vmatmul.bf16.gmra.mxu2 %v16627_v53  ;;  %v12200_v31 = vld [vmem:[%s14397_s12 + $0x1c0] sm:$0xf] }
 0xb9c   : > { %7461 = vmatmul.bf16.gmra.mxu3 %v16631_v2  ;;  %8345 = vmatpush.bf16.msrb.mxu0 %v12093_v40  ;;  %v12201_v53 = vor.u32 %v13192_v13, %v12200_v31  ;;  %v12077_v2 = vor.u32 %v13158_v37, %v12074_v10  ;;  %v12120_v31 = vld [vmem:[%s14397_s12 + $0x120] sm:$0xf]  ;;  %v13172_v13 = vld [vmem:[%s14397_s12 + $0x12c] sm:$0xf0]  ;;  %v13138_v37 = vld [vmem:[%s14397_s12 + $0x24] sm:$0xf] }
 0xb9d   : > { %v11994_v10 = vld [vmem:[%s14397_s12 + $0x30] sm:$0xf0] }
 0xb9e   : > { %8289 = vmatpush.bf16.msra.mxu1 %v12201_v53  ;;  %v12121_v53 = vor.u32 %v13172_v13, %v12120_v31  ;;  %v11997_v35 = vor.u32 %v13138_v37, %v11994_v10  ;;  %v13220_v31 = vld [vmem:[%s14397_s12 + $0x2ac] sm:$0xf0]  ;;  %v13186_v13 = vld [vmem:[%s14397_s12 + $0x1a4] sm:$0xf] }
 0xba0   : > { %8346 = vmatpush.bf16.msrb.mxu0 %v12077_v2 }
 0xba2   : > { %8290 = vmatpush.bf16.msra.mxu1 %v12185_v30  ;;  %v12104_v30 = vld [vmem:[%s14397_s12 + $0x100] sm:$0xf] }
 0xba4   : > { %8347 = vmatpush.bf16.msrb.mxu0 %v12061_v12  ;;  %v12105_v12 = vor.u32 %v13168_v56, %v12104_v30 }
 0xba6   : > { %8291 = vmatpush.bf16.msra.mxu1 %v12169_v6  ;;  %v11981_v6 = vor.u32 %v13134_v49, %v11978_v41  ;;  %v16838_v49 = vperm.slane %v16783_v47, 1 }
 0xba7   : > { %v7172_v8 = vpop.f32.mrf.mxu0  ;;  %v7191_v18 = vpop.f32.mrf.mxu1 }
 0xba8   : > { %v7173_v1 = vadd.f32 %v7172_v8, %v16790_v24  ;;  %8348 = vmatpush.bf16.msrb.mxu0 %v12045_v46  ;;  %v13228_v46 = vld [vmem:[%s14397_s12 + $0x2ec] sm:$0xf0] }
 0xbaa   : > { %v7192_v42 = vadd.f32 %v7191_v18, %v7173_v1  ;;  %8292 = vmatpush.bf16.msra.mxu1 %v12153_v43  ;;  %v12344_v1 = vld [vmem:[%s14397_s12 + $0x2e0] sm:$0xf] }
 0xbab   : > { %v12345_v33 = vor.u32 %v13228_v46, %v12344_v1  ;;  %v13182_v1 = vld [vmem:[%s14397_s12 + $0x184] sm:$0xf] }
 0xbac   : > { %8349 = vmatpush.bf16.msrb.mxu0 %v12029_v55 }
 0xbad   : > { %8307 = vmatpush.bf16.msra.mxu2 %v12345_v33 }
 0xbae   : > { %v7210_v63 = vpop.f32.mrf.mxu2  ;;  %v7229_v7 = vpop.f32.mrf.mxu3  ;;  %8293 = vmatpush.bf16.msra.mxu1 %v12137_v39  ;;  %v13190_v39 = vld [vmem:[%s14397_s12 + $0x1c4] sm:$0xf] }
 0xbaf   : > { %v7174_v3 = vpop.f32.mrf.mxu0  ;;  %v7193_v4 = vpop.f32.mrf.mxu1  ;;  %v7211_v15 = vadd.f32 %v7210_v63, %v7192_v42  ;;  %v13194_v63 = vld [vmem:[%s14397_s12 + $0x1e4] sm:$0xf] }
 0xbb0   : > { %v7175_v14 = vadd.f32 %v7174_v3, %v16790_v24  ;;  %8350 = vmatpush.bf16.msrb.mxu0 %v12013_v62  ;;  %v12221_v42 = vor.u32 %v13194_v63, %v12218_v51  ;;  %v13161_v62 = vld [vmem:[%s14397_s12 + $0xd4] sm:$0xf0]  ;;  %v12170_v63 = vld [vmem:[%s14397_s12 + $0x190] sm:$0xf0] }
 0xbb1   : > { %v7230_v45 = vadd.f32 %v7229_v7, %v7211_v15  ;;  %8308 = vmatpush.bf16.msra.mxu2 %v12329_v21  ;;  %v12032_v21 = vld [vmem:[%s14397_s12 + $0x68] sm:$0xf] }
 0xbb2   : > { %v7194_v34 = vadd.f32 %v7193_v4, %v7175_v14  ;;  %8294 = vmatpush.bf16.msra.mxu1 %v12121_v53  ;;  %v13165_v4 = vld [vmem:[%s14397_s12 + $0xf4] sm:$0xf0] }
 0xbb3   : > { %v7467_v17 = vmax.f32 %v7230_v45, 0.0  ;;  %v12097_v14 = vor.u32 %v13165_v4, %v12096_v52  ;;  %v12205_v45 = vor.u32 %v13190_v39, %v12202_v48  ;;  %v12173_v52 = vor.u32 %v13182_v1, %v12170_v63  ;;  %v12154_v39 = vld [vmem:[%s14397_s12 + $0x170] sm:$0xf0]  ;;  %v13149_v48 = vld [vmem:[%s14397_s12 + $0x74] sm:$0xf0] }
 0xbb4   : > { %8351 = vmatpush.bf16.msrb.mxu0 %v11997_v35  ;;  %v12000_v1 = vld [vmem:[%s14397_s12 + $0x28] sm:$0xf] }
 0xbb6   : > { %v7212_v25 = vpop.f32.mrf.mxu2  ;;  %v7231_v40 = vpop.f32.mrf.mxu3  ;;  %8295 = vmatpush.bf16.msra.mxu1 %v12105_v12 }
 0xbb7   : > { %v7213_v60 = vadd.f32 %v7212_v25, %v7194_v34  ;;  %v7177_v8 = vpop.f32.mrf.mxu0  ;;  %v12080_v34 = vld [vmem:[%s14397_s12 + $0xc8] sm:$0xf] }
 0xbb8   : > { %v7196_v19 = vpop.f32.mrf.mxu1  ;;  %v7178_v26 = vadd.f32 %v7177_v8, %v16790_v24  ;;  %8352 = vmatpush.bf16.msrb.mxu0 %v11981_v6  ;;  %v12064_v8 = vld [vmem:[%s14397_s12 + $0xa8] sm:$0xf]  ;;  %v12296_v6 = vld [vmem:[%s14397_s12 + $0x280] sm:$0xf] }
 0xbb9   : > { %v7232_v2 = vadd.f32 %v7231_v40, %v7213_v60  ;;  %v12081_v60 = vor.u32 %v13161_v62, %v12080_v34  ;;  %v12312_v40 = vld [vmem:[%s14397_s12 + $0x2a0] sm:$0xf] }
 0xbba   : > { %v7197_v55 = vadd.f32 %v7196_v19, %v7178_v26  ;;  %8364 = vmatpush.bf16.msrb.mxu1 %v12221_v42  ;;  %v12313_v10 = vor.u32 %v13220_v31, %v12312_v40  ;;  %v13157_v19 = vld [vmem:[%s14397_s12 + $0xb4] sm:$0xf0]  ;;  %v13216_v26 = vld [vmem:[%s14397_s12 + $0x28c] sm:$0xf0]  ;;  %v12280_v42 = vld [vmem:[%s14397_s12 + $0x260] sm:$0xf] }
 0xbbb   : > { %v7471_v18 = vmax.f32 %v7232_v2, 0.0  ;;  %v12186_v2 = vld [vmem:[%s14397_s12 + $0x1b0] sm:$0xf0]  ;;  %v12065_v12 = vor.u32 %v13157_v19, %v12064_v8  ;;  %v12297_v46 = vor.u32 %v13216_v26, %v12296_v6  ;;  %v12264_v40 = vld [vmem:[%s14397_s12 + $0x240] sm:$0xf] }
 0xbbc   : > { %v12189_v56 = vor.u32 %v13186_v13, %v12186_v2  ;;  %8309 = vmatpush.bf16.msra.mxu2 %v12313_v10  ;;  %v13208_v31 = vld [vmem:[%s14397_s12 + $0x24c] sm:$0xf0]  ;;  %v13174_v13 = vld [vmem:[%s14397_s12 + $0x144] sm:$0xf]  ;;  %v12016_v10 = vld [vmem:[%s14397_s12 + $0x48] sm:$0xf] }
 0xbbd   : > { %v16814_v16 = vpack.c.bf16 %v7471_v18, %v7467_v17  ;;  %v13145_v2 = vld [vmem:[%s14397_s12 + $0x54] sm:$0xf0]  ;;  %v12122_v26 = vld [vmem:[%s14397_s12 + $0x130] sm:$0xf0] }
 0xbbe   : > { %v7215_v7 = vpop.f32.mrf.mxu2  ;;  %8365 = vmatpush.bf16.msrb.mxu1 %v12205_v45  ;;  %v12033_v45 = vor.u32 %v13149_v48, %v12032_v21 }
 0xbbf   : > { %8277 = vmatmul.bf16.vlgmr.msra.gmra.mxu0 %v16814_v16  ;;  %v7234_v3 = vpop.f32.mrf.mxu3  ;;  %v7179_v43 = vpop.f32.mrf.mxu0  ;;  %v7216_v25 = vadd.f32 %v7215_v7, %v7197_v55  ;;  %v12048_v7 = vld [vmem:[%s14397_s12 + $0x88] sm:$0xf]  ;;  %v13178_v55 = vld [vmem:[%s14397_s12 + $0x164] sm:$0xf] }
 0xbc0   : > { %v7198_v5 = vpop.f32.mrf.mxu1  ;;  %v7180_v15 = vadd.f32 %v7179_v43, %v16790_v24  ;;  %8421 = vmatpush.bf16.msra.mxu0 %v12097_v14  ;;  %8310 = vmatpush.bf16.msra.mxu2 %v12297_v46  ;;  %v13212_v14 = vld [vmem:[%s14397_s12 + $0x26c] sm:$0xf0]  ;;  %v13141_v46 = vld [vmem:[%s14397_s12 + $0x34] sm:$0xf0] }
 0xbc1   : > { %v7235_v35 = vadd.f32 %v7234_v3, %v7216_v25  ;;  %v13153_v3 = vld [vmem:[%s14397_s12 + $0x94] sm:$0xf0]  ;;  %v12281_v9 = vor.u32 %v13212_v14, %v12280_v42  ;;  %v12157_v25 = vor.u32 %v13178_v55, %v12154_v39  ;;  %v13200_v42 = vld [vmem:[%s14397_s12 + $0x20c] sm:$0xf0]  ;;  %v13166_v14 = vld [vmem:[%s14397_s12 + $0x104] sm:$0xf] }
 0xbc2   : > { %v7199_v24 = vadd.f32 %v7198_v5, %v7180_v15  ;;  %8366 = vmatpush.bf16.msrb.mxu1 %v12189_v56  ;;  %v12049_v4 = vor.u32 %v13153_v3, %v12048_v7  ;;  %v13170_v56 = vld [vmem:[%s14397_s12 + $0x124] sm:$0xf] }
 0xbc3   : > { %v7475_v33 = vmax.f32 %v7235_v35, 0.0  ;;  %v12017_v35 = vor.u32 %v13145_v2, %v12016_v10 }
 0xbc4   : > { %8422 = vmatpush.bf16.msra.mxu0 %v12081_v60  ;;  %8311 = vmatpush.bf16.msra.mxu2 %v12281_v9  ;;  %v11984_v9 = vld [vmem:[%s14397_s12 + $0x8] sm:$0xf] }
 0xbc6   : > { %v7217_v37 = vpop.f32.mrf.mxu2  ;;  %8367 = vmatpush.bf16.msrb.mxu1 %v12173_v52  ;;  %v12001_v52 = vor.u32 %v13141_v46, %v12000_v1 }
 0xbc7   : > { %v7236_v53 = vpop.f32.mrf.mxu3  ;;  %v7218_v17 = vadd.f32 %v7217_v37, %v7199_v24  ;;  %v7248_v18 = vpop.f32.mrf.mxu0  ;;  %v12265_v37 = vor.u32 %v13208_v31, %v12264_v40 }
 0xbc8   : > { %v7267_v30 = vpop.f32.mrf.mxu1  ;;  %8423 = vmatpush.bf16.msra.mxu0 %v12065_v12  ;;  %v7249_v5 = vadd.f32 %v7248_v18, %v16838_v49  ;;  %v12248_v18 = vld [vmem:[%s14397_s12 + $0x220] sm:$0xf] }
 0xbc9   : > { %v7237_v41 = vadd.f32 %v7236_v53, %v7218_v17  ;;  %v12138_v53 = vld [vmem:[%s14397_s12 + $0x150] sm:$0xf0]  ;;  %8312 = vmatpush.bf16.msra.mxu2 %v12265_v37 }
 0xbca   : > { %v7268_v60 = vadd.f32 %v7267_v30, %v7249_v5  ;;  %8368 = vmatpush.bf16.msrb.mxu1 %v12157_v25  ;;  %v12141_v19 = vor.u32 %v13174_v13, %v12138_v53  ;;  %v13204_v30 = vld [vmem:[%s14397_s12 + $0x22c] sm:$0xf0]  ;;  %v12232_v5 = vld [vmem:[%s14397_s12 + $0x200] sm:$0xf]  ;;  %v13226_v13 = vld [vmem:[%s14397_s12 + $0x2e4] sm:$0xf] }
 0xbcb   : > { %v7479_v51 = vmax.f32 %v7237_v41, 0.0  ;;  %v12249_v6 = vor.u32 %v13204_v30, %v12248_v18  ;;  %v12233_v55 = vor.u32 %v13200_v42, %v12232_v5  ;;  %v12346_v37 = vld [vmem:[%s14397_s12 + $0x2f0] sm:$0xf0]  ;;  %v12224_v53 = vld [vmem:[%s14397_s12 + $0x1e8] sm:$0xf] }
 0xbcc   : > { %8424 = vmatpush.bf16.msra.mxu0 %v12049_v4 }
 0xbcd   : > { %v16846_v43 = vpack.c.bf16 %v7479_v51, %v7475_v33  ;;  %v12125_v51 = vor.u32 %v13170_v56, %v12122_v26  ;;  %8313 = vmatpush.bf16.msra.mxu2 %v12249_v6  ;;  %v13256_v6 = vld [vmem:[%s14397_s12 + $0x3cc] sm:$0xf0]  ;;  %v13222_v26 = vld [vmem:[%s14397_s12 + $0x2c4] sm:$0xf] }
 0xbce   : > { %v7286_v15 = vpop.f32.mrf.mxu2  ;;  %8369 = vmatpush.bf16.msrb.mxu1 %v12141_v19  ;;  %v13197_v19 = vld [vmem:[%s14397_s12 + $0x1f4] sm:$0xf0] }
 0xbcf   : > { %v7305_v61 = vpop.f32.mrf.mxu3  ;;  %8282 = vmatmul.bf16.gmra.mxu0 %v16846_v43  ;;  %v7250_v34 = vpop.f32.mrf.mxu0  ;;  %v7287_v8 = vadd.f32 %v7286_v15, %v7268_v60  ;;  %v12106_v15 = vld [vmem:[%s14397_s12 + $0x110] sm:$0xf0]  ;;  %v13260_v60 = vld [vmem:[%s14397_s12 + $0x3ec] sm:$0xf0]  ;;  %v12225_v18 = vor.u32 %v13197_v19, %v12224_v53  ;;  %v13214_v19 = vld [vmem:[%s14397_s12 + $0x284] sm:$0xf] }
 0xbd0   : > { %v7269_v62 = vpop.f32.mrf.mxu1  ;;  %v7251_v24 = vadd.f32 %v7250_v34, %v16838_v49  ;;  %8425 = vmatpush.bf16.msra.mxu0 %v12033_v45  ;;  %v12109_v48 = vor.u32 %v13166_v14, %v12106_v15  ;;  %v12472_v45 = vld [vmem:[%s14397_s12 + $0x3e0] sm:$0xf]  ;;  %v13252_v15 = vld [vmem:[%s14397_s12 + $0x3ac] sm:$0xf0] }
 0xbd1   : > { %v7306_v63 = vadd.f32 %v7305_v61, %v7287_v8  ;;  %v13137_v61 = vld [vmem:[%s14397_s12 + $0x14] sm:$0xf0]  ;;  %8314 = vmatpush.bf16.msra.mxu2 %v12233_v55  ;;  %v12473_v31 = vor.u32 %v13260_v60, %v12472_v45  ;;  %v12349_v8 = vor.u32 %v13226_v13, %v12346_v37  ;;  %v12440_v55 = vld [vmem:[%s14397_s12 + $0x3a0] sm:$0xf]  ;;  %v12192_v45 = vld [vmem:[%s14397_s12 + $0x1a8] sm:$0xf] }
 0xbd2   : > { %v7270_v17 = vadd.f32 %v7269_v62, %v7251_v24  ;;  %8370 = vmatpush.bf16.msrb.mxu1 %v12125_v51  ;;  %v11985_v34 = vor.u32 %v13137_v61, %v11984_v9  ;;  %v13193_v51 = vld [vmem:[%s14397_s12 + $0x1d4] sm:$0xf0]  ;;  %v13218_v9 = vld [vmem:[%s14397_s12 + $0x2a4] sm:$0xf]  ;;  %v13155_v13 = vld [vmem:[%s14397_s12 + $0xac] sm:$0xf] }
 0xbd3   : > { %v7468_v39 = vmax.f32 %v7306_v63, 0.0  ;;  %8326 = vmatpush.bf16.msra.mxu3 %v12473_v31  ;;  %v12330_v63 = vld [vmem:[%s14397_s12 + $0x2d0] sm:$0xf0]  ;;  %v13189_v60 = vld [vmem:[%s14397_s12 + $0x1b4] sm:$0xf0] }
 0xbd4   : > { %8426 = vmatpush.bf16.msra.mxu0 %v12017_v35  ;;  %v13163_v35 = vld [vmem:[%s14397_s12 + $0xec] sm:$0xf]  ;;  %v12193_v31 = vor.u32 %v13189_v60, %v12192_v45  ;;  %v12066_v37 = vld [vmem:[%s14397_s12 + $0xb8] sm:$0xf0]  ;;  %v12392_v60 = vld [vmem:[%s14397_s12 + $0x340] sm:$0xf] }
 0xbd5   : > { %8383 = vmatpush.bf16.msrb.mxu2 %v12349_v8  ;;  %v13248_v8 = vld [vmem:[%s14397_s12 + $0x38c] sm:$0xf0] }
 0xbd6   : > { %v7288_v12 = vpop.f32.mrf.mxu2  ;;  %8371 = vmatpush.bf16.msrb.mxu1 %v12109_v48 }
 0xbd7   : > { %v7307_v41 = vpop.f32.mrf.mxu3  ;;  %v7289_v7 = vadd.f32 %v7288_v12, %v7270_v17  ;;  %v7253_v3 = vpop.f32.mrf.mxu0  ;;  %v12098_v17 = vld [vmem:[%s14397_s12 + $0xf8] sm:$0xf0] }
 0xbd8   : > { %v7272_v33 = vpop.f32.mrf.mxu1  ;;  %8427 = vmatpush.bf16.msra.mxu0 %v12001_v52  ;;  %v7254_v25 = vadd.f32 %v7253_v3, %v16838_v49  ;;  %v12101_v30 = vor.u32 %v13163_v35, %v12098_v17  ;;  %v12333_v3 = vor.u32 %v13222_v26, %v12330_v63  ;;  %v13159_v52 = vld [vmem:[%s14397_s12 + $0xcc] sm:$0xf]  ;;  %v12050_v26 = vld [vmem:[%s14397_s12 + $0x98] sm:$0xf0] }
 0xbd9   : > { %v7308_v4 = vadd.f32 %v7307_v41, %v7289_v7  ;;  %v12456_v41 = vld [vmem:[%s14397_s12 + $0x3c0] sm:$0xf]  ;;  %v12208_v7 = vld [vmem:[%s14397_s12 + $0x1c8] sm:$0xf] }
 0xbda   : > { %v7273_v56 = vadd.f32 %v7272_v33, %v7254_v25  ;;  %v12457_v46 = vor.u32 %v13256_v6, %v12456_v41  ;;  %8384 = vmatpush.bf16.msrb.mxu2 %v12333_v3  ;;  %v12314_v25 = vld [vmem:[%s14397_s12 + $0x2b0] sm:$0xf0]  ;;  %v13185_v41 = vld [vmem:[%s14397_s12 + $0x194] sm:$0xf0]  ;;  %v13151_v6 = vld [vmem:[%s14397_s12 + $0x8c] sm:$0xf] }
 0xbdb   : > { %v7472_v21 = vmax.f32 %v7308_v4, 0.0  ;;  %v12082_v4 = vld [vmem:[%s14397_s12 + $0xd8] sm:$0xf0] }
 0xbdc   : > { %8428 = vmatpush.bf16.msra.mxu0 %v11985_v34  ;;  %8327 = vmatpush.bf16.msra.mxu3 %v12457_v46  ;;  %v12085_v5 = vor.u32 %v13159_v52, %v12082_v4  ;;  %v12441_v34 = vor.u32 %v13252_v15, %v12440_v55  ;;  %v12408_v52 = vld [vmem:[%s14397_s12 + $0x360] sm:$0xf]  ;;  %v13244_v4 = vld [vmem:[%s14397_s12 + $0x36c] sm:$0xf0]  ;;  %v12160_v55 = vld [vmem:[%s14397_s12 + $0x168] sm:$0xf] }
 0xbdd   : > { %v16875_v62 = vpack.c.bf16 %v7472_v21, %v7468_v39  ;;  %v13181_v15 = vld [vmem:[%s14397_s12 + $0x174] sm:$0xf0] }
 0xbde   : > { %v7291_v24 = vpop.f32.mrf.mxu2 }
 0xbdf   : > { %v7310_v40 = vpop.f32.mrf.mxu3  ;;  %8296 = vmatmul.bf16.vlgmr.msra.gmra.mxu1 %v16875_v62  ;;  %8353 = vmatmul.bf16.vlgmr.msrb.gmra.mxu0 %v16814_v16  ;;  %v7255_v10 = vpop.f32.mrf.mxu0  ;;  %v7292_v1 = vadd.f32 %v7291_v24, %v7273_v56  ;;  %v12317_v24 = vor.u32 %v13218_v9, %v12314_v25  ;;  %v12176_v56 = vld [vmem:[%s14397_s12 + $0x188] sm:$0xf] }
 0xbe0   : > { %v7274_v2 = vpop.f32.mrf.mxu1  ;;  %v7256_v12 = vadd.f32 %v7255_v10, %v16838_v49  ;;  %8440 = vmatpush.bf16.msra.mxu1 %v12225_v18  ;;  %8497 = vmatpush.bf16.msrb.mxu0 %v12101_v30  ;;  %v12209_v49 = vor.u32 %v13193_v51, %v12208_v7  ;;  %v12069_v10 = vor.u32 %v13155_v13, %v12066_v37  ;;  %v12298_v30 = vld [vmem:[%s14397_s12 + $0x290] sm:$0xf0] }
 0xbe1   : > { %v7311_v61 = vadd.f32 %v7310_v40, %v7292_v1  ;;  %v16906_v40 = vperm.slane %v16783_v47, 2  ;;  %8328 = vmatpush.bf16.msra.mxu3 %v12441_v34  ;;  %8385 = vmatpush.bf16.msrb.mxu2 %v12317_v24  ;;  %v12177_v63 = vor.u32 %v13185_v41, %v12176_v56  ;;  %v12053_v7 = vor.u32 %v13151_v6, %v12050_v26  ;;  %v13240_v24 = vld [vmem:[%s14397_s12 + $0x34c] sm:$0xf0]  ;;  %v13202_v6 = vld [vmem:[%s14397_s12 + $0x224] sm:$0xf] }
 0xbe2   : > { %v7275_v33 = vadd.f32 %v7274_v2, %v7256_v12  ;;  %v12424_v2 = vld [vmem:[%s14397_s12 + $0x380] sm:$0xf]  ;;  %v12301_v12 = vor.u32 %v13214_v19, %v12298_v30  ;;  %v12393_v37 = vor.u32 %v13240_v24, %v12392_v60  ;;  %v12018_v19 = vld [vmem:[%s14397_s12 + $0x58] sm:$0xf0]  ;;  %v13236_v41 = vld [vmem:[%s14397_s12 + $0x32c] sm:$0xf0] }
 0xbe3   : > { %v7476_v35 = vmax.f32 %v7311_v61, 0.0  ;;  %v12425_v18 = vor.u32 %v13248_v8, %v12424_v2  ;;  %v12161_v61 = vor.u32 %v13181_v15, %v12160_v55  ;;  %v13177_v2 = vld [vmem:[%s14397_s12 + $0x154] sm:$0xf0]  ;;  %v13143_v8 = vld [vmem:[%s14397_s12 + $0x4c] sm:$0xf] }
 0xbe4   : > { %8441 = vmatpush.bf16.msra.mxu1 %v12209_v49  ;;  %8498 = vmatpush.bf16.msrb.mxu0 %v12085_v5  ;;  %v12360_v15 = vld [vmem:[%s14397_s12 + $0x300] sm:$0xf]  ;;  %v13169_v24 = vld [vmem:[%s14397_s12 + $0x114] sm:$0xf0] }
 0xbe5   : > { %8329 = vmatpush.bf16.msra.mxu3 %v12425_v18  ;;  %8386 = vmatpush.bf16.msrb.mxu2 %v12301_v12  ;;  %v12021_v18 = vor.u32 %v13143_v8, %v12018_v19  ;;  %v12376_v12 = vld [vmem:[%s14397_s12 + $0x320] sm:$0xf]  ;;  %v13258_v19 = vld [vmem:[%s14397_s12 + $0x3e4] sm:$0xf] }
 0xbe6   : > { %v7293_v42 = vpop.f32.mrf.mxu2 }
 0xbe7   : > { %v7312_v14 = vpop.f32.mrf.mxu3  ;;  %v7294_v39 = vadd.f32 %v7293_v42, %v7275_v33  ;;  %v7324_v21 = vpop.f32.mrf.mxu0  ;;  %v13210_v33 = vld [vmem:[%s14397_s12 + $0x264] sm:$0xf]  ;;  %v12409_v42 = vor.u32 %v13244_v4, %v12408_v52  ;;  %v12250_v52 = vld [vmem:[%s14397_s12 + $0x230] sm:$0xf0]  ;;  %v12128_v4 = vld [vmem:[%s14397_s12 + $0x128] sm:$0xf] }
 0xbe8   : > { %v7343_v48 = vpop.f32.mrf.mxu1  ;;  %8442 = vmatpush.bf16.msra.mxu1 %v12193_v31  ;;  %8499 = vmatpush.bf16.msrb.mxu0 %v12069_v10  ;;  %v7325_v46 = vadd.f32 %v7324_v21, %v16906_v40  ;;  %v12034_v21 = vld [vmem:[%s14397_s12 + $0x78] sm:$0xf0]  ;;  %v13206_v31 = vld [vmem:[%s14397_s12 + $0x244] sm:$0xf]  ;;  %v12144_v10 = vld [vmem:[%s14397_s12 + $0x148] sm:$0xf] }
 0xbe9   : > { %v7313_v53 = vadd.f32 %v7312_v14, %v7294_v39  ;;  %v12282_v14 = vld [vmem:[%s14397_s12 + $0x270] sm:$0xf0]  ;;  %v13147_v39 = vld [vmem:[%s14397_s12 + $0x6c] sm:$0xf]  ;;  %8330 = vmatpush.bf16.msra.mxu3 %v12409_v42 }
 0xbea   : > { %v12285_v9 = vor.u32 %v13210_v33, %v12282_v14  ;;  %v7344_v34 = vadd.f32 %v7343_v48, %v7325_v46  ;;  %v12037_v45 = vor.u32 %v13147_v39, %v12034_v21  ;;  %v13173_v33 = vld [vmem:[%s14397_s12 + $0x134] sm:$0xf0]  ;;  %v13139_v42 = vld [vmem:[%s14397_s12 + $0x2c] sm:$0xf]  ;;  %v12002_v14 = vld [vmem:[%s14397_s12 + $0x38] sm:$0xf0] }
 0xbeb   : > { %v7480_v17 = vmax.f32 %v7313_v53, 0.0  ;;  %v12266_v53 = vld [vmem:[%s14397_s12 + $0x250] sm:$0xf0]  ;;  %v12005_v55 = vor.u32 %v13139_v42, %v12002_v14  ;;  %v13225_v42 = vld [vmem:[%s14397_s12 + $0x2d4] sm:$0xf0] }
 0xbec   : > { %8443 = vmatpush.bf16.msra.mxu1 %v12177_v63  ;;  %8500 = vmatpush.bf16.msrb.mxu0 %v12053_v7  ;;  %v12269_v48 = vor.u32 %v13206_v31, %v12266_v53  ;;  %v13135_v31 = vld [vmem:[%s14397_s12 + $0xc] sm:$0xf] }
 0xbed   : > { %v16916_v1 = vpack.c.bf16 %v7480_v17, %v7476_v35  ;;  %8387 = vmatpush.bf16.msrb.mxu2 %v12285_v9  ;;  %8331 = vmatpush.bf16.msra.mxu3 %v12393_v37  ;;  %v12145_v17 = vor.u32 %v13177_v2, %v12144_v10  ;;  %v13232_v9 = vld [vmem:[%s14397_s12 + $0x30c] sm:$0xf0]  ;;  %v13191_v14 = vld [vmem:[%s14397_s12 + $0x1cc] sm:$0xf] }
 0xbee   : > { %v7362_v3 = vpop.f32.mrf.mxu2 }
 0xbef   : > { %v7381_v51 = vpop.f32.mrf.mxu3  ;;  %8301 = vmatmul.bf16.gmra.mxu1 %v16916_v1  ;;  %8358 = vmatmul.bf16.gmra.mxu0 %v16846_v43  ;;  %v7326_v49 = vpop.f32.mrf.mxu0  ;;  %v7363_v13 = vadd.f32 %v7362_v3, %v7344_v34  ;;  %v12377_v3 = vor.u32 %v13236_v41, %v12376_v12  ;;  %v12361_v34 = vor.u32 %v13232_v9, %v12360_v15  ;;  %v13229_v12 = vld [vmem:[%s14397_s12 + $0x2f4] sm:$0xf0]  ;;  %v13195_v41 = vld [vmem:[%s14397_s12 + $0x1ec] sm:$0xf] }
 0xbf0   : > { %v7345_v5 = vpop.f32.mrf.mxu1  ;;  %v7327_v25 = vadd.f32 %v7326_v49, %v16906_v40  ;;  %8444 = vmatpush.bf16.msra.mxu1 %v12161_v61  ;;  %8501 = vmatpush.bf16.msrb.mxu0 %v12037_v45  ;;  %v12253_v49 = vor.u32 %v13202_v6, %v12250_v52  ;;  %v13198_v61 = vld [vmem:[%s14397_s12 + $0x204] sm:$0xf]  ;;  %v12112_v45 = vld [vmem:[%s14397_s12 + $0x108] sm:$0xf]  ;;  %v12226_v6 = vld [vmem:[%s14397_s12 + $0x1f8] sm:$0xf0] }
 0xbf1   : > { %8388 = vmatpush.bf16.msrb.mxu2 %v12269_v48  ;;  %v7382_v26 = vadd.f32 %v7381_v51, %v7363_v13  ;;  %8332 = vmatpush.bf16.msra.mxu3 %v12377_v3  ;;  %v11986_v13 = vld [vmem:[%s14397_s12 + $0x18] sm:$0xf0]  ;;  %v12113_v10 = vor.u32 %v13169_v24, %v12112_v45  ;;  %v13254_v52 = vld [vmem:[%s14397_s12 + $0x3c4] sm:$0xf] }
 0xbf2   : > { %v7346_v35 = vadd.f32 %v7345_v5, %v7327_v25  ;;  %v12129_v5 = vor.u32 %v13173_v33, %v12128_v4  ;;  %v12234_v25 = vld [vmem:[%s14397_s12 + $0x210] sm:$0xf0]  ;;  %v11989_v48 = vor.u32 %v13135_v31, %v11986_v13  ;;  %v12336_v33 = vld [vmem:[%s14397_s12 + $0x2c8] sm:$0xf]  ;;  %v13221_v31 = vld [vmem:[%s14397_s12 + $0x2b4] sm:$0xf0] }
 0xbf3   : > { %v7469_v39 = vmax.f32 %v7382_v26, 0.0  ;;  %v12237_v60 = vor.u32 %v13198_v61, %v12234_v25  ;;  %v12458_v4 = vld [vmem:[%s14397_s12 + $0x3d0] sm:$0xf0]  ;;  %v13250_v61 = vld [vmem:[%s14397_s12 + $0x3a4] sm:$0xf] }
 0xbf4   : > { %8445 = vmatpush.bf16.msra.mxu1 %v12145_v17  ;;  %8502 = vmatpush.bf16.msrb.mxu0 %v12021_v18  ;;  %v12352_v17 = vld [vmem:[%s14397_s12 + $0x2e8] sm:$0xf]  ;;  %v13187_v13 = vld [vmem:[%s14397_s12 + $0x1ac] sm:$0xf] }
 0xbf5   : > { %8389 = vmatpush.bf16.msrb.mxu2 %v12253_v49  ;;  %8333 = vmatpush.bf16.msra.mxu3 %v12361_v34  ;;  %v12353_v26 = vor.u32 %v13229_v12, %v12352_v17  ;;  %v12304_v17 = vld [vmem:[%s14397_s12 + $0x288] sm:$0xf]  ;;  %v13217_v12 = vld [vmem:[%s14397_s12 + $0x294] sm:$0xf0] }
 0xbf6   : > { %v7364_v30 = vpop.f32.mrf.mxu2 }
 0xbf7   : > { %v7383_v56 = vpop.f32.mrf.mxu3  ;;  %v7365_v46 = vadd.f32 %v7364_v30, %v7346_v35  ;;  %v7329_v63 = vpop.f32.mrf.mxu0  ;;  %v12474_v35 = vld [vmem:[%s14397_s12 + $0x3f0] sm:$0xf0] }
 0xbf8   : > { %v7348_v7 = vpop.f32.mrf.mxu1  ;;  %8446 = vmatpush.bf16.msra.mxu1 %v12129_v5  ;;  %8503 = vmatpush.bf16.msrb.mxu0 %v12005_v55  ;;  %v7330_v53 = vadd.f32 %v7329_v63, %v16906_v40  ;;  %v12461_v5 = vor.u32 %v13254_v52, %v12458_v4  ;;  %v12210_v55 = vld [vmem:[%s14397_s12 + $0x1d8] sm:$0xf0]  ;;  %v13242_v4 = vld [vmem:[%s14397_s12 + $0x364] sm:$0xf] }
 0xbf9   : > { %v7384_v51 = vadd.f32 %v7383_v56, %v7365_v46  ;;  %8390 = vmatpush.bf16.msrb.mxu2 %v12237_v60  ;;  %v12477_v56 = vor.u32 %v13258_v19, %v12474_v35  ;;  %v12229_v46 = vor.u32 %v13195_v41, %v12226_v6  ;;  %v16980_v19 = vperm.slane %v16783_v47, 3  ;;  %v12426_v35 = vld [vmem:[%s14397_s12 + $0x390] sm:$0xf0]  ;;  %v13183_v41 = vld [vmem:[%s14397_s12 + $0x18c] sm:$0xf] }
 0xbfa   : > { %v7349_v63 = vadd.f32 %v7348_v7, %v7330_v53  ;;  %v12194_v53 = vld [vmem:[%s14397_s12 + $0x1b8] sm:$0xf0]  ;;  %v12305_v6 = vor.u32 %v13217_v12, %v12304_v17 }
 0xbfb   : > { %v7473_v21 = vmax.f32 %v7384_v51, 0.0  ;;  %8402 = vmatpush.bf16.msrb.mxu3 %v12477_v56  ;;  %v12337_v51 = vor.u32 %v13225_v42, %v12336_v33  ;;  %v12410_v33 = vld [vmem:[%s14397_s12 + $0x370] sm:$0xf0] }
 0xbfc   : > { %8447 = vmatpush.bf16.msra.mxu1 %v12113_v10  ;;  %8504 = vmatpush.bf16.msrb.mxu0 %v11989_v48  ;;  %v12197_v48 = vor.u32 %v13187_v13, %v12194_v53  ;;  %v12413_v42 = vor.u32 %v13242_v4, %v12410_v33  ;;  %v13234_v53 = vld [vmem:[%s14397_s12 + $0x324] sm:$0xf] }
 0xbfd   : > { %v16954_v37 = vpack.c.bf16 %v7473_v21, %v7469_v39  ;;  %v12442_v39 = vld [vmem:[%s14397_s12 + $0x3b0] sm:$0xf0]  ;;  %v12320_v21 = vld [vmem:[%s14397_s12 + $0x2a8] sm:$0xf] }
 0xbfe   : > { %v7367_v2 = vpop.f32.mrf.mxu2  ;;  %v12445_v24 = vor.u32 %v13250_v61, %v12442_v39  ;;  %v12321_v10 = vor.u32 %v13221_v31, %v12320_v21  ;;  %v12394_v61 = vld [vmem:[%s14397_s12 + $0x350] sm:$0xf0]  ;;  %v12272_v39 = vld [vmem:[%s14397_s12 + $0x248] sm:$0xf]  ;;  %v12146_v31 = vld [vmem:[%s14397_s12 + $0x158] sm:$0xf0] }
 0xbff   : > { %v7386_v8 = vpop.f32.mrf.mxu3  ;;  %8315 = vmatmul.bf16.vlgmr.msra.gmra.mxu2 %v16954_v37  ;;  %8372 = vmatmul.bf16.vlgmr.msrb.gmra.mxu1 %v16875_v62  ;;  %v7331_v18 = vpop.f32.mrf.mxu0  ;;  %v7368_v49 = vadd.f32 %v7367_v2, %v7349_v63 }
 0xc00   : > { %v7350_v30 = vpop.f32.mrf.mxu1  ;;  %8429 = vmatmul.bf16.vlgmr.msra.gmra.mxu0 %v16814_v16  ;;  %v7332_v3 = vadd.f32 %v7331_v18, %v16906_v40  ;;  %8459 = vmatpush.bf16.msra.mxu2 %v12353_v26  ;;  %v12213_v40 = vor.u32 %v13191_v14, %v12210_v55  ;;  %v12178_v26 = vld [vmem:[%s14397_s12 + $0x198] sm:$0xf0]  ;;  %v13213_v14 = vld [vmem:[%s14397_s12 + $0x274] sm:$0xf0] }
 0xc01   : > { %8516 = vmatpush.bf16.msrb.mxu1 %v12229_v46  ;;  %8403 = vmatpush.bf16.msrb.mxu3 %v12461_v5  ;;  %v7387_v34 = vadd.f32 %v7386_v8, %v7368_v49  ;;  %v13246_v8 = vld [vmem:[%s14397_s12 + $0x384] sm:$0xf]  ;;  %v12181_v63 = vor.u32 %v13183_v41, %v12178_v26  ;;  %v12288_v49 = vld [vmem:[%s14397_s12 + $0x268] sm:$0xf]  ;;  %v12162_v55 = vld [vmem:[%s14397_s12 + $0x178] sm:$0xf0] }
 0xc02   : > { %v7351_v7 = vadd.f32 %v7350_v30, %v7332_v3  ;;  %v12429_v56 = vor.u32 %v13246_v8, %v12426_v35  ;;  %v13205_v8 = vld [vmem:[%s14397_s12 + $0x234] sm:$0xf0]  ;;  %v12362_v26 = vld [vmem:[%s14397_s12 + $0x310] sm:$0xf0] }
 0xc03   : > { %v7477_v18 = vmax.f32 %v7387_v34, 0.0 }
 0xc04   : > { %8460 = vmatpush.bf16.msra.mxu2 %v12337_v51  ;;  %v13179_v51 = vld [vmem:[%s14397_s12 + $0x16c] sm:$0xf] }
 0xc05   : > { %8517 = vmatpush.bf16.msrb.mxu1 %v12213_v40  ;;  %8404 = vmatpush.bf16.msrb.mxu3 %v12445_v24  ;;  %v12289_v40 = vor.u32 %v13213_v14, %v12288_v49  ;;  %v13175_v24 = vld [vmem:[%s14397_s12 + $0x14c] sm:$0xf]  ;;  %v13201_v14 = vld [vmem:[%s14397_s12 + $0x214] sm:$0xf0] }
 0xc06   : > { %v7369_v15 = vpop.f32.mrf.mxu2 }
 0xc07   : > { %v7388_v9 = vpop.f32.mrf.mxu3  ;;  %v7370_v25 = vadd.f32 %v7369_v15, %v7351_v7  ;;  %v7400_v45 = vpop.f32.mrf.mxu0  ;;  %v12165_v15 = vor.u32 %v13179_v51, %v12162_v55  ;;  %v13167_v51 = vld [vmem:[%s14397_s12 + $0x10c] sm:$0xf] }
 0xc08   : > { %v7419_v60 = vpop.f32.mrf.mxu1  ;;  %8461 = vmatpush.bf16.msra.mxu2 %v12321_v10  ;;  %v7401_v46 = vadd.f32 %v7400_v45, %v16980_v19  ;;  %v13209_v45 = vld [vmem:[%s14397_s12 + $0x254] sm:$0xf0]  ;;  %v12378_v10 = vld [vmem:[%s14397_s12 + $0x330] sm:$0xf0] }
 0xc09   : > { %v7389_v2 = vadd.f32 %v7388_v9, %v7370_v25  ;;  %8518 = vmatpush.bf16.msrb.mxu1 %v12197_v48  ;;  %8405 = vmatpush.bf16.msrb.mxu3 %v12429_v56  ;;  %v13238_v9 = vld [vmem:[%s14397_s12 + $0x344] sm:$0xf]  ;;  %v12273_v13 = vor.u32 %v13209_v45, %v12272_v39  ;;  %v12381_v17 = vor.u32 %v13234_v53, %v12378_v10  ;;  %v13227_v45 = vld [vmem:[%s14397_s12 + $0x2ec] sm:$0xf]  ;;  %v12464_v10 = vld [vmem:[%s14397_s12 + $0x3c8] sm:$0xf] }
 0xc0a   : > { %v7420_v21 = vadd.f32 %v7419_v60, %v7401_v46  ;;  %v12397_v25 = vor.u32 %v13238_v9, %v12394_v61  ;;  %v12149_v60 = vor.u32 %v13175_v24, %v12146_v31 }
 0xc0b   : > { %v7481_v30 = vmax.f32 %v7389_v2, 0.0  ;;  %v12256_v2 = vld [vmem:[%s14397_s12 + $0x228] sm:$0xf] }
 0xc0c   : > { %8462 = vmatpush.bf16.msra.mxu2 %v12305_v6  ;;  %v12257_v41 = vor.u32 %v13205_v8, %v12256_v2  ;;  %v13230_v6 = vld [vmem:[%s14397_s12 + $0x304] sm:$0xf] }
 0xc0d   : > { %v16988_v47 = vpack.c.bf16 %v7481_v30, %v7477_v18  ;;  %8519 = vmatpush.bf16.msrb.mxu1 %v12181_v63  ;;  %8406 = vmatpush.bf16.msrb.mxu3 %v12413_v42  ;;  %v13171_v18 = vld [vmem:[%s14397_s12 + $0x12c] sm:$0xf]  ;;  %v12130_v30 = vld [vmem:[%s14397_s12 + $0x138] sm:$0xf0]  ;;  %v12365_v49 = vor.u32 %v13230_v6, %v12362_v26  ;;  %v12240_v42 = vld [vmem:[%s14397_s12 + $0x208] sm:$0xf] }
 0xc0e   : > { %v7438_v3 = vpop.f32.mrf.mxu2  ;;  %v12133_v4 = vor.u32 %v13171_v18, %v12130_v30  ;;  %v12322_v6 = vld [vmem:[%s14397_s12 + $0x2b8] sm:$0xf0] }
 0xc0f   : > { %v7457_v52 = vpop.f32.mrf.mxu3  ;;  %8320 = vmatmul.bf16.gmra.mxu2 %v16988_v47  ;;  %8377 = vmatmul.bf16.gmra.mxu1 %v16916_v1  ;;  %v7402_v5 = vpop.f32.mrf.mxu0  ;;  %v7439_v48 = vadd.f32 %v7438_v3, %v7420_v21 }
 0xc10   : > { %8434 = vmatmul.bf16.gmra.mxu0 %v16846_v43  ;;  %v7421_v7 = vpop.f32.mrf.mxu1  ;;  %v7403_v34 = vadd.f32 %v7402_v5, %v16980_v19  ;;  %8463 = vmatpush.bf16.msra.mxu2 %v12289_v40  ;;  %v12241_v40 = vor.u32 %v13201_v14, %v12240_v42 }
 0xc11   : > { %8520 = vmatpush.bf16.msrb.mxu1 %v12165_v15  ;;  %8407 = vmatpush.bf16.msrb.mxu3 %v12397_v25  ;;  %v7458_v46 = vadd.f32 %v7457_v52, %v7439_v48  ;;  %v12114_v52 = vld [vmem:[%s14397_s12 + $0x118] sm:$0xf0]  ;;  %v13261_v25 = vld [vmem:[%s14397_s12 + $0x3f4] sm:$0xf0] }
 0xc12   : > { %v7422_v35 = vadd.f32 %v7421_v7, %v7403_v34  ;;  %v12117_v61 = vor.u32 %v13167_v51, %v12114_v52  ;;  %v12480_v34 = vld [vmem:[%s14397_s12 + $0x3e8] sm:$0xf]  ;;  %v13257_v48 = vld [vmem:[%s14397_s12 + $0x3d4] sm:$0xf0]  ;;  %v13215_v51 = vld [vmem:[%s14397_s12 + $0x28c] sm:$0xf] }
 0xc13   : > { %v7470_v55 = vmax.f32 %v7458_v46, 0.0  ;;  %v12481_v31 = vor.u32 %v13261_v25, %v12480_v34  ;;  %v12290_v25 = vld [vmem:[%s14397_s12 + $0x278] sm:$0xf0] }
 0xc14   : > { %8464 = vmatpush.bf16.msra.mxu2 %v12273_v13  ;;  %v12354_v13 = vld [vmem:[%s14397_s12 + $0x2f8] sm:$0xf0] }
 0xc15   : > { %8521 = vmatpush.bf16.msrb.mxu1 %v12149_v60  ;;  %8408 = vmatpush.bf16.msrb.mxu3 %v12381_v17  ;;  %v12357_v53 = vor.u32 %v13227_v45, %v12354_v13  ;;  %v12465_v60 = vor.u32 %v13257_v48, %v12464_v10  ;;  %v12338_v17 = vld [vmem:[%s14397_s12 + $0x2d8] sm:$0xf0] }
 0xc16   : > { %v7440_v56 = vpop.f32.mrf.mxu2  ;;  %v12274_v10 = vld [vmem:[%s14397_s12 + $0x258] sm:$0xf0] }
 0xc17   : > { %v7459_v12 = vpop.f32.mrf.mxu3  ;;  %v7441_v63 = vadd.f32 %v7440_v56, %v7422_v35  ;;  %v7405_v3 = vpop.f32.mrf.mxu0  ;;  %v13223_v35 = vld [vmem:[%s14397_s12 + $0x2cc] sm:$0xf]  ;;  %v12448_v56 = vld [vmem:[%s14397_s12 + $0x3a8] sm:$0xf] }
 0xc18   : > { %v7424_v5 = vpop.f32.mrf.mxu1  ;;  %8465 = vmatpush.bf16.msra.mxu2 %v12257_v41  ;;  %v7406_v9 = vadd.f32 %v7405_v3, %v16980_v19  ;;  %v12341_v30 = vor.u32 %v13223_v35, %v12338_v17  ;;  %v13219_v41 = vld [vmem:[%s14397_s12 + $0x2ac] sm:$0xf]  ;;  %v12432_v3 = vld [vmem:[%s14397_s12 + $0x388] sm:$0xf]  ;;  %v12258_v35 = vld [vmem:[%s14397_s12 + $0x238] sm:$0xf0] }
 0xc19   : > { %v7460_v33 = vadd.f32 %v7459_v12, %v7441_v63  ;;  %8522 = vmatpush.bf16.msrb.mxu1 %v12133_v4  ;;  %8409 = vmatpush.bf16.msrb.mxu3 %v12365_v49  ;;  %v12325_v63 = vor.u32 %v13219_v41, %v12322_v6  ;;  %v13249_v4 = vld [vmem:[%s14397_s12 + $0x394] sm:$0xf0]  ;;  %v12368_v17 = vld [vmem:[%s14397_s12 + $0x308] sm:$0xf]  ;;  %v13259_v6 = vld [vmem:[%s14397_s12 + $0x3ec] sm:$0xf] }
 0xc1a   : > { %v7425_v2 = vadd.f32 %v7424_v5, %v7406_v9  ;;  %v12433_v14 = vor.u32 %v13249_v4, %v12432_v3  ;;  %v13251_v4 = vld [vmem:[%s14397_s12 + $0x3ac] sm:$0xf] }
 0xc1b   : > { %v7474_v7 = vmax.f32 %v7460_v33, 0.0 }
 0xc1c   : > { %8466 = vmatpush.bf16.msra.mxu2 %v12241_v40 }
 0xc1d   : > { %v17019_v15 = vpack.c.bf16 %v7474_v7, %v7470_v55  ;;  %8523 = vmatpush.bf16.msrb.mxu1 %v12117_v61  ;;  %v12306_v55 = vld [vmem:[%s14397_s12 + $0x298] sm:$0xf0]  ;;  %v12416_v61 = vld [vmem:[%s14397_s12 + $0x368] sm:$0xf] }
 0xc1e   : > { %v7443_v39 = vpop.f32.mrf.mxu2  ;;  %v12309_v52 = vor.u32 %v13215_v51, %v12306_v55  ;;  %v13243_v51 = vld [vmem:[%s14397_s12 + $0x36c] sm:$0xf]  ;;  %v12418_v55 = vld [vmem:[%s14397_s12 + $0x378] sm:$0xf0] }
 0xc1f   : > { %v7462_v21 = vpop.f32.mrf.mxu3  ;;  %8334 = vmatmul.bf16.vlgmr.msra.gmra.mxu3 %v17019_v15  ;;  %8391 = vmatmul.bf16.vlgmr.msrb.gmra.mxu2 %v16954_v37  ;;  %v7407_v24 = vpop.f32.mrf.mxu0  ;;  %v7444_v18 = vadd.f32 %v7443_v39, %v7425_v2  ;;  %v13245_v39 = vld [vmem:[%s14397_s12 + $0x374] sm:$0xf0]  ;;  %v12384_v2 = vld [vmem:[%s14397_s12 + $0x328] sm:$0xf] }
 0xc20   : > { %8448 = vmatmul.bf16.vlgmr.msra.gmra.mxu1 %v16875_v62  ;;  %8505 = vmatmul.bf16.vlgmr.msrb.gmra.mxu0 %v16814_v16  ;;  %v7408_v8 = vadd.f32 %v7407_v24, %v16980_v19  ;;  %v13253_v16 = vld [vmem:[%s14397_s12 + $0x3b4] sm:$0xf0]  ;;  %v7426_v12 = vpop.f32.mrf.mxu1  ;;  %v12417_v34 = vor.u32 %v13245_v39, %v12416_v61  ;;  %v12400_v24 = vld [vmem:[%s14397_s12 + $0x348] sm:$0xf]  ;;  %v17085_v39 = vld [vmem:[%s867_s4] sm:$0xf] }
 0xc21   : > { %8478 = vmatpush.bf16.msra.mxu3 %v12481_v31  ;;  %8535 = vmatpush.bf16.msrb.mxu2 %v12357_v53  ;;  %v12449_v19 = vor.u32 %v13253_v16, %v12448_v56  ;;  %v7463_v33 = vadd.f32 %v7462_v21, %v7444_v18  ;;  %v13211_v21 = vld [vmem:[%s14397_s12 + $0x26c] sm:$0xf]  ;;  %v13241_v31 = vld [vmem:[%s14397_s12 + $0x354] sm:$0xf0] }
 0xc22   : > { %v7427_v26 = vadd.f32 %v7426_v12, %v7408_v8  ;;  %v12293_v45 = vor.u32 %v13211_v21, %v12290_v25  ;;  %v12401_v13 = vor.u32 %v13241_v31, %v12400_v24  ;;  %v13207_v53 = vld [vmem:[%s14397_s12 + $0x24c] sm:$0xf]  ;;  %v13237_v8 = vld [vmem:[%s14397_s12 + $0x334] sm:$0xf0]  ;;  %v12242_v12 = vld [vmem:[%s14397_s12 + $0x218] sm:$0xf0] }
 0xc23   : > { %v7478_v7 = vmax.f32 %v7463_v33, 0.0  ;;  %v12277_v48 = vor.u32 %v13207_v53, %v12274_v10  ;;  %v13233_v18 = vld [vmem:[%s14397_s12 + $0x314] sm:$0xf0]  ;;  %v13199_v16 = vld [vmem:[%s14397_s12 + $0x20c] sm:$0xf]  ;;  %v7621_v31 = vperm.slane %v17085_v39, 0 }
 0xc24   : > { %v12369_v56 = vor.u32 %v13233_v18, %v12368_v17  ;;  %v12245_v41 = vor.u32 %v13199_v16, %v12242_v12  ;;  %v12450_v33 = vld [vmem:[%s14397_s12 + $0x3b8] sm:$0xf0]  ;;  %v13235_v21 = vld [vmem:[%s14397_s12 + $0x32c] sm:$0xf] }
 0xc25   : > { %8479 = vmatpush.bf16.msra.mxu3 %v12465_v60  ;;  %8536 = vmatpush.bf16.msrb.mxu2 %v12341_v30  ;;  %v13203_v60 = vld [vmem:[%s14397_s12 + $0x22c] sm:$0xf]  ;;  %v12370_v24 = vld [vmem:[%s14397_s12 + $0x318] sm:$0xf0] }
 0xc26   : > { %v7445_v46 = vpop.f32.mrf.mxu2  ;;  %v12261_v30 = vor.u32 %v13203_v60, %v12258_v35 }
 0xc27   : > { %v7446_v49 = vadd.f32 %v7445_v46, %v7427_v26  ;;  %v7464_v5 = vpop.f32.mrf.mxu3  ;;  %v12482_v26 = vld [vmem:[%s14397_s12 + $0x3f8] sm:$0xf0]  ;;  %v13255_v46 = vld [vmem:[%s14397_s12 + $0x3cc] sm:$0xf] }
 0xc29   : > { %v7465_v42 = vadd.f32 %v7464_v5, %v7446_v49  ;;  %8480 = vmatpush.bf16.msra.mxu3 %v12449_v19  ;;  %8537 = vmatpush.bf16.msrb.mxu2 %v12325_v63  ;;  %v12485_v19 = vor.u32 %v13259_v6, %v12482_v26  ;;  %v12466_v63 = vld [vmem:[%s14397_s12 + $0x3d8] sm:$0xf0]  ;;  %v12453_v49 = vor.u32 %v13251_v4, %v12450_v33  ;;  %v13247_v5 = vld [vmem:[%s14397_s12 + $0x38c] sm:$0xf] }
 0xc2a   : > { %v12469_v3 = vor.u32 %v13255_v46, %v12466_v63 }
 0xc2b   : > { %v7482_v40 = vmax.f32 %v7465_v42, 0.0  ;;  %v12434_v42 = vld [vmem:[%s14397_s12 + $0x398] sm:$0xf0] }
 0xc2d   : > { %v17043_v9 = vpack.c.bf16 %v7482_v40, %v7478_v7  ;;  %8481 = vmatpush.bf16.msra.mxu3 %v12433_v14  ;;  %8538 = vmatpush.bf16.msrb.mxu2 %v12309_v52  ;;  %v12437_v14 = vor.u32 %v13247_v5, %v12434_v42  ;;  %v13239_v7 = vld [vmem:[%s14397_s12 + $0x34c] sm:$0xf]  ;;  %v12402_v40 = vld [vmem:[%s14397_s12 + $0x358] sm:$0xf0] }
 0xc2e   : > { %v12405_v52 = vor.u32 %v13239_v7, %v12402_v40 }
 0xc2f   : > { %8339 = vmatmul.bf16.gmra.mxu3 %v17043_v9  ;;  %8396 = vmatmul.bf16.gmra.mxu2 %v16988_v47 }
 0xc30   : > { %8453 = vmatmul.bf16.gmra.mxu1 %v16916_v1  ;;  %8510 = vmatmul.bf16.gmra.mxu0 %v16846_v43  ;;  %v12385_v43 = vor.u32 %v13237_v8, %v12384_v2 }
 0xc31   : > { %8482 = vmatpush.bf16.msra.mxu3 %v12417_v34  ;;  %8539 = vmatpush.bf16.msrb.mxu2 %v12293_v45  ;;  %v12386_v34 = vld [vmem:[%s14397_s12 + $0x338] sm:$0xf0]  ;;  %v13231_v45 = vld [vmem:[%s14397_s12 + $0x30c] sm:$0xf] }
 0xc32   : > { %v12389_v25 = vor.u32 %v13235_v21, %v12386_v34 }
 0xc35   : > { %8483 = vmatpush.bf16.msra.mxu3 %v12401_v13  ;;  %8540 = vmatpush.bf16.msrb.mxu2 %v12277_v48  ;;  %v12373_v13 = vor.u32 %v13231_v45, %v12370_v24 }
 0xc39   : > { %8484 = vmatpush.bf16.msra.mxu3 %v12385_v43  ;;  %8541 = vmatpush.bf16.msrb.mxu2 %v12261_v30 }
 0xc3c   : > { %v8278_v61 = vpop.f32.mrf.mxu0 }
 0xc3d   : > { %8485 = vmatpush.bf16.msra.mxu3 %v12369_v56  ;;  %8542 = vmatpush.bf16.msrb.mxu2 %v12245_v41  ;;  %v8279_v53 = vadd.f32 %v8278_v61, %v7621_v31 }
 0xc3f   : > { %8410 = vmatmul.bf16.vlgmr.msrb.gmra.mxu3 %v17019_v15  ;;  %8467 = vmatmul.bf16.vlgmr.msra.gmra.mxu2 %v16954_v37 }
 0xc40   : > { %8524 = vmatmul.bf16.vlgmr.msrb.gmra.mxu1 %v16875_v62  ;;  %v12421_v62 = vor.u32 %v13243_v51, %v12418_v55 }
 0xc41   : > { %8554 = vmatpush.bf16.msrb.mxu3 %v12485_v19 }
 0xc44   : > { %v8280_v10 = vpop.f32.mrf.mxu0 }
 0xc45   : > { %8555 = vmatpush.bf16.msrb.mxu3 %v12469_v3  ;;  %v8281_v2 = vadd.f32 %v8280_v10, %v7621_v31 }
 0xc49   : > { %8556 = vmatpush.bf16.msrb.mxu3 %v12453_v49 }
 0xc4c   : > { %v8283_v43 = vpop.f32.mrf.mxu0 }
 0xc4d   : > { %8557 = vmatpush.bf16.msrb.mxu3 %v12437_v14  ;;  %v8284_v35 = vadd.f32 %v8283_v43, %v7621_v31 }
 0xc4f   : > { %8415 = vmatmul.bf16.gmra.mxu3 %v17043_v9  ;;  %8472 = vmatmul.bf16.gmra.mxu2 %v16988_v47 }
 0xc50   : > { %8529 = vmatmul.bf16.gmra.mxu1 %v16916_v1 }
 0xc51   : > { %8558 = vmatpush.bf16.msrb.mxu3 %v12421_v62 }
 0xc54   : > { %v8285_v30 = vpop.f32.mrf.mxu0 }
 0xc55   : > { %8559 = vmatpush.bf16.msrb.mxu3 %v12405_v52  ;;  %v8286_v56 = vadd.f32 %v8285_v30, %v7621_v31 }
 0xc59   : > { %8560 = vmatpush.bf16.msrb.mxu3 %v12389_v25 }
 0xc5c   : > { %v8297_v48 = vpop.f32.mrf.mxu1  ;;  %v8354_v49 = vpop.f32.mrf.mxu0 }
 0xc5d   : > { %v8298_v1 = vadd.f32 %v8297_v48, %v8279_v53  ;;  %8561 = vmatpush.bf16.msrb.mxu3 %v12373_v13 }
 0xc5f   : > { %8486 = vmatmul.bf16.vlgmr.msra.gmra.mxu3 %v17019_v15  ;;  %8543 = vmatmul.bf16.vlgmr.msrb.gmra.mxu2 %v16954_v37 }
 0xc64   : > { %v8299_v8 = vpop.f32.mrf.mxu1  ;;  %v8356_v51 = vpop.f32.mrf.mxu0 }
 0xc65   : > { %v8300_v60 = vadd.f32 %v8299_v8, %v8281_v2 }
 0xc6c   : > { %v8302_v17 = vpop.f32.mrf.mxu1  ;;  %v8359_v40 = vpop.f32.mrf.mxu0 }
 0xc6d   : > { %v8303_v18 = vadd.f32 %v8302_v17, %v8284_v35 }
 0xc6f   : > { %8491 = vmatmul.bf16.gmra.mxu3 %v17043_v9  ;;  %8548 = vmatmul.bf16.gmra.mxu2 %v16988_v47 }
 0xc74   : > { %v8304_v16 = vpop.f32.mrf.mxu1  ;;  %v17108_v34 = vpop.f32.mrf.mxu0 }
 0xc75   : > { %v8305_v12 = vadd.f32 %v8304_v16, %v8286_v56 }
 0xc7c   : > { %v8373_v47 = vpop.f32.mrf.mxu1 }
 0xc7d   : > { %v8430_v13 = vpop.f32.mrf.mxu0 }
 0xc7f   : > { %8562 = vmatmul.bf16.vlgmr.msrb.gmra.mxu3 %v17019_v15 }
 0xc82   : > { %v8316_v41 = vpop.f32.mrf.mxu2 }
 0xc83   : > { %v8317_v6 = vadd.f32 %v8316_v41, %v8298_v1  ;;  %v7622_v41 = vperm.slane %v17085_v39, 1 }
 0xc84   : > { %v8375_v15 = vpop.f32.mrf.mxu1 }
 0xc85   : > { %v8432_v1 = vpop.f32.mrf.mxu0 }
 0xc8a   : > { %v8318_v37 = vpop.f32.mrf.mxu2 }
 0xc8b   : > { %v8319_v26 = vadd.f32 %v8318_v37, %v8300_v60  ;;  %v17126_v37 = vperm.slane %v17085_v39, 2 }
 0xc8d   : > { %v8435_v43 = vpop.f32.mrf.mxu0 }
 0xc8f   : > { %8567 = vmatmul.bf16.gmra.mxu3 %v17043_v9  ;;  %v17102_v9 = vpop.f32.mrf.mxu1 }
 0xc92   : > { %v8321_v19 = vpop.f32.mrf.mxu2 }
 0xc93   : > { %v8322_v46 = vadd.f32 %v8321_v19, %v8303_v18  ;;  %v8355_v19 = vadd.f32 %v8354_v49, %v7622_v41 }
 0xc95   : > { %v17118_v30 = vpop.f32.mrf.mxu0 }
 0xc97   : > { %v17110_v45 = vpop.f32.mrf.mxu1 }
 0xc9a   : > { %v8323_v63 = vpop.f32.mrf.mxu2 }
 0xc9b   : > { %v8324_v3 = vadd.f32 %v8323_v63, %v8305_v12  ;;  %v8374_v63 = vadd.f32 %v8373_v47, %v8355_v19  ;;  %v8433_v47 = vadd.f32 %v8432_v1, %v17126_v37 }
 0xc9f   : > { %v8449_v53 = vpop.f32.mrf.mxu1 }
 0xca2   : > { %v8335_v4 = vpop.f32.mrf.mxu3  ;;  %v8392_v5 = vpop.f32.mrf.mxu2 }
 0xca3   : > { %v8336_v33 = vadd.f32 %v8335_v4, %v8317_v6 }
 0xca7   : > { %v8451_v2 = vpop.f32.mrf.mxu1 }
 0xcaa   : > { %v8337_v42 = vpop.f32.mrf.mxu3  ;;  %v8394_v55 = vpop.f32.mrf.mxu2 }
 0xcab   : > { %v17098_v14 = vadd.f32 %v8337_v42, %v8319_v26  ;;  %v8506_v26 = vpop.f32.mrf.mxu0 }
 0xcaf   : > { %v8454_v35 = vpop.f32.mrf.mxu1 }
 0xcb2   : > { %v8340_v62 = vpop.f32.mrf.mxu3  ;;  %v17106_v21 = vpop.f32.mrf.mxu2 }
 0xcb3   : > { %v17100_v7 = vadd.f32 %v8340_v62, %v8322_v46  ;;  %v17130_v62 = vperm.slane %v17085_v39, 3  ;;  %v8508_v32 = vpop.f32.mrf.mxu0  ;;  %v17140_v39 = vadd.f32 %v8336_v33, %v16453_v27 }
 0xcb5   : > { %v8507_v29 = vadd.f32 %v8506_v26, %v17130_v62 }
 0xcb7   : > { %v17120_v16 = vpop.f32.mrf.mxu1 }
 0xcba   : > { %v8342_v52 = vpop.f32.mrf.mxu3  ;;  %v17112_v24 = vpop.f32.mrf.mxu2 }
 0xcbb   : > { %v17104_v61 = vadd.f32 %v8342_v52, %v8324_v3  ;;  %v8431_v3 = vadd.f32 %v8430_v13, %v17126_v37  ;;  %v8393_v52 = vadd.f32 %v8392_v5, %v8374_v63 }
 0xcbd   : > { %17699 = vst [vmem:[#allocation53_spill] sm:$0xff] %v17104_v61  ;;  %v8450_v42 = vadd.f32 %v8449_v53, %v8431_v3  ;;  %v8357_v61 = vadd.f32 %v8356_v51, %v7622_v41  ;;  %v8452_v53 = vadd.f32 %v8451_v2, %v8433_v47 }
 0xcbf   : > { %v8525_v46 = vpop.f32.mrf.mxu1  ;;  %v8376_v49 = vadd.f32 %v8375_v15, %v8357_v61 }
 0xcc0   : > { %v8526_v19 = vadd.f32 %v8525_v46, %v8507_v29 }
 0xcc1   : > { %v8395_v63 = vadd.f32 %v8394_v55, %v8376_v49  ;;  %v8438_v49 = vadd.f32 %v17118_v30, %v17126_v37 }
 0xcc2   : > { %v8411_v25 = vpop.f32.mrf.mxu3  ;;  %v8468_v10 = vpop.f32.mrf.mxu2 }
 0xcc3   : > { %v8412_v20 = vadd.f32 %v8411_v25, %v8393_v52  ;;  %v8469_v54 = vadd.f32 %v8468_v10, %v8450_v42 }
 0xcc5   : > { %v17137_v13 = vadd.f32 %v8412_v20, %v16471_v57  ;;  %v8360_v57 = vadd.f32 %v8359_v40, %v7622_v41  ;;  %v8509_v20 = vadd.f32 %v8508_v32, %v17130_v62  ;;  %v17160_v40 = vadd.f32 %v17098_v14, %v16476_v36  ;;  %v8511_v32 = vpop.f32.mrf.mxu0 }
 0xcc6   : > { %v8362_v36 = vadd.f32 %v17108_v34, %v7622_v41  ;;  %v8581_v34 = vadd.f32 %v17100_v7, %v16584_v58  ;;  %v8457_v41 = vadd.f32 %v17120_v16, %v8438_v49  ;;  %v17700_v16 = vld [vmem:[#allocation46_spill] sm:$0xff] }
 0xcc7   : > { %v8527_v5 = vpop.f32.mrf.mxu1  ;;  %v8591_v15 = vadd.f32 %v17137_v13, %v17140_v39 }
 0xcc8   : > { %v8528_v2 = vadd.f32 %v8527_v5, %v8509_v20  ;;  %v8381_v52 = vadd.f32 %v17110_v45, %v8362_v36 }
 0xcca   : > { %v8413_v31 = vpop.f32.mrf.mxu3  ;;  %v8470_v8 = vpop.f32.mrf.mxu2 }
 0xccb   : > { %v8414_v61 = vadd.f32 %v8413_v31, %v8395_v63  ;;  %v8471_v29 = vadd.f32 %v8470_v8, %v8452_v53 }
 0xccd   : > { %v8513_v45 = vpop.f32.mrf.mxu0 }
 0xcce   : > { %v8514_v58 = vadd.f32 %v8513_v45, %v17130_v62 }
 0xcd2   : > { %v17114_v48 = vpop.f32.mrf.mxu3  ;;  %v8473_v18 = vpop.f32.mrf.mxu2 }
 0xcda   : > { %v17116_v60 = vpop.f32.mrf.mxu3  ;;  %v17122_v12 = vpop.f32.mrf.mxu2 }
 0xce2   : > { %v8487_v17 = vpop.f32.mrf.mxu3  ;;  %v8544_v4 = vpop.f32.mrf.mxu2 }
 0xce3   : > { %v8488_v59 = vadd.f32 %v8487_v17, %v8469_v54  ;;  %v8545_v51 = vadd.f32 %v8544_v4, %v8526_v19  ;;  %v17155_v17 = vadd.f32 %v8414_v61, %v16479_v38 }
 0xce5   : > { %v17143_v25 = vadd.f32 %v8488_v59, %v16494_v28  ;;  %v8379_v28 = vadd.f32 %v17102_v9, %v8360_v57  ;;  %v8436_v59 = vadd.f32 %v8435_v43, %v17126_v37  ;;  %v8530_v43 = vpop.f32.mrf.mxu1  ;;  %v8596_v38 = vadd.f32 %v17155_v17, %v17160_v40 }
 0xce7   : > { %v8592_v55 = vadd.f32 %v8591_v15, %v17143_v25  ;;  %v8455_v8 = vadd.f32 %v8454_v35, %v8436_v59  ;;  %v8512_v35 = vadd.f32 %v8511_v32, %v17130_v62  ;;  %v17706_v32 = vld [vmem:[#allocation45_spill] sm:$0xff] }
 0xce9   : > { %v8474_v3 = vadd.f32 %v8473_v18, %v8455_v8  ;;  %v8531_v47 = vadd.f32 %v8530_v43, %v8512_v35 }
 0xcea   : > { %v8489_v56 = vpop.f32.mrf.mxu3  ;;  %v8546_v10 = vpop.f32.mrf.mxu2 }
 0xceb   : > { %v8490_v27 = vadd.f32 %v8489_v56, %v8471_v29  ;;  %v8547_v9 = vadd.f32 %v8546_v10, %v8528_v2  ;;  %v17702_v29 = vld [vmem:[#allocation44_spill] sm:$0xff] }
 0xced   : > { %v17164_v56 = vadd.f32 %v8490_v27, %v16482_v22  ;;  %v8532_v63 = vpop.f32.mrf.mxu1 }
 0xcee   : > { %v8533_v10 = vadd.f32 %v8532_v63, %v8514_v58 }
 0xcef   : > { %v8597_v42 = vadd.f32 %v8596_v38, %v17164_v56 }
 0xcf2   : > { %v8492_v6 = vpop.f32.mrf.mxu3  ;;  %v8549_v14 = vpop.f32.mrf.mxu2 }
 0xcf3   : > { %v8550_v19 = vadd.f32 %v8549_v14, %v8531_v47 }
 0xcfa   : > { %v17132_v44 = vpop.f32.mrf.mxu3 }
 0xd02   : > { %v8563_v54 = vpop.f32.mrf.mxu3 }
 0xd03   : > { %v8564_v1 = vadd.f32 %v8563_v54, %v8545_v51  ;;  %v17701_v54 = vld [vmem:[#allocation52_spill] sm:$0xff] }
 0xd05   : > { %v17149_v33 = vadd.f32 %v8564_v1, %v16497_v11  ;;  %v8398_v11 = vadd.f32 %v17106_v21, %v8379_v28  ;;  %v8493_v21 = vadd.f32 %v8492_v6, %v8474_v3  ;;  %v8400_v6 = vadd.f32 %v17112_v24, %v8381_v52  ;;  %v17703_v1 = vld [vmem:[#allocation53_spill] sm:$0xff]  ;;  %v17705_v28 = vld [vmem:[#allocation56_spill] sm:$0xff] }
 0xd06   : > { %v8585_v57 = vadd.f32 %v17703_v1, %v17702_v29 }
 0xd07   : > { %v8593_v31 = vadd.f32 %v8592_v55, %v17149_v33  ;;  %v8417_v46 = vadd.f32 %v17114_v48, %v8398_v11  ;;  %v8419_v37 = vadd.f32 %v17116_v60, %v8400_v6  ;;  %v17704_v60 = vld [vmem:[#allocation51_spill] sm:$0xff] }
 0xd09   : > { %8594 = vadd.xlane.f32.xlu1 %v8593_v31  ;;  %v17177_v48 = vadd.f32 %v8417_v46, %v16587_v23  ;;  %v8476_v23 = vadd.f32 %v17122_v12, %v8457_v41  ;;  %v8586_v15 = vadd.f32 %v8419_v37, %v17701_v54 }
 0xd0a   : > { %v8565_v26 = vpop.f32.mrf.mxu3 }
 0xd0b   : > { %v8566_v4 = vadd.f32 %v8565_v26, %v8547_v9  ;;  %v8601_v30 = vadd.f32 %v17177_v48, %v8581_v34  ;;  %v8495_v7 = vadd.f32 %v17132_v44, %v8476_v23  ;;  %v8606_v55 = vadd.f32 %v8586_v15, %v8585_v57 }
 0xd0d   : > { %v8580_v22 = vadd.f32 %v8566_v4, %v16485_v50  ;;  %v8583_v50 = vadd.f32 %v8493_v21, %v16590_v0  ;;  %v8551_v0 = vpop.f32.mrf.mxu2  ;;  %v8587_v20 = vadd.f32 %v8495_v7, %v17704_v60 }
 0xd0e   : > { %v8552_v12 = vadd.f32 %v8551_v0, %v8533_v10 }
 0xd0f   : > { %v8598_v18 = vadd.f32 %v8597_v42, %v8580_v22  ;;  %v8602_v51 = vadd.f32 %v8601_v30, %v8583_v50  ;;  %v8607_v59 = vadd.f32 %v8606_v55, %v8587_v20 }
 0xd11   : > { %8599 = vadd.xlane.f32.xlu2 %v8598_v18 }
 0xd12   : > { %v8568_v5 = vpop.f32.mrf.mxu3 }
 0xd13   : > { %v8569_v53 = vadd.f32 %v8568_v5, %v8550_v19 }
 0xd15   : > { %v8584_v24 = vadd.f32 %v8569_v53, %v17700_v16 }
 0xd17   : > { %v8603_v61 = vadd.f32 %v8602_v51, %v8584_v24 }
 0xd19   : > { %8604 = vadd.xlane.f32.xlu0 %v8603_v61 }
 0xd1a   : > { %v8570_v27 = vpop.f32.mrf.mxu3 }
 0xd1b   : > { %v8571_v62 = vadd.f32 %v8570_v27, %v8552_v12 }
 0xd1d   : > { %v8588_v44 = vadd.f32 %v8571_v62, %v17705_v28 }
 0xd1f   : > { %v8608_v2 = vadd.f32 %v8607_v59, %v8588_v44  ;;  %v8589_v59 = vld [vmem:[%s877_s25] sm:$0xf] }
 0xd21   : > { %8609 = vadd.xlane.f32.xlu1 %v8608_v2 }
 0xd7c   : > { %v8595_v31 = vpop.xlane.xlu1 %8594 }
 0xd7d   : > { %v8611_v8 = vmul.f32 %v8595_v31, %v17706_v32 }
 0xd7f   : > { %v17197_v11 = vsub.f32 %v17140_v39, %v8611_v8  ;;  %v17200_v9 = vsub.f32 %v17137_v13, %v8611_v8  ;;  %v17203_v43 = vsub.f32 %v17143_v25, %v8611_v8  ;;  %v17206_v26 = vsub.f32 %v17149_v33, %v8611_v8 }
 0xd81   : > { %v8631_v38 = vmul.f32 %v17197_v11, %v17197_v11  ;;  %v8632_v46 = vmul.f32 %v17200_v9, %v17200_v9  ;;  %v8633_v3 = vmul.f32 %v17203_v43, %v17203_v43  ;;  %v8634_v25 = vmul.f32 %v17206_v26, %v17206_v26 }
 0xd83   : > { %v8647_v39 = vadd.f32 %v8632_v46, %v8631_v38  ;;  %v8590_v38 = vld [vmem:[%s887_s5] sm:$0xf] }
 0xd84   : > { %v8600_v4 = vpop.xlane.xlu2 %8599 }
 0xd85   : > { %v8612_v13 = vmul.f32 %v8600_v4, %v17706_v32  ;;  %v8648_v36 = vadd.f32 %v8647_v39, %v8633_v3  ;;  %v17278_v39 = vperm.slane %v8589_v59, 0 }
 0xd87   : > { %v17218_v33 = vsub.f32 %v17160_v40, %v8612_v13  ;;  %v17221_v14 = vsub.f32 %v17155_v17, %v8612_v13  ;;  %v8649_v35 = vadd.f32 %v8648_v36, %v8634_v25  ;;  %v17224_v21 = vsub.f32 %v17164_v56, %v8612_v13 }
 0xd88   : > { %v17226_v42 = vsub.f32 %v8580_v22, %v8612_v13  ;;  %v17282_v13 = vperm.slane %v8589_v59, 1 }
 0xd89   : > { %8650 = vadd.xlane.f32.xlu2 %v8649_v35  ;;  %v8635_v52 = vmul.f32 %v17218_v33, %v17218_v33  ;;  %v8636_v49 = vmul.f32 %v17221_v14, %v17221_v14  ;;  %v8637_v40 = vmul.f32 %v17224_v21, %v17224_v21  ;;  %v17284_v35 = vperm.slane %v8589_v59, 2 }
 0xd8a   : > { %v8638_v56 = vmul.f32 %v17226_v42, %v17226_v42 }
 0xd8b   : > { %v8652_v47 = vadd.f32 %v8636_v49, %v8635_v52  ;;  %v17286_v52 = vperm.slane %v8589_v59, 3  ;;  %v17288_v49 = vperm.slane %v8590_v38, 0 }
 0xd8c   : > { %v8605_v18 = vpop.xlane.xlu0 %8604 }
 0xd8d   : > { %v8613_v17 = vmul.f32 %v8605_v18, %v17706_v32  ;;  %v8653_v41 = vadd.f32 %v8652_v47, %v8637_v40  ;;  %v17291_v40 = vperm.slane %v8590_v38, 1  ;;  %v17293_v47 = vperm.slane %v8590_v38, 2 }
 0xd8f   : > { %v17237_v6 = vsub.f32 %v8581_v34, %v8613_v17  ;;  %v17240_v22 = vsub.f32 %v17177_v48, %v8613_v17  ;;  %v8654_v19 = vadd.f32 %v8653_v41, %v8638_v56  ;;  %v17242_v45 = vsub.f32 %v8583_v50, %v8613_v17 }
 0xd90   : > { %v17244_v5 = vsub.f32 %v8584_v24, %v8613_v17 }
 0xd91   : > { %8655 = vadd.xlane.f32.xlu0 %v8654_v19  ;;  %v8639_v30 = vmul.f32 %v17237_v6, %v17237_v6  ;;  %v8640_v37 = vmul.f32 %v17240_v22, %v17240_v22  ;;  %v8641_v23 = vmul.f32 %v17242_v45, %v17242_v45 }
 0xd92   : > { %v8642_v50 = vmul.f32 %v17244_v5, %v17244_v5 }
 0xd93   : > { %v8657_v34 = vadd.f32 %v8640_v37, %v8639_v30  ;;  %v17299_v37 = vperm.slane %v8590_v38, 3 }
 0xd94   : > { %v8610_v53 = vpop.xlane.xlu1 %8609 }
 0xd95   : > { %v8614_v48 = vmul.f32 %v8610_v53, %v17706_v32  ;;  %v8658_v63 = vadd.f32 %v8657_v34, %v8641_v23 }
 0xd97   : > { %v17255_v58 = vsub.f32 %v8585_v57, %v8614_v48  ;;  %v17257_v7 = vsub.f32 %v8586_v15, %v8614_v48  ;;  %v8659_v16 = vadd.f32 %v8658_v63, %v8642_v50  ;;  %v17259_v24 = vsub.f32 %v8587_v20, %v8614_v48 }
 0xd98   : > { %v17261_v51 = vsub.f32 %v8588_v44, %v8614_v48 }
 0xd99   : > { %8660 = vadd.xlane.f32.xlu1 %v8659_v16  ;;  %v8643_v0 = vmul.f32 %v17255_v58, %v17255_v58  ;;  %v8644_v10 = vmul.f32 %v17257_v7, %v17257_v7  ;;  %v8645_v54 = vmul.f32 %v17259_v24, %v17259_v24 }
 0xd9a   : > { %v8646_v15 = vmul.f32 %v17261_v51, %v17261_v51 }
 0xd9b   : > { %v8662_v61 = vadd.f32 %v8644_v10, %v8643_v0 }
 0xd9d   : > { %v8663_v29 = vadd.f32 %v8662_v61, %v8645_v54 }
 0xd9f   : > { %v8664_v1 = vadd.f32 %v8663_v29, %v8646_v15 }
 0xda1   : > { %8665 = vadd.xlane.f32.xlu2 %v8664_v1 }
 0xdfc   : > { %v8651_v57 = vpop.xlane.xlu2 %8650 }
 0xdfd   : > { %v8667_v60 = vmul.f32 %v8651_v57, %v17706_v32 }
 0xdff   : > { %v8671_v20 = vadd.f32 1e-05, %v8667_v60 }
 0xe01   : > { %13461 = vrsqrt.f32 %v8671_v20  ;;  %vm8681_vm0 = vweird.f32 %v8671_v20 }
 0xe04   : > { %v8656_v12 = vpop.xlane.xlu0 %8655 }
 0xe05   : > { %v8668_v27 = vmul.f32 %v8656_v12, %v17706_v32 }
 0xe07   : > { %v13462_v55 = vpop.eup %13461  ;;  %v8672_v62 = vadd.f32 1e-05, %v8668_v27 }
 0xe08   : > { %v8676_v28 = vmul.f32 %v13462_v55, %v8671_v20  ;;  %vm8682_vm15 = vweird.f32 %v13462_v55 }
 0xe09   : > { %13463 = vrsqrt.f32 %v8672_v62  ;;  %vm8683_vm1 = vmor %vm8681_vm0, %vm8682_vm15  ;;  %vm8691_vm3 = vweird.f32 %v8672_v62 }
 0xe0a   : > { %v8677_v44 = vmul.f32 %v13462_v55, %v8676_v28 }
 0xe0c   : > { %v8678_v2 = vmul.f32 0.5, %v8677_v44  ;;  %v8661_v31 = vpop.xlane.xlu1 %8660 }
 0xe0d   : > { %v8669_v8 = vmul.f32 %v8661_v31, %v17706_v32 }
 0xe0e   : > { %v8679_v46 = vsub.f32 1.5, %v8678_v2 }
 0xe0f   : > { %v13464_v3 = vpop.eup %13463  ;;  %v17280_v4 = vadd.f32 1e-05, %v8669_v8 }
 0xe10   : > { %v8680_v25 = vmul.f32 %v13462_v55, %v8679_v46  ;;  %v8686_v36 = vmul.f32 %v13464_v3, %v8672_v62  ;;  %vm8692_vm2 = vweird.f32 %v13464_v3 }
 0xe11   : > { %13465 = vrsqrt.f32 %v17280_v4  ;;  %vm8693_vm4 = vmor %vm8691_vm3, %vm8692_vm2  ;;  %vm8701_vm6 = vweird.f32 %v17280_v4 }
 0xe12   : > { %v8684_v18 = vsel %vm8683_vm1, %v13462_v55, %v8680_v25  ;;  %v8687_v17 = vmul.f32 %v13464_v3, %v8686_v36 }
 0xe13   : > { %v8715_v56 = vmul.f32 %v8684_v18, %v17197_v11  ;;  %v8716_v41 = vmul.f32 %v8684_v18, %v17200_v9  ;;  %v8717_v19 = vmul.f32 %v8684_v18, %v17203_v43  ;;  %v8718_v30 = vmul.f32 %v8684_v18, %v17206_v26 }
 0xe14   : > { %v8688_v23 = vmul.f32 0.5, %v8687_v17  ;;  %v8666_v34 = vpop.xlane.xlu2 %8665 }
 0xe15   : > { %v8740_v53 = vmul.f32 %v17278_v39, %v8715_v56  ;;  %v8741_v48 = vmul.f32 %v17282_v13, %v8716_v41  ;;  %v8742_v50 = vmul.f32 %v17284_v35, %v8717_v19  ;;  %v8743_v63 = vmul.f32 %v17286_v52, %v8718_v30 }
 0xe16   : > { %v8689_v16 = vsub.f32 1.5, %v8688_v23  ;;  %v8670_v11 = vmul.f32 %v8666_v34, %v17706_v32 }
 0xe17   : > { %v13466_v9 = vpop.eup %13465  ;;  %v17307_v43 = vadd.f32 %v17288_v49, %v8740_v53  ;;  %v17310_v26 = vadd.f32 %v17291_v40, %v8741_v48  ;;  %v17313_v0 = vadd.f32 %v17293_v47, %v8742_v50  ;;  %v17316_v10 = vadd.f32 %v17299_v37, %v8743_v63 }
 0xe18   : > { %v8690_v54 = vmul.f32 %v13464_v3, %v8689_v16  ;;  %v8696_v61 = vmul.f32 %v13466_v9, %v17280_v4  ;;  %v8674_v15 = vadd.f32 1e-05, %v8670_v11  ;;  %vm8702_vm5 = vweird.f32 %v13466_v9 }
 0xe19   : > { %8781 = vst [vmem:[#allocation2 + $0x30] sm:$0xff] %v17307_v43  ;;  %vm8703_vm7 = vmor %vm8701_vm6, %vm8702_vm5 }
 0xe1a   : > { %8782 = vst [vmem:[#allocation2] sm:$0xff] %v17310_v26  ;;  %v8694_v32 = vsel %vm8693_vm4, %v13464_v3, %v8690_v54  ;;  %v8697_v29 = vmul.f32 %v13466_v9, %v8696_v61  ;;  %13467 = vrsqrt.f32 %v8674_v15  ;;  %vm8711_vm9 = vweird.f32 %v8674_v15 }
 0xe1b   : > { %8783 = vst [vmem:[#allocation2 + $0x58] sm:$0xff] %v17313_v0  ;;  %v8719_v1 = vmul.f32 %v8694_v32, %v17218_v33  ;;  %v8720_v57 = vmul.f32 %v8694_v32, %v17221_v14  ;;  %v8721_v60 = vmul.f32 %v8694_v32, %v17224_v21  ;;  %v8722_v20 = vmul.f32 %v8694_v32, %v17226_v42 }
 0xe1c   : > { %8784 = vst [vmem:[#allocation2 + $0x18] sm:$0xff] %v17316_v10  ;;  %v8698_v12 = vmul.f32 0.5, %v8697_v29 }
 0xe1d   : > { %v8744_v27 = vmul.f32 %v17278_v39, %v8719_v1  ;;  %v8745_v55 = vmul.f32 %v17282_v13, %v8720_v57  ;;  %v8746_v62 = vmul.f32 %v17284_v35, %v8721_v60  ;;  %v8747_v28 = vmul.f32 %v17286_v52, %v8722_v20 }
 0xe1e   : > { %v8699_v44 = vsub.f32 1.5, %v8698_v12 }
 0xe1f   : > { %v17332_v33 = vadd.f32 %v17288_v49, %v8744_v27  ;;  %v17335_v14 = vadd.f32 %v17291_v40, %v8745_v55  ;;  %v17338_v21 = vadd.f32 %v17293_v47, %v8746_v62  ;;  %v17341_v59 = vadd.f32 %v17299_v37, %v8747_v28 }
 0xe20   : > { %v13468_v42 = vpop.eup %13467  ;;  %v8700_v2 = vmul.f32 %v13466_v9, %v8699_v44 }
 0xe21   : > { %8785 = vst [vmem:[#allocation2 + $0x50] sm:$0xff] %v17332_v33  ;;  %v8706_v31 = vmul.f32 %v13468_v42, %v8674_v15  ;;  %vm8712_vm8 = vweird.f32 %v13468_v42 }
 0xe22   : > { %8786 = vst [vmem:[#allocation2 + $0x68] sm:$0xff] %v17335_v14  ;;  %v8704_v8 = vsel %vm8703_vm7, %v13466_v9, %v8700_v2  ;;  %vm8713_vm10 = vmor %vm8711_vm9, %vm8712_vm8 }
 0xe23   : > { %8787 = vst [vmem:[#allocation2 + $0x8] sm:$0xff] %v17338_v21  ;;  %v8723_v38 = vmul.f32 %v8704_v8, %v17237_v6  ;;  %v8724_v46 = vmul.f32 %v8704_v8, %v17240_v22  ;;  %v8725_v3 = vmul.f32 %v8704_v8, %v17242_v45  ;;  %v8726_v25 = vmul.f32 %v8704_v8, %v17244_v5 }
 0xe24   : > { %8788 = vst [vmem:[#allocation2 + $0x48] sm:$0xff] %v17341_v59  ;;  %v8707_v4 = vmul.f32 %v13468_v42, %v8706_v31 }
 0xe25   : > { %v8748_v36 = vmul.f32 %v17278_v39, %v8723_v38  ;;  %v8749_v18 = vmul.f32 %v17282_v13, %v8724_v46  ;;  %v8750_v17 = vmul.f32 %v17284_v35, %v8725_v3  ;;  %v8751_v56 = vmul.f32 %v17286_v52, %v8726_v25 }
 0xe26   : > { %v8708_v41 = vmul.f32 0.5, %v8707_v4 }
 0xe27   : > { %v8773_v6 = vadd.f32 %v17288_v49, %v8748_v36  ;;  %v8774_v22 = vadd.f32 %v17291_v40, %v8749_v18  ;;  %v8775_v45 = vadd.f32 %v17293_v47, %v8750_v17  ;;  %v8776_v5 = vadd.f32 %v17299_v37, %v8751_v56 }
 0xe28   : > { %v8709_v19 = vsub.f32 1.5, %v8708_v41 }
 0xe29   : > { %8789 = vst [vmem:[#allocation2 + $0x40] sm:$0xff] %v8773_v6 }
 0xe2a   : > { %8790 = vst [vmem:[#allocation2 + $0x20] sm:$0xff] %v8774_v22  ;;  %v8710_v30 = vmul.f32 %v13468_v42, %v8709_v19 }
 0xe2b   : > { %8791 = vst [vmem:[#allocation2 + $0x10] sm:$0xff] %v8775_v45 }
 0xe2c   : > { %8792 = vst [vmem:[#allocation2 + $0x38] sm:$0xff] %v8776_v5  ;;  %v8714_v23 = vsel %vm8713_vm10, %v13468_v42, %v8710_v30 }
 0xe2d   : > { %v8727_v34 = vmul.f32 %v8714_v23, %v17255_v58  ;;  %v8728_v53 = vmul.f32 %v8714_v23, %v17257_v7  ;;  %v8729_v48 = vmul.f32 %v8714_v23, %v17259_v24  ;;  %v8730_v50 = vmul.f32 %v8714_v23, %v17261_v51 }
 0xe2f   : > { %v8752_v63 = vmul.f32 %v17278_v39, %v8727_v34  ;;  %v8753_v16 = vmul.f32 %v17282_v13, %v8728_v53  ;;  %v8754_v11 = vmul.f32 %v17284_v35, %v8729_v48  ;;  %v8755_v9 = vmul.f32 %v17286_v52, %v8730_v50 }
 0xe31   : > { %v8777_v54 = vadd.f32 %v17288_v49, %v8752_v63  ;;  %v8778_v61 = vadd.f32 %v17291_v40, %v8753_v16  ;;  %v8779_v58 = vadd.f32 %v17293_v47, %v8754_v11  ;;  %v8780_v7 = vadd.f32 %v17299_v37, %v8755_v9 }
 0xe32   : > { %8800 = sbr.rel (%p12486_p1) target bundleno = 3937 (0xf61), region = 148 }
 0xe33   : > { %8793 = vst [vmem:[#allocation2 + $0x60] sm:$0xff] %v8777_v54 }
 0xe34   : > { %8794 = vst [vmem:[#allocation2 + $0x70] sm:$0xff] %v8778_v61 }
 0xe35   : > { %8795 = vst [vmem:[#allocation2 + $0x78] sm:$0xff] %v8779_v58 }
 0xe36   : > { %8796 = vst [vmem:[#allocation2 + $0x28] sm:$0xff] %v8780_v7 }
 0xe37   : > { %v8813_v24 = vadd.f32 %v8774_v22, %v8773_v6  ;;  %v8803_v51 = vadd.f32 %v17310_v26, %v17307_v43  ;;  %v8818_v35 = vadd.f32 %v8778_v61, %v8777_v54  ;;  %v8808_v52 = vadd.f32 %v17335_v14, %v17332_v33  ;;  %v17708_v57 = vld [vmem:[#allocation45_spill] sm:$0xff] }
 0xe39   : > { %v8814_v39 = vadd.f32 %v8813_v24, %v8775_v45  ;;  %v8804_v13 = vadd.f32 %v8803_v51, %v17313_v0  ;;  %v8819_v47 = vadd.f32 %v8818_v35, %v8779_v58  ;;  %v8809_v37 = vadd.f32 %v8808_v52, %v17338_v21 }
 0xe3b   : > { %v8815_v49 = vadd.f32 %v8814_v39, %v8776_v5  ;;  %v8805_v40 = vadd.f32 %v8804_v13, %v17316_v10  ;;  %v8820_v15 = vadd.f32 %v8819_v47, %v8780_v7  ;;  %v8810_v32 = vadd.f32 %v8809_v37, %v17341_v59 }
 0xe3d   : > { %8816 = vadd.xlane.f32.xlu1 %v8815_v49  ;;  %8806 = vadd.xlane.f32.xlu0 %v8805_v40 }
 0xe45   : > { %8821 = vadd.xlane.f32.xlu1 %v8820_v15  ;;  %8811 = vadd.xlane.f32.xlu0 %v8810_v32 }
 0xeb0   : > { %v8817_v29 = vpop.xlane.xlu1 %8816  ;;  %v8807_v1 = vpop.xlane.xlu0 %8806 }
 0xeb1   : > { %v8825_v60 = vmul.f32 %v8817_v29, %v17708_v57  ;;  %v8823_v20 = vmul.f32 %v8807_v1, %v17708_v57 }
 0xeb3   : > { %v17383_v12 = vsub.f32 %v8773_v6, %v8825_v60  ;;  %v17385_v27 = vsub.f32 %v8774_v22, %v8825_v60  ;;  %v17387_v55 = vsub.f32 %v8775_v45, %v8825_v60  ;;  %v17390_v62 = vsub.f32 %v17307_v43, %v8823_v20 }
 0xeb4   : > { %v17393_v28 = vsub.f32 %v17310_v26, %v8823_v20  ;;  %v17396_v44 = vsub.f32 %v17313_v0, %v8823_v20  ;;  %v17402_v31 = vsub.f32 %v8776_v5, %v8825_v60  ;;  %v17405_v8 = vsub.f32 %v17316_v10, %v8823_v20 }
 0xeb5   : > { %v8851_v42 = vmul.f32 %v17383_v12, %v17383_v12  ;;  %v8852_v2 = vmul.f32 %v17385_v27, %v17385_v27  ;;  %v8843_v43 = vmul.f32 %v17390_v62, %v17390_v62  ;;  %v8853_v0 = vmul.f32 %v17387_v55, %v17387_v55 }
 0xeb6   : > { %v8844_v26 = vmul.f32 %v17393_v28, %v17393_v28  ;;  %v8845_v25 = vmul.f32 %v17396_v44, %v17396_v44  ;;  %v8854_v17 = vmul.f32 %v17402_v31, %v17402_v31  ;;  %v8846_v56 = vmul.f32 %v17405_v8, %v17405_v8 }
 0xeb7   : > { %v8869_v38 = vadd.f32 %v8852_v2, %v8851_v42 }
 0xeb8   : > { %v8822_v46 = vpop.xlane.xlu1 %8821  ;;  %v8812_v3 = vpop.xlane.xlu0 %8811  ;;  %v8859_v4 = vadd.f32 %v8844_v26, %v8843_v43  ;;  %v8801_v43 = vld [vmem:[#allocation24] sm:$0xf] }
 0xeb9   : > { %v8826_v36 = vmul.f32 %v8822_v46, %v17708_v57  ;;  %v8824_v10 = vmul.f32 %v8812_v3, %v17708_v57  ;;  %v8870_v18 = vadd.f32 %v8869_v38, %v8853_v0  ;;  %v8802_v38 = vld [vmem:[#allocation26] sm:$0xf] }
 0xeba   : > { %v8860_v41 = vadd.f32 %v8859_v4, %v8845_v25  ;;  %v17471_v4 = vperm.slane %v8801_v43, 1 }
 0xebb   : > { %v17421_v6 = vsub.f32 %v8777_v54, %v8826_v36  ;;  %v17423_v22 = vsub.f32 %v8778_v61, %v8826_v36  ;;  %v17426_v45 = vsub.f32 %v17332_v33, %v8824_v10  ;;  %v17429_v5 = vsub.f32 %v17335_v14, %v8824_v10 }
 0xebc   : > { %v8871_v19 = vadd.f32 %v8870_v18, %v8854_v17  ;;  %v8861_v30 = vadd.f32 %v8860_v41, %v8846_v56  ;;  %v17431_v23 = vsub.f32 %v8779_v58, %v8826_v36  ;;  %v17433_v34 = vsub.f32 %v8780_v7, %v8826_v36 }
 0xebd   : > { %v8855_v53 = vmul.f32 %v17421_v6, %v17421_v6  ;;  %v8856_v48 = vmul.f32 %v17423_v22, %v17423_v22  ;;  %v17440_v50 = vsub.f32 %v17338_v21, %v8824_v10  ;;  %v8847_v33 = vmul.f32 %v17426_v45, %v17426_v45 }
 0xebe   : > { %8872 = vadd.xlane.f32.xlu0 %v8871_v19  ;;  %8862 = vadd.xlane.f32.xlu2 %v8861_v30  ;;  %v8857_v14 = vmul.f32 %v17431_v23, %v17431_v23  ;;  %v17447_v16 = vsub.f32 %v17341_v59, %v8824_v10  ;;  %v8848_v11 = vmul.f32 %v17429_v5, %v17429_v5  ;;  %v17473_v36 = vperm.slane %v8801_v43, 2 }
 0xebf   : > { %v8874_v63 = vadd.f32 %v8856_v48, %v8855_v53  ;;  %v8858_v9 = vmul.f32 %v17433_v34, %v17433_v34  ;;  %v8849_v54 = vmul.f32 %v17440_v50, %v17440_v50  ;;  %v17475_v10 = vperm.slane %v8801_v43, 3 }
 0xec0   : > { %v8864_v61 = vadd.f32 %v8848_v11, %v8847_v33  ;;  %v8850_v7 = vmul.f32 %v17447_v16, %v17447_v16  ;;  %v17479_v41 = vperm.slane %v8802_v38, 0  ;;  %v17481_v30 = vperm.slane %v8802_v38, 1 }
 0xec1   : > { %v8875_v21 = vadd.f32 %v8874_v63, %v8857_v14  ;;  %v17483_v53 = vperm.slane %v8802_v38, 2  ;;  %v17486_v63 = vperm.slane %v8802_v38, 3 }
 0xec2   : > { %v8865_v24 = vadd.f32 %v8864_v61, %v8849_v54 }
 0xec3   : > { %v8876_v58 = vadd.f32 %v8875_v21, %v8858_v9 }
 0xec4   : > { %v8866_v51 = vadd.f32 %v8865_v24, %v8850_v7 }
 0xec5   : > { %8877 = vadd.xlane.f32.xlu1 %v8876_v58 }
 0xec6   : > { %8867 = vadd.xlane.f32.xlu2 %v8866_v51 }
 0xf31   : > { %v8863_v59 = vpop.xlane.xlu2 %8862  ;;  %v8873_v39 = vpop.xlane.xlu0 %8872 }
 0xf32   : > { %v8879_v13 = vmul.f32 %v8863_v59, %v17708_v57  ;;  %v8881_v35 = vmul.f32 %v8873_v39, %v17708_v57 }
 0xf34   : > { %v8883_v52 = vadd.f32 1e-05, %v8879_v13  ;;  %v8885_v49 = vadd.f32 1e-05, %v8881_v35 }
 0xf36   : > { %13487 = vrsqrt.f32 %v8883_v52  ;;  %vm8893_vm12 = vweird.f32 %v8883_v52  ;;  %vm8913_vm15 = vweird.f32 %v8885_v49 }
 0xf37   : > { %13489 = vrsqrt.f32 %v8885_v49 }
 0xf38   : > { %v8878_v40 = vpop.xlane.xlu1 %8877 }
 0xf39   : > { %v8882_v47 = vmul.f32 %v8878_v40, %v17708_v57  ;;  %v8868_v37 = vpop.xlane.xlu2 %8867 }
 0xf3a   : > { %v8880_v32 = vmul.f32 %v8868_v37, %v17708_v57  ;;  %v17469_v57 = vperm.slane %v8801_v43, 0 }
 0xf3b   : > { %v17460_v15 = vadd.f32 1e-05, %v8882_v47 }
 0xf3c   : > { %v13488_v29 = vpop.eup %13487  ;;  %v17464_v42 = vadd.f32 1e-05, %v8880_v32 }
 0xf3d   : > { %v13490_v1 = vpop.eup %13489  ;;  %v8888_v60 = vmul.f32 %v13488_v29, %v8883_v52  ;;  %13491 = vrsqrt.f32 %v17460_v15  ;;  %vm8894_vm11 = vweird.f32 %v13488_v29  ;;  %vm8923_vm2 = vweird.f32 %v17460_v15 }
 0xf3e   : > { %v8908_v20 = vmul.f32 %v13490_v1, %v8885_v49  ;;  %13493 = vrsqrt.f32 %v17464_v42  ;;  %vm8914_vm13 = vweird.f32 %v13490_v1  ;;  %vm8895_vm14 = vmor %vm8893_vm12, %vm8894_vm11  ;;  %vm8903_vm5 = vweird.f32 %v17464_v42 }
 0xf3f   : > { %v8889_v2 = vmul.f32 %v13488_v29, %v8888_v60  ;;  %vm8915_vm0 = vmor %vm8913_vm15, %vm8914_vm13 }
 0xf40   : > { %v8909_v26 = vmul.f32 %v13490_v1, %v8908_v20 }
 0xf41   : > { %v8890_v0 = vmul.f32 0.5, %v8889_v2 }
 0xf42   : > { %v8910_v46 = vmul.f32 0.5, %v8909_v26 }
 0xf43   : > { %v17467_v3 = vpop.eup %13491  ;;  %v8891_v25 = vsub.f32 1.5, %v8890_v0 }
 0xf44   : > { %v8911_v18 = vsub.f32 1.5, %v8910_v46  ;;  %v8918_v17 = vmul.f32 %v17467_v3, %v17460_v15  ;;  %v13494_v19 = vpop.eup %13493  ;;  %vm8924_vm1 = vweird.f32 %v17467_v3 }
 0xf45   : > { %v8892_v56 = vmul.f32 %v13488_v29, %v8891_v25  ;;  %v8898_v11 = vmul.f32 %v13494_v19, %v17464_v42  ;;  %vm8904_vm3 = vweird.f32 %v13494_v19  ;;  %vm8925_vm4 = vmor %vm8923_vm2, %vm8924_vm1 }
 0xf46   : > { %v8912_v48 = vmul.f32 %v13490_v1, %v8911_v18  ;;  %v8919_v33 = vmul.f32 %v17467_v3, %v8918_v17  ;;  %vm8905_vm6 = vmor %vm8903_vm5, %vm8904_vm3 }
 0xf47   : > { %v8896_v14 = vsel %vm8895_vm14, %v13488_v29, %v8892_v56  ;;  %v8899_v24 = vmul.f32 %v13494_v19, %v8898_v11 }
 0xf48   : > { %v8927_v9 = vmul.f32 %v8896_v14, %v17390_v62  ;;  %v8928_v21 = vmul.f32 %v8896_v14, %v17393_v28  ;;  %v8929_v54 = vmul.f32 %v8896_v14, %v17396_v44  ;;  %v8930_v61 = vmul.f32 %v8896_v14, %v17405_v8 }
 0xf49   : > { %v8916_v58 = vsel %vm8915_vm0, %v13490_v1, %v8912_v48  ;;  %v8920_v7 = vmul.f32 0.5, %v8919_v33 }
 0xf4a   : > { %v8952_v51 = vmul.f32 %v17469_v57, %v8927_v9  ;;  %v8953_v59 = vmul.f32 %v17471_v4, %v8928_v21  ;;  %v8954_v39 = vmul.f32 %v17473_v36, %v8929_v54  ;;  %v8955_v13 = vmul.f32 %v17475_v10, %v8930_v61 }
 0xf4b   : > { %v8935_v62 = vmul.f32 %v8916_v58, %v17383_v12  ;;  %v8936_v28 = vmul.f32 %v8916_v58, %v17385_v27  ;;  %v8937_v44 = vmul.f32 %v8916_v58, %v17387_v55  ;;  %v8938_v8 = vmul.f32 %v8916_v58, %v17402_v31 }
 0xf4c   : > { %v8977_v35 = vadd.f32 %v17479_v41, %v8952_v51  ;;  %v8978_v52 = vadd.f32 %v17481_v30, %v8953_v59  ;;  %v8979_v49 = vadd.f32 %v17483_v53, %v8954_v39  ;;  %v8980_v40 = vadd.f32 %v17486_v63, %v8955_v13 }
 0xf4d   : > { %v8960_v47 = vmul.f32 %v17469_v57, %v8935_v62  ;;  %v8961_v37 = vmul.f32 %v17471_v4, %v8936_v28  ;;  %v8962_v12 = vmul.f32 %v17473_v36, %v8937_v44  ;;  %v8963_v27 = vmul.f32 %v17475_v10, %v8938_v8 }
 0xf4e   : > { %8993 = vst [vmem:[#allocation27] sm:$0xff] %v8977_v35  ;;  %v8921_v55 = vsub.f32 1.5, %v8920_v7  ;;  %v8900_v31 = vmul.f32 0.5, %v8899_v24 }
 0xf4f   : > { %8994 = vst [vmem:[#allocation27 + $0x8] sm:$0xff] %v8978_v52  ;;  %v8985_v32 = vadd.f32 %v17479_v41, %v8960_v47  ;;  %v8986_v29 = vadd.f32 %v17481_v30, %v8961_v37  ;;  %v8987_v1 = vadd.f32 %v17483_v53, %v8962_v12  ;;  %v8988_v2 = vadd.f32 %v17486_v63, %v8963_v27 }
 0xf50   : > { %8995 = vst [vmem:[#allocation27 + $0x10] sm:$0xff] %v8979_v49  ;;  %v8922_v60 = vmul.f32 %v17467_v3, %v8921_v55  ;;  %v8901_v20 = vsub.f32 1.5, %v8900_v31 }
 0xf51   : > { %8996 = vst [vmem:[#allocation27 + $0x18] sm:$0xff] %v8980_v40 }
 0xf52   : > { %9001 = vst [vmem:[#allocation27 + $0x40] sm:$0xff] %v8985_v32  ;;  %v8926_v43 = vsel %vm8925_vm4, %v17467_v3, %v8922_v60  ;;  %v8902_v26 = vmul.f32 %v13494_v19, %v8901_v20 }
 0xf53   : > { %9002 = vst [vmem:[#allocation27 + $0x48] sm:$0xff] %v8986_v29  ;;  %v8939_v15 = vmul.f32 %v8926_v43, %v17421_v6  ;;  %v8940_v0 = vmul.f32 %v8926_v43, %v17423_v22  ;;  %v8941_v38 = vmul.f32 %v8926_v43, %v17431_v23  ;;  %v8942_v46 = vmul.f32 %v8926_v43, %v17433_v34 }
 0xf54   : > { %9003 = vst [vmem:[#allocation27 + $0x50] sm:$0xff] %v8987_v1  ;;  %v8906_v25 = vsel %vm8905_vm6, %v13494_v19, %v8902_v26 }
 0xf55   : > { %9004 = vst [vmem:[#allocation27 + $0x58] sm:$0xff] %v8988_v2  ;;  %v8964_v18 = vmul.f32 %v17469_v57, %v8939_v15  ;;  %v8965_v3 = vmul.f32 %v17471_v4, %v8940_v0  ;;  %v8966_v17 = vmul.f32 %v17473_v36, %v8941_v38  ;;  %v8967_v42 = vmul.f32 %v17475_v10, %v8942_v46 }
 0xf56   : > { %v8931_v6 = vmul.f32 %v8906_v25, %v17426_v45  ;;  %v8932_v22 = vmul.f32 %v8906_v25, %v17429_v5  ;;  %v8933_v23 = vmul.f32 %v8906_v25, %v17440_v50  ;;  %v8934_v34 = vmul.f32 %v8906_v25, %v17447_v16 }
 0xf57   : > { %v8989_v56 = vadd.f32 %v17479_v41, %v8964_v18  ;;  %v8990_v19 = vadd.f32 %v17481_v30, %v8965_v3  ;;  %v8991_v48 = vadd.f32 %v17483_v53, %v8966_v17  ;;  %v8992_v33 = vadd.f32 %v17486_v63, %v8967_v42 }
 0xf58   : > { %v8956_v14 = vmul.f32 %v17469_v57, %v8931_v6  ;;  %v8957_v11 = vmul.f32 %v17471_v4, %v8932_v22  ;;  %v8958_v45 = vmul.f32 %v17473_v36, %v8933_v23  ;;  %v8959_v5 = vmul.f32 %v17475_v10, %v8934_v34 }
 0xf59   : > { %9005 = vst [vmem:[#allocation27 + $0x60] sm:$0xff] %v8989_v56 }
 0xf5a   : > { %9006 = vst [vmem:[#allocation27 + $0x68] sm:$0xff] %v8990_v19  ;;  %v8981_v50 = vadd.f32 %v17479_v41, %v8956_v14  ;;  %v8982_v16 = vadd.f32 %v17481_v30, %v8957_v11  ;;  %v8983_v9 = vadd.f32 %v17483_v53, %v8958_v45  ;;  %v8984_v21 = vadd.f32 %v17486_v63, %v8959_v5 }
 0xf5b   : > { %9007 = vst [vmem:[#allocation27 + $0x70] sm:$0xff] %v8991_v48 }
 0xf5c   : > { %9008 = vst [vmem:[#allocation27 + $0x78] sm:$0xff] %v8992_v33 }
 0xf5d   : > { %8997 = vst [vmem:[#allocation27 + $0x20] sm:$0xff] %v8981_v50 }
 0xf5e   : > { %8998 = vst [vmem:[#allocation27 + $0x28] sm:$0xff] %v8982_v16 }
 0xf5f   : > { %8999 = vst [vmem:[#allocation27 + $0x30] sm:$0xff] %v8983_v9 }
 0xf60   : > { %9000 = vst [vmem:[#allocation27 + $0x38] sm:$0xff] %v8984_v21 }
 0xf61 PF: > { %s17709_s30 = sld [smem:[#allocation39_spill]]  ;;  %s14043_s21 = smov [#allocation27]  }
 0xf62   : > { %s17710_s10 = sld [smem:[#allocation73_spill]]  ;;  %s9018_s13 = sshll.u32 %s14043_s21, 4  ;;  %s9019_s13 = int_to_ptr.vmem [resolvable:$true] %s9018_s13 }
 0xf63   : > { %s14044_s0 = smov 512   ;;  %s14045_s18 = smov 32  }
 0xf67   : > { %p13324_p2 = scmp.eq.s32.totalorder %s17709_s30, 1 }
 0xf68   : > { %s9020_s24 = sshll.u32 %s17710_s10, 4  ;;  %s9021_s24 = int_to_ptr.hbm [resolvable:$true] %s9020_s24 }
 0xf69   : > { %13305 = dma.vmem_to_hbm [thread:$0]  (%p13324_p2), %s9019_s13, 2048, %s9021_s24, [#allocation5], %s14044_s0, %s14044_s0, %s14045_s18  }
 0xf6a   : > { %14006 = dma.done.wait (%p13324_p2), [#allocation5], 2048  }
 0xf6b   : > { %14008 = vsyncadd (%p13324_p2), [#allocation5], 4294965248 }
 0xf6c PF: > { %s46_s23 = sadd.s32 1, %s14031_s23   ;;  %s17711_s18 = sld [smem:[#allocation37_spill]] }
 0xf6d   : > { %p43_p3 = scmp.ge.s32.totalorder %s46_s23, 4   ;;  %s17712_s1 = sld [smem:[#allocation42_spill]] }
 0xf6e   : > { %s17713_s28 = sld [smem:[#allocation40_spill]]  ;;  %s17714_s19 = smov %s14019_s20 }
 0xf6f   : > { %s17716_s21 = smov %s14027_s22 }
 0xf70   :  { %45 = sbr.rel (!%p43_p3) target bundleno = 28 (0x1c), region = 271 }
 0xf73   : > { %s17715_s20 = smov %s17712_s1 }
 0xf74   : > { %s17717_s22 = smov %s17713_s28 }
 0xf75   :  { %9037 = vsyncpa [#allocation4], 1 }
 0xf76   :  { %9039 = vsyncpa [#allocation4 + $0x1], 1 }
 0xf77   :  { %9040 = vsyncpa [#allocation7], 1 }
 0xf78   :  { %9042 = vsyncpa [#allocation7 + $0x1], 1 }
 0xf79   :  { %9043 = vsyncpa [#allocation10], 1 }
 0xf7a   :  { %9045 = vsyncpa [#allocation10 + $0x1], 1 }
 0xf7b   :  { %9046 = vsyncpa [#allocation13], 1 }
 0xf7c   :  { %9048 = vsyncpa [#allocation13 + $0x1], 1 }
 0xf7d   :  { %9049 = vsyncpa [#allocation16], 1 }
 0xf7e   :  { %9051 = vsyncpa [#allocation16 + $0x1], 1 }
 0xf7f   :  { %9052 = vsyncpa [#allocation19], 1 }
 0xf80   :  { %9054 = vsyncpa [#allocation19 + $0x1], 1 }
 0xf81   :  { %9055 = vsyncpa [#allocation22], 1 }
 0xf82   :  { %9057 = vsyncpa [#allocation22 + $0x1], 1 }
 0xf83   :  { %9058 = vsyncpa [#allocation25], 1 }
 0xf84   :  { %9059 = vsyncpa [#allocation5], 1 }
 0xf85   :  { %9061 = vsyncpa [#allocation5 + $0x1], 1 }

</bundles_post_ra>
